<compile_context>
chip_gen: v7x
topology: tpu7x:2x2x1
jax: 0.10.0
libtpu: 0.0.40
codegen_flags: <defaults>
</compile_context>

<pallas_src>
import functools
import math

import jax
import jax.numpy as jnp
from jax.experimental import pallas as pl
from jax.experimental.pallas import tpu as pltpu


def _vmem_limit_bytes():
    # ~75% of physical VMEM, capped at 100 MiB (v5e/v6e: 128 MiB -> 96 MiB,
    # v7x: 64 MiB -> 48 MiB). Fall back to 64 MiB if the query is unavailable.
    try:
        cap = int(pltpu.get_tpu_info().vmem_capacity_bytes)
        return int(min(100 * 1024 * 1024, (cap * 3) // 4))
    except Exception:
        return 64 * 1024 * 1024


def _layernorm(v, w, b, eps=1e-5):
    mu = jnp.mean(v, axis=-1, keepdims=True)
    var = jnp.mean(jnp.square(v - mu), axis=-1, keepdims=True)
    return (v - mu) * jax.lax.rsqrt(var + eps) * w + b


def _gelu_tanh(x):
    # GELU with tanh approximation (matches nn.GELU(approximate='tanh'))
    c = 0.7978845608028654  # sqrt(2/pi)
    return 0.5 * x * (1.0 + jnp.tanh(c * (x + 0.044715 * x * x * x)))


# --------------------------------------------------------------------------
# Kernel 1: LN1 + fused QKV projection (per sequence tile).
# q, v emitted head-major (B, H, T, hd); K emitted pre-transposed (B, H, hd, T).
# --------------------------------------------------------------------------
def qkv_kernel(x_ref, ln1w_ref, ln1b_ref, wqkv_ref, bqkv_ref,
               q_ref, kT_ref, v_ref, *, n_head, head_dim, scale):
    x = x_ref[0].astype(jnp.float32)                       # (Tt, C)
    C = x.shape[-1]
    h = _layernorm(x, ln1w_ref[0], ln1b_ref[0])
    qkv = jnp.dot(h.astype(jnp.bfloat16), wqkv_ref[...],
                  preferred_element_type=jnp.float32) + bqkv_ref[0]
    q = (qkv[:, 0:C] * scale).astype(q_ref.dtype)          # fold 1/sqrt(hd) into q
    kT = qkv[:, C:2 * C].T                                 # (C, Tt): one XLU transpose per tile
    v = qkv[:, 2 * C:3 * C].astype(v_ref.dtype)
    for hh in range(n_head):                               # static loop, slice stores
        sl = slice(hh * head_dim, (hh + 1) * head_dim)
        q_ref[0, hh] = q[:, sl]
        kT_ref[0, hh] = kT[sl, :].astype(kT_ref.dtype)     # lane-dense (hd, Tt) store
        v_ref[0, hh] = v[:, sl]


# --------------------------------------------------------------------------
# Kernel 2: flash causal attention over the lower-triangular (qi, ki) blocks
# (flattened into one grid axis via scalar-prefetch tables) with a fused
# attn-proj / residual / LN2 / MLP / residual epilogue on the diagonal block.
# --------------------------------------------------------------------------
def attn_mlp_kernel(qi_tbl, ki_tbl,
                    xq_ref, q_ref, kT_ref, v_ref,
                    wattn_ref, battn_ref, ln2w_ref, ln2b_ref,
                    wfc_ref, bfc_ref, wproj_ref, bproj_ref,
                    out_ref,
                    m_scr, l_scr, acc_scr,
                    *, n_head, head_dim, block_t):
    step = pl.program_id(1)
    qi = qi_tbl[step]
    ki = ki_tbl[step]

    @pl.when(ki == 0)
    def _init():
        m_scr[...] = jnp.full_like(m_scr, -1e30)
        l_scr[...] = jnp.zeros_like(l_scr)
        acc_scr[...] = jnp.zeros_like(acc_scr)

    # Strictly-below-diagonal kv blocks: fully visible, no causal mask needed.
    @pl.when(ki < qi)
    def _accumulate():
        q = q_ref[0]                   # (H, Tt, hd) bf16, pre-scaled
        kT = kT_ref[0]                 # (H, hd, Tt) bf16
        v = v_ref[0]                   # (H, Tt, hd) bf16
        s = jnp.einsum('hqd,hdk->hqk', q, kT,
                       preferred_element_type=jnp.float32)
        m_prev = m_scr[...]
        m_new = jnp.maximum(m_prev, jnp.max(s, axis=-1, keepdims=True))
        alpha = jnp.exp(m_prev - m_new)
        p = jnp.exp(s - m_new)
        l_scr[...] = alpha * l_scr[...] + jnp.sum(p, axis=-1, keepdims=True)
        acc_scr[...] = alpha * acc_scr[...] + jnp.einsum(
            'hqk,hkd->hqd', p.astype(v.dtype), v,
            preferred_element_type=jnp.float32)
        m_scr[...] = m_new

    # Diagonal block: masked accumulate + fused epilogue (last kv contribution).
    @pl.when(ki == qi)
    def _diag_and_epilogue():
        q = q_ref[0]
        kT = kT_ref[0]
        v = v_ref[0]
        s = jnp.einsum('hqd,hdk->hqk', q, kT,
                       preferred_element_type=jnp.float32)
        row = jax.lax.broadcasted_iota(jnp.int32, (block_t, block_t), 0)
        col = jax.lax.broadcasted_iota(jnp.int32, (block_t, block_t), 1)
        s = jnp.where(col <= row, s, -1e30)                # static diagonal mask
        m_prev = m_scr[...]
        m_new = jnp.maximum(m_prev, jnp.max(s, axis=-1, keepdims=True))
        alpha = jnp.exp(m_prev - m_new)
        p = jnp.exp(s - m_new)
        l_fin = alpha * l_scr[...] + jnp.sum(p, axis=-1, keepdims=True)
        acc_fin = alpha * acc_scr[...] + jnp.einsum(
            'hqk,hkd->hqd', p.astype(v.dtype), v,
            preferred_element_type=jnp.float32)

        inv_l = pl.reciprocal(l_fin, approx=True)          # (H, Tt, 1) on EUP
        acc_n = acc_fin * inv_l                            # (H, Tt, hd) f32

        # Head merge fused into the attention output projection:
        # per-head (Tt,hd)x(hd,C) matmuls accumulated in f32 (MXU only, no
        # relayout / masked slice stores).
        C = n_head * head_dim
        y = jnp.zeros((block_t, C), jnp.float32)
        for hh in range(n_head):
            y = y + jnp.dot(acc_n[hh].astype(jnp.bfloat16), wattn_ref[hh],
                            preferred_element_type=jnp.float32)
        y = y + battn_ref[0]

        x1 = xq_ref[0].astype(jnp.float32) + y             # residual 1
        h2 = _layernorm(x1, ln2w_ref[0], ln2b_ref[0])
        hmid = jnp.dot(h2.astype(jnp.bfloat16), wfc_ref[...],
                       preferred_element_type=jnp.float32) + bfc_ref[0]
        hmid = _gelu_tanh(hmid)
        x2 = x1 + jnp.dot(hmid.astype(jnp.bfloat16), wproj_ref[...],
                          preferred_element_type=jnp.float32) + bproj_ref[0]
        out_ref[0] = x2.astype(out_ref.dtype)              # residual 2


# --------------------------------------------------------------------------
# Wrapper
# --------------------------------------------------------------------------
def block_forward(x, params, n_head, block_t=256, single_buffer_weights=True):
    B, T, C = x.shape
    assert C % n_head == 0
    head_dim = C // n_head
    block_t = min(block_t, T)
    assert T % block_t == 0, "T must be divisible by the sequence tile"
    n_t = T // block_t
    scale = 1.0 / math.sqrt(head_dim)

    (ln1w, ln1b, wqkv, bqkv, wattn, battn,
     ln2w, ln2b, wfc, bfc, wproj, bproj) = params

    # bf16 weights: MXU bf16 rate + half the resident/streamed weight bytes.
    bf16 = jnp.bfloat16
    wqkv_h = wqkv.astype(bf16)
    wattn_h = wattn.astype(bf16).reshape(n_head, head_dim, C)  # head-split c_proj
    wfc_h = wfc.astype(bf16)
    wproj_h = wproj.astype(bf16)

    vmem_limit = _vmem_limit_bytes()
    cparams1 = pltpu.CompilerParams(
        dimension_semantics=("parallel", "parallel"),
        vmem_limit_bytes=vmem_limit)
    cparams2 = pltpu.CompilerParams(
        dimension_semantics=("parallel", "arbitrary"),
        vmem_limit_bytes=vmem_limit)

    # Constant-index operands (weights / biases / LN params): fetched once,
    # single-buffered so they don't pay double-buffer VMEM.
    def const1(shape):
        idx = lambda b, t: (0,) * len(shape)
        if single_buffer_weights:
            return pl.BlockSpec(shape, idx, pipeline_mode=pl.Buffered(1))
        return pl.BlockSpec(shape, idx)

    def const2(shape):
        idx = lambda b, s, qt, kt: (0,) * len(shape)
        if single_buffer_weights:
            return pl.BlockSpec(shape, idx, pipeline_mode=pl.Buffered(1))
        return pl.BlockSpec(shape, idx)

    qv_spec1 = pl.BlockSpec((1, n_head, block_t, head_dim), lambda b, t: (b, 0, t, 0))
    kT_spec1 = pl.BlockSpec((1, n_head, head_dim, block_t), lambda b, t: (b, 0, 0, t))

    # ---- kernel 1: LN1 + QKV projection (K pre-transposed) ----
    q, kT, v = pl.pallas_call(
        functools.partial(qkv_kernel, n_head=n_head, head_dim=head_dim,
                          scale=scale),
        out_shape=(
            jax.ShapeDtypeStruct((B, n_head, T, head_dim), bf16),
            jax.ShapeDtypeStruct((B, n_head, head_dim, T), bf16),
            jax.ShapeDtypeStruct((B, n_head, T, head_dim), bf16),
        ),
        grid_spec=pltpu.PrefetchScalarGridSpec(
            num_scalar_prefetch=0,
            grid=(B, n_t),
            in_specs=[
                pl.BlockSpec((1, block_t, C), lambda b, t: (b, t, 0)),
                const1((1, C)), const1((1, C)),
                const1((C, 3 * C)), const1((1, 3 * C)),
            ],
            out_specs=[qv_spec1, kT_spec1, qv_spec1],
        ),
        compiler_params=cparams1,
    )(x, ln1w, ln1b, wqkv_h, bqkv)

    # ---- kernel 2: triangular flash attention + fused epilogue ----
    # Flatten (qi, ki) into one axis over the n_t*(n_t+1)/2 lower-triangular
    # blocks; the kv sweep for each qi ends on the diagonal block, where the
    # epilogue runs.
    qi_list, ki_list = [], []
    for qi in range(n_t):
        for ki in range(qi + 1):
            qi_list.append(qi)
            ki_list.append(ki)
    n_tri = len(qi_list)
    qi_tbl = jnp.array(qi_list, dtype=jnp.int32)
    ki_tbl = jnp.array(ki_list, dtype=jnp.int32)

    out = pl.pallas_call(
        functools.partial(attn_mlp_kernel, n_head=n_head, head_dim=head_dim,
                          block_t=block_t),
        out_shape=jax.ShapeDtypeStruct((B, T, C), x.dtype),
        grid_spec=pltpu.PrefetchScalarGridSpec(
            num_scalar_prefetch=2,
            grid=(B, n_tri),
            in_specs=[
                pl.BlockSpec((1, block_t, C),
                             lambda b, s, qt, kt: (b, qt[s], 0)),        # x (residual)
                pl.BlockSpec((1, n_head, block_t, head_dim),
                             lambda b, s, qt, kt: (b, 0, qt[s], 0)),     # q
                pl.BlockSpec((1, n_head, head_dim, block_t),
                             lambda b, s, qt, kt: (b, 0, 0, kt[s])),     # k^T
                pl.BlockSpec((1, n_head, block_t, head_dim),
                             lambda b, s, qt, kt: (b, 0, kt[s], 0)),     # v
                const2((n_head, head_dim, C)), const2((1, C)),           # attn c_proj
                const2((1, C)), const2((1, C)),                          # ln2 w, b
                const2((C, 4 * C)), const2((1, 4 * C)),                  # c_fc
                const2((4 * C, C)), const2((1, C)),                      # mlp c_proj
            ],
            out_specs=pl.BlockSpec((1, block_t, C),
                                   lambda b, s, qt, kt: (b, qt[s], 0)),
            scratch_shapes=[
                pltpu.VMEM((n_head, block_t, 1), jnp.float32),           # running max
                pltpu.VMEM((n_head, block_t, 1), jnp.float32),           # running sum
                pltpu.VMEM((n_head, block_t, head_dim), jnp.float32),    # acc
            ],
        ),
        compiler_params=cparams2,
    )(qi_tbl, ki_tbl, x, q, kT, v,
      wattn_h, battn, ln2w, ln2b, wfc_h, bfc, wproj_h, bproj)
    return out


def init_params(key, C):
    # Deterministic synthetic init (shapes match the PyTorch module's __init__),
    # Linear weights stored pre-transposed as (in_features, out_features).
    ks = jax.random.split(key, 4)

    def lin(k, fan_in, fan_out):
        bound = 1.0 / math.sqrt(fan_in)
        kw, kb = jax.random.split(k)
        W = jax.random.uniform(kw, (fan_in, fan_out), jnp.float32, -bound, bound)
        b = jax.random.uniform(kb, (1, fan_out), jnp.float32, -bound, bound)
        return W, b

    ln1_w = jnp.ones((1, C), jnp.float32)
    ln1_b = jnp.zeros((1, C), jnp.float32)
    ln2_w = jnp.ones((1, C), jnp.float32)
    ln2_b = jnp.zeros((1, C), jnp.float32)
    w_qkv, b_qkv = lin(ks[0], C, 3 * C)
    w_ap, b_ap = lin(ks[1], C, C)
    w_fc, b_fc = lin(ks[2], C, 4 * C)
    w_mp, b_mp = lin(ks[3], 4 * C, C)
    return (ln1_w, ln1_b, w_qkv, b_qkv, w_ap, b_ap,
            ln2_w, ln2_b, w_fc, b_fc, w_mp, b_mp)


if __name__ == "__main__":
    B, T, C, n_head = 2, 8, 32, 4
    key = jax.random.PRNGKey(0)
    kx, kp = jax.random.split(key)
    x = jax.random.normal(kx, (B, T, C), jnp.float32)
    params = init_params(kp, C)

    fwd = jax.jit(functools.partial(block_forward, n_head=n_head))
    try:
        out = fwd(x, params)
        jax.block_until_ready(out)
    except Exception:
        # Safety net: retry with default double-buffered weight pipelining.
        fwd = jax.jit(functools.partial(block_forward, n_head=n_head,
                                        single_buffer_weights=False))
        out = fwd(x, params)
        jax.block_until_ready(out)

    assert out.shape == (B, T, C)
    assert bool(jnp.all(jnp.isfinite(out)))
    print("KERNEL_OK")
</pallas_src>

<mosaic_0001>
module attributes {stable_mosaic.version = 11 : i64} {
  func.func @qkv_kernel(%arg0: i32, %arg1: i32, %arg2: memref<1x8x32xf32, #tpu.memory_space<vmem>>, %arg3: memref<1x32xf32, #tpu.memory_space<vmem>>, %arg4: memref<1x32xf32, #tpu.memory_space<vmem>>, %arg5: memref<32x96xbf16, #tpu.memory_space<vmem>>, %arg6: memref<1x96xf32, #tpu.memory_space<vmem>>, %arg7: memref<1x4x8x8xbf16, #tpu.memory_space<vmem>>, %arg8: memref<1x4x8x8xbf16, #tpu.memory_space<vmem>>, %arg9: memref<1x4x8x8xbf16, #tpu.memory_space<vmem>>) attributes {dimension_semantics = [#tpu.dimension_semantics<parallel>, #tpu.dimension_semantics<parallel>], iteration_bounds = array<i64: 2, 1>, scalar_prefetch = 0 : i64, scratch_operands = 0 : i64, tpu.core_type = #tpu.core_type<tc>, window_params = [{transform_indices = @transform_0, window_bounds = array<i64: 1, 8, 32>}, {pipeline_mode = #tpu.pipeline_mode<synchronous>, transform_indices = @transform_1, window_bounds = array<i64: 1, 32>}, {pipeline_mode = #tpu.pipeline_mode<synchronous>, transform_indices = @transform_2, window_bounds = array<i64: 1, 32>}, {pipeline_mode = #tpu.pipeline_mode<synchronous>, transform_indices = @transform_3, window_bounds = array<i64: 32, 96>}, {pipeline_mode = #tpu.pipeline_mode<synchronous>, transform_indices = @transform_4, window_bounds = array<i64: 1, 96>}, {transform_indices = @transform_5, window_bounds = array<i64: 1, 4, 8, 8>}, {transform_indices = @transform_6, window_bounds = array<i64: 1, 4, 8, 8>}, {transform_indices = @transform_7, window_bounds = array<i64: 1, 4, 8, 8>}]} {
    %c0 = arith.constant 0 : index
    %c0_0 = arith.constant 0 : index
    %c0_1 = arith.constant 0 : index
    %0 = vector.load %arg2[%c0, %c0_0, %c0_1] : memref<1x8x32xf32, #tpu.memory_space<vmem>>, vector<1x8x32xf32>
    %1 = vector.shape_cast %0 : vector<1x8x32xf32> to vector<8x32xf32>
    %c0_2 = arith.constant 0 : index
    %c0_3 = arith.constant 0 : index
    %2 = vector.load %arg3[%c0_2, %c0_3] : memref<1x32xf32, #tpu.memory_space<vmem>>, vector<1x32xf32>
    %3 = vector.shape_cast %2 : vector<1x32xf32> to vector<32xf32>
    %c0_4 = arith.constant 0 : index
    %c0_5 = arith.constant 0 : index
    %4 = vector.load %arg4[%c0_4, %c0_5] : memref<1x32xf32, #tpu.memory_space<vmem>>, vector<1x32xf32>
    %5 = vector.shape_cast %4 : vector<1x32xf32> to vector<32xf32>
    %cst = arith.constant dense<0.000000e+00> : vector<8xf32>
    %6 = vector.multi_reduction <add>, %1, %cst [1] : vector<8x32xf32> to vector<8xf32>
    %7 = vector.shape_cast %6 : vector<8xf32> to vector<8x1xf32>
    %cst_6 = arith.constant 3.200000e+01 : f32
    %8 = vector.broadcast %cst_6 : f32 to vector<8x1xf32>
    %9 = arith.divf %7, %8 : vector<8x1xf32>
    %10 = vector.broadcast %9 : vector<8x1xf32> to vector<8x32xf32>
    %11 = arith.subf %1, %10 : vector<8x32xf32>
    %12 = arith.mulf %11, %11 : vector<8x32xf32>
    %cst_7 = arith.constant dense<0.000000e+00> : vector<8xf32>
    %13 = vector.multi_reduction <add>, %12, %cst_7 [1] : vector<8x32xf32> to vector<8xf32>
    %14 = vector.shape_cast %13 : vector<8xf32> to vector<8x1xf32>
    %cst_8 = arith.constant 3.200000e+01 : f32
    %15 = vector.broadcast %cst_8 : f32 to vector<8x1xf32>
    %16 = arith.divf %14, %15 : vector<8x1xf32>
    %17 = vector.broadcast %9 : vector<8x1xf32> to vector<8x32xf32>
    %18 = arith.subf %1, %17 : vector<8x32xf32>
    %cst_9 = arith.constant 9.99999974E-6 : f32
    %19 = vector.broadcast %cst_9 : f32 to vector<8x1xf32>
    %20 = arith.addf %16, %19 : vector<8x1xf32>
    %21 = math.rsqrt %20 : vector<8x1xf32>
    %22 = vector.broadcast %21 : vector<8x1xf32> to vector<8x32xf32>
    %23 = arith.mulf %18, %22 : vector<8x32xf32>
    %24 = vector.shape_cast %3 : vector<32xf32> to vector<1x32xf32>
    %25 = vector.broadcast %24 : vector<1x32xf32> to vector<8x32xf32>
    %26 = arith.mulf %23, %25 : vector<8x32xf32>
    %27 = vector.shape_cast %5 : vector<32xf32> to vector<1x32xf32>
    %28 = vector.broadcast %27 : vector<1x32xf32> to vector<8x32xf32>
    %29 = arith.addf %26, %28 : vector<8x32xf32>
    %30 = arith.truncf %29 : vector<8x32xf32> to vector<8x32xbf16>
    %c0_10 = arith.constant 0 : index
    %c0_11 = arith.constant 0 : index
    %31 = vector.load %arg5[%c0_10, %c0_11] : memref<32x96xbf16, #tpu.memory_space<vmem>>, vector<32x96xbf16>
    %cst_12 = arith.constant dense<0.000000e+00> : vector<8x96xf32>
    %32 = tpu.matmul %30, %31, %cst_12 {dimension_numbers = #tpu.dot_dimension_numbers<[1], [0], [0], [1], [0, 0, 1, 1], [], []>} : vector<8x32xbf16>, vector<32x96xbf16>, vector<8x96xf32> -> vector<8x96xf32>
    %c0_13 = arith.constant 0 : index
    %c0_14 = arith.constant 0 : index
    %33 = vector.load %arg6[%c0_13, %c0_14] : memref<1x96xf32, #tpu.memory_space<vmem>>, vector<1x96xf32>
    %34 = vector.shape_cast %33 : vector<1x96xf32> to vector<96xf32>
    %35 = vector.shape_cast %34 : vector<96xf32> to vector<1x96xf32>
    %36 = vector.broadcast %35 : vector<1x96xf32> to vector<8x96xf32>
    %37 = arith.addf %32, %36 : vector<8x96xf32>
    %38 = vector.extract_strided_slice %37 {offsets = [0, 0], sizes = [8, 32], strides = [1, 1]} : vector<8x96xf32> to vector<8x32xf32>
    %cst_15 = arith.constant 0.353553385 : f32
    %39 = vector.broadcast %cst_15 : f32 to vector<8x32xf32>
    %40 = arith.mulf %38, %39 : vector<8x32xf32>
    %41 = arith.truncf %40 : vector<8x32xf32> to vector<8x32xbf16>
    %42 = vector.extract_strided_slice %37 {offsets = [0, 32], sizes = [8, 32], strides = [1, 1]} : vector<8x96xf32> to vector<8x32xf32>
    %43 = tpu.transpose %42, [1, 0] : vector<8x32xf32> -> vector<32x8xf32>
    %44 = vector.extract_strided_slice %37 {offsets = [0, 64], sizes = [8, 32], strides = [1, 1]} : vector<8x96xf32> to vector<8x32xf32>
    %45 = arith.truncf %44 : vector<8x32xf32> to vector<8x32xbf16>
    %46 = vector.extract_strided_slice %41 {offsets = [0, 0], sizes = [8, 8], strides = [1, 1]} : vector<8x32xbf16> to vector<8x8xbf16>
    %c0_16 = arith.constant 0 : index
    %c0_17 = arith.constant 0 : index
    %c0_18 = arith.constant 0 : index
    %c0_19 = arith.constant 0 : index
    %47 = vector.load %arg7[%c0_16, %c0_17, %c0_18, %c0_19] : memref<1x4x8x8xbf16, #tpu.memory_space<vmem>>, vector<1x1x8x8xbf16>
    %48 = vector.shape_cast %47 : vector<1x1x8x8xbf16> to vector<8x8xbf16>
    %49 = vector.shape_cast %46 : vector<8x8xbf16> to vector<1x1x8x8xbf16>
    tpu.vector_store %arg7[%c0_16, %c0_17, %c0_18, %c0_19], %49 {strides = array<i32>} : memref<1x4x8x8xbf16, #tpu.memory_space<vmem>>, vector<1x1x8x8xbf16>,
    %50 = vector.extract_strided_slice %43 {offsets = [0, 0], sizes = [8, 8], strides = [1, 1]} : vector<32x8xf32> to vector<8x8xf32>
    %51 = arith.truncf %50 : vector<8x8xf32> to vector<8x8xbf16>
    %c0_20 = arith.constant 0 : index
    %c0_21 = arith.constant 0 : index
    %c0_22 = arith.constant 0 : index
    %c0_23 = arith.constant 0 : index
    %52 = vector.load %arg8[%c0_20, %c0_21, %c0_22, %c0_23] : memref<1x4x8x8xbf16, #tpu.memory_space<vmem>>, vector<1x1x8x8xbf16>
    %53 = vector.shape_cast %52 : vector<1x1x8x8xbf16> to vector<8x8xbf16>
    %54 = vector.shape_cast %51 : vector<8x8xbf16> to vector<1x1x8x8xbf16>
    tpu.vector_store %arg8[%c0_20, %c0_21, %c0_22, %c0_23], %54 {strides = array<i32>} : memref<1x4x8x8xbf16, #tpu.memory_space<vmem>>, vector<1x1x8x8xbf16>,
    %55 = vector.extract_strided_slice %45 {offsets = [0, 0], sizes = [8, 8], strides = [1, 1]} : vector<8x32xbf16> to vector<8x8xbf16>
    %c0_24 = arith.constant 0 : index
    %c0_25 = arith.constant 0 : index
    %c0_26 = arith.constant 0 : index
    %c0_27 = arith.constant 0 : index
    %56 = vector.load %arg9[%c0_24, %c0_25, %c0_26, %c0_27] : memref<1x4x8x8xbf16, #tpu.memory_space<vmem>>, vector<1x1x8x8xbf16>
    %57 = vector.shape_cast %56 : vector<1x1x8x8xbf16> to vector<8x8xbf16>
    %58 = vector.shape_cast %55 : vector<8x8xbf16> to vector<1x1x8x8xbf16>
    tpu.vector_store %arg9[%c0_24, %c0_25, %c0_26, %c0_27], %58 {strides = array<i32>} : memref<1x4x8x8xbf16, #tpu.memory_space<vmem>>, vector<1x1x8x8xbf16>,
    %59 = vector.extract_strided_slice %41 {offsets = [0, 8], sizes = [8, 8], strides = [1, 1]} : vector<8x32xbf16> to vector<8x8xbf16>
    %c0_28 = arith.constant 0 : index
    %c1 = arith.constant 1 : index
    %c0_29 = arith.constant 0 : index
    %c0_30 = arith.constant 0 : index
    %60 = vector.load %arg7[%c0_28, %c1, %c0_29, %c0_30] : memref<1x4x8x8xbf16, #tpu.memory_space<vmem>>, vector<1x1x8x8xbf16>
    %61 = vector.shape_cast %60 : vector<1x1x8x8xbf16> to vector<8x8xbf16>
    %62 = vector.shape_cast %59 : vector<8x8xbf16> to vector<1x1x8x8xbf16>
    tpu.vector_store %arg7[%c0_28, %c1, %c0_29, %c0_30], %62 {strides = array<i32>} : memref<1x4x8x8xbf16, #tpu.memory_space<vmem>>, vector<1x1x8x8xbf16>,
    %63 = vector.extract_strided_slice %43 {offsets = [8, 0], sizes = [8, 8], strides = [1, 1]} : vector<32x8xf32> to vector<8x8xf32>
    %64 = arith.truncf %63 : vector<8x8xf32> to vector<8x8xbf16>
    %c0_31 = arith.constant 0 : index
    %c1_32 = arith.constant 1 : index
    %c0_33 = arith.constant 0 : index
    %c0_34 = arith.constant 0 : index
    %65 = vector.load %arg8[%c0_31, %c1_32, %c0_33, %c0_34] : memref<1x4x8x8xbf16, #tpu.memory_space<vmem>>, vector<1x1x8x8xbf16>
    %66 = vector.shape_cast %65 : vector<1x1x8x8xbf16> to vector<8x8xbf16>
    %67 = vector.shape_cast %64 : vector<8x8xbf16> to vector<1x1x8x8xbf16>
    tpu.vector_store %arg8[%c0_31, %c1_32, %c0_33, %c0_34], %67 {strides = array<i32>} : memref<1x4x8x8xbf16, #tpu.memory_space<vmem>>, vector<1x1x8x8xbf16>,
    %68 = vector.extract_strided_slice %45 {offsets = [0, 8], sizes = [8, 8], strides = [1, 1]} : vector<8x32xbf16> to vector<8x8xbf16>
    %c0_35 = arith.constant 0 : index
    %c1_36 = arith.constant 1 : index
    %c0_37 = arith.constant 0 : index
    %c0_38 = arith.constant 0 : index
    %69 = vector.load %arg9[%c0_35, %c1_36, %c0_37, %c0_38] : memref<1x4x8x8xbf16, #tpu.memory_space<vmem>>, vector<1x1x8x8xbf16>
    %70 = vector.shape_cast %69 : vector<1x1x8x8xbf16> to vector<8x8xbf16>
    %71 = vector.shape_cast %68 : vector<8x8xbf16> to vector<1x1x8x8xbf16>
    tpu.vector_store %arg9[%c0_35, %c1_36, %c0_37, %c0_38], %71 {strides = array<i32>} : memref<1x4x8x8xbf16, #tpu.memory_space<vmem>>, vector<1x1x8x8xbf16>,
    %72 = vector.extract_strided_slice %41 {offsets = [0, 16], sizes = [8, 8], strides = [1, 1]} : vector<8x32xbf16> to vector<8x8xbf16>
    %c0_39 = arith.constant 0 : index
    %c2 = arith.constant 2 : index
    %c0_40 = arith.constant 0 : index
    %c0_41 = arith.constant 0 : index
    %73 = vector.load %arg7[%c0_39, %c2, %c0_40, %c0_41] : memref<1x4x8x8xbf16, #tpu.memory_space<vmem>>, vector<1x1x8x8xbf16>
    %74 = vector.shape_cast %73 : vector<1x1x8x8xbf16> to vector<8x8xbf16>
    %75 = vector.shape_cast %72 : vector<8x8xbf16> to vector<1x1x8x8xbf16>
    tpu.vector_store %arg7[%c0_39, %c2, %c0_40, %c0_41], %75 {strides = array<i32>} : memref<1x4x8x8xbf16, #tpu.memory_space<vmem>>, vector<1x1x8x8xbf16>,
    %76 = vector.extract_strided_slice %43 {offsets = [16, 0], sizes = [8, 8], strides = [1, 1]} : vector<32x8xf32> to vector<8x8xf32>
    %77 = arith.truncf %76 : vector<8x8xf32> to vector<8x8xbf16>
    %c0_42 = arith.constant 0 : index
    %c2_43 = arith.constant 2 : index
    %c0_44 = arith.constant 0 : index
    %c0_45 = arith.constant 0 : index
    %78 = vector.load %arg8[%c0_42, %c2_43, %c0_44, %c0_45] : memref<1x4x8x8xbf16, #tpu.memory_space<vmem>>, vector<1x1x8x8xbf16>
    %79 = vector.shape_cast %78 : vector<1x1x8x8xbf16> to vector<8x8xbf16>
    %80 = vector.shape_cast %77 : vector<8x8xbf16> to vector<1x1x8x8xbf16>
    tpu.vector_store %arg8[%c0_42, %c2_43, %c0_44, %c0_45], %80 {strides = array<i32>} : memref<1x4x8x8xbf16, #tpu.memory_space<vmem>>, vector<1x1x8x8xbf16>,
    %81 = vector.extract_strided_slice %45 {offsets = [0, 16], sizes = [8, 8], strides = [1, 1]} : vector<8x32xbf16> to vector<8x8xbf16>
    %c0_46 = arith.constant 0 : index
    %c2_47 = arith.constant 2 : index
    %c0_48 = arith.constant 0 : index
    %c0_49 = arith.constant 0 : index
    %82 = vector.load %arg9[%c0_46, %c2_47, %c0_48, %c0_49] : memref<1x4x8x8xbf16, #tpu.memory_space<vmem>>, vector<1x1x8x8xbf16>
    %83 = vector.shape_cast %82 : vector<1x1x8x8xbf16> to vector<8x8xbf16>
    %84 = vector.shape_cast %81 : vector<8x8xbf16> to vector<1x1x8x8xbf16>
    tpu.vector_store %arg9[%c0_46, %c2_47, %c0_48, %c0_49], %84 {strides = array<i32>} : memref<1x4x8x8xbf16, #tpu.memory_space<vmem>>, vector<1x1x8x8xbf16>,
    %85 = vector.extract_strided_slice %41 {offsets = [0, 24], sizes = [8, 8], strides = [1, 1]} : vector<8x32xbf16> to vector<8x8xbf16>
    %c0_50 = arith.constant 0 : index
    %c3 = arith.constant 3 : index
    %c0_51 = arith.constant 0 : index
    %c0_52 = arith.constant 0 : index
    %86 = vector.load %arg7[%c0_50, %c3, %c0_51, %c0_52] : memref<1x4x8x8xbf16, #tpu.memory_space<vmem>>, vector<1x1x8x8xbf16>
    %87 = vector.shape_cast %86 : vector<1x1x8x8xbf16> to vector<8x8xbf16>
    %88 = vector.shape_cast %85 : vector<8x8xbf16> to vector<1x1x8x8xbf16>
    tpu.vector_store %arg7[%c0_50, %c3, %c0_51, %c0_52], %88 {strides = array<i32>} : memref<1x4x8x8xbf16, #tpu.memory_space<vmem>>, vector<1x1x8x8xbf16>,
    %89 = vector.extract_strided_slice %43 {offsets = [24, 0], sizes = [8, 8], strides = [1, 1]} : vector<32x8xf32> to vector<8x8xf32>
    %90 = arith.truncf %89 : vector<8x8xf32> to vector<8x8xbf16>
    %c0_53 = arith.constant 0 : index
    %c3_54 = arith.constant 3 : index
    %c0_55 = arith.constant 0 : index
    %c0_56 = arith.constant 0 : index
    %91 = vector.load %arg8[%c0_53, %c3_54, %c0_55, %c0_56] : memref<1x4x8x8xbf16, #tpu.memory_space<vmem>>, vector<1x1x8x8xbf16>
    %92 = vector.shape_cast %91 : vector<1x1x8x8xbf16> to vector<8x8xbf16>
    %93 = vector.shape_cast %90 : vector<8x8xbf16> to vector<1x1x8x8xbf16>
    tpu.vector_store %arg8[%c0_53, %c3_54, %c0_55, %c0_56], %93 {strides = array<i32>} : memref<1x4x8x8xbf16, #tpu.memory_space<vmem>>, vector<1x1x8x8xbf16>,
    %94 = vector.extract_strided_slice %45 {offsets = [0, 24], sizes = [8, 8], strides = [1, 1]} : vector<8x32xbf16> to vector<8x8xbf16>
    %c0_57 = arith.constant 0 : index
    %c3_58 = arith.constant 3 : index
    %c0_59 = arith.constant 0 : index
    %c0_60 = arith.constant 0 : index
    %95 = vector.load %arg9[%c0_57, %c3_58, %c0_59, %c0_60] : memref<1x4x8x8xbf16, #tpu.memory_space<vmem>>, vector<1x1x8x8xbf16>
    %96 = vector.shape_cast %95 : vector<1x1x8x8xbf16> to vector<8x8xbf16>
    %97 = vector.shape_cast %94 : vector<8x8xbf16> to vector<1x1x8x8xbf16>
    tpu.vector_store %arg9[%c0_57, %c3_58, %c0_59, %c0_60], %97 {strides = array<i32>} : memref<1x4x8x8xbf16, #tpu.memory_space<vmem>>, vector<1x1x8x8xbf16>,
    return
  }
  func.func @transform_0(%arg0: i32, %arg1: i32) -> (i32, i32, i32) {
    %c0_i32 = arith.constant 0 : i32
    %c0_i32_0 = arith.constant 0 : i32
    return %arg0, %arg1, %c0_i32 : i32, i32, i32
  }
  func.func @transform_1(%arg0: i32, %arg1: i32) -> (i32, i32) {
    %c0_i32 = arith.constant 0 : i32
    %c0_i32_0 = arith.constant 0 : i32
    %c0_i32_1 = arith.constant 0 : i32
    return %c0_i32, %c0_i32_0 : i32, i32
  }
  func.func @transform_2(%arg0: i32, %arg1: i32) -> (i32, i32) {
    %c0_i32 = arith.constant 0 : i32
    %c0_i32_0 = arith.constant 0 : i32
    %c0_i32_1 = arith.constant 0 : i32
    return %c0_i32, %c0_i32_0 : i32, i32
  }
  func.func @transform_3(%arg0: i32, %arg1: i32) -> (i32, i32) {
    %c0_i32 = arith.constant 0 : i32
    %c0_i32_0 = arith.constant 0 : i32
    %c0_i32_1 = arith.constant 0 : i32
    return %c0_i32, %c0_i32_0 : i32, i32
  }
  func.func @transform_4(%arg0: i32, %arg1: i32) -> (i32, i32) {
    %c0_i32 = arith.constant 0 : i32
    %c0_i32_0 = arith.constant 0 : i32
    %c0_i32_1 = arith.constant 0 : i32
    return %c0_i32, %c0_i32_0 : i32, i32
  }
  func.func @transform_5(%arg0: i32, %arg1: i32) -> (i32, i32, i32, i32) {
    %c0_i32 = arith.constant 0 : i32
    %c0_i32_0 = arith.constant 0 : i32
    %c0_i32_1 = arith.constant 0 : i32
    return %arg0, %c0_i32, %arg1, %c0_i32_0 : i32, i32, i32, i32
  }
  func.func @transform_6(%arg0: i32, %arg1: i32) -> (i32, i32, i32, i32) {
    %c0_i32 = arith.constant 0 : i32
    %c0_i32_0 = arith.constant 0 : i32
    %c0_i32_1 = arith.constant 0 : i32
    return %arg0, %c0_i32, %c0_i32_0, %arg1 : i32, i32, i32, i32
  }
  func.func @transform_7(%arg0: i32, %arg1: i32) -> (i32, i32, i32, i32) {
    %c0_i32 = arith.constant 0 : i32
    %c0_i32_0 = arith.constant 0 : i32
    %c0_i32_1 = arith.constant 0 : i32
    return %arg0, %c0_i32, %arg1, %c0_i32_0 : i32, i32, i32, i32
  }
}

module attributes {stable_mosaic.version = 11 : i64} {
  func.func @attn_mlp_kernel(%arg0: i32, %arg1: i32, %arg2: memref<1xi32, #tpu.memory_space<smem>>, %arg3: memref<1xi32, #tpu.memory_space<smem>>, %arg4: memref<1x8x32xf32, #tpu.memory_space<vmem>>, %arg5: memref<1x4x8x8xbf16, #tpu.memory_space<vmem>>, %arg6: memref<1x4x8x8xbf16, #tpu.memory_space<vmem>>, %arg7: memref<1x4x8x8xbf16, #tpu.memory_space<vmem>>, %arg8: memref<4x8x32xbf16, #tpu.memory_space<vmem>>, %arg9: memref<1x32xf32, #tpu.memory_space<vmem>>, %arg10: memref<1x32xf32, #tpu.memory_space<vmem>>, %arg11: memref<1x32xf32, #tpu.memory_space<vmem>>, %arg12: memref<32x128xbf16, #tpu.memory_space<vmem>>, %arg13: memref<1x128xf32, #tpu.memory_space<vmem>>, %arg14: memref<128x32xbf16, #tpu.memory_space<vmem>>, %arg15: memref<1x32xf32, #tpu.memory_space<vmem>>, %arg16: memref<1x8x32xf32, #tpu.memory_space<vmem>>, %arg17: memref<4x8x1xf32, #tpu.memory_space<vmem>>, %arg18: memref<4x8x1xf32, #tpu.memory_space<vmem>>, %arg19: memref<4x8x8xf32, #tpu.memory_space<vmem>>) attributes {dimension_semantics = [#tpu.dimension_semantics<parallel>, #tpu.dimension_semantics<arbitrary>], iteration_bounds = array<i64: 2, 1>, scalar_prefetch = 2 : i64, scratch_operands = 3 : i64, tpu.core_type = #tpu.core_type<tc>, window_params = [{transform_indices = @transform_0, window_bounds = array<i64: 1, 8, 32>}, {transform_indices = @transform_1, window_bounds = array<i64: 1, 4, 8, 8>}, {transform_indices = @transform_2, window_bounds = array<i64: 1, 4, 8, 8>}, {transform_indices = @transform_3, window_bounds = array<i64: 1, 4, 8, 8>}, {pipeline_mode = #tpu.pipeline_mode<synchronous>, transform_indices = @transform_4, window_bounds = array<i64: 4, 8, 32>}, {pipeline_mode = #tpu.pipeline_mode<synchronous>, transform_indices = @transform_5, window_bounds = array<i64: 1, 32>}, {pipeline_mode = #tpu.pipeline_mode<synchronous>, transform_indices = @transform_6, window_bounds = array<i64: 1, 32>}, {pipeline_mode = #tpu.pipeline_mode<synchronous>, transform_indices = @transform_7, window_bounds = array<i64: 1, 32>}, {pipeline_mode = #tpu.pipeline_mode<synchronous>, transform_indices = @transform_8, window_bounds = array<i64: 32, 128>}, {pipeline_mode = #tpu.pipeline_mode<synchronous>, transform_indices = @transform_9, window_bounds = array<i64: 1, 128>}, {pipeline_mode = #tpu.pipeline_mode<synchronous>, transform_indices = @transform_10, window_bounds = array<i64: 128, 32>}, {pipeline_mode = #tpu.pipeline_mode<synchronous>, transform_indices = @transform_11, window_bounds = array<i64: 1, 32>}, {transform_indices = @transform_12, window_bounds = array<i64: 1, 8, 32>}]} {
    %0 = arith.index_cast %arg1 : i32 to index
    %1 = memref.load %arg2[%0] : memref<1xi32, #tpu.memory_space<smem>>
    %2 = arith.index_cast %arg1 : i32 to index
    %3 = memref.load %arg3[%2] : memref<1xi32, #tpu.memory_space<smem>>
    %c0_i32 = arith.constant 0 : i32
    %4 = arith.cmpi eq, %3, %c0_i32 : i32
    %5 = arith.extui %4 : i1 to i32
    %c0_i32_0 = arith.constant 0 : i32
    %6 = arith.cmpi ne, %5, %c0_i32_0 : i32
    scf.if %6 {
      %cst = arith.constant -1.000000e+30 : f32
      %13 = vector.broadcast %cst : f32 to vector<4x8x1xf32>
      %c0 = arith.constant 0 : index
      %c0_3 = arith.constant 0 : index
      %c0_4 = arith.constant 0 : index
      %14 = vector.load %arg17[%c0, %c0_3, %c0_4] : memref<4x8x1xf32, #tpu.memory_space<vmem>>, vector<4x8x1xf32>
      tpu.vector_store %arg17[%c0, %c0_3, %c0_4], %13 {strides = array<i32>} : memref<4x8x1xf32, #tpu.memory_space<vmem>>, vector<4x8x1xf32>,
      %cst_5 = arith.constant 0.000000e+00 : f32
      %15 = vector.broadcast %cst_5 : f32 to vector<4x8x1xf32>
      %c0_6 = arith.constant 0 : index
      %c0_7 = arith.constant 0 : index
      %c0_8 = arith.constant 0 : index
      %16 = vector.load %arg18[%c0_6, %c0_7, %c0_8] : memref<4x8x1xf32, #tpu.memory_space<vmem>>, vector<4x8x1xf32>
      tpu.vector_store %arg18[%c0_6, %c0_7, %c0_8], %15 {strides = array<i32>} : memref<4x8x1xf32, #tpu.memory_space<vmem>>, vector<4x8x1xf32>,
      %cst_9 = arith.constant 0.000000e+00 : f32
      %17 = vector.broadcast %cst_9 : f32 to vector<4x8x8xf32>
      %c0_10 = arith.constant 0 : index
      %c0_11 = arith.constant 0 : index
      %c0_12 = arith.constant 0 : index
      %18 = vector.load %arg19[%c0_10, %c0_11, %c0_12] : memref<4x8x8xf32, #tpu.memory_space<vmem>>, vector<4x8x8xf32>
      tpu.vector_store %arg19[%c0_10, %c0_11, %c0_12], %17 {strides = array<i32>} : memref<4x8x8xf32, #tpu.memory_space<vmem>>, vector<4x8x8xf32>,
    } else {
    }
    %7 = arith.cmpi slt, %3, %1 : i32
    %8 = arith.extui %7 : i1 to i32
    %c0_i32_1 = arith.constant 0 : i32
    %9 = arith.cmpi ne, %8, %c0_i32_1 : i32
    scf.if %9 {
      %c0 = arith.constant 0 : index
      %c0_3 = arith.constant 0 : index
      %c0_4 = arith.constant 0 : index
      %c0_5 = arith.constant 0 : index
      %13 = vector.load %arg5[%c0, %c0_3, %c0_4, %c0_5] : memref<1x4x8x8xbf16, #tpu.memory_space<vmem>>, vector<1x4x8x8xbf16>
      %14 = vector.shape_cast %13 : vector<1x4x8x8xbf16> to vector<4x8x8xbf16>
      %c0_6 = arith.constant 0 : index
      %c0_7 = arith.constant 0 : index
      %c0_8 = arith.constant 0 : index
      %c0_9 = arith.constant 0 : index
      %15 = vector.load %arg6[%c0_6, %c0_7, %c0_8, %c0_9] : memref<1x4x8x8xbf16, #tpu.memory_space<vmem>>, vector<1x4x8x8xbf16>
      %16 = vector.shape_cast %15 : vector<1x4x8x8xbf16> to vector<4x8x8xbf16>
      %c0_10 = arith.constant 0 : index
      %c0_11 = arith.constant 0 : index
      %c0_12 = arith.constant 0 : index
      %c0_13 = arith.constant 0 : index
      %17 = vector.load %arg7[%c0_10, %c0_11, %c0_12, %c0_13] : memref<1x4x8x8xbf16, #tpu.memory_space<vmem>>, vector<1x4x8x8xbf16>
      %18 = vector.shape_cast %17 : vector<1x4x8x8xbf16> to vector<4x8x8xbf16>
      "tpu.trace_start"() <{level = 10 : i32, message = "hqd,hdk->hqk"}> : () -> ()
      %cst = arith.constant dense<0.000000e+00> : vector<4x8x8xf32>
      %19 = tpu.matmul %14, %16, %cst {dimension_numbers = #tpu.dot_dimension_numbers<[2], [1], [1], [2], [0, 0, 0, 1, 1, 2], [0], [0]>} : vector<4x8x8xbf16>, vector<4x8x8xbf16>, vector<4x8x8xf32> -> vector<4x8x8xf32>
      "tpu.trace_stop"() : () -> ()
      %c0_14 = arith.constant 0 : index
      %c0_15 = arith.constant 0 : index
      %c0_16 = arith.constant 0 : index
      %20 = vector.load %arg17[%c0_14, %c0_15, %c0_16] : memref<4x8x1xf32, #tpu.memory_space<vmem>>, vector<4x8x1xf32>
      %cst_17 = arith.constant dense<0xFF800000> : vector<4x8xf32>
      %21 = vector.multi_reduction <maximumf>, %19, %cst_17 [2] : vector<4x8x8xf32> to vector<4x8xf32>
      %22 = vector.shape_cast %21 : vector<4x8xf32> to vector<4x8x1xf32>
      %23 = arith.maximumf %20, %22 : vector<4x8x1xf32>
      %24 = arith.subf %20, %23 : vector<4x8x1xf32>
      %25 = math.exp %24 : vector<4x8x1xf32>
      %26 = vector.broadcast %23 : vector<4x8x1xf32> to vector<4x8x8xf32>
      %27 = arith.subf %19, %26 : vector<4x8x8xf32>
      %28 = math.exp %27 : vector<4x8x8xf32>
      %c0_18 = arith.constant 0 : index
      %c0_19 = arith.constant 0 : index
      %c0_20 = arith.constant 0 : index
      %29 = vector.load %arg18[%c0_18, %c0_19, %c0_20] : memref<4x8x1xf32, #tpu.memory_space<vmem>>, vector<4x8x1xf32>
      %30 = arith.mulf %25, %29 : vector<4x8x1xf32>
      %cst_21 = arith.constant dense<0.000000e+00> : vector<4x8xf32>
      %31 = vector.multi_reduction <add>, %28, %cst_21 [2] : vector<4x8x8xf32> to vector<4x8xf32>
      %32 = vector.shape_cast %31 : vector<4x8xf32> to vector<4x8x1xf32>
      %33 = arith.addf %30, %32 : vector<4x8x1xf32>
      %c0_22 = arith.constant 0 : index
      %c0_23 = arith.constant 0 : index
      %c0_24 = arith.constant 0 : index
      %34 = vector.load %arg18[%c0_22, %c0_23, %c0_24] : memref<4x8x1xf32, #tpu.memory_space<vmem>>, vector<4x8x1xf32>
      tpu.vector_store %arg18[%c0_22, %c0_23, %c0_24], %33 {strides = array<i32>} : memref<4x8x1xf32, #tpu.memory_space<vmem>>, vector<4x8x1xf32>,
      %c0_25 = arith.constant 0 : index
      %c0_26 = arith.constant 0 : index
      %c0_27 = arith.constant 0 : index
      %35 = vector.load %arg19[%c0_25, %c0_26, %c0_27] : memref<4x8x8xf32, #tpu.memory_space<vmem>>, vector<4x8x8xf32>
      %36 = vector.broadcast %25 : vector<4x8x1xf32> to vector<4x8x8xf32>
      %37 = arith.mulf %36, %35 : vector<4x8x8xf32>
      %38 = arith.truncf %28 : vector<4x8x8xf32> to vector<4x8x8xbf16>
      "tpu.trace_start"() <{level = 10 : i32, message = "hqk,hkd->hqd"}> : () -> ()
      %cst_28 = arith.constant dense<0.000000e+00> : vector<4x8x8xf32>
      %39 = tpu.matmul %38, %18, %cst_28 {dimension_numbers = #tpu.dot_dimension_numbers<[2], [1], [1], [2], [0, 0, 0, 1, 1, 2], [0], [0]>} : vector<4x8x8xbf16>, vector<4x8x8xbf16>, vector<4x8x8xf32> -> vector<4x8x8xf32>
      "tpu.trace_stop"() : () -> ()
      %40 = arith.addf %37, %39 : vector<4x8x8xf32>
      %c0_29 = arith.constant 0 : index
      %c0_30 = arith.constant 0 : index
      %c0_31 = arith.constant 0 : index
      %41 = vector.load %arg19[%c0_29, %c0_30, %c0_31] : memref<4x8x8xf32, #tpu.memory_space<vmem>>, vector<4x8x8xf32>
      tpu.vector_store %arg19[%c0_29, %c0_30, %c0_31], %40 {strides = array<i32>} : memref<4x8x8xf32, #tpu.memory_space<vmem>>, vector<4x8x8xf32>,
      %c0_32 = arith.constant 0 : index
      %c0_33 = arith.constant 0 : index
      %c0_34 = arith.constant 0 : index
      %42 = vector.load %arg17[%c0_32, %c0_33, %c0_34] : memref<4x8x1xf32, #tpu.memory_space<vmem>>, vector<4x8x1xf32>
      tpu.vector_store %arg17[%c0_32, %c0_33, %c0_34], %23 {strides = array<i32>} : memref<4x8x1xf32, #tpu.memory_space<vmem>>, vector<4x8x1xf32>,
    } else {
    }
    %10 = arith.cmpi eq, %3, %1 : i32
    %11 = arith.extui %10 : i1 to i32
    %c0_i32_2 = arith.constant 0 : i32
    %12 = arith.cmpi ne, %11, %c0_i32_2 : i32
    scf.if %12 {
      %c0 = arith.constant 0 : index
      %c0_3 = arith.constant 0 : index
      %c0_4 = arith.constant 0 : index
      %c0_5 = arith.constant 0 : index
      %13 = vector.load %arg5[%c0, %c0_3, %c0_4, %c0_5] : memref<1x4x8x8xbf16, #tpu.memory_space<vmem>>, vector<1x4x8x8xbf16>
      %14 = vector.shape_cast %13 : vector<1x4x8x8xbf16> to vector<4x8x8xbf16>
      %c0_6 = arith.constant 0 : index
      %c0_7 = arith.constant 0 : index
      %c0_8 = arith.constant 0 : index
      %c0_9 = arith.constant 0 : index
      %15 = vector.load %arg6[%c0_6, %c0_7, %c0_8, %c0_9] : memref<1x4x8x8xbf16, #tpu.memory_space<vmem>>, vector<1x4x8x8xbf16>
      %16 = vector.shape_cast %15 : vector<1x4x8x8xbf16> to vector<4x8x8xbf16>
      %c0_10 = arith.constant 0 : index
      %c0_11 = arith.constant 0 : index
      %c0_12 = arith.constant 0 : index
      %c0_13 = arith.constant 0 : index
      %17 = vector.load %arg7[%c0_10, %c0_11, %c0_12, %c0_13] : memref<1x4x8x8xbf16, #tpu.memory_space<vmem>>, vector<1x4x8x8xbf16>
      %18 = vector.shape_cast %17 : vector<1x4x8x8xbf16> to vector<4x8x8xbf16>
      "tpu.trace_start"() <{level = 10 : i32, message = "hqd,hdk->hqk"}> : () -> ()
      %cst = arith.constant dense<0.000000e+00> : vector<4x8x8xf32>
      %19 = tpu.matmul %14, %16, %cst {dimension_numbers = #tpu.dot_dimension_numbers<[2], [1], [1], [2], [0, 0, 0, 1, 1, 2], [0], [0]>} : vector<4x8x8xbf16>, vector<4x8x8xbf16>, vector<4x8x8xf32> -> vector<4x8x8xf32>
      "tpu.trace_stop"() : () -> ()
      %20 = tpu.iota {dimensions = array<i32: 0>} : vector<8x8xi32>
      %21 = tpu.iota {dimensions = array<i32: 1>} : vector<8x8xi32>
      %22 = arith.cmpi sle, %21, %20 : vector<8x8xi32>
      %cst_14 = arith.constant -1.000000e+30 : f32
      %23 = vector.shape_cast %22 : vector<8x8xi1> to vector<1x8x8xi1>
      %24 = vector.broadcast %23 : vector<1x8x8xi1> to vector<4x8x8xi1>
      %25 = vector.broadcast %cst_14 : f32 to vector<4x8x8xf32>
      %26 = arith.select %24, %19, %25 : vector<4x8x8xi1>, vector<4x8x8xf32>
      %c0_15 = arith.constant 0 : index
      %c0_16 = arith.constant 0 : index
      %c0_17 = arith.constant 0 : index
      %27 = vector.load %arg17[%c0_15, %c0_16, %c0_17] : memref<4x8x1xf32, #tpu.memory_space<vmem>>, vector<4x8x1xf32>
      %cst_18 = arith.constant dense<0xFF800000> : vector<4x8xf32>
      %28 = vector.multi_reduction <maximumf>, %26, %cst_18 [2] : vector<4x8x8xf32> to vector<4x8xf32>
      %29 = vector.shape_cast %28 : vector<4x8xf32> to vector<4x8x1xf32>
      %30 = arith.maximumf %27, %29 : vector<4x8x1xf32>
      %31 = arith.subf %27, %30 : vector<4x8x1xf32>
      %32 = math.exp %31 : vector<4x8x1xf32>
      %33 = vector.broadcast %30 : vector<4x8x1xf32> to vector<4x8x8xf32>
      %34 = arith.subf %26, %33 : vector<4x8x8xf32>
      %35 = math.exp %34 : vector<4x8x8xf32>
      %c0_19 = arith.constant 0 : index
      %c0_20 = arith.constant 0 : index
      %c0_21 = arith.constant 0 : index
      %36 = vector.load %arg18[%c0_19, %c0_20, %c0_21] : memref<4x8x1xf32, #tpu.memory_space<vmem>>, vector<4x8x1xf32>
      %37 = arith.mulf %32, %36 : vector<4x8x1xf32>
      %cst_22 = arith.constant dense<0.000000e+00> : vector<4x8xf32>
      %38 = vector.multi_reduction <add>, %35, %cst_22 [2] : vector<4x8x8xf32> to vector<4x8xf32>
      %39 = vector.shape_cast %38 : vector<4x8xf32> to vector<4x8x1xf32>
      %40 = arith.addf %37, %39 : vector<4x8x1xf32>
      %c0_23 = arith.constant 0 : index
      %c0_24 = arith.constant 0 : index
      %c0_25 = arith.constant 0 : index
      %41 = vector.load %arg19[%c0_23, %c0_24, %c0_25] : memref<4x8x8xf32, #tpu.memory_space<vmem>>, vector<4x8x8xf32>
      %42 = vector.broadcast %32 : vector<4x8x1xf32> to vector<4x8x8xf32>
      %43 = arith.mulf %42, %41 : vector<4x8x8xf32>
      %44 = arith.truncf %35 : vector<4x8x8xf32> to vector<4x8x8xbf16>
      "tpu.trace_start"() <{level = 10 : i32, message = "hqk,hkd->hqd"}> : () -> ()
      %cst_26 = arith.constant dense<0.000000e+00> : vector<4x8x8xf32>
      %45 = tpu.matmul %44, %18, %cst_26 {dimension_numbers = #tpu.dot_dimension_numbers<[2], [1], [1], [2], [0, 0, 0, 1, 1, 2], [0], [0]>} : vector<4x8x8xbf16>, vector<4x8x8xbf16>, vector<4x8x8xf32> -> vector<4x8x8xf32>
      "tpu.trace_stop"() : () -> ()
      %46 = arith.addf %43, %45 : vector<4x8x8xf32>
      %47 = tpu.reciprocal %40 {approx = true} : vector<4x8x1xf32> -> vector<4x8x1xf32>
      %48 = vector.broadcast %47 : vector<4x8x1xf32> to vector<4x8x8xf32>
      %49 = arith.mulf %46, %48 : vector<4x8x8xf32>
      %cst_27 = arith.constant 0.000000e+00 : f32
      %50 = vector.broadcast %cst_27 : f32 to vector<8x32xf32>
      %51 = vector.extract_strided_slice %49 {offsets = [0, 0, 0], sizes = [1, 8, 8], strides = [1, 1, 1]} : vector<4x8x8xf32> to vector<1x8x8xf32>
      %52 = vector.shape_cast %51 : vector<1x8x8xf32> to vector<8x8xf32>
      %53 = arith.truncf %52 : vector<8x8xf32> to vector<8x8xbf16>
      %c0_28 = arith.constant 0 : index
      %c0_29 = arith.constant 0 : index
      %c0_30 = arith.constant 0 : index
      %54 = vector.load %arg8[%c0_28, %c0_29, %c0_30] : memref<4x8x32xbf16, #tpu.memory_space<vmem>>, vector<1x8x32xbf16>
      %55 = vector.shape_cast %54 : vector<1x8x32xbf16> to vector<8x32xbf16>
      %cst_31 = arith.constant dense<0.000000e+00> : vector<8x32xf32>
      %56 = tpu.matmul %53, %55, %cst_31 {dimension_numbers = #tpu.dot_dimension_numbers<[1], [0], [0], [1], [0, 0, 1, 1], [], []>} : vector<8x8xbf16>, vector<8x32xbf16>, vector<8x32xf32> -> vector<8x32xf32>
      %57 = arith.addf %50, %56 : vector<8x32xf32>
      %58 = vector.extract_strided_slice %49 {offsets = [1, 0, 0], sizes = [1, 8, 8], strides = [1, 1, 1]} : vector<4x8x8xf32> to vector<1x8x8xf32>
      %59 = vector.shape_cast %58 : vector<1x8x8xf32> to vector<8x8xf32>
      %60 = arith.truncf %59 : vector<8x8xf32> to vector<8x8xbf16>
      %c1 = arith.constant 1 : index
      %c0_32 = arith.constant 0 : index
      %c0_33 = arith.constant 0 : index
      %61 = vector.load %arg8[%c1, %c0_32, %c0_33] : memref<4x8x32xbf16, #tpu.memory_space<vmem>>, vector<1x8x32xbf16>
      %62 = vector.shape_cast %61 : vector<1x8x32xbf16> to vector<8x32xbf16>
      %cst_34 = arith.constant dense<0.000000e+00> : vector<8x32xf32>
      %63 = tpu.matmul %60, %62, %cst_34 {dimension_numbers = #tpu.dot_dimension_numbers<[1], [0], [0], [1], [0, 0, 1, 1], [], []>} : vector<8x8xbf16>, vector<8x32xbf16>, vector<8x32xf32> -> vector<8x32xf32>
      %64 = arith.addf %57, %63 : vector<8x32xf32>
      %65 = vector.extract_strided_slice %49 {offsets = [2, 0, 0], sizes = [1, 8, 8], strides = [1, 1, 1]} : vector<4x8x8xf32> to vector<1x8x8xf32>
      %66 = vector.shape_cast %65 : vector<1x8x8xf32> to vector<8x8xf32>
      %67 = arith.truncf %66 : vector<8x8xf32> to vector<8x8xbf16>
      %c2 = arith.constant 2 : index
      %c0_35 = arith.constant 0 : index
      %c0_36 = arith.constant 0 : index
      %68 = vector.load %arg8[%c2, %c0_35, %c0_36] : memref<4x8x32xbf16, #tpu.memory_space<vmem>>, vector<1x8x32xbf16>
      %69 = vector.shape_cast %68 : vector<1x8x32xbf16> to vector<8x32xbf16>
      %cst_37 = arith.constant dense<0.000000e+00> : vector<8x32xf32>
      %70 = tpu.matmul %67, %69, %cst_37 {dimension_numbers = #tpu.dot_dimension_numbers<[1], [0], [0], [1], [0, 0, 1, 1], [], []>} : vector<8x8xbf16>, vector<8x32xbf16>, vector<8x32xf32> -> vector<8x32xf32>
      %71 = arith.addf %64, %70 : vector<8x32xf32>
      %72 = vector.extract_strided_slice %49 {offsets = [3, 0, 0], sizes = [1, 8, 8], strides = [1, 1, 1]} : vector<4x8x8xf32> to vector<1x8x8xf32>
      %73 = vector.shape_cast %72 : vector<1x8x8xf32> to vector<8x8xf32>
      %74 = arith.truncf %73 : vector<8x8xf32> to vector<8x8xbf16>
      %c3 = arith.constant 3 : index
      %c0_38 = arith.constant 0 : index
      %c0_39 = arith.constant 0 : index
      %75 = vector.load %arg8[%c3, %c0_38, %c0_39] : memref<4x8x32xbf16, #tpu.memory_space<vmem>>, vector<1x8x32xbf16>
      %76 = vector.shape_cast %75 : vector<1x8x32xbf16> to vector<8x32xbf16>
      %cst_40 = arith.constant dense<0.000000e+00> : vector<8x32xf32>
      %77 = tpu.matmul %74, %76, %cst_40 {dimension_numbers = #tpu.dot_dimension_numbers<[1], [0], [0], [1], [0, 0, 1, 1], [], []>} : vector<8x8xbf16>, vector<8x32xbf16>, vector<8x32xf32> -> vector<8x32xf32>
      %78 = arith.addf %71, %77 : vector<8x32xf32>
      %c0_41 = arith.constant 0 : index
      %c0_42 = arith.constant 0 : index
      %79 = vector.load %arg9[%c0_41, %c0_42] : memref<1x32xf32, #tpu.memory_space<vmem>>, vector<1x32xf32>
      %80 = vector.shape_cast %79 : vector<1x32xf32> to vector<32xf32>
      %81 = vector.shape_cast %80 : vector<32xf32> to vector<1x32xf32>
      %82 = vector.broadcast %81 : vector<1x32xf32> to vector<8x32xf32>
      %83 = arith.addf %78, %82 : vector<8x32xf32>
      %c0_43 = arith.constant 0 : index
      %c0_44 = arith.constant 0 : index
      %c0_45 = arith.constant 0 : index
      %84 = vector.load %arg4[%c0_43, %c0_44, %c0_45] : memref<1x8x32xf32, #tpu.memory_space<vmem>>, vector<1x8x32xf32>
      %85 = vector.shape_cast %84 : vector<1x8x32xf32> to vector<8x32xf32>
      %86 = arith.addf %85, %83 : vector<8x32xf32>
      %c0_46 = arith.constant 0 : index
      %c0_47 = arith.constant 0 : index
      %87 = vector.load %arg10[%c0_46, %c0_47] : memref<1x32xf32, #tpu.memory_space<vmem>>, vector<1x32xf32>
      %88 = vector.shape_cast %87 : vector<1x32xf32> to vector<32xf32>
      %c0_48 = arith.constant 0 : index
      %c0_49 = arith.constant 0 : index
      %89 = vector.load %arg11[%c0_48, %c0_49] : memref<1x32xf32, #tpu.memory_space<vmem>>, vector<1x32xf32>
      %90 = vector.shape_cast %89 : vector<1x32xf32> to vector<32xf32>
      %cst_50 = arith.constant dense<0.000000e+00> : vector<8xf32>
      %91 = vector.multi_reduction <add>, %86, %cst_50 [1] : vector<8x32xf32> to vector<8xf32>
      %92 = vector.shape_cast %91 : vector<8xf32> to vector<8x1xf32>
      %cst_51 = arith.constant 3.200000e+01 : f32
      %93 = vector.broadcast %cst_51 : f32 to vector<8x1xf32>
      %94 = arith.divf %92, %93 : vector<8x1xf32>
      %95 = vector.broadcast %94 : vector<8x1xf32> to vector<8x32xf32>
      %96 = arith.subf %86, %95 : vector<8x32xf32>
      %97 = arith.mulf %96, %96 : vector<8x32xf32>
      %cst_52 = arith.constant dense<0.000000e+00> : vector<8xf32>
      %98 = vector.multi_reduction <add>, %97, %cst_52 [1] : vector<8x32xf32> to vector<8xf32>
      %99 = vector.shape_cast %98 : vector<8xf32> to vector<8x1xf32>
      %cst_53 = arith.constant 3.200000e+01 : f32
      %100 = vector.broadcast %cst_53 : f32 to vector<8x1xf32>
      %101 = arith.divf %99, %100 : vector<8x1xf32>
      %102 = vector.broadcast %94 : vector<8x1xf32> to vector<8x32xf32>
      %103 = arith.subf %86, %102 : vector<8x32xf32>
      %cst_54 = arith.constant 9.99999974E-6 : f32
      %104 = vector.broadcast %cst_54 : f32 to vector<8x1xf32>
      %105 = arith.addf %101, %104 : vector<8x1xf32>
      %106 = math.rsqrt %105 : vector<8x1xf32>
      %107 = vector.broadcast %106 : vector<8x1xf32> to vector<8x32xf32>
      %108 = arith.mulf %103, %107 : vector<8x32xf32>
      %109 = vector.shape_cast %88 : vector<32xf32> to vector<1x32xf32>
      %110 = vector.broadcast %109 : vector<1x32xf32> to vector<8x32xf32>
      %111 = arith.mulf %108, %110 : vector<8x32xf32>
      %112 = vector.shape_cast %90 : vector<32xf32> to vector<1x32xf32>
      %113 = vector.broadcast %112 : vector<1x32xf32> to vector<8x32xf32>
      %114 = arith.addf %111, %113 : vector<8x32xf32>
      %115 = arith.truncf %114 : vector<8x32xf32> to vector<8x32xbf16>
      %c0_55 = arith.constant 0 : index
      %c0_56 = arith.constant 0 : index
      %116 = vector.load %arg12[%c0_55, %c0_56] : memref<32x128xbf16, #tpu.memory_space<vmem>>, vector<32x128xbf16>
      %cst_57 = arith.constant dense<0.000000e+00> : vector<8x128xf32>
      %117 = tpu.matmul %115, %116, %cst_57 {dimension_numbers = #tpu.dot_dimension_numbers<[1], [0], [0], [1], [0, 0, 1, 1], [], []>} : vector<8x32xbf16>, vector<32x128xbf16>, vector<8x128xf32> -> vector<8x128xf32>
      %c0_58 = arith.constant 0 : index
      %c0_59 = arith.constant 0 : index
      %118 = vector.load %arg13[%c0_58, %c0_59] : memref<1x128xf32, #tpu.memory_space<vmem>>, vector<1x128xf32>
      %119 = vector.shape_cast %118 : vector<1x128xf32> to vector<128xf32>
      %120 = vector.shape_cast %119 : vector<128xf32> to vector<1x128xf32>
      %121 = vector.broadcast %120 : vector<1x128xf32> to vector<8x128xf32>
      %122 = arith.addf %117, %121 : vector<8x128xf32>
      %cst_60 = arith.constant 5.000000e-01 : f32
      %123 = vector.broadcast %cst_60 : f32 to vector<8x128xf32>
      %124 = arith.mulf %123, %122 : vector<8x128xf32>
      %cst_61 = arith.constant 4.471500e-02 : f32
      %125 = vector.broadcast %cst_61 : f32 to vector<8x128xf32>
      %126 = arith.mulf %125, %122 : vector<8x128xf32>
      %127 = arith.mulf %126, %122 : vector<8x128xf32>
      %128 = arith.mulf %127, %122 : vector<8x128xf32>
      %129 = arith.addf %122, %128 : vector<8x128xf32>
      %cst_62 = arith.constant 0.797884583 : f32
      %130 = vector.broadcast %cst_62 : f32 to vector<8x128xf32>
      %131 = arith.mulf %130, %129 : vector<8x128xf32>
      %132 = math.tanh %131 : vector<8x128xf32>
      %cst_63 = arith.constant 1.000000e+00 : f32
      %133 = vector.broadcast %cst_63 : f32 to vector<8x128xf32>
      %134 = arith.addf %133, %132 : vector<8x128xf32>
      %135 = arith.mulf %124, %134 : vector<8x128xf32>
      %136 = arith.truncf %135 : vector<8x128xf32> to vector<8x128xbf16>
      %c0_64 = arith.constant 0 : index
      %c0_65 = arith.constant 0 : index
      %137 = vector.load %arg14[%c0_64, %c0_65] : memref<128x32xbf16, #tpu.memory_space<vmem>>, vector<128x32xbf16>
      %cst_66 = arith.constant dense<0.000000e+00> : vector<8x32xf32>
      %138 = tpu.matmul %136, %137, %cst_66 {dimension_numbers = #tpu.dot_dimension_numbers<[1], [0], [0], [1], [0, 0, 1, 1], [], []>} : vector<8x128xbf16>, vector<128x32xbf16>, vector<8x32xf32> -> vector<8x32xf32>
      %139 = arith.addf %86, %138 : vector<8x32xf32>
      %c0_67 = arith.constant 0 : index
      %c0_68 = arith.constant 0 : index
      %140 = vector.load %arg15[%c0_67, %c0_68] : memref<1x32xf32, #tpu.memory_space<vmem>>, vector<1x32xf32>
      %141 = vector.shape_cast %140 : vector<1x32xf32> to vector<32xf32>
      %142 = vector.shape_cast %141 : vector<32xf32> to vector<1x32xf32>
      %143 = vector.broadcast %142 : vector<1x32xf32> to vector<8x32xf32>
      %144 = arith.addf %139, %143 : vector<8x32xf32>
      %c0_69 = arith.constant 0 : index
      %c0_70 = arith.constant 0 : index
      %c0_71 = arith.constant 0 : index
      %145 = vector.load %arg16[%c0_69, %c0_70, %c0_71] : memref<1x8x32xf32, #tpu.memory_space<vmem>>, vector<1x8x32xf32>
      %146 = vector.shape_cast %145 : vector<1x8x32xf32> to vector<8x32xf32>
      %147 = vector.shape_cast %144 : vector<8x32xf32> to vector<1x8x32xf32>
      tpu.vector_store %arg16[%c0_69, %c0_70, %c0_71], %147 {strides = array<i32>} : memref<1x8x32xf32, #tpu.memory_space<vmem>>, vector<1x8x32xf32>,
    } else {
    }
    return
  }
  func.func @transform_0(%arg0: i32, %arg1: i32, %arg2: memref<1xi32, #tpu.memory_space<smem>>, %arg3: memref<1xi32, #tpu.memory_space<smem>>) -> (i32, i32, i32) {
    %0 = arith.index_cast %arg1 : i32 to index
    %1 = memref.load %arg2[%0] : memref<1xi32, #tpu.memory_space<smem>>
    %c0_i32 = arith.constant 0 : i32
    %c0_i32_0 = arith.constant 0 : i32
    return %arg0, %1, %c0_i32 : i32, i32, i32
  }
  func.func @transform_1(%arg0: i32, %arg1: i32, %arg2: memref<1xi32, #tpu.memory_space<smem>>, %arg3: memref<1xi32, #tpu.memory_space<smem>>) -> (i32, i32, i32, i32) {
    %0 = arith.index_cast %arg1 : i32 to index
    %1 = memref.load %arg2[%0] : memref<1xi32, #tpu.memory_space<smem>>
    %c0_i32 = arith.constant 0 : i32
    %c0_i32_0 = arith.constant 0 : i32
    %c0_i32_1 = arith.constant 0 : i32
    return %arg0, %c0_i32, %1, %c0_i32_0 : i32, i32, i32, i32
  }
  func.func @transform_2(%arg0: i32, %arg1: i32, %arg2: memref<1xi32, #tpu.memory_space<smem>>, %arg3: memref<1xi32, #tpu.memory_space<smem>>) -> (i32, i32, i32, i32) {
    %0 = arith.index_cast %arg1 : i32 to index
    %1 = memref.load %arg3[%0] : memref<1xi32, #tpu.memory_space<smem>>
    %c0_i32 = arith.constant 0 : i32
    %c0_i32_0 = arith.constant 0 : i32
    %c0_i32_1 = arith.constant 0 : i32
    return %arg0, %c0_i32, %c0_i32_0, %1 : i32, i32, i32, i32
  }
  func.func @transform_3(%arg0: i32, %arg1: i32, %arg2: memref<1xi32, #tpu.memory_space<smem>>, %arg3: memref<1xi32, #tpu.memory_space<smem>>) -> (i32, i32, i32, i32) {
    %0 = arith.index_cast %arg1 : i32 to index
    %1 = memref.load %arg3[%0] : memref<1xi32, #tpu.memory_space<smem>>
    %c0_i32 = arith.constant 0 : i32
    %c0_i32_0 = arith.constant 0 : i32
    %c0_i32_1 = arith.constant 0 : i32
    return %arg0, %c0_i32, %1, %c0_i32_0 : i32, i32, i32, i32
  }
  func.func @transform_4(%arg0: i32, %arg1: i32, %arg2: memref<1xi32, #tpu.memory_space<smem>>, %arg3: memref<1xi32, #tpu.memory_space<smem>>) -> (i32, i32, i32) {
    %c0_i32 = arith.constant 0 : i32
    %c0_i32_0 = arith.constant 0 : i32
    %c0_i32_1 = arith.constant 0 : i32
    %c0_i32_2 = arith.constant 0 : i32
    return %c0_i32, %c0_i32_0, %c0_i32_1 : i32, i32, i32
  }
  func.func @transform_5(%arg0: i32, %arg1: i32, %arg2: memref<1xi32, #tpu.memory_space<smem>>, %arg3: memref<1xi32, #tpu.memory_space<smem>>) -> (i32, i32) {
    %c0_i32 = arith.constant 0 : i32
    %c0_i32_0 = arith.constant 0 : i32
    %c0_i32_1 = arith.constant 0 : i32
    return %c0_i32, %c0_i32_0 : i32, i32
  }
  func.func @transform_6(%arg0: i32, %arg1: i32, %arg2: memref<1xi32, #tpu.memory_space<smem>>, %arg3: memref<1xi32, #tpu.memory_space<smem>>) -> (i32, i32) {
    %c0_i32 = arith.constant 0 : i32
    %c0_i32_0 = arith.constant 0 : i32
    %c0_i32_1 = arith.constant 0 : i32
    return %c0_i32, %c0_i32_0 : i32, i32
  }
  func.func @transform_7(%arg0: i32, %arg1: i32, %arg2: memref<1xi32, #tpu.memory_space<smem>>, %arg3: memref<1xi32, #tpu.memory_space<smem>>) -> (i32, i32) {
    %c0_i32 = arith.constant 0 : i32
    %c0_i32_0 = arith.constant 0 : i32
    %c0_i32_1 = arith.constant 0 : i32
    return %c0_i32, %c0_i32_0 : i32, i32
  }
  func.func @transform_8(%arg0: i32, %arg1: i32, %arg2: memref<1xi32, #tpu.memory_space<smem>>, %arg3: memref<1xi32, #tpu.memory_space<smem>>) -> (i32, i32) {
    %c0_i32 = arith.constant 0 : i32
    %c0_i32_0 = arith.constant 0 : i32
    %c0_i32_1 = arith.constant 0 : i32
    return %c0_i32, %c0_i32_0 : i32, i32
  }
  func.func @transform_9(%arg0: i32, %arg1: i32, %arg2: memref<1xi32, #tpu.memory_space<smem>>, %arg3: memref<1xi32, #tpu.memory_space<smem>>) -> (i32, i32) {
    %c0_i32 = arith.constant 0 : i32
    %c0_i32_0 = arith.constant 0 : i32
    %c0_i32_1 = arith.constant 0 : i32
    return %c0_i32, %c0_i32_0 : i32, i32
  }
  func.func @transform_10(%arg0: i32, %arg1: i32, %arg2: memref<1xi32, #tpu.memory_space<smem>>, %arg3: memref<1xi32, #tpu.memory_space<smem>>) -> (i32, i32) {
    %c0_i32 = arith.constant 0 : i32
    %c0_i32_0 = arith.constant 0 : i32
    %c0_i32_1 = arith.constant 0 : i32
    return %c0_i32, %c0_i32_0 : i32, i32
  }
  func.func @transform_11(%arg0: i32, %arg1: i32, %arg2: memref<1xi32, #tpu.memory_space<smem>>, %arg3: memref<1xi32, #tpu.memory_space<smem>>) -> (i32, i32) {
    %c0_i32 = arith.constant 0 : i32
    %c0_i32_0 = arith.constant 0 : i32
    %c0_i32_1 = arith.constant 0 : i32
    return %c0_i32, %c0_i32_0 : i32, i32
  }
  func.func @transform_12(%arg0: i32, %arg1: i32, %arg2: memref<1xi32, #tpu.memory_space<smem>>, %arg3: memref<1xi32, #tpu.memory_space<smem>>) -> (i32, i32, i32) {
    %0 = arith.index_cast %arg1 : i32 to index
    %1 = memref.load %arg2[%0] : memref<1xi32, #tpu.memory_space<smem>>
    %c0_i32 = arith.constant 0 : i32
    %c0_i32_0 = arith.constant 0 : i32
    return %arg0, %1, %c0_i32 : i32, i32, i32
  }
}

module attributes {stable_mosaic.version = 11 : i64} {
  func.func @qkv_kernel(%arg0: i32, %arg1: i32, %arg2: memref<1x8x32xf32, #tpu.memory_space<vmem>>, %arg3: memref<1x32xf32, #tpu.memory_space<vmem>>, %arg4: memref<1x32xf32, #tpu.memory_space<vmem>>, %arg5: memref<32x96xbf16, #tpu.memory_space<vmem>>, %arg6: memref<1x96xf32, #tpu.memory_space<vmem>>, %arg7: memref<1x4x8x8xbf16, #tpu.memory_space<vmem>>, %arg8: memref<1x4x8x8xbf16, #tpu.memory_space<vmem>>, %arg9: memref<1x4x8x8xbf16, #tpu.memory_space<vmem>>) attributes {dimension_semantics = [#tpu.dimension_semantics<parallel>, #tpu.dimension_semantics<parallel>], iteration_bounds = array<i64: 2, 1>, scalar_prefetch = 0 : i64, scratch_operands = 0 : i64, tpu.core_type = #tpu.core_type<tc>, window_params = [{transform_indices = @transform_0, window_bounds = array<i64: 1, 8, 32>}, {pipeline_mode = #tpu.pipeline_mode<synchronous>, transform_indices = @transform_1, window_bounds = array<i64: 1, 32>}, {pipeline_mode = #tpu.pipeline_mode<synchronous>, transform_indices = @transform_2, window_bounds = array<i64: 1, 32>}, {pipeline_mode = #tpu.pipeline_mode<synchronous>, transform_indices = @transform_3, window_bounds = array<i64: 32, 96>}, {pipeline_mode = #tpu.pipeline_mode<synchronous>, transform_indices = @transform_4, window_bounds = array<i64: 1, 96>}, {transform_indices = @transform_5, window_bounds = array<i64: 1, 4, 8, 8>}, {transform_indices = @transform_6, window_bounds = array<i64: 1, 4, 8, 8>}, {transform_indices = @transform_7, window_bounds = array<i64: 1, 4, 8, 8>}]} {
    %c0 = arith.constant 0 : index
    %c0_0 = arith.constant 0 : index
    %c0_1 = arith.constant 0 : index
    %0 = vector.load %arg2[%c0, %c0_0, %c0_1] : memref<1x8x32xf32, #tpu.memory_space<vmem>>, vector<1x8x32xf32>
    %1 = vector.shape_cast %0 : vector<1x8x32xf32> to vector<8x32xf32>
    %c0_2 = arith.constant 0 : index
    %c0_3 = arith.constant 0 : index
    %2 = vector.load %arg3[%c0_2, %c0_3] : memref<1x32xf32, #tpu.memory_space<vmem>>, vector<1x32xf32>
    %3 = vector.shape_cast %2 : vector<1x32xf32> to vector<32xf32>
    %c0_4 = arith.constant 0 : index
    %c0_5 = arith.constant 0 : index
    %4 = vector.load %arg4[%c0_4, %c0_5] : memref<1x32xf32, #tpu.memory_space<vmem>>, vector<1x32xf32>
    %5 = vector.shape_cast %4 : vector<1x32xf32> to vector<32xf32>
    %cst = arith.constant dense<0.000000e+00> : vector<8xf32>
    %6 = vector.multi_reduction <add>, %1, %cst [1] : vector<8x32xf32> to vector<8xf32>
    %7 = vector.shape_cast %6 : vector<8xf32> to vector<8x1xf32>
    %cst_6 = arith.constant 3.200000e+01 : f32
    %8 = vector.broadcast %cst_6 : f32 to vector<8x1xf32>
    %9 = arith.divf %7, %8 : vector<8x1xf32>
    %10 = vector.broadcast %9 : vector<8x1xf32> to vector<8x32xf32>
    %11 = arith.subf %1, %10 : vector<8x32xf32>
    %12 = arith.mulf %11, %11 : vector<8x32xf32>
    %cst_7 = arith.constant dense<0.000000e+00> : vector<8xf32>
    %13 = vector.multi_reduction <add>, %12, %cst_7 [1] : vector<8x32xf32> to vector<8xf32>
    %14 = vector.shape_cast %13 : vector<8xf32> to vector<8x1xf32>
    %cst_8 = arith.constant 3.200000e+01 : f32
    %15 = vector.broadcast %cst_8 : f32 to vector<8x1xf32>
    %16 = arith.divf %14, %15 : vector<8x1xf32>
    %17 = vector.broadcast %9 : vector<8x1xf32> to vector<8x32xf32>
    %18 = arith.subf %1, %17 : vector<8x32xf32>
    %cst_9 = arith.constant 9.99999974E-6 : f32
    %19 = vector.broadcast %cst_9 : f32 to vector<8x1xf32>
    %20 = arith.addf %16, %19 : vector<8x1xf32>
    %21 = math.rsqrt %20 : vector<8x1xf32>
    %22 = vector.broadcast %21 : vector<8x1xf32> to vector<8x32xf32>
    %23 = arith.mulf %18, %22 : vector<8x32xf32>
    %24 = vector.shape_cast %3 : vector<32xf32> to vector<1x32xf32>
    %25 = vector.broadcast %24 : vector<1x32xf32> to vector<8x32xf32>
    %26 = arith.mulf %23, %25 : vector<8x32xf32>
    %27 = vector.shape_cast %5 : vector<32xf32> to vector<1x32xf32>
    %28 = vector.broadcast %27 : vector<1x32xf32> to vector<8x32xf32>
    %29 = arith.addf %26, %28 : vector<8x32xf32>
    %30 = arith.truncf %29 : vector<8x32xf32> to vector<8x32xbf16>
    %c0_10 = arith.constant 0 : index
    %c0_11 = arith.constant 0 : index
    %31 = vector.load %arg5[%c0_10, %c0_11] : memref<32x96xbf16, #tpu.memory_space<vmem>>, vector<32x96xbf16>
    %cst_12 = arith.constant dense<0.000000e+00> : vector<8x96xf32>
    %32 = tpu.matmul %30, %31, %cst_12 {dimension_numbers = #tpu.dot_dimension_numbers<[1], [0], [0], [1], [0, 0, 1, 1], [], []>} : vector<8x32xbf16>, vector<32x96xbf16>, vector<8x96xf32> -> vector<8x96xf32>
    %c0_13 = arith.constant 0 : index
    %c0_14 = arith.constant 0 : index
    %33 = vector.load %arg6[%c0_13, %c0_14] : memref<1x96xf32, #tpu.memory_space<vmem>>, vector<1x96xf32>
    %34 = vector.shape_cast %33 : vector<1x96xf32> to vector<96xf32>
    %35 = vector.shape_cast %34 : vector<96xf32> to vector<1x96xf32>
    %36 = vector.broadcast %35 : vector<1x96xf32> to vector<8x96xf32>
    %37 = arith.addf %32, %36 : vector<8x96xf32>
    %38 = vector.extract_strided_slice %37 {offsets = [0, 0], sizes = [8, 32], strides = [1, 1]} : vector<8x96xf32> to vector<8x32xf32>
    %cst_15 = arith.constant 0.353553385 : f32
    %39 = vector.broadcast %cst_15 : f32 to vector<8x32xf32>
    %40 = arith.mulf %38, %39 : vector<8x32xf32>
    %41 = arith.truncf %40 : vector<8x32xf32> to vector<8x32xbf16>
    %42 = vector.extract_strided_slice %37 {offsets = [0, 32], sizes = [8, 32], strides = [1, 1]} : vector<8x96xf32> to vector<8x32xf32>
    %43 = tpu.transpose %42, [1, 0] : vector<8x32xf32> -> vector<32x8xf32>
    %44 = vector.extract_strided_slice %37 {offsets = [0, 64], sizes = [8, 32], strides = [1, 1]} : vector<8x96xf32> to vector<8x32xf32>
    %45 = arith.truncf %44 : vector<8x32xf32> to vector<8x32xbf16>
    %46 = vector.extract_strided_slice %41 {offsets = [0, 0], sizes = [8, 8], strides = [1, 1]} : vector<8x32xbf16> to vector<8x8xbf16>
    %c0_16 = arith.constant 0 : index
    %c0_17 = arith.constant 0 : index
    %c0_18 = arith.constant 0 : index
    %c0_19 = arith.constant 0 : index
    %47 = vector.load %arg7[%c0_16, %c0_17, %c0_18, %c0_19] : memref<1x4x8x8xbf16, #tpu.memory_space<vmem>>, vector<1x1x8x8xbf16>
    %48 = vector.shape_cast %47 : vector<1x1x8x8xbf16> to vector<8x8xbf16>
    %49 = vector.shape_cast %46 : vector<8x8xbf16> to vector<1x1x8x8xbf16>
    tpu.vector_store %arg7[%c0_16, %c0_17, %c0_18, %c0_19], %49 {strides = array<i32>} : memref<1x4x8x8xbf16, #tpu.memory_space<vmem>>, vector<1x1x8x8xbf16>,
    %50 = vector.extract_strided_slice %43 {offsets = [0, 0], sizes = [8, 8], strides = [1, 1]} : vector<32x8xf32> to vector<8x8xf32>
    %51 = arith.truncf %50 : vector<8x8xf32> to vector<8x8xbf16>
    %c0_20 = arith.constant 0 : index
    %c0_21 = arith.constant 0 : index
    %c0_22 = arith.constant 0 : index
    %c0_23 = arith.constant 0 : index
    %52 = vector.load %arg8[%c0_20, %c0_21, %c0_22, %c0_23] : memref<1x4x8x8xbf16, #tpu.memory_space<vmem>>, vector<1x1x8x8xbf16>
    %53 = vector.shape_cast %52 : vector<1x1x8x8xbf16> to vector<8x8xbf16>
    %54 = vector.shape_cast %51 : vector<8x8xbf16> to vector<1x1x8x8xbf16>
    tpu.vector_store %arg8[%c0_20, %c0_21, %c0_22, %c0_23], %54 {strides = array<i32>} : memref<1x4x8x8xbf16, #tpu.memory_space<vmem>>, vector<1x1x8x8xbf16>,
    %55 = vector.extract_strided_slice %45 {offsets = [0, 0], sizes = [8, 8], strides = [1, 1]} : vector<8x32xbf16> to vector<8x8xbf16>
    %c0_24 = arith.constant 0 : index
    %c0_25 = arith.constant 0 : index
    %c0_26 = arith.constant 0 : index
    %c0_27 = arith.constant 0 : index
    %56 = vector.load %arg9[%c0_24, %c0_25, %c0_26, %c0_27] : memref<1x4x8x8xbf16, #tpu.memory_space<vmem>>, vector<1x1x8x8xbf16>
    %57 = vector.shape_cast %56 : vector<1x1x8x8xbf16> to vector<8x8xbf16>
    %58 = vector.shape_cast %55 : vector<8x8xbf16> to vector<1x1x8x8xbf16>
    tpu.vector_store %arg9[%c0_24, %c0_25, %c0_26, %c0_27], %58 {strides = array<i32>} : memref<1x4x8x8xbf16, #tpu.memory_space<vmem>>, vector<1x1x8x8xbf16>,
    %59 = vector.extract_strided_slice %41 {offsets = [0, 8], sizes = [8, 8], strides = [1, 1]} : vector<8x32xbf16> to vector<8x8xbf16>
    %c0_28 = arith.constant 0 : index
    %c1 = arith.constant 1 : index
    %c0_29 = arith.constant 0 : index
    %c0_30 = arith.constant 0 : index
    %60 = vector.load %arg7[%c0_28, %c1, %c0_29, %c0_30] : memref<1x4x8x8xbf16, #tpu.memory_space<vmem>>, vector<1x1x8x8xbf16>
    %61 = vector.shape_cast %60 : vector<1x1x8x8xbf16> to vector<8x8xbf16>
    %62 = vector.shape_cast %59 : vector<8x8xbf16> to vector<1x1x8x8xbf16>
    tpu.vector_store %arg7[%c0_28, %c1, %c0_29, %c0_30], %62 {strides = array<i32>} : memref<1x4x8x8xbf16, #tpu.memory_space<vmem>>, vector<1x1x8x8xbf16>,
    %63 = vector.extract_strided_slice %43 {offsets = [8, 0], sizes = [8, 8], strides = [1, 1]} : vector<32x8xf32> to vector<8x8xf32>
    %64 = arith.truncf %63 : vector<8x8xf32> to vector<8x8xbf16>
    %c0_31 = arith.constant 0 : index
    %c1_32 = arith.constant 1 : index
    %c0_33 = arith.constant 0 : index
    %c0_34 = arith.constant 0 : index
    %65 = vector.load %arg8[%c0_31, %c1_32, %c0_33, %c0_34] : memref<1x4x8x8xbf16, #tpu.memory_space<vmem>>, vector<1x1x8x8xbf16>
    %66 = vector.shape_cast %65 : vector<1x1x8x8xbf16> to vector<8x8xbf16>
    %67 = vector.shape_cast %64 : vector<8x8xbf16> to vector<1x1x8x8xbf16>
    tpu.vector_store %arg8[%c0_31, %c1_32, %c0_33, %c0_34], %67 {strides = array<i32>} : memref<1x4x8x8xbf16, #tpu.memory_space<vmem>>, vector<1x1x8x8xbf16>,
    %68 = vector.extract_strided_slice %45 {offsets = [0, 8], sizes = [8, 8], strides = [1, 1]} : vector<8x32xbf16> to vector<8x8xbf16>
    %c0_35 = arith.constant 0 : index
    %c1_36 = arith.constant 1 : index
    %c0_37 = arith.constant 0 : index
    %c0_38 = arith.constant 0 : index
    %69 = vector.load %arg9[%c0_35, %c1_36, %c0_37, %c0_38] : memref<1x4x8x8xbf16, #tpu.memory_space<vmem>>, vector<1x1x8x8xbf16>
    %70 = vector.shape_cast %69 : vector<1x1x8x8xbf16> to vector<8x8xbf16>
    %71 = vector.shape_cast %68 : vector<8x8xbf16> to vector<1x1x8x8xbf16>
    tpu.vector_store %arg9[%c0_35, %c1_36, %c0_37, %c0_38], %71 {strides = array<i32>} : memref<1x4x8x8xbf16, #tpu.memory_space<vmem>>, vector<1x1x8x8xbf16>,
    %72 = vector.extract_strided_slice %41 {offsets = [0, 16], sizes = [8, 8], strides = [1, 1]} : vector<8x32xbf16> to vector<8x8xbf16>
    %c0_39 = arith.constant 0 : index
    %c2 = arith.constant 2 : index
    %c0_40 = arith.constant 0 : index
    %c0_41 = arith.constant 0 : index
    %73 = vector.load %arg7[%c0_39, %c2, %c0_40, %c0_41] : memref<1x4x8x8xbf16, #tpu.memory_space<vmem>>, vector<1x1x8x8xbf16>
    %74 = vector.shape_cast %73 : vector<1x1x8x8xbf16> to vector<8x8xbf16>
    %75 = vector.shape_cast %72 : vector<8x8xbf16> to vector<1x1x8x8xbf16>
    tpu.vector_store %arg7[%c0_39, %c2, %c0_40, %c0_41], %75 {strides = array<i32>} : memref<1x4x8x8xbf16, #tpu.memory_space<vmem>>, vector<1x1x8x8xbf16>,
    %76 = vector.extract_strided_slice %43 {offsets = [16, 0], sizes = [8, 8], strides = [1, 1]} : vector<32x8xf32> to vector<8x8xf32>
    %77 = arith.truncf %76 : vector<8x8xf32> to vector<8x8xbf16>
    %c0_42 = arith.constant 0 : index
    %c2_43 = arith.constant 2 : index
    %c0_44 = arith.constant 0 : index
    %c0_45 = arith.constant 0 : index
    %78 = vector.load %arg8[%c0_42, %c2_43, %c0_44, %c0_45] : memref<1x4x8x8xbf16, #tpu.memory_space<vmem>>, vector<1x1x8x8xbf16>
    %79 = vector.shape_cast %78 : vector<1x1x8x8xbf16> to vector<8x8xbf16>
    %80 = vector.shape_cast %77 : vector<8x8xbf16> to vector<1x1x8x8xbf16>
    tpu.vector_store %arg8[%c0_42, %c2_43, %c0_44, %c0_45], %80 {strides = array<i32>} : memref<1x4x8x8xbf16, #tpu.memory_space<vmem>>, vector<1x1x8x8xbf16>,
    %81 = vector.extract_strided_slice %45 {offsets = [0, 16], sizes = [8, 8], strides = [1, 1]} : vector<8x32xbf16> to vector<8x8xbf16>
    %c0_46 = arith.constant 0 : index
    %c2_47 = arith.constant 2 : index
    %c0_48 = arith.constant 0 : index
    %c0_49 = arith.constant 0 : index
    %82 = vector.load %arg9[%c0_46, %c2_47, %c0_48, %c0_49] : memref<1x4x8x8xbf16, #tpu.memory_space<vmem>>, vector<1x1x8x8xbf16>
    %83 = vector.shape_cast %82 : vector<1x1x8x8xbf16> to vector<8x8xbf16>
    %84 = vector.shape_cast %81 : vector<8x8xbf16> to vector<1x1x8x8xbf16>
    tpu.vector_store %arg9[%c0_46, %c2_47, %c0_48, %c0_49], %84 {strides = array<i32>} : memref<1x4x8x8xbf16, #tpu.memory_space<vmem>>, vector<1x1x8x8xbf16>,
    %85 = vector.extract_strided_slice %41 {offsets = [0, 24], sizes = [8, 8], strides = [1, 1]} : vector<8x32xbf16> to vector<8x8xbf16>
    %c0_50 = arith.constant 0 : index
    %c3 = arith.constant 3 : index
    %c0_51 = arith.constant 0 : index
    %c0_52 = arith.constant 0 : index
    %86 = vector.load %arg7[%c0_50, %c3, %c0_51, %c0_52] : memref<1x4x8x8xbf16, #tpu.memory_space<vmem>>, vector<1x1x8x8xbf16>
    %87 = vector.shape_cast %86 : vector<1x1x8x8xbf16> to vector<8x8xbf16>
    %88 = vector.shape_cast %85 : vector<8x8xbf16> to vector<1x1x8x8xbf16>
    tpu.vector_store %arg7[%c0_50, %c3, %c0_51, %c0_52], %88 {strides = array<i32>} : memref<1x4x8x8xbf16, #tpu.memory_space<vmem>>, vector<1x1x8x8xbf16>,
    %89 = vector.extract_strided_slice %43 {offsets = [24, 0], sizes = [8, 8], strides = [1, 1]} : vector<32x8xf32> to vector<8x8xf32>
    %90 = arith.truncf %89 : vector<8x8xf32> to vector<8x8xbf16>
    %c0_53 = arith.constant 0 : index
    %c3_54 = arith.constant 3 : index
    %c0_55 = arith.constant 0 : index
    %c0_56 = arith.constant 0 : index
    %91 = vector.load %arg8[%c0_53, %c3_54, %c0_55, %c0_56] : memref<1x4x8x8xbf16, #tpu.memory_space<vmem>>, vector<1x1x8x8xbf16>
    %92 = vector.shape_cast %91 : vector<1x1x8x8xbf16> to vector<8x8xbf16>
    %93 = vector.shape_cast %90 : vector<8x8xbf16> to vector<1x1x8x8xbf16>
    tpu.vector_store %arg8[%c0_53, %c3_54, %c0_55, %c0_56], %93 {strides = array<i32>} : memref<1x4x8x8xbf16, #tpu.memory_space<vmem>>, vector<1x1x8x8xbf16>,
    %94 = vector.extract_strided_slice %45 {offsets = [0, 24], sizes = [8, 8], strides = [1, 1]} : vector<8x32xbf16> to vector<8x8xbf16>
    %c0_57 = arith.constant 0 : index
    %c3_58 = arith.constant 3 : index
    %c0_59 = arith.constant 0 : index
    %c0_60 = arith.constant 0 : index
    %95 = vector.load %arg9[%c0_57, %c3_58, %c0_59, %c0_60] : memref<1x4x8x8xbf16, #tpu.memory_space<vmem>>, vector<1x1x8x8xbf16>
    %96 = vector.shape_cast %95 : vector<1x1x8x8xbf16> to vector<8x8xbf16>
    %97 = vector.shape_cast %94 : vector<8x8xbf16> to vector<1x1x8x8xbf16>
    tpu.vector_store %arg9[%c0_57, %c3_58, %c0_59, %c0_60], %97 {strides = array<i32>} : memref<1x4x8x8xbf16, #tpu.memory_space<vmem>>, vector<1x1x8x8xbf16>,
    return
  }
  func.func @transform_0(%arg0: i32, %arg1: i32) -> (i32, i32, i32) {
    %c0_i32 = arith.constant 0 : i32
    %c0_i32_0 = arith.constant 0 : i32
    return %arg0, %arg1, %c0_i32 : i32, i32, i32
  }
  func.func @transform_1(%arg0: i32, %arg1: i32) -> (i32, i32) {
    %c0_i32 = arith.constant 0 : i32
    %c0_i32_0 = arith.constant 0 : i32
    %c0_i32_1 = arith.constant 0 : i32
    return %c0_i32, %c0_i32_0 : i32, i32
  }
  func.func @transform_2(%arg0: i32, %arg1: i32) -> (i32, i32) {
    %c0_i32 = arith.constant 0 : i32
    %c0_i32_0 = arith.constant 0 : i32
    %c0_i32_1 = arith.constant 0 : i32
    return %c0_i32, %c0_i32_0 : i32, i32
  }
  func.func @transform_3(%arg0: i32, %arg1: i32) -> (i32, i32) {
    %c0_i32 = arith.constant 0 : i32
    %c0_i32_0 = arith.constant 0 : i32
    %c0_i32_1 = arith.constant 0 : i32
    return %c0_i32, %c0_i32_0 : i32, i32
  }
  func.func @transform_4(%arg0: i32, %arg1: i32) -> (i32, i32) {
    %c0_i32 = arith.constant 0 : i32
    %c0_i32_0 = arith.constant 0 : i32
    %c0_i32_1 = arith.constant 0 : i32
    return %c0_i32, %c0_i32_0 : i32, i32
  }
  func.func @transform_5(%arg0: i32, %arg1: i32) -> (i32, i32, i32, i32) {
    %c0_i32 = arith.constant 0 : i32
    %c0_i32_0 = arith.constant 0 : i32
    %c0_i32_1 = arith.constant 0 : i32
    return %arg0, %c0_i32, %arg1, %c0_i32_0 : i32, i32, i32, i32
  }
  func.func @transform_6(%arg0: i32, %arg1: i32) -> (i32, i32, i32, i32) {
    %c0_i32 = arith.constant 0 : i32
    %c0_i32_0 = arith.constant 0 : i32
    %c0_i32_1 = arith.constant 0 : i32
    return %arg0, %c0_i32, %c0_i32_0, %arg1 : i32, i32, i32, i32
  }
  func.func @transform_7(%arg0: i32, %arg1: i32) -> (i32, i32, i32, i32) {
    %c0_i32 = arith.constant 0 : i32
    %c0_i32_0 = arith.constant 0 : i32
    %c0_i32_1 = arith.constant 0 : i32
    return %arg0, %c0_i32, %arg1, %c0_i32_0 : i32, i32, i32, i32
  }
}

module attributes {stable_mosaic.version = 11 : i64} {
  func.func @attn_mlp_kernel(%arg0: i32, %arg1: i32, %arg2: memref<1xi32, #tpu.memory_space<smem>>, %arg3: memref<1xi32, #tpu.memory_space<smem>>, %arg4: memref<1x8x32xf32, #tpu.memory_space<vmem>>, %arg5: memref<1x4x8x8xbf16, #tpu.memory_space<vmem>>, %arg6: memref<1x4x8x8xbf16, #tpu.memory_space<vmem>>, %arg7: memref<1x4x8x8xbf16, #tpu.memory_space<vmem>>, %arg8: memref<4x8x32xbf16, #tpu.memory_space<vmem>>, %arg9: memref<1x32xf32, #tpu.memory_space<vmem>>, %arg10: memref<1x32xf32, #tpu.memory_space<vmem>>, %arg11: memref<1x32xf32, #tpu.memory_space<vmem>>, %arg12: memref<32x128xbf16, #tpu.memory_space<vmem>>, %arg13: memref<1x128xf32, #tpu.memory_space<vmem>>, %arg14: memref<128x32xbf16, #tpu.memory_space<vmem>>, %arg15: memref<1x32xf32, #tpu.memory_space<vmem>>, %arg16: memref<1x8x32xf32, #tpu.memory_space<vmem>>, %arg17: memref<4x8x1xf32, #tpu.memory_space<vmem>>, %arg18: memref<4x8x1xf32, #tpu.memory_space<vmem>>, %arg19: memref<4x8x8xf32, #tpu.memory_space<vmem>>) attributes {dimension_semantics = [#tpu.dimension_semantics<parallel>, #tpu.dimension_semantics<arbitrary>], iteration_bounds = array<i64: 2, 1>, scalar_prefetch = 2 : i64, scratch_operands = 3 : i64, tpu.core_type = #tpu.core_type<tc>, window_params = [{transform_indices = @transform_0, window_bounds = array<i64: 1, 8, 32>}, {transform_indices = @transform_1, window_bounds = array<i64: 1, 4, 8, 8>}, {transform_indices = @transform_2, window_bounds = array<i64: 1, 4, 8, 8>}, {transform_indices = @transform_3, window_bounds = array<i64: 1, 4, 8, 8>}, {pipeline_mode = #tpu.pipeline_mode<synchronous>, transform_indices = @transform_4, window_bounds = array<i64: 4, 8, 32>}, {pipeline_mode = #tpu.pipeline_mode<synchronous>, transform_indices = @transform_5, window_bounds = array<i64: 1, 32>}, {pipeline_mode = #tpu.pipeline_mode<synchronous>, transform_indices = @transform_6, window_bounds = array<i64: 1, 32>}, {pipeline_mode = #tpu.pipeline_mode<synchronous>, transform_indices = @transform_7, window_bounds = array<i64: 1, 32>}, {pipeline_mode = #tpu.pipeline_mode<synchronous>, transform_indices = @transform_8, window_bounds = array<i64: 32, 128>}, {pipeline_mode = #tpu.pipeline_mode<synchronous>, transform_indices = @transform_9, window_bounds = array<i64: 1, 128>}, {pipeline_mode = #tpu.pipeline_mode<synchronous>, transform_indices = @transform_10, window_bounds = array<i64: 128, 32>}, {pipeline_mode = #tpu.pipeline_mode<synchronous>, transform_indices = @transform_11, window_bounds = array<i64: 1, 32>}, {transform_indices = @transform_12, window_bounds = array<i64: 1, 8, 32>}]} {
    %0 = arith.index_cast %arg1 : i32 to index
    %1 = memref.load %arg2[%0] : memref<1xi32, #tpu.memory_space<smem>>
    %2 = arith.index_cast %arg1 : i32 to index
    %3 = memref.load %arg3[%2] : memref<1xi32, #tpu.memory_space<smem>>
    %c0_i32 = arith.constant 0 : i32
    %4 = arith.cmpi eq, %3, %c0_i32 : i32
    %5 = arith.extui %4 : i1 to i32
    %c0_i32_0 = arith.constant 0 : i32
    %6 = arith.cmpi ne, %5, %c0_i32_0 : i32
    scf.if %6 {
      %cst = arith.constant -1.000000e+30 : f32
      %13 = vector.broadcast %cst : f32 to vector<4x8x1xf32>
      %c0 = arith.constant 0 : index
      %c0_3 = arith.constant 0 : index
      %c0_4 = arith.constant 0 : index
      %14 = vector.load %arg17[%c0, %c0_3, %c0_4] : memref<4x8x1xf32, #tpu.memory_space<vmem>>, vector<4x8x1xf32>
      tpu.vector_store %arg17[%c0, %c0_3, %c0_4], %13 {strides = array<i32>} : memref<4x8x1xf32, #tpu.memory_space<vmem>>, vector<4x8x1xf32>,
      %cst_5 = arith.constant 0.000000e+00 : f32
      %15 = vector.broadcast %cst_5 : f32 to vector<4x8x1xf32>
      %c0_6 = arith.constant 0 : index
      %c0_7 = arith.constant 0 : index
      %c0_8 = arith.constant 0 : index
      %16 = vector.load %arg18[%c0_6, %c0_7, %c0_8] : memref<4x8x1xf32, #tpu.memory_space<vmem>>, vector<4x8x1xf32>
      tpu.vector_store %arg18[%c0_6, %c0_7, %c0_8], %15 {strides = array<i32>} : memref<4x8x1xf32, #tpu.memory_space<vmem>>, vector<4x8x1xf32>,
      %cst_9 = arith.constant 0.000000e+00 : f32
      %17 = vector.broadcast %cst_9 : f32 to vector<4x8x8xf32>
      %c0_10 = arith.constant 0 : index
      %c0_11 = arith.constant 0 : index
      %c0_12 = arith.constant 0 : index
      %18 = vector.load %arg19[%c0_10, %c0_11, %c0_12] : memref<4x8x8xf32, #tpu.memory_space<vmem>>, vector<4x8x8xf32>
      tpu.vector_store %arg19[%c0_10, %c0_11, %c0_12], %17 {strides = array<i32>} : memref<4x8x8xf32, #tpu.memory_space<vmem>>, vector<4x8x8xf32>,
    } else {
    }
    %7 = arith.cmpi slt, %3, %1 : i32
    %8 = arith.extui %7 : i1 to i32
    %c0_i32_1 = arith.constant 0 : i32
    %9 = arith.cmpi ne, %8, %c0_i32_1 : i32
    scf.if %9 {
      %c0 = arith.constant 0 : index
      %c0_3 = arith.constant 0 : index
      %c0_4 = arith.constant 0 : index
      %c0_5 = arith.constant 0 : index
      %13 = vector.load %arg5[%c0, %c0_3, %c0_4, %c0_5] : memref<1x4x8x8xbf16, #tpu.memory_space<vmem>>, vector<1x4x8x8xbf16>
      %14 = vector.shape_cast %13 : vector<1x4x8x8xbf16> to vector<4x8x8xbf16>
      %c0_6 = arith.constant 0 : index
      %c0_7 = arith.constant 0 : index
      %c0_8 = arith.constant 0 : index
      %c0_9 = arith.constant 0 : index
      %15 = vector.load %arg6[%c0_6, %c0_7, %c0_8, %c0_9] : memref<1x4x8x8xbf16, #tpu.memory_space<vmem>>, vector<1x4x8x8xbf16>
      %16 = vector.shape_cast %15 : vector<1x4x8x8xbf16> to vector<4x8x8xbf16>
      %c0_10 = arith.constant 0 : index
      %c0_11 = arith.constant 0 : index
      %c0_12 = arith.constant 0 : index
      %c0_13 = arith.constant 0 : index
      %17 = vector.load %arg7[%c0_10, %c0_11, %c0_12, %c0_13] : memref<1x4x8x8xbf16, #tpu.memory_space<vmem>>, vector<1x4x8x8xbf16>
      %18 = vector.shape_cast %17 : vector<1x4x8x8xbf16> to vector<4x8x8xbf16>
      "tpu.trace_start"() <{level = 10 : i32, message = "hqd,hdk->hqk"}> : () -> ()
      %cst = arith.constant dense<0.000000e+00> : vector<4x8x8xf32>
      %19 = tpu.matmul %14, %16, %cst {dimension_numbers = #tpu.dot_dimension_numbers<[2], [1], [1], [2], [0, 0, 0, 1, 1, 2], [0], [0]>} : vector<4x8x8xbf16>, vector<4x8x8xbf16>, vector<4x8x8xf32> -> vector<4x8x8xf32>
      "tpu.trace_stop"() : () -> ()
      %c0_14 = arith.constant 0 : index
      %c0_15 = arith.constant 0 : index
      %c0_16 = arith.constant 0 : index
      %20 = vector.load %arg17[%c0_14, %c0_15, %c0_16] : memref<4x8x1xf32, #tpu.memory_space<vmem>>, vector<4x8x1xf32>
      %cst_17 = arith.constant dense<0xFF800000> : vector<4x8xf32>
      %21 = vector.multi_reduction <maximumf>, %19, %cst_17 [2] : vector<4x8x8xf32> to vector<4x8xf32>
      %22 = vector.shape_cast %21 : vector<4x8xf32> to vector<4x8x1xf32>
      %23 = arith.maximumf %20, %22 : vector<4x8x1xf32>
      %24 = arith.subf %20, %23 : vector<4x8x1xf32>
      %25 = math.exp %24 : vector<4x8x1xf32>
      %26 = vector.broadcast %23 : vector<4x8x1xf32> to vector<4x8x8xf32>
      %27 = arith.subf %19, %26 : vector<4x8x8xf32>
      %28 = math.exp %27 : vector<4x8x8xf32>
      %c0_18 = arith.constant 0 : index
      %c0_19 = arith.constant 0 : index
      %c0_20 = arith.constant 0 : index
      %29 = vector.load %arg18[%c0_18, %c0_19, %c0_20] : memref<4x8x1xf32, #tpu.memory_space<vmem>>, vector<4x8x1xf32>
      %30 = arith.mulf %25, %29 : vector<4x8x1xf32>
      %cst_21 = arith.constant dense<0.000000e+00> : vector<4x8xf32>
      %31 = vector.multi_reduction <add>, %28, %cst_21 [2] : vector<4x8x8xf32> to vector<4x8xf32>
      %32 = vector.shape_cast %31 : vector<4x8xf32> to vector<4x8x1xf32>
      %33 = arith.addf %30, %32 : vector<4x8x1xf32>
      %c0_22 = arith.constant 0 : index
      %c0_23 = arith.constant 0 : index
      %c0_24 = arith.constant 0 : index
      %34 = vector.load %arg18[%c0_22, %c0_23, %c0_24] : memref<4x8x1xf32, #tpu.memory_space<vmem>>, vector<4x8x1xf32>
      tpu.vector_store %arg18[%c0_22, %c0_23, %c0_24], %33 {strides = array<i32>} : memref<4x8x1xf32, #tpu.memory_space<vmem>>, vector<4x8x1xf32>,
      %c0_25 = arith.constant 0 : index
      %c0_26 = arith.constant 0 : index
      %c0_27 = arith.constant 0 : index
      %35 = vector.load %arg19[%c0_25, %c0_26, %c0_27] : memref<4x8x8xf32, #tpu.memory_space<vmem>>, vector<4x8x8xf32>
      %36 = vector.broadcast %25 : vector<4x8x1xf32> to vector<4x8x8xf32>
      %37 = arith.mulf %36, %35 : vector<4x8x8xf32>
      %38 = arith.truncf %28 : vector<4x8x8xf32> to vector<4x8x8xbf16>
      "tpu.trace_start"() <{level = 10 : i32, message = "hqk,hkd->hqd"}> : () -> ()
      %cst_28 = arith.constant dense<0.000000e+00> : vector<4x8x8xf32>
      %39 = tpu.matmul %38, %18, %cst_28 {dimension_numbers = #tpu.dot_dimension_numbers<[2], [1], [1], [2], [0, 0, 0, 1, 1, 2], [0], [0]>} : vector<4x8x8xbf16>, vector<4x8x8xbf16>, vector<4x8x8xf32> -> vector<4x8x8xf32>
      "tpu.trace_stop"() : () -> ()
      %40 = arith.addf %37, %39 : vector<4x8x8xf32>
      %c0_29 = arith.constant 0 : index
      %c0_30 = arith.constant 0 : index
      %c0_31 = arith.constant 0 : index
      %41 = vector.load %arg19[%c0_29, %c0_30, %c0_31] : memref<4x8x8xf32, #tpu.memory_space<vmem>>, vector<4x8x8xf32>
      tpu.vector_store %arg19[%c0_29, %c0_30, %c0_31], %40 {strides = array<i32>} : memref<4x8x8xf32, #tpu.memory_space<vmem>>, vector<4x8x8xf32>,
      %c0_32 = arith.constant 0 : index
      %c0_33 = arith.constant 0 : index
      %c0_34 = arith.constant 0 : index
      %42 = vector.load %arg17[%c0_32, %c0_33, %c0_34] : memref<4x8x1xf32, #tpu.memory_space<vmem>>, vector<4x8x1xf32>
      tpu.vector_store %arg17[%c0_32, %c0_33, %c0_34], %23 {strides = array<i32>} : memref<4x8x1xf32, #tpu.memory_space<vmem>>, vector<4x8x1xf32>,
    } else {
    }
    %10 = arith.cmpi eq, %3, %1 : i32
    %11 = arith.extui %10 : i1 to i32
    %c0_i32_2 = arith.constant 0 : i32
    %12 = arith.cmpi ne, %11, %c0_i32_2 : i32
    scf.if %12 {
      %c0 = arith.constant 0 : index
      %c0_3 = arith.constant 0 : index
      %c0_4 = arith.constant 0 : index
      %c0_5 = arith.constant 0 : index
      %13 = vector.load %arg5[%c0, %c0_3, %c0_4, %c0_5] : memref<1x4x8x8xbf16, #tpu.memory_space<vmem>>, vector<1x4x8x8xbf16>
      %14 = vector.shape_cast %13 : vector<1x4x8x8xbf16> to vector<4x8x8xbf16>
      %c0_6 = arith.constant 0 : index
      %c0_7 = arith.constant 0 : index
      %c0_8 = arith.constant 0 : index
      %c0_9 = arith.constant 0 : index
      %15 = vector.load %arg6[%c0_6, %c0_7, %c0_8, %c0_9] : memref<1x4x8x8xbf16, #tpu.memory_space<vmem>>, vector<1x4x8x8xbf16>
      %16 = vector.shape_cast %15 : vector<1x4x8x8xbf16> to vector<4x8x8xbf16>
      %c0_10 = arith.constant 0 : index
      %c0_11 = arith.constant 0 : index
      %c0_12 = arith.constant 0 : index
      %c0_13 = arith.constant 0 : index
      %17 = vector.load %arg7[%c0_10, %c0_11, %c0_12, %c0_13] : memref<1x4x8x8xbf16, #tpu.memory_space<vmem>>, vector<1x4x8x8xbf16>
      %18 = vector.shape_cast %17 : vector<1x4x8x8xbf16> to vector<4x8x8xbf16>
      "tpu.trace_start"() <{level = 10 : i32, message = "hqd,hdk->hqk"}> : () -> ()
      %cst = arith.constant dense<0.000000e+00> : vector<4x8x8xf32>
      %19 = tpu.matmul %14, %16, %cst {dimension_numbers = #tpu.dot_dimension_numbers<[2], [1], [1], [2], [0, 0, 0, 1, 1, 2], [0], [0]>} : vector<4x8x8xbf16>, vector<4x8x8xbf16>, vector<4x8x8xf32> -> vector<4x8x8xf32>
      "tpu.trace_stop"() : () -> ()
      %20 = tpu.iota {dimensions = array<i32: 0>} : vector<8x8xi32>
      %21 = tpu.iota {dimensions = array<i32: 1>} : vector<8x8xi32>
      %22 = arith.cmpi sle, %21, %20 : vector<8x8xi32>
      %cst_14 = arith.constant -1.000000e+30 : f32
      %23 = vector.shape_cast %22 : vector<8x8xi1> to vector<1x8x8xi1>
      %24 = vector.broadcast %23 : vector<1x8x8xi1> to vector<4x8x8xi1>
      %25 = vector.broadcast %cst_14 : f32 to vector<4x8x8xf32>
      %26 = arith.select %24, %19, %25 : vector<4x8x8xi1>, vector<4x8x8xf32>
      %c0_15 = arith.constant 0 : index
      %c0_16 = arith.constant 0 : index
      %c0_17 = arith.constant 0 : index
      %27 = vector.load %arg17[%c0_15, %c0_16, %c0_17] : memref<4x8x1xf32, #tpu.memory_space<vmem>>, vector<4x8x1xf32>
      %cst_18 = arith.constant dense<0xFF800000> : vector<4x8xf32>
      %28 = vector.multi_reduction <maximumf>, %26, %cst_18 [2] : vector<4x8x8xf32> to vector<4x8xf32>
      %29 = vector.shape_cast %28 : vector<4x8xf32> to vector<4x8x1xf32>
      %30 = arith.maximumf %27, %29 : vector<4x8x1xf32>
      %31 = arith.subf %27, %30 : vector<4x8x1xf32>
      %32 = math.exp %31 : vector<4x8x1xf32>
      %33 = vector.broadcast %30 : vector<4x8x1xf32> to vector<4x8x8xf32>
      %34 = arith.subf %26, %33 : vector<4x8x8xf32>
      %35 = math.exp %34 : vector<4x8x8xf32>
      %c0_19 = arith.constant 0 : index
      %c0_20 = arith.constant 0 : index
      %c0_21 = arith.constant 0 : index
      %36 = vector.load %arg18[%c0_19, %c0_20, %c0_21] : memref<4x8x1xf32, #tpu.memory_space<vmem>>, vector<4x8x1xf32>
      %37 = arith.mulf %32, %36 : vector<4x8x1xf32>
      %cst_22 = arith.constant dense<0.000000e+00> : vector<4x8xf32>
      %38 = vector.multi_reduction <add>, %35, %cst_22 [2] : vector<4x8x8xf32> to vector<4x8xf32>
      %39 = vector.shape_cast %38 : vector<4x8xf32> to vector<4x8x1xf32>
      %40 = arith.addf %37, %39 : vector<4x8x1xf32>
      %c0_23 = arith.constant 0 : index
      %c0_24 = arith.constant 0 : index
      %c0_25 = arith.constant 0 : index
      %41 = vector.load %arg19[%c0_23, %c0_24, %c0_25] : memref<4x8x8xf32, #tpu.memory_space<vmem>>, vector<4x8x8xf32>
      %42 = vector.broadcast %32 : vector<4x8x1xf32> to vector<4x8x8xf32>
      %43 = arith.mulf %42, %41 : vector<4x8x8xf32>
      %44 = arith.truncf %35 : vector<4x8x8xf32> to vector<4x8x8xbf16>
      "tpu.trace_start"() <{level = 10 : i32, message = "hqk,hkd->hqd"}> : () -> ()
      %cst_26 = arith.constant dense<0.000000e+00> : vector<4x8x8xf32>
      %45 = tpu.matmul %44, %18, %cst_26 {dimension_numbers = #tpu.dot_dimension_numbers<[2], [1], [1], [2], [0, 0, 0, 1, 1, 2], [0], [0]>} : vector<4x8x8xbf16>, vector<4x8x8xbf16>, vector<4x8x8xf32> -> vector<4x8x8xf32>
      "tpu.trace_stop"() : () -> ()
      %46 = arith.addf %43, %45 : vector<4x8x8xf32>
      %47 = tpu.reciprocal %40 {approx = true} : vector<4x8x1xf32> -> vector<4x8x1xf32>
      %48 = vector.broadcast %47 : vector<4x8x1xf32> to vector<4x8x8xf32>
      %49 = arith.mulf %46, %48 : vector<4x8x8xf32>
      %cst_27 = arith.constant 0.000000e+00 : f32
      %50 = vector.broadcast %cst_27 : f32 to vector<8x32xf32>
      %51 = vector.extract_strided_slice %49 {offsets = [0, 0, 0], sizes = [1, 8, 8], strides = [1, 1, 1]} : vector<4x8x8xf32> to vector<1x8x8xf32>
      %52 = vector.shape_cast %51 : vector<1x8x8xf32> to vector<8x8xf32>
      %53 = arith.truncf %52 : vector<8x8xf32> to vector<8x8xbf16>
      %c0_28 = arith.constant 0 : index
      %c0_29 = arith.constant 0 : index
      %c0_30 = arith.constant 0 : index
      %54 = vector.load %arg8[%c0_28, %c0_29, %c0_30] : memref<4x8x32xbf16, #tpu.memory_space<vmem>>, vector<1x8x32xbf16>
      %55 = vector.shape_cast %54 : vector<1x8x32xbf16> to vector<8x32xbf16>
      %cst_31 = arith.constant dense<0.000000e+00> : vector<8x32xf32>
      %56 = tpu.matmul %53, %55, %cst_31 {dimension_numbers = #tpu.dot_dimension_numbers<[1], [0], [0], [1], [0, 0, 1, 1], [], []>} : vector<8x8xbf16>, vector<8x32xbf16>, vector<8x32xf32> -> vector<8x32xf32>
      %57 = arith.addf %50, %56 : vector<8x32xf32>
      %58 = vector.extract_strided_slice %49 {offsets = [1, 0, 0], sizes = [1, 8, 8], strides = [1, 1, 1]} : vector<4x8x8xf32> to vector<1x8x8xf32>
      %59 = vector.shape_cast %58 : vector<1x8x8xf32> to vector<8x8xf32>
      %60 = arith.truncf %59 : vector<8x8xf32> to vector<8x8xbf16>
      %c1 = arith.constant 1 : index
      %c0_32 = arith.constant 0 : index
      %c0_33 = arith.constant 0 : index
      %61 = vector.load %arg8[%c1, %c0_32, %c0_33] : memref<4x8x32xbf16, #tpu.memory_space<vmem>>, vector<1x8x32xbf16>
      %62 = vector.shape_cast %61 : vector<1x8x32xbf16> to vector<8x32xbf16>
      %cst_34 = arith.constant dense<0.000000e+00> : vector<8x32xf32>
      %63 = tpu.matmul %60, %62, %cst_34 {dimension_numbers = #tpu.dot_dimension_numbers<[1], [0], [0], [1], [0, 0, 1, 1], [], []>} : vector<8x8xbf16>, vector<8x32xbf16>, vector<8x32xf32> -> vector<8x32xf32>
      %64 = arith.addf %57, %63 : vector<8x32xf32>
      %65 = vector.extract_strided_slice %49 {offsets = [2, 0, 0], sizes = [1, 8, 8], strides = [1, 1, 1]} : vector<4x8x8xf32> to vector<1x8x8xf32>
      %66 = vector.shape_cast %65 : vector<1x8x8xf32> to vector<8x8xf32>
      %67 = arith.truncf %66 : vector<8x8xf32> to vector<8x8xbf16>
      %c2 = arith.constant 2 : index
      %c0_35 = arith.constant 0 : index
      %c0_36 = arith.constant 0 : index
      %68 = vector.load %arg8[%c2, %c0_35, %c0_36] : memref<4x8x32xbf16, #tpu.memory_space<vmem>>, vector<1x8x32xbf16>
      %69 = vector.shape_cast %68 : vector<1x8x32xbf16> to vector<8x32xbf16>
      %cst_37 = arith.constant dense<0.000000e+00> : vector<8x32xf32>
      %70 = tpu.matmul %67, %69, %cst_37 {dimension_numbers = #tpu.dot_dimension_numbers<[1], [0], [0], [1], [0, 0, 1, 1], [], []>} : vector<8x8xbf16>, vector<8x32xbf16>, vector<8x32xf32> -> vector<8x32xf32>
      %71 = arith.addf %64, %70 : vector<8x32xf32>
      %72 = vector.extract_strided_slice %49 {offsets = [3, 0, 0], sizes = [1, 8, 8], strides = [1, 1, 1]} : vector<4x8x8xf32> to vector<1x8x8xf32>
      %73 = vector.shape_cast %72 : vector<1x8x8xf32> to vector<8x8xf32>
      %74 = arith.truncf %73 : vector<8x8xf32> to vector<8x8xbf16>
      %c3 = arith.constant 3 : index
      %c0_38 = arith.constant 0 : index
      %c0_39 = arith.constant 0 : index
      %75 = vector.load %arg8[%c3, %c0_38, %c0_39] : memref<4x8x32xbf16, #tpu.memory_space<vmem>>, vector<1x8x32xbf16>
      %76 = vector.shape_cast %75 : vector<1x8x32xbf16> to vector<8x32xbf16>
      %cst_40 = arith.constant dense<0.000000e+00> : vector<8x32xf32>
      %77 = tpu.matmul %74, %76, %cst_40 {dimension_numbers = #tpu.dot_dimension_numbers<[1], [0], [0], [1], [0, 0, 1, 1], [], []>} : vector<8x8xbf16>, vector<8x32xbf16>, vector<8x32xf32> -> vector<8x32xf32>
      %78 = arith.addf %71, %77 : vector<8x32xf32>
      %c0_41 = arith.constant 0 : index
      %c0_42 = arith.constant 0 : index
      %79 = vector.load %arg9[%c0_41, %c0_42] : memref<1x32xf32, #tpu.memory_space<vmem>>, vector<1x32xf32>
      %80 = vector.shape_cast %79 : vector<1x32xf32> to vector<32xf32>
      %81 = vector.shape_cast %80 : vector<32xf32> to vector<1x32xf32>
      %82 = vector.broadcast %81 : vector<1x32xf32> to vector<8x32xf32>
      %83 = arith.addf %78, %82 : vector<8x32xf32>
      %c0_43 = arith.constant 0 : index
      %c0_44 = arith.constant 0 : index
      %c0_45 = arith.constant 0 : index
      %84 = vector.load %arg4[%c0_43, %c0_44, %c0_45] : memref<1x8x32xf32, #tpu.memory_space<vmem>>, vector<1x8x32xf32>
      %85 = vector.shape_cast %84 : vector<1x8x32xf32> to vector<8x32xf32>
      %86 = arith.addf %85, %83 : vector<8x32xf32>
      %c0_46 = arith.constant 0 : index
      %c0_47 = arith.constant 0 : index
      %87 = vector.load %arg10[%c0_46, %c0_47] : memref<1x32xf32, #tpu.memory_space<vmem>>, vector<1x32xf32>
      %88 = vector.shape_cast %87 : vector<1x32xf32> to vector<32xf32>
      %c0_48 = arith.constant 0 : index
      %c0_49 = arith.constant 0 : index
      %89 = vector.load %arg11[%c0_48, %c0_49] : memref<1x32xf32, #tpu.memory_space<vmem>>, vector<1x32xf32>
      %90 = vector.shape_cast %89 : vector<1x32xf32> to vector<32xf32>
      %cst_50 = arith.constant dense<0.000000e+00> : vector<8xf32>
      %91 = vector.multi_reduction <add>, %86, %cst_50 [1] : vector<8x32xf32> to vector<8xf32>
      %92 = vector.shape_cast %91 : vector<8xf32> to vector<8x1xf32>
      %cst_51 = arith.constant 3.200000e+01 : f32
      %93 = vector.broadcast %cst_51 : f32 to vector<8x1xf32>
      %94 = arith.divf %92, %93 : vector<8x1xf32>
      %95 = vector.broadcast %94 : vector<8x1xf32> to vector<8x32xf32>
      %96 = arith.subf %86, %95 : vector<8x32xf32>
      %97 = arith.mulf %96, %96 : vector<8x32xf32>
      %cst_52 = arith.constant dense<0.000000e+00> : vector<8xf32>
      %98 = vector.multi_reduction <add>, %97, %cst_52 [1] : vector<8x32xf32> to vector<8xf32>
      %99 = vector.shape_cast %98 : vector<8xf32> to vector<8x1xf32>
      %cst_53 = arith.constant 3.200000e+01 : f32
      %100 = vector.broadcast %cst_53 : f32 to vector<8x1xf32>
      %101 = arith.divf %99, %100 : vector<8x1xf32>
      %102 = vector.broadcast %94 : vector<8x1xf32> to vector<8x32xf32>
      %103 = arith.subf %86, %102 : vector<8x32xf32>
      %cst_54 = arith.constant 9.99999974E-6 : f32
      %104 = vector.broadcast %cst_54 : f32 to vector<8x1xf32>
      %105 = arith.addf %101, %104 : vector<8x1xf32>
      %106 = math.rsqrt %105 : vector<8x1xf32>
      %107 = vector.broadcast %106 : vector<8x1xf32> to vector<8x32xf32>
      %108 = arith.mulf %103, %107 : vector<8x32xf32>
      %109 = vector.shape_cast %88 : vector<32xf32> to vector<1x32xf32>
      %110 = vector.broadcast %109 : vector<1x32xf32> to vector<8x32xf32>
      %111 = arith.mulf %108, %110 : vector<8x32xf32>
      %112 = vector.shape_cast %90 : vector<32xf32> to vector<1x32xf32>
      %113 = vector.broadcast %112 : vector<1x32xf32> to vector<8x32xf32>
      %114 = arith.addf %111, %113 : vector<8x32xf32>
      %115 = arith.truncf %114 : vector<8x32xf32> to vector<8x32xbf16>
      %c0_55 = arith.constant 0 : index
      %c0_56 = arith.constant 0 : index
      %116 = vector.load %arg12[%c0_55, %c0_56] : memref<32x128xbf16, #tpu.memory_space<vmem>>, vector<32x128xbf16>
      %cst_57 = arith.constant dense<0.000000e+00> : vector<8x128xf32>
      %117 = tpu.matmul %115, %116, %cst_57 {dimension_numbers = #tpu.dot_dimension_numbers<[1], [0], [0], [1], [0, 0, 1, 1], [], []>} : vector<8x32xbf16>, vector<32x128xbf16>, vector<8x128xf32> -> vector<8x128xf32>
      %c0_58 = arith.constant 0 : index
      %c0_59 = arith.constant 0 : index
      %118 = vector.load %arg13[%c0_58, %c0_59] : memref<1x128xf32, #tpu.memory_space<vmem>>, vector<1x128xf32>
      %119 = vector.shape_cast %118 : vector<1x128xf32> to vector<128xf32>
      %120 = vector.shape_cast %119 : vector<128xf32> to vector<1x128xf32>
      %121 = vector.broadcast %120 : vector<1x128xf32> to vector<8x128xf32>
      %122 = arith.addf %117, %121 : vector<8x128xf32>
      %cst_60 = arith.constant 5.000000e-01 : f32
      %123 = vector.broadcast %cst_60 : f32 to vector<8x128xf32>
      %124 = arith.mulf %123, %122 : vector<8x128xf32>
      %cst_61 = arith.constant 4.471500e-02 : f32
      %125 = vector.broadcast %cst_61 : f32 to vector<8x128xf32>
      %126 = arith.mulf %125, %122 : vector<8x128xf32>
      %127 = arith.mulf %126, %122 : vector<8x128xf32>
      %128 = arith.mulf %127, %122 : vector<8x128xf32>
      %129 = arith.addf %122, %128 : vector<8x128xf32>
      %cst_62 = arith.constant 0.797884583 : f32
      %130 = vector.broadcast %cst_62 : f32 to vector<8x128xf32>
      %131 = arith.mulf %130, %129 : vector<8x128xf32>
      %132 = math.tanh %131 : vector<8x128xf32>
      %cst_63 = arith.constant 1.000000e+00 : f32
      %133 = vector.broadcast %cst_63 : f32 to vector<8x128xf32>
      %134 = arith.addf %133, %132 : vector<8x128xf32>
      %135 = arith.mulf %124, %134 : vector<8x128xf32>
      %136 = arith.truncf %135 : vector<8x128xf32> to vector<8x128xbf16>
      %c0_64 = arith.constant 0 : index
      %c0_65 = arith.constant 0 : index
      %137 = vector.load %arg14[%c0_64, %c0_65] : memref<128x32xbf16, #tpu.memory_space<vmem>>, vector<128x32xbf16>
      %cst_66 = arith.constant dense<0.000000e+00> : vector<8x32xf32>
      %138 = tpu.matmul %136, %137, %cst_66 {dimension_numbers = #tpu.dot_dimension_numbers<[1], [0], [0], [1], [0, 0, 1, 1], [], []>} : vector<8x128xbf16>, vector<128x32xbf16>, vector<8x32xf32> -> vector<8x32xf32>
      %139 = arith.addf %86, %138 : vector<8x32xf32>
      %c0_67 = arith.constant 0 : index
      %c0_68 = arith.constant 0 : index
      %140 = vector.load %arg15[%c0_67, %c0_68] : memref<1x32xf32, #tpu.memory_space<vmem>>, vector<1x32xf32>
      %141 = vector.shape_cast %140 : vector<1x32xf32> to vector<32xf32>
      %142 = vector.shape_cast %141 : vector<32xf32> to vector<1x32xf32>
      %143 = vector.broadcast %142 : vector<1x32xf32> to vector<8x32xf32>
      %144 = arith.addf %139, %143 : vector<8x32xf32>
      %c0_69 = arith.constant 0 : index
      %c0_70 = arith.constant 0 : index
      %c0_71 = arith.constant 0 : index
      %145 = vector.load %arg16[%c0_69, %c0_70, %c0_71] : memref<1x8x32xf32, #tpu.memory_space<vmem>>, vector<1x8x32xf32>
      %146 = vector.shape_cast %145 : vector<1x8x32xf32> to vector<8x32xf32>
      %147 = vector.shape_cast %144 : vector<8x32xf32> to vector<1x8x32xf32>
      tpu.vector_store %arg16[%c0_69, %c0_70, %c0_71], %147 {strides = array<i32>} : memref<1x8x32xf32, #tpu.memory_space<vmem>>, vector<1x8x32xf32>,
    } else {
    }
    return
  }
  func.func @transform_0(%arg0: i32, %arg1: i32, %arg2: memref<1xi32, #tpu.memory_space<smem>>, %arg3: memref<1xi32, #tpu.memory_space<smem>>) -> (i32, i32, i32) {
    %0 = arith.index_cast %arg1 : i32 to index
    %1 = memref.load %arg2[%0] : memref<1xi32, #tpu.memory_space<smem>>
    %c0_i32 = arith.constant 0 : i32
    %c0_i32_0 = arith.constant 0 : i32
    return %arg0, %1, %c0_i32 : i32, i32, i32
  }
  func.func @transform_1(%arg0: i32, %arg1: i32, %arg2: memref<1xi32, #tpu.memory_space<smem>>, %arg3: memref<1xi32, #tpu.memory_space<smem>>) -> (i32, i32, i32, i32) {
    %0 = arith.index_cast %arg1 : i32 to index
    %1 = memref.load %arg2[%0] : memref<1xi32, #tpu.memory_space<smem>>
    %c0_i32 = arith.constant 0 : i32
    %c0_i32_0 = arith.constant 0 : i32
    %c0_i32_1 = arith.constant 0 : i32
    return %arg0, %c0_i32, %1, %c0_i32_0 : i32, i32, i32, i32
  }
  func.func @transform_2(%arg0: i32, %arg1: i32, %arg2: memref<1xi32, #tpu.memory_space<smem>>, %arg3: memref<1xi32, #tpu.memory_space<smem>>) -> (i32, i32, i32, i32) {
    %0 = arith.index_cast %arg1 : i32 to index
    %1 = memref.load %arg3[%0] : memref<1xi32, #tpu.memory_space<smem>>
    %c0_i32 = arith.constant 0 : i32
    %c0_i32_0 = arith.constant 0 : i32
    %c0_i32_1 = arith.constant 0 : i32
    return %arg0, %c0_i32, %c0_i32_0, %1 : i32, i32, i32, i32
  }
  func.func @transform_3(%arg0: i32, %arg1: i32, %arg2: memref<1xi32, #tpu.memory_space<smem>>, %arg3: memref<1xi32, #tpu.memory_space<smem>>) -> (i32, i32, i32, i32) {
    %0 = arith.index_cast %arg1 : i32 to index
    %1 = memref.load %arg3[%0] : memref<1xi32, #tpu.memory_space<smem>>
    %c0_i32 = arith.constant 0 : i32
    %c0_i32_0 = arith.constant 0 : i32
    %c0_i32_1 = arith.constant 0 : i32
    return %arg0, %c0_i32, %1, %c0_i32_0 : i32, i32, i32, i32
  }
  func.func @transform_4(%arg0: i32, %arg1: i32, %arg2: memref<1xi32, #tpu.memory_space<smem>>, %arg3: memref<1xi32, #tpu.memory_space<smem>>) -> (i32, i32, i32) {
    %c0_i32 = arith.constant 0 : i32
    %c0_i32_0 = arith.constant 0 : i32
    %c0_i32_1 = arith.constant 0 : i32
    %c0_i32_2 = arith.constant 0 : i32
    return %c0_i32, %c0_i32_0, %c0_i32_1 : i32, i32, i32
  }
  func.func @transform_5(%arg0: i32, %arg1: i32, %arg2: memref<1xi32, #tpu.memory_space<smem>>, %arg3: memref<1xi32, #tpu.memory_space<smem>>) -> (i32, i32) {
    %c0_i32 = arith.constant 0 : i32
    %c0_i32_0 = arith.constant 0 : i32
    %c0_i32_1 = arith.constant 0 : i32
    return %c0_i32, %c0_i32_0 : i32, i32
  }
  func.func @transform_6(%arg0: i32, %arg1: i32, %arg2: memref<1xi32, #tpu.memory_space<smem>>, %arg3: memref<1xi32, #tpu.memory_space<smem>>) -> (i32, i32) {
    %c0_i32 = arith.constant 0 : i32
    %c0_i32_0 = arith.constant 0 : i32
    %c0_i32_1 = arith.constant 0 : i32
    return %c0_i32, %c0_i32_0 : i32, i32
  }
  func.func @transform_7(%arg0: i32, %arg1: i32, %arg2: memref<1xi32, #tpu.memory_space<smem>>, %arg3: memref<1xi32, #tpu.memory_space<smem>>) -> (i32, i32) {
    %c0_i32 = arith.constant 0 : i32
    %c0_i32_0 = arith.constant 0 : i32
    %c0_i32_1 = arith.constant 0 : i32
    return %c0_i32, %c0_i32_0 : i32, i32
  }
  func.func @transform_8(%arg0: i32, %arg1: i32, %arg2: memref<1xi32, #tpu.memory_space<smem>>, %arg3: memref<1xi32, #tpu.memory_space<smem>>) -> (i32, i32) {
    %c0_i32 = arith.constant 0 : i32
    %c0_i32_0 = arith.constant 0 : i32
    %c0_i32_1 = arith.constant 0 : i32
    return %c0_i32, %c0_i32_0 : i32, i32
  }
  func.func @transform_9(%arg0: i32, %arg1: i32, %arg2: memref<1xi32, #tpu.memory_space<smem>>, %arg3: memref<1xi32, #tpu.memory_space<smem>>) -> (i32, i32) {
    %c0_i32 = arith.constant 0 : i32
    %c0_i32_0 = arith.constant 0 : i32
    %c0_i32_1 = arith.constant 0 : i32
    return %c0_i32, %c0_i32_0 : i32, i32
  }
  func.func @transform_10(%arg0: i32, %arg1: i32, %arg2: memref<1xi32, #tpu.memory_space<smem>>, %arg3: memref<1xi32, #tpu.memory_space<smem>>) -> (i32, i32) {
    %c0_i32 = arith.constant 0 : i32
    %c0_i32_0 = arith.constant 0 : i32
    %c0_i32_1 = arith.constant 0 : i32
    return %c0_i32, %c0_i32_0 : i32, i32
  }
  func.func @transform_11(%arg0: i32, %arg1: i32, %arg2: memref<1xi32, #tpu.memory_space<smem>>, %arg3: memref<1xi32, #tpu.memory_space<smem>>) -> (i32, i32) {
    %c0_i32 = arith.constant 0 : i32
    %c0_i32_0 = arith.constant 0 : i32
    %c0_i32_1 = arith.constant 0 : i32
    return %c0_i32, %c0_i32_0 : i32, i32
  }
  func.func @transform_12(%arg0: i32, %arg1: i32, %arg2: memref<1xi32, #tpu.memory_space<smem>>, %arg3: memref<1xi32, #tpu.memory_space<smem>>) -> (i32, i32, i32) {
    %0 = arith.index_cast %arg1 : i32 to index
    %1 = memref.load %arg2[%0] : memref<1xi32, #tpu.memory_space<smem>>
    %c0_i32 = arith.constant 0 : i32
    %c0_i32_0 = arith.constant 0 : i32
    return %arg0, %1, %c0_i32 : i32, i32, i32
  }
}

</mosaic_0001>

<bundles_post_ra>
// kernel: block_forward.2
= control target key start
LH: loop header
LB: loop body
LE: loop exit
PB: predicated region body
PF: predicated region fallthrough
CT: control target
= control target key end

     0   :  { %s1772_s0 = inlined_call_operand.hbm [shape: f32[2,8,32], index: 0, kind: input, shape index: {}]   ;;  %s1773_s1 = inlined_call_operand.hbm [shape: f32[1,32], index: 1, kind: input, shape index: {}]   ;;  %s1774_s2 = inlined_call_operand.hbm [shape: f32[1,32], index: 2, kind: input, shape index: {}]   ;;  %s1775_s3 = inlined_call_operand.hbm [shape: bf16[32,96], index: 3, kind: input, shape index: {}]   ;;  %s1776_s4 = inlined_call_operand.hbm [shape: f32[1,96], index: 4, kind: input, shape index: {}]   ;;  %s1777_s5 = inlined_call_operand.hbm [shape: bf16[2,4,8,8], index: 5, kind: output, shape index: {0}]   ;;  %s1778_s6 = inlined_call_operand.hbm [shape: bf16[2,4,8,8], index: 6, kind: output, shape index: {1}]   ;;  %s1779_s7 = inlined_call_operand.hbm [shape: bf16[2,4,8,8], index: 7, kind: output, shape index: {2}]  }
   0x1   :  { %1784 = sst [smem:[#allocation20_spill]] %s1773_s1 }
   0x2   :  { %1785 = sst [smem:[#allocation21_spill]] %s1774_s2 }
   0x3   :  { %13 = vsyncpa [#allocation3], 0 }
   0x4   :  { %15 = vsyncpa [#allocation3 + $0x1], 0 }
   0x5   :  { %16 = vsyncpa [#allocation6], 0 }
   0x6   :  { %17 = vsyncpa [#allocation9], 0 }
   0x7   :  { %18 = vsyncpa [#allocation4], 0 }
   0x8   :  { %20 = vsyncpa [#allocation4 + $0x1], 0 }
   0x9   :  { %21 = vsyncpa [#allocation13], 0 }
   0xa   :  { %23 = vsyncpa [#allocation13 + $0x1], 0  ;;  %s1371_s24 = smov 0   ;;  %s1373_s25 = smov 0  }
   0xb   :  { %s1375_s26 = smov 0   ;;  %s1377_s27 = smov 0  }
   0xc   :  { %s1379_s28 = smov 0   ;;  %s1381_s29 = smov 0  }
   0xd LB: > { %s1402_s30 = sadd.s32 4294967295, %s1308_s29   ;;  %p825_p0 = scmp.ge.s32.totalorder %s1308_s29, 1  ;;  %s1308_s29 = sphi %s1381_s29, %s29_s29   ;;  %s1304_s28 = sphi %s1379_s28, %s1811_s28   ;;  %s1300_s27 = sphi %s1377_s27, %s1810_s27   ;;  %s1296_s26 = sphi %s1375_s26, %s1809_s26   ;;  %s1292_s25 = sphi %s1373_s25, %s1808_s25   ;;  %s1288_s24 = sphi %s1371_s24, %s1807_s24  }
   0xe   : > { %p1780_p1 = scmp.eq.s32.totalorder %s1402_s30, 0  ;;  %p242_p2 = scmp.lt.s32.totalorder %s1308_s29, 3 }
   0xf   : > { %s1310_s9 = smov [#allocation5]   ;;  %s1311_s11 = smov [#allocation8]  }
  0x10   : > { %p1407_p3 = pnand %p825_p0, %p242_p2  ;;  %s255_s10 = sshll.u32 %s1310_s9, 4  ;;  %s256_s10 = int_to_ptr.vmem [resolvable:$true] %s255_s10 }
  0x11   : > { %s276_s12 = sshll.u32 %s1311_s11, 4  ;;  %s1312_s14 = smov [#allocation7]   ;;  %s1420_s12 = int_to_ptr.vmem [resolvable:$true] %s276_s12 }
  0x12   : > { %s1786_s8 = scalar_select %p1407_p3, 1, 0 }
  0x13   : > { %p910_p5 = pneg %p1407_p3  ;;  %s1422_s15 = sshll.u32 %s1312_s14, 4  ;;  %s267_s15 = int_to_ptr.vmem [resolvable:$true] %s1422_s15 }
  0x14   : > { %s1788_s1 = sld [smem:[#allocation20_spill]] }
  0x15   : > { %p1416_p6 = pnand %p910_p5, %p1780_p1 }
  0x17   : > { %p1432_p8 = pneg %p1416_p6 }
  0x1a   : > { %s1016_s18 = scalar_lea.hbm %s1788_s1, 16 }
  0x1b   : > { %p1017_p7 = scmp.ne.s32.totalorder %s1788_s1, %s1016_s18  ;;  %p1023_p11 = scmp.lt.u32.totalorder %s1016_s18, %s1788_s1 }
  0x1d   : > { %p1019_p9 = pnand %p1432_p8, %p1017_p7 }
  0x1f   : > { %p1020_p10 = pneg %p1019_p9 }
  0x21   : > { %p1025_p12 = pnand %p1023_p11, %p1020_p10 }
  0x23   : > { %1028 = shalt.err (!%p1025_p12)
}
  0x24   : > { %s1029_s9 = scalar_lea.vmem %s256_s10, 16  ;;  %s1036_s11 = scalar_lea.vmem %s256_s10, 32 }
  0x25   : > { %p1030_p13 = scmp.ne.s32.totalorder %s256_s10, %s1029_s9  ;;  %p1037_p5 = scmp.lt.s32.totalorder %s256_s10, %s256_s10 }
  0x26   : > { %p1038_p4 = scmp.lt.s32.totalorder %s1036_s11, %s1029_s9 }
  0x27   : > { %p1032_p0 = pnand %p1030_p13, %p1432_p8 }
  0x28   : > { %p1039_p1 = por %p1038_p4, %p1037_p5 }
  0x29   : > { %p1033_p2 = pneg %p1032_p0 }
  0x2b   : > { %p1040_p3 = pnand %p1039_p1, %p1033_p2 }
  0x2d   : > { %1043 = shalt.err (!%p1040_p3)
}
  0x2e   : > { %913 = dma.hbm_to_vmem [thread:$0]  (!%p1416_p6), %s1788_s1, 16, %s256_s10, [#allocation6]  }
  0x2f   : > { %s1044_s19 = scalar_lea.hbm %s1775_s3, 256 }
  0x30   : > { %p1045_p7 = scmp.ne.s32.totalorder %s1775_s3, %s1044_s19  ;;  %p1051_p1 = scmp.lt.u32.totalorder %s1044_s19, %s1775_s3 }
  0x32   : > { %p1047_p9 = pnand %p1045_p7, %p1432_p8 }
  0x34   : > { %p1048_p4 = pneg %p1047_p9 }
  0x36   : > { %p1053_p3 = pnand %p1051_p1, %p1048_p4 }
  0x38   : > { %1056 = shalt.err (!%p1053_p3)
}
  0x39   : > { %s1057_s10 = scalar_lea.vmem %s1420_s12, 256  ;;  %p1065_p13 = scmp.lt.s32.totalorder %s1420_s12, %s1420_s12 }
  0x3a   : > { %p1058_p10 = scmp.ne.s32.totalorder %s1420_s12, %s1057_s10  ;;  %p1066_p0 = scmp.lt.s32.totalorder %s1057_s10, %s1057_s10 }
  0x3c   : > { %p1060_p11 = pnand %p1058_p10, %p1432_p8  ;;  %p1067_p2 = por %p1066_p0, %p1065_p13 }
  0x3e   : > { %p1061_p12 = pneg %p1060_p11 }
  0x40   : > { %p1068_p5 = pnand %p1067_p2, %p1061_p12 }
  0x42   : > { %1071 = shalt.err (!%p1068_p5)
}
  0x43   : > { %s1313_s11 = smov 64   ;;  %s1314_s14 = smov 4  }
  0x44   : > { %919 = dma.hbm_to_vmem [thread:$0]  (!%p1416_p6), %s1775_s3, 256, %s1420_s12, [#allocation9], %s1313_s11, %s1313_s11, %s1314_s14  }
  0x45   : > { %s1790_s2 = sld [smem:[#allocation21_spill]] }
  0x4b   : > { %s1072_s20 = scalar_lea.hbm %s1790_s2, 16 }
  0x4c   : > { %p1073_p7 = scmp.ne.s32.totalorder %s1790_s2, %s1072_s20  ;;  %p1079_p1 = scmp.lt.u32.totalorder %s1072_s20, %s1790_s2 }
  0x4e   : > { %p1075_p9 = pnand %p1073_p7, %p1432_p8 }
  0x50   : > { %p1076_p4 = pneg %p1075_p9 }
  0x52   : > { %p1081_p3 = pnand %p1079_p1, %p1076_p4 }
  0x54   : > { %1084 = shalt.err (!%p1081_p3)
}
  0x55   : > { %s1085_s16 = scalar_lea.vmem %s267_s15, 16  ;;  %s1092_s12 = scalar_lea.vmem %s267_s15, 32 }
  0x56   : > { %p1086_p10 = scmp.ne.s32.totalorder %s267_s15, %s1085_s16  ;;  %p1093_p13 = scmp.lt.s32.totalorder %s267_s15, %s267_s15 }
  0x57   : > { %p1094_p0 = scmp.lt.s32.totalorder %s1092_s12, %s1085_s16 }
  0x58   : > { %p1088_p11 = pnand %p1086_p10, %p1432_p8 }
  0x59   : > { %p1095_p2 = por %p1094_p0, %p1093_p13 }
  0x5a   : > { %p1089_p12 = pneg %p1088_p11 }
  0x5c   : > { %p1096_p5 = pnand %p1095_p2, %p1089_p12 }
  0x5e   : > { %1099 = shalt.err (!%p1096_p5)
}
  0x5f   : > { %916 = dma.hbm_to_vmem [thread:$0]  (!%p1416_p6), %s1790_s2, 16, %s267_s15, [#allocation6]  }
  0x60   : > { %s1315_s17 = smov [#allocation10]   ;;  %s1100_s22 = scalar_lea.hbm %s1776_s4, 16 }
  0x61   : > { %s290_s18 = sshll.u32 %s1315_s17, 4  ;;  %p1101_p7 = scmp.ne.s32.totalorder %s1776_s4, %s1100_s22  ;;  %s291_s18 = int_to_ptr.vmem [resolvable:$true] %s290_s18 }
  0x62   : > { %p1107_p1 = scmp.lt.u32.totalorder %s1100_s22, %s1776_s4 }
  0x63   : > { %p1103_p9 = pnand %p1101_p7, %p1432_p8 }
  0x65   : > { %p1104_p4 = pneg %p1103_p9 }
  0x67   : > { %p1109_p3 = pnand %p1107_p1, %p1104_p4 }
  0x69   : > { %1112 = shalt.err (!%p1109_p3)
}
  0x6a   : > { %s1113_s15 = scalar_lea.vmem %s291_s18, 16  ;;  %s1120_s12 = scalar_lea.vmem %s291_s18, 32 }
  0x6b   : > { %p1114_p10 = scmp.ne.s32.totalorder %s291_s18, %s1113_s15  ;;  %p1121_p13 = scmp.lt.s32.totalorder %s291_s18, %s291_s18 }
  0x6c   : > { %p1122_p0 = scmp.lt.s32.totalorder %s1120_s12, %s1113_s15 }
  0x6d   : > { %p1116_p11 = pnand %p1114_p10, %p1432_p8 }
  0x6e   : > { %p1123_p2 = por %p1122_p0, %p1121_p13 }
  0x6f   : > { %p1117_p12 = pneg %p1116_p11 }
  0x71   : > { %p1124_p5 = pnand %p1123_p2, %p1117_p12 }
  0x73   : > { %1127 = shalt.err (!%p1124_p5)
}
  0x74   : > { %922 = dma.hbm_to_vmem [thread:$0]  (!%p1416_p6), %s1776_s4, 16, %s291_s18, [#allocation9]  }
  0x75   : > { %s1782_s21 = sadd.s32 4294967294, %s1308_s29   ;;  %s41_s17 = sadd.s32 1, %s1304_s28 }
  0x76   : > { %p43_p8 = scmp.ge.s32.totalorder %s41_s17, 2  ;;  %s50_s13 = sadd.s32 1, %s1296_s26 }
  0x77   : > { %p57_p7 = scmp.ne.s32.totalorder %s1296_s26, %s1292_s25  ;;  %p58_p9 = scmp.eq.s32.totalorder %s1308_s29, 0 }
  0x78   : > { %s1813_s17 = smov (%p43_p8, %s41_s17), 0  ;;  %p63_p1 = scmp.ne.s32.totalorder %s1292_s25, %s1288_s24 }
  0x79   : > { %p1516_p4 = por %p58_p9, %p57_p7  ;;  %s45_s18 = ssub.s32 %s1304_s28, %s1813_s17 }
  0x7a   : > { %p173_p6 = scmp.eq.s32.totalorder %s1402_s30, 1  ;;  %p48_p3 = scmp.eq.s32.totalorder %s45_s18, 0 }
  0x7b   : > { %p1792_p10 = scmp.eq.s32.totalorder %s1402_s30, 0  ;;  %p179_p13 = scmp.eq.s32.totalorder %s1782_s21, 1 }
  0x7c   : > { %p1531_p12 = por %p173_p6, %p57_p7  ;;  %p941_p2 = scmp.lt.s32.totalorder %s1308_s29, 2 }
  0x7d   : > { %p1527_p11 = por %p1792_p10, %p63_p1  ;;  %p1540_p0 = por %p179_p13, %p63_p1 }
  0x7e   : > { %s1794_s22 = scalar_select %p1531_p12, 1, 0 }
  0x7f   : > { %s1538_s23 = scalar_select %p48_p3, %s1296_s26, %s50_s13  }
  0x80   : > { %s1795_s9 = scalar_select %p1540_p0, 1, 0 }
  0x81   : > { %s301_s10 = sand.u32 1, %s1296_s26   ;;  %s832_s16 = sshll.u32 %s1304_s28, 7 }
  0x82   : > { %s831_s15 = sshll.u32 %s301_s10, 3  ;;  %s1550_s14 = scalar_lea.hbm %s1772_s0, %s832_s16 }
  0x83   : > { %s305_s18 = scalar_lea.vmem [#allocation2], %s831_s15  ;;  %p1554_p5 = pnand %p941_p2, %p1516_p4 }
  0x84   : > { %s313_s13 = sshll.u32 %s305_s18, 4  ;;  %s302_s1 = scalar_lea.sflag [#allocation3], %s301_s10  ;;  %s1558_s13 = int_to_ptr.vmem [resolvable:$true] %s313_s13 }
  0x85   : > { %s1128_s2 = scalar_lea.hbm %s1550_s14, 128  ;;  %p1130_p7 = pneg %p1554_p5 }
  0x86   : > { %p1129_p8 = scmp.ne.s32.totalorder %s1550_s14, %s1128_s2  ;;  %s1133_s19 = scalar_lea.hbm %s1772_s0, 256 }
  0x87   : > { %p1134_p4 = scmp.lt.u32.totalorder %s1550_s14, %s1772_s0  ;;  %p1135_p6 = scmp.lt.u32.totalorder %s1133_s19, %s1128_s2 }
  0x88   : > { %p1131_p9 = pnand %p1130_p7, %p1129_p8  ;;  %p1137_p10 = scmp.lt.u32.totalorder %s1128_s2, %s1550_s14 }
  0x89   : > { %p1136_p3 = por %p1135_p6, %p1134_p4 }
  0x8a   : > { %p1132_p1 = pneg %p1131_p9 }
  0x8b   : > { %p1138_p13 = por %p1137_p10, %p1136_p3 }
  0x8d   : > { %p1139_p2 = pnand %p1138_p13, %p1132_p1 }
  0x8f   : > { %1142 = shalt.err (!%p1139_p2)
}
  0x90   : > { %s1143_s10 = scalar_lea.vmem %s1558_s13, 128  ;;  %s1316_s18 = smov [#allocation2]  }
  0x91   : > { %p1144_p8 = scmp.ne.s32.totalorder %s1558_s13, %s1143_s10  ;;  %s1148_s16 = sshll.u32 %s1316_s18, 4  ;;  %s1149_s16 = int_to_ptr.vmem [resolvable:$false] %s1148_s16 }
  0x92   : > { %s1150_s15 = scalar_lea.vmem %s1149_s16, 256  ;;  %p1151_p12 = scmp.lt.s32.totalorder %s1558_s13, %s1149_s16 }
  0x93   : > { %p1146_p9 = pnand %p1144_p8, %p1130_p7  ;;  %p1152_p4 = scmp.lt.s32.totalorder %s1150_s15, %s1143_s10 }
  0x95   : > { %p1147_p0 = pneg %p1146_p9  ;;  %p1153_p6 = por %p1152_p4, %p1151_p12 }
  0x97   : > { %p1154_p3 = pnand %p1153_p6, %p1147_p0 }
  0x99   : > { %1157 = shalt.err (!%p1154_p3)
}
  0x9a   : > { %926 = dma.hbm_to_vmem [thread:$0]  (!%p1554_p5), %s1550_s14, 128, %s1558_s13, %s302_s1  }
  0x9b   : > { %p1797_p1 = scmp.ne.s32.totalorder %s1786_s8, 0 }
  0x9c   : > { %s1588_s2 = sand.u32 (!%p1797_p1), 1, %s1292_s25  }
  0x9d   : > { %322 = sbr.rel (%p1797_p1) target bundleno = 996 (0x3e4), region = 40  ;;  %s834_s19 = sshll.u32 (!%p1797_p1), %s1588_s2, 3 }
  0x9e   : > { %s325_s12 = scalar_lea.sflag (!%p1797_p1), [#allocation3], %s1588_s2  ;;  %s328_s11 = scalar_lea.vmem (!%p1797_p1), [#allocation2], %s834_s19 }
  0xa4   : > { %1267 = dma.done.wait (%p1527_p11), %s325_s12, 128  }
  0xa5   : > { %1269 = vsyncadd (%p1527_p11), %s325_s12, 4294967168  ;;  %p1798_p12 = scmp.eq.s32.totalorder %s1402_s30, 0 }
  0xa7   : > { %1271 = dma.done.wait (%p1798_p12), [#allocation6], 32   ;;  %p1799_p0 = pmov %p1798_p12 }
  0xa9   : > { %1273 = vsyncadd (%p1799_p0), [#allocation6], 4294967264  ;;  %p1800_p5 = pmov %p1799_p0 }
  0xaa   : > { %p1801_p7 = pmov %p1799_p0 }
  0xab   : > { %1275 = dma.done.wait (%p1800_p5), [#allocation9], 272  }
  0xac   : > { %1277 = vsyncadd (%p1801_p7), [#allocation9], 4294967024  ;;  %vm389_vm0 = vcmask 261120   ;;  %v386_v0 = vld [vmem:[%s328_s11] sm:$0xff]  ;;  %v1012_v7 = vld [vmem:[#allocation8] sm:$0xff]   ;;  %v1317_v8 = vmov 0.0  }
  0xad   : > { %v390_v1 = vsel %vm389_vm0, %v386_v0, 0.0  ;;  %878 = vmatprep.subr.bf16.mxu0 %v1317_v8  ;;  %vm1318_vm1 = vmmov 0   ;;  %v1013_v9 = vld [vmem:[#allocation8 + $0x8] sm:$0xff]   ;;  %v842_v14 = vld [vmem:[#allocation5] ss:$0 sm:$0xff]  ;;  %s1608_s1 = sshll.u32 %s1588_s2, 4 }
  0xae   : > { %391 = vadd.xlane.f32.xlu0 %v390_v1  ;;  %882 = vmatprep.mubr.msk.bf16.mxu0 %vm1318_vm1, %v1317_v8  ;;  %v843_v16 = vld [vmem:[#allocation7] ss:$0 sm:$0xff]  ;;  %v844_v20 = vld [vmem:[#allocation10] ss:$0 sm:$0xff]  ;;  %s1319_s8 = smov 96   ;;  %vm524_vm2 = vcmask 60416  }
  0xaf   : > { %879 = vmatpush3.bf16.msra.mxu0 %v1012_v7  ;;  %s1320_s21 = smov 64   ;;  %s1321_s20 = smov 120  }
  0xb0   : > { %880 = vmatprep.subr.bf16.mxu0 %v1317_v8  ;;  %s1612_s14 = scalar_lea.vmem [#allocation11], %s1608_s1  ;;  %s1322_s13 = smov 56  }
  0xb1   : > { %s1323_s10 = smov 48   ;;  %s1324_s18 = smov 40  }
  0xb2   : > { %s1325_s16 = smov 112   ;;  %s1326_s15 = smov 104  }
  0xb3   : > { %881 = vmatpush3.bf16.msra.mxu0 %v1013_v9  ;;  %s1617_s19 = scalar_lea.vmem [#allocation14], %s1608_s1  ;;  %s602_s12 = sshll.u32 %s1612_s14, 4  ;;  %s1635_s12 = int_to_ptr.vmem [resolvable:$true] %s602_s12 }
  0xb4   : > { %s1631_s11 = sshll.u32 %s1300_s27, 8  ;;  %p1802_p10 = scmp.ne.s32.totalorder %s1794_s22, 0 }
  0xb5   : > { %s1327_s27 = smov [#allocation11]  }
 0x13b   : > { %v392_v2 = vpop.xlane.xlu0 %391 }
 0x13c   : > { %v394_v3 = vmul.f32 0.03125, %v392_v2 }
 0x13e   : > { %v395_v4 = vsub.f32 %v386_v0, %v394_v3 }
 0x140   : > { %v396_v5 = vmul.f32 %v395_v4, %v395_v4 }
 0x142   : > { %v397_v6 = vsel %vm389_vm0, %v396_v5, 0.0 }
 0x143   : > { %398 = vadd.xlane.f32.xlu0 %v397_v6 }
 0x1d0   : > { %v399_v10 = vpop.xlane.xlu0 %398 }
 0x1d1   : > { %v400_v11 = vmul.f32 0.03125, %v399_v10 }
 0x1d3   : > { %v401_v12 = vadd.f32 1e-05, %v400_v11 }
 0x1d5   : > { %1014 = vrsqrt.f32 %v401_v12 }
 0x1df   : > { %v1015_v13 = vpop.eup %1014 }
 0x1e0   : > { %v403_v15 = vmul.f32 %v1015_v13, %v395_v4 }
 0x1e2   : > { %v410_v17 = vmul.f32 %v842_v14, %v403_v15 }
 0x1e4   : > { %v417_v18 = vadd.f32 %v843_v16, %v410_v17 }
 0x1e6   : > { %v418_v19 = vpack.c.bf16 %v417_v18, %v417_v18 }
 0x1e8   : > { %883 = vmatmul.mubr.msk.bf16.vlgmr.msra.gmra.mrb[0].mxu0 %vm389_vm0, %v418_v19 }
 0x2bb   : > { %v479_v21 = vpop.f32.mrb[0].mxu0 }
 0x2bc   : > { %v480_v22 = vadd.f32 %v844_v20, %v479_v21  ;;  %v884_v23 = vpop.f32.mrb[1].mxu0 }
 0x2bd   : > { %v482_v24 = vpop.f32.mrb[2].mxu0 }
 0x2be   : > { %v485_v25 = vmul.f32 0.35355338, %v480_v22  ;;  %488 = vrot.lane.b32.xlu1 %v480_v22, %s1319_s8  ;;  %v885_v26 = vpop.f32.mrb[3].mxu0  ;;  %v870_v28 = vpack.c.bf16 %v480_v22, %v480_v22 }
 0x2c0   : > { %v486_v27 = vpack.c.bf16 %v485_v25, %v485_v25 }
 0x2c2   : > { %531 = vrot.lane.b32.xlu1 %v870_v28, %s1320_s21  ;;  %538 = vrot.lane.b32.xlu0 %v486_v27, %s1321_s20  ;;  %525 = vst.msk [vmem:[%s1612_s14] sm:$0xf] %vm524_vm2, %v486_v27 }
 0x2c6   : > { %546 = vrot.lane.b32.xlu1 %v870_v28, %s1322_s13  ;;  %s1641_s13 = scalar_lea.hbm %s1777_s5, %s1631_s11 }
 0x2ca   : > { %559 = vrot.lane.b32.xlu1 %v870_v28, %s1323_s10 }
 0x2ce   : > { %572 = vrot.lane.b32.xlu1 %v870_v28, %s1324_s18  ;;  %s1158_s18 = scalar_lea.vmem %s1635_s12, 256 }
 0x2cf   : > { %p1159_p11 = scmp.ne.s32.totalorder %s1635_s12, %s1158_s18 }
 0x2d1   : > { %p1160_p13 = pnand %p1159_p11, %p1802_p10 }
 0x2d2   : > { %551 = vrot.lane.b32.xlu1 %v486_v27, %s1325_s16  ;;  %s1162_s16 = sshll.u32 %s1327_s27, 4  ;;  %s1163_s16 = int_to_ptr.vmem [resolvable:$false] %s1162_s16 }
 0x2d3   : > { %p1161_p2 = pneg %p1160_p13  ;;  %p1165_p8 = scmp.lt.s32.totalorder %s1635_s12, %s1163_s16 }
 0x2d6   : > { %564 = vrot.lane.b32.xlu1 %v486_v27, %s1326_s15  ;;  %s1164_s15 = scalar_lea.vmem %s1163_s16, 512 }
 0x2d7   : > { %p1166_p9 = scmp.lt.s32.totalorder %s1164_s15, %s1158_s18 }
 0x2d9   : > { %p1167_p4 = por %p1166_p9, %p1165_p8 }
 0x2db   : > { %p1168_p6 = pnand %p1167_p4, %p1161_p2 }
 0x330   : > { %v489_v29 = vpop.permute.xlu1 %488 }
 0x331   : > { %491 = vxpose.xlu1.b32.start.end [1/1] (short) (narrow) %v489_v29, 32 }
 0x334   : > { %v532_v30 = vpop.permute.xlu1 %531  ;;  %v539_v31 = vpop.permute.xlu0 %538 }
 0x335   : > { %534 = vst.msk [vmem:[%s1617_s19] sm:$0xf] %vm524_vm2, %v532_v30  ;;  %850 = vst.msk [vmem:[%s1612_s14 + $0x4] sm:$0xf] %vm524_vm2, %v539_v31 }
 0x338   : > { %v547_v32 = vpop.permute.xlu1 %546 }
 0x339   : > { %852 = vst.msk [vmem:[%s1617_s19 + $0x4] sm:$0xf] %vm524_vm2, %v547_v32 }
 0x33c   : > { %v560_v33 = vpop.permute.xlu1 %559 }
 0x33d   : > { %855 = vst.msk [vmem:[%s1617_s19 + $0x8] sm:$0xf] %vm524_vm2, %v560_v33 }
 0x340   : > { %v573_v34 = vpop.permute.xlu1 %572 }
 0x341   : > { %858 = vst.msk [vmem:[%s1617_s19 + $0xc] sm:$0xf] %vm524_vm2, %v573_v34 }
 0x344   : > { %v552_v35 = vpop.permute.xlu1 %551 }
 0x345   : > { %853 = vst.msk [vmem:[%s1612_s14 + $0x8] sm:$0xf] %vm524_vm2, %v552_v35 }
 0x348   : > { %v565_v36 = vpop.permute.xlu1 %564 }
 0x349   : > { %856 = vst.msk [vmem:[%s1612_s14 + $0xc] sm:$0xf] %vm524_vm2, %v565_v36 }
 0x34a   : > { %1171 = shalt.err (!%p1168_p6)
}
 0x34b   : > { %s1172_s14 = scalar_lea.hbm %s1641_s13, 256  ;;  %s1176_s27 = scalar_lea.hbm %s1777_s5, 512 }
 0x34c   : > { %p1173_p3 = scmp.ne.s32.totalorder %s1641_s13, %s1172_s14  ;;  %p1177_p0 = scmp.lt.u32.totalorder %s1641_s13, %s1777_s5 }
 0x34d   : > { %p1178_p5 = scmp.lt.u32.totalorder %s1176_s27, %s1172_s14  ;;  %p1180_p11 = scmp.lt.u32.totalorder %s1172_s14, %s1641_s13 }
 0x34e   : > { %p1174_p1 = pnand %p1173_p3, %p1802_p10 }
 0x34f   : > { %p1179_p7 = por %p1178_p5, %p1177_p0 }
 0x350   : > { %p1175_p12 = pneg %p1174_p1 }
 0x351   : > { %p1181_p13 = por %p1180_p11, %p1179_p7 }
 0x353   : > { %p1182_p2 = pnand %p1181_p13, %p1175_p12 }
 0x355   : > { %1185 = shalt.err (!%p1182_p2)
}
 0x356   : > { %s1328_s18 = smov 4   ;;  %s1803_s15 = scalar_lea.sflag [#allocation4], %s1588_s2 }
 0x357   : > { %904 = dma.vmem_to_hbm [thread:$0]  (%p1802_p10), %s1635_s12, 256, %s1641_s13, %s1803_s15, %s1320_s21, %s1320_s21, %s1328_s18  }
 0x358   : > { %s377_s10 = scalar_lea.vmem [#allocation12], %s1608_s1  ;;  %s582_s14 = sand.u32 1, %s1402_s30  }
 0x359   : > { %s619_s2 = sshll.u32 %s377_s10, 4  ;;  %s636_s8 = sshll.u32 %s1617_s19, 4  ;;  %s1678_s2 = int_to_ptr.vmem [resolvable:$true] %s619_s2  ;;  %s1686_s8 = int_to_ptr.vmem [resolvable:$true] %s636_s8 }
 0x35a   : > { %s1684_s13 = scalar_lea.hbm %s1778_s6, %s1631_s11  ;;  %s1692_s30 = scalar_lea.hbm %s1779_s7, %s1631_s11 }
 0x35b   : > { %s1695_s19 = scalar_lea.sflag [#allocation13], %s582_s14  ;;  %s1186_s16 = scalar_lea.vmem %s1678_s2, 256 }
 0x35c   : > { %p1187_p8 = scmp.ne.s32.totalorder %s1678_s2, %s1186_s16  ;;  %s1329_s15 = smov [#allocation12]  }
 0x35d   : > { %s1190_s1 = sshll.u32 %s1329_s15, 4  ;;  %s1191_s1 = int_to_ptr.vmem [resolvable:$false] %s1190_s1 }
 0x35e   : > { %p1188_p9 = pnand %p1187_p8, %p1802_p10  ;;  %s1192_s12 = scalar_lea.vmem %s1191_s1, 512 }
 0x35f   : > { %p1193_p6 = scmp.lt.s32.totalorder %s1678_s2, %s1191_s1  ;;  %p1194_p3 = scmp.lt.s32.totalorder %s1192_s12, %s1186_s16 }
 0x360   : > { %p1189_p4 = pneg %p1188_p9 }
 0x361   : > { %p1195_p1 = por %p1194_p3, %p1193_p6 }
 0x363   : > { %p1196_p12 = pnand %p1195_p1, %p1189_p4 }
 0x3b1   : > { %v507_v37 = vpop.trf.xlu1 }
 0x3b2   : > { %v526_v38 = vpack.c.bf16 %v507_v37, %v507_v37 }
 0x3b4   : > { %527 = vst.msk [vmem:[%s377_s10] sm:$0xf] %vm524_vm2, %v526_v38 }
 0x3b5   : > { %v508_v39 = vpop.trf.xlu1 }
 0x3b6   : > { %v543_v40 = vpack.c.bf16 %v508_v39, %v508_v39 }
 0x3b8   : > { %851 = vst.msk [vmem:[%s377_s10 + $0x4] sm:$0xf] %vm524_vm2, %v543_v40 }
 0x3b9   : > { %v509_v41 = vpop.trf.xlu1 }
 0x3ba   : > { %v556_v42 = vpack.c.bf16 %v509_v41, %v509_v41 }
 0x3bc   : > { %854 = vst.msk [vmem:[%s377_s10 + $0x8] sm:$0xf] %vm524_vm2, %v556_v42 }
 0x3bd   : > { %v510_v43 = vpop.trf.xlu1 }
 0x3be   : > { %v569_v44 = vpack.c.bf16 %v510_v43, %v510_v43 }
 0x3c0   : > { %857 = vst.msk [vmem:[%s377_s10 + $0xc] sm:$0xf] %vm524_vm2, %v569_v44 }
 0x3c1   : > { %1199 = shalt.err (!%p1196_p12)
}
 0x3c2   : > { %s1200_s11 = scalar_lea.hbm %s1684_s13, 256  ;;  %s1204_s20 = scalar_lea.hbm %s1778_s6, 512 }
 0x3c3   : > { %p1201_p0 = scmp.ne.s32.totalorder %s1684_s13, %s1200_s11  ;;  %p1205_p11 = scmp.lt.u32.totalorder %s1684_s13, %s1778_s6 }
 0x3c4   : > { %p1206_p13 = scmp.lt.u32.totalorder %s1204_s20, %s1200_s11  ;;  %p1208_p8 = scmp.lt.u32.totalorder %s1200_s11, %s1684_s13 }
 0x3c5   : > { %p1202_p5 = pnand %p1201_p0, %p1802_p10 }
 0x3c6   : > { %p1207_p2 = por %p1206_p13, %p1205_p11 }
 0x3c7   : > { %p1203_p7 = pneg %p1202_p5 }
 0x3c8   : > { %p1209_p9 = por %p1208_p8, %p1207_p2 }
 0x3ca   : > { %p1210_p4 = pnand %p1209_p9, %p1203_p7 }
 0x3cc   : > { %1213 = shalt.err (!%p1210_p4)
}
 0x3cd   : > { %905 = dma.vmem_to_hbm [thread:$0]  (%p1802_p10), %s1678_s2, 256, %s1684_s13, %s1695_s19, %s1320_s21, %s1320_s21, %s1328_s18  }
 0x3ce   : > { %s1214_s16 = scalar_lea.vmem %s1686_s8, 256  ;;  %s1330_s1 = smov [#allocation14]  }
 0x3cf   : > { %p1215_p6 = scmp.ne.s32.totalorder %s1686_s8, %s1214_s16  ;;  %s1218_s12 = sshll.u32 %s1330_s1, 4  ;;  %s1219_s12 = int_to_ptr.vmem [resolvable:$false] %s1218_s12 }
 0x3d0   : > { %s1220_s11 = scalar_lea.vmem %s1219_s12, 512  ;;  %p1221_p12 = scmp.lt.s32.totalorder %s1686_s8, %s1219_s12 }
 0x3d1   : > { %p1216_p3 = pnand %p1215_p6, %p1802_p10  ;;  %p1222_p0 = scmp.lt.s32.totalorder %s1220_s11, %s1214_s16 }
 0x3d3   : > { %p1217_p1 = pneg %p1216_p3  ;;  %p1223_p5 = por %p1222_p0, %p1221_p12 }
 0x3d5   : > { %p1224_p7 = pnand %p1223_p5, %p1217_p1 }
 0x3d7   : > { %1227 = shalt.err (!%p1224_p7)
}
 0x3d8   : > { %s1228_s2 = scalar_lea.hbm %s1692_s30, 256  ;;  %s1232_s14 = scalar_lea.hbm %s1779_s7, 512 }
 0x3d9   : > { %p1229_p11 = scmp.ne.s32.totalorder %s1692_s30, %s1228_s2  ;;  %p1233_p8 = scmp.lt.u32.totalorder %s1692_s30, %s1779_s7 }
 0x3da   : > { %p1234_p9 = scmp.lt.u32.totalorder %s1232_s14, %s1228_s2  ;;  %p1236_p6 = scmp.lt.u32.totalorder %s1228_s2, %s1692_s30 }
 0x3db   : > { %p1230_p13 = pnand %p1229_p11, %p1802_p10 }
 0x3dc   : > { %p1235_p4 = por %p1234_p9, %p1233_p8 }
 0x3dd   : > { %p1231_p2 = pneg %p1230_p13 }
 0x3de   : > { %p1237_p3 = por %p1236_p6, %p1235_p4 }
 0x3e0   : > { %p1238_p1 = pnand %p1237_p3, %p1231_p2 }
 0x3e2   : > { %1241 = shalt.err (!%p1238_p1)
}
 0x3e3   : > { %906 = dma.vmem_to_hbm [thread:$0]  (%p1802_p10), %s1686_s8, 256, %s1692_s30, %s1695_s19, %s1320_s21, %s1320_s21, %s1328_s18  }
 0x3e4 PF: > { %s651_s15 = sand.u32 1, %s1288_s24   ;;  %p1804_p12 = scmp.ne.s32.totalorder %s1795_s9, 0 }
 0x3e5   : > { %p1805_p0 = scmp.ge.s32.totalorder %s1308_s29, 2  ;;  %s652_s16 = scalar_lea.sflag [#allocation4], %s651_s15 }
 0x3e7   : > { %p928_p5 = pnand %p1805_p0, %p1804_p12 }
 0x3e9   : > { %1279 = dma.done.wait (!%p928_p5), %s652_s16, 256  }
 0x3ea   : > { %1281 = vsyncadd (!%p928_p5), %s652_s16, 4294967040  ;;  %s1806_s22 = sadd.s32 4294967294, %s1308_s29  }
 0x3eb   : > { %s660_s1 = sand.u32 1, %s1806_s22  }
 0x3ec   : > { %s661_s12 = scalar_lea.sflag [#allocation13], %s660_s1 }
 0x3ed   : > { %1283 = dma.done.wait (!%p928_p5), %s661_s12, 512  }
 0x3ee   : > { %1285 = vsyncadd (!%p928_p5), %s661_s12, 4294966784  ;;  %s29_s29 = sadd.s32 1, %s1308_s29   ;;  %s1807_s24 = smov %s1292_s25 }
 0x3ef   : > { %p26_p10 = scmp.ge.s32.totalorder %s29_s29, 4   ;;  %s1808_s25 = smov %s1296_s26 }
 0x3f0   : > { %s1809_s26 = smov %s1538_s23  ;;  %s1810_s27 = smov %s1304_s28 }
 0x3f1   : > { %s1811_s28 = smov %s1813_s17  ;;  %28 = sbr.rel (!%p26_p10) target bundleno = 13 (0xd), region = 142 }
 0x3f8   :  { %675 = vsyncpa [#allocation3], 1 }
 0x3f9   :  { %677 = vsyncpa [#allocation3 + $0x1], 1 }
 0x3fa   :  { %678 = vsyncpa [#allocation6], 1 }
 0x3fb   :  { %679 = vsyncpa [#allocation9], 1 }
 0x3fc   :  { %680 = vsyncpa [#allocation4], 1 }
 0x3fd   :  { %682 = vsyncpa [#allocation4 + $0x1], 1 }
 0x3fe   :  { %683 = vsyncpa [#allocation13], 1 }
 0x3ff   :  { %685 = vsyncpa [#allocation13 + $0x1], 1 }

// kernel: block_forward.3
= control target key start
LH: loop header
LB: loop body
LE: loop exit
PB: predicated region body
PF: predicated region fallthrough
CT: control target
= control target key end

     0   :  { %s4728_s0 = inlined_call_operand.<no memory space> [shape: s32[1], index: 0, kind: input, shape index: {}, may-alias: {0,1}]   ;;  %s4729_s1 = inlined_call_operand.<no memory space> [shape: s32[1], index: 1, kind: input, shape index: {}, may-alias: {0,1}]   ;;  %s4730_s2 = inlined_call_operand.hbm [shape: f32[2,8,32], index: 2, kind: input, shape index: {}]   ;;  %s4731_s3 = inlined_call_operand.hbm [shape: bf16[2,4,8,8], index: 3, kind: input, shape index: {}]   ;;  %s4732_s4 = inlined_call_operand.hbm [shape: bf16[2,4,8,8], index: 4, kind: input, shape index: {}]   ;;  %s4733_s5 = inlined_call_operand.hbm [shape: bf16[2,4,8,8], index: 5, kind: input, shape index: {}]   ;;  %s4734_s6 = inlined_call_operand.hbm [shape: bf16[4,8,32], index: 6, kind: input, shape index: {}]   ;;  %s4735_s7 = inlined_call_operand.hbm [shape: f32[1,32], index: 7, kind: input, shape index: {}]   ;;  %s4736_s8 = inlined_call_operand.hbm [shape: f32[1,32], index: 8, kind: input, shape index: {}]   ;;  %s4737_s9 = inlined_call_operand.hbm [shape: f32[1,32], index: 9, kind: input, shape index: {}]   ;;  %s4738_s10 = inlined_call_operand.hbm [shape: bf16[32,128], index: 10, kind: input, shape index: {}]   ;;  %s4739_s11 = inlined_call_operand.hbm [shape: f32[1,128], index: 11, kind: input, shape index: {}]   ;;  %s4740_s12 = inlined_call_operand.hbm [shape: bf16[128,32], index: 12, kind: input, shape index: {}]   ;;  %s4741_s13 = inlined_call_operand.hbm [shape: f32[1,32], index: 13, kind: input, shape index: {}]   ;;  %s4742_s14 = inlined_call_operand.hbm [shape: f32[2,8,32], index: 14, kind: output, shape index: {}]  }
   0x1   :  { %4785 = sst [smem:[#allocation56_spill]] %s4730_s2 }
   0x2   :  { %4786 = sst [smem:[#allocation57_spill]] %s4731_s3 }
   0x3   :  { %4787 = sst [smem:[#allocation58_spill]] %s4732_s4 }
   0x4   :  { %4788 = sst [smem:[#allocation59_spill]] %s4733_s5 }
   0x5   :  { %4789 = sst [smem:[#allocation60_spill]] %s4734_s6 }
   0x6   :  { %4790 = sst [smem:[#allocation61_spill]] %s4735_s7 }
   0x7   :  { %4791 = sst [smem:[#allocation62_spill]] %s4736_s8 }
   0x8   :  { %4792 = sst [smem:[#allocation63_spill]] %s4737_s9 }
   0x9   :  { %4793 = sst [smem:[#allocation64_spill]] %s4738_s10 }
   0xa   :  { %4794 = sst [smem:[#allocation65_spill]] %s4739_s11 }
   0xb   :  { %4795 = sst [smem:[#allocation66_spill]] %s4740_s12 }
   0xc   :  { %4796 = sst [smem:[#allocation67_spill]] %s4741_s13 }
   0xd   :  { %4797 = sst [smem:[#allocation68_spill]] %s4742_s14 }
   0xe   :  { %19 = sst [smem:[#allocation6]] %s4728_s0 }
   0xf   :  { %20 = sst [smem:[#allocation7]] %s4729_s1 }
  0x10   :  { %21 = vsyncpa [#allocation9], 0 }
  0x11   :  { %23 = vsyncpa [#allocation9 + $0x1], 0 }
  0x12   :  { %24 = vsyncpa [#allocation12], 0 }
  0x13   :  { %26 = vsyncpa [#allocation12 + $0x1], 0 }
  0x14   :  { %27 = vsyncpa [#allocation15], 0 }
  0x15   :  { %29 = vsyncpa [#allocation15 + $0x1], 0 }
  0x16   :  { %30 = vsyncpa [#allocation18], 0 }
  0x17   :  { %31 = vsyncpa [#allocation21], 0 }
  0x18   :  { %32 = vsyncpa [#allocation24], 0 }
  0x19   :  { %33 = vsyncpa [#allocation27], 0 }
  0x1a   :  { %34 = vsyncpa [#allocation10], 0 }
  0x1b   :  { %36 = vsyncpa [#allocation10 + $0x1], 0  ;;  %s3729_s17 = smov 0   ;;  %s3731_s18 = smov 0  }
  0x1c   :  { %s3733_s0 = smov 0   ;;  %s3735_s19 = smov 0  }
  0x1d   :  { %s3737_s1 = smov 0   ;;  %s3739_s20 = smov 0  }
  0x1e   :  { %s3741_s21 = smov 0   ;;  %s3743_s22 = smov 0  }
  0x1f   :  { %s3745_s23 = smov 0   ;;  %s3747_s24 = smov 0  }
  0x20   :  { %s3749_s25 = smov 0   ;;  %s3751_s26 = smov 0  }
  0x21   :  { %s3753_s27 = smov 0   ;;  %s3755_s28 = smov 0  }
  0x22   :  { %s3757_s29 = smov 0   ;;  %s3759_s30 = smov 0  }
  0x23   :  { %s3761_s15 = smov 0   ;;  %s3763_s16 = smov 0  }
  0x24 LB: > { %4798 = sst [smem:[#allocation39_spill]] %s3563_s0  ;;  %s3820_s14 = sadd.s32 4294967295, %s3623_s16   ;;  %s3623_s16 = sphi %s3763_s16, %s42_s16   ;;  %s3619_s15 = sphi %s3761_s15, %s4919_s15   ;;  %s3615_s30 = sphi %s3759_s30, %s4918_s30   ;;  %s3611_s29 = sphi %s3757_s29, %s4917_s29   ;;  %s3607_s28 = sphi %s3755_s28, %s4916_s28   ;;  %s3603_s27 = sphi %s3753_s27, %s4904_s27   ;;  %s3599_s26 = sphi %s3751_s26, %s4915_s26   ;;  %s3595_s25 = sphi %s3749_s25, %s4914_s25   ;;  %s3591_s24 = sphi %s3747_s24, %s4913_s24   ;;  %s3587_s23 = sphi %s3745_s23, %s4912_s23   ;;  %s3583_s22 = sphi %s3743_s22, %s4901_s22   ;;  %s3579_s21 = sphi %s3741_s21, %s4900_s21   ;;  %s3575_s20 = sphi %s3739_s20, %s4911_s20   ;;  %s3571_s1 = sphi %s3737_s1, %s4910_s1   ;;  %s3567_s19 = sphi %s3735_s19, %s4898_s19   ;;  %s3563_s0 = sphi %s3733_s0, %s4897_s0   ;;  %s3559_s18 = sphi %s3731_s18, %s4909_s18   ;;  %s3555_s17 = sphi %s3729_s17, %s4907_s17  }
  0x25   : > { %4799 = sst [smem:[#allocation40_spill]] %s3567_s19  ;;  %p2469_p0 = scmp.ge.s32.totalorder %s3623_s16, 1 }
  0x26   : > { %4800 = sst [smem:[#allocation41_spill]] %s3571_s1  ;;  %p4757_p1 = scmp.eq.s32.totalorder %s3820_s14, 0 }
  0x27   : > { %4801 = sst [smem:[#allocation42_spill]] %s3575_s20  ;;  %p377_p2 = scmp.lt.s32.totalorder %s3623_s16, 3 }
  0x28   : > { %4802 = sst [smem:[#allocation43_spill]] %s3579_s21  ;;  %s3626_s20 = smov [#allocation17]  }
  0x29   : > { %4803 = sst [smem:[#allocation44_spill]] %s3583_s22  ;;  %p3825_p3 = pnand %p2469_p0, %p377_p2 }
  0x2a   : > { %4804 = sst [smem:[#allocation45_spill]] %s3587_s23  ;;  %s403_s4 = sshll.u32 %s3626_s20, 4  ;;  %s3840_s4 = int_to_ptr.vmem [resolvable:$true] %s403_s4 }
  0x2b   : > { %4805 = sst [smem:[#allocation46_spill]] %s3599_s26  ;;  %p2789_p4 = pneg %p3825_p3 }
  0x2c   : > { %4806 = sst [smem:[#allocation47_spill]] %s3603_s27  ;;  %s3627_s21 = smov [#allocation20]  }
  0x2d   : > { %4807 = sst [smem:[#allocation48_spill]] %s3607_s28  ;;  %p3836_p6 = pnand %p2789_p4, %p4757_p1 }
  0x2e   : > { %4808 = sst [smem:[#allocation49_spill]] %s3611_s29  ;;  %s3842_s22 = sshll.u32 %s3627_s21, 4  ;;  %s426_s22 = int_to_ptr.vmem [resolvable:$true] %s3842_s22 }
  0x2f   : > { %4809 = sst [smem:[#allocation50_spill]] %s3615_s30  ;;  %s3625_s30 = smov [#allocation16]  }
  0x30   : > { %s4810_s5 = scalar_select %p3825_p3, 1, 0 }
  0x31   : > { %s389_s19 = sshll.u32 %s3625_s30, 4  ;;  %s4813_s6 = sld [smem:[#allocation60_spill]]  ;;  %s3829_s19 = int_to_ptr.vmem [resolvable:$true] %s389_s19 }
  0x32   : > { %4811 = sst [smem:[#allocation51_spill]] %s4810_s5  ;;  %p3852_p8 = pneg %p3836_p6 }
  0x33   : > { %s4812_s1 = scalar_select %p3836_p6, 1, 0 }
  0x37   : > { %s3069_s2 = scalar_lea.hbm %s4813_s6, 256 }
  0x38   : > { %p3070_p7 = scmp.ne.s32.totalorder %s4813_s6, %s3069_s2  ;;  %p3076_p11 = scmp.lt.u32.totalorder %s3069_s2, %s4813_s6 }
  0x3a   : > { %p3072_p9 = pnand %p3852_p8, %p3070_p7 }
  0x3c   : > { %p3073_p10 = pneg %p3072_p9 }
  0x3e   : > { %p3078_p12 = pnand %p3076_p11, %p3073_p10 }
  0x40   : > { %3081 = shalt.err (!%p3078_p12)
}
  0x41   : > { %s3082_s5 = scalar_lea.vmem %s3829_s19, 256  ;;  %p3090_p4 = scmp.lt.s32.totalorder %s3829_s19, %s3829_s19 }
  0x42   : > { %p3083_p13 = scmp.ne.s32.totalorder %s3829_s19, %s3082_s5  ;;  %p3091_p5 = scmp.lt.s32.totalorder %s3082_s5, %s3082_s5 }
  0x44   : > { %p3085_p0 = pnand %p3083_p13, %p3852_p8  ;;  %p3092_p7 = por %p3091_p5, %p3090_p4 }
  0x46   : > { %p3086_p2 = pneg %p3085_p0 }
  0x48   : > { %p3093_p9 = pnand %p3092_p7, %p3086_p2 }
  0x4a   : > { %3096 = shalt.err (!%p3093_p9)
}
  0x4b   : > { %s4759_s23 = smov 64   ;;  %s4761_s2 = smov 4  }
  0x4c   : > { %2792 = dma.hbm_to_vmem [thread:$0]  (!%p3836_p6), %s4813_s6, 256, %s3829_s19, [#allocation15], %s4759_s23, %s4759_s23, %s4761_s2  }
  0x4d   : > { %s4815_s7 = sld [smem:[#allocation61_spill]] }
  0x53   : > { %s3097_s5 = scalar_lea.hbm %s4815_s7, 16 }
  0x54   : > { %p3098_p5 = scmp.ne.s32.totalorder %s4815_s7, %s3097_s5  ;;  %p3104_p12 = scmp.lt.u32.totalorder %s3097_s5, %s4815_s7 }
  0x56   : > { %p3100_p10 = pnand %p3098_p5, %p3852_p8 }
  0x58   : > { %p3101_p11 = pneg %p3100_p10 }
  0x5a   : > { %p3106_p13 = pnand %p3104_p12, %p3101_p11 }
  0x5c   : > { %3109 = shalt.err (!%p3106_p13)
}
  0x5d   : > { %s3110_s19 = scalar_lea.vmem %s3840_s4, 16  ;;  %s3117_s13 = scalar_lea.vmem %s3840_s4, 32 }
  0x5e   : > { %p3111_p0 = scmp.ne.s32.totalorder %s3840_s4, %s3110_s19  ;;  %p3118_p7 = scmp.lt.s32.totalorder %s3840_s4, %s3840_s4 }
  0x5f   : > { %p3119_p9 = scmp.lt.s32.totalorder %s3117_s13, %s3110_s19 }
  0x60   : > { %p3113_p2 = pnand %p3111_p0, %p3852_p8 }
  0x61   : > { %p3120_p5 = por %p3119_p9, %p3118_p7 }
  0x62   : > { %p3114_p4 = pneg %p3113_p2 }
  0x64   : > { %p3121_p10 = pnand %p3120_p5, %p3114_p4 }
  0x66   : > { %3124 = shalt.err (!%p3121_p10)
}
  0x67   : > { %2795 = dma.hbm_to_vmem [thread:$0]  (!%p3836_p6), %s4815_s7, 16, %s3840_s4, [#allocation18]  }
  0x68   : > { %s4816_s9 = sld [smem:[#allocation63_spill]] }
  0x6e   : > { %s3125_s30 = scalar_lea.hbm %s4816_s9, 16 }
  0x6f   : > { %p3126_p11 = scmp.ne.s32.totalorder %s4816_s9, %s3125_s30  ;;  %p3132_p0 = scmp.lt.u32.totalorder %s3125_s30, %s4816_s9 }
  0x71   : > { %p3128_p12 = pnand %p3126_p11, %p3852_p8 }
  0x73   : > { %p3129_p13 = pneg %p3128_p12 }
  0x75   : > { %p3134_p2 = pnand %p3132_p0, %p3129_p13 }
  0x77   : > { %3137 = shalt.err (!%p3134_p2)
}
  0x78   : > { %s3138_s13 = scalar_lea.vmem %s426_s22, 16  ;;  %s3145_s4 = scalar_lea.vmem %s426_s22, 32 }
  0x79   : > { %p3139_p4 = scmp.ne.s32.totalorder %s426_s22, %s3138_s13  ;;  %p3146_p5 = scmp.lt.s32.totalorder %s426_s22, %s426_s22 }
  0x7a   : > { %p3147_p10 = scmp.lt.s32.totalorder %s3145_s4, %s3138_s13 }
  0x7b   : > { %p3141_p7 = pnand %p3139_p4, %p3852_p8 }
  0x7c   : > { %p3148_p1 = por %p3147_p10, %p3146_p5 }
  0x7d   : > { %p3142_p9 = pneg %p3141_p7 }
  0x7f   : > { %p3149_p3 = pnand %p3148_p1, %p3142_p9 }
  0x81   : > { %3152 = shalt.err (!%p3149_p3)
}
  0x82   : > { %2801 = dma.hbm_to_vmem [thread:$0]  (!%p3836_p6), %s4816_s9, 16, %s426_s22, [#allocation21]  }
  0x83   : > { %s3630_s29 = smov [#allocation23]   ;;  %s4817_s11 = sld [smem:[#allocation65_spill]] }
  0x84   : > { %s449_s27 = sshll.u32 %s3630_s29, 4  ;;  %s450_s27 = int_to_ptr.vmem [resolvable:$true] %s449_s27 }
  0x89   : > { %s3153_s21 = scalar_lea.hbm %s4817_s11, 16 }
  0x8a   : > { %p3154_p11 = scmp.ne.s32.totalorder %s4817_s11, %s3153_s21  ;;  %p3160_p12 = scmp.lt.u32.totalorder %s3153_s21, %s4817_s11 }
  0x8c   : > { %p3156_p1 = pnand %p3154_p11, %p3852_p8 }
  0x8e   : > { %p3157_p3 = pneg %p3156_p1 }
  0x90   : > { %p3162_p13 = pnand %p3160_p12, %p3157_p3 }
  0x92   : > { %3165 = shalt.err (!%p3162_p13)
}
  0x93   : > { %s3166_s22 = scalar_lea.vmem %s450_s27, 16  ;;  %s3173_s10 = scalar_lea.vmem %s450_s27, 32 }
  0x94   : > { %p3167_p0 = scmp.ne.s32.totalorder %s450_s27, %s3166_s22  ;;  %p3174_p7 = scmp.lt.s32.totalorder %s450_s27, %s450_s27 }
  0x95   : > { %p3175_p9 = scmp.lt.s32.totalorder %s3173_s10, %s3166_s22 }
  0x96   : > { %p3169_p2 = pnand %p3167_p0, %p3852_p8 }
  0x97   : > { %p3176_p5 = por %p3175_p9, %p3174_p7 }
  0x98   : > { %p3170_p4 = pneg %p3169_p2 }
  0x9a   : > { %p3177_p10 = pnand %p3176_p5, %p3170_p4 }
  0x9c   : > { %3180 = shalt.err (!%p3177_p10)
}
  0x9d   : > { %2807 = dma.hbm_to_vmem [thread:$0]  (!%p3836_p6), %s4817_s11, 16, %s450_s27, [#allocation24]  }
  0x9e   : > { %s2468_s30 = sadd.s32 4294967294, %s3623_s16   ;;  %s54_s20 = sadd.s32 1, %s3619_s15 }
  0x9f   : > { %p56_p11 = scmp.ge.s32.totalorder %s54_s20, 2  ;;  %p4766_p1 = scmp.eq.s32.totalorder %s3623_s16, 0 }
  0xa0   : > { %s3940_s21 = sld [smem:[#allocation6]]  ;;  %s95_s5 = sadd.s32 1, %s3599_s26 }
  0xa1   : > { %s4921_s20 = smov (%p56_p11, %s54_s20), 0  ;;  %p102_p3 = scmp.ne.s32.totalorder %s3599_s26, %s3595_s25 }
  0xa2   : > { %4818 = sst [smem:[#allocation52_spill]] %s4921_s20  ;;  %p108_p12 = scmp.ne.s32.totalorder %s3595_s25, %s3591_s24 }
  0xa3   : > { %s60_s27 = ssub.s32 %s3619_s15, %s4921_s20  ;;  %s353_s19 = sadd.s32 1, %s3563_s0 }
  0xa4   : > { %p3954_p13 = por %p102_p3, %p4766_p1  ;;  %p4820_p0 = scmp.eq.s32.totalorder %s3820_s14, 0 }
  0xa5   : > { %p363_p4 = scmp.ne.s32.totalorder %s3563_s0, %s3559_s18  ;;  %p364_p7 = scmp.eq.s32.totalorder %s3820_s14, 1 }
  0xa6   : > { %p3960_p2 = por %p108_p12, %p4820_p0  ;;  %p369_p9 = scmp.ne.s32.totalorder %s3559_s18, %s3555_s17 }
  0xa7   : > { %p3969_p5 = por %p364_p7, %p363_p4  ;;  %p3973_p10 = scmp.eq.s32.totalorder %s60_s27, 0 }
  0xa8   : > { %s4821_s4 = scalar_select %p3960_p2, 1, 0 }
  0xa9   : > { %s4823_s24 = scalar_select %p3969_p5, 1, 0 }
  0xaa   : > { %4822 = sst [smem:[#allocation53_spill]] %s4821_s4  ;;  %p370_p11 = scmp.eq.s32.totalorder %s2468_s30, 1 }
  0xab   : > { %s4824_s22 = scalar_select %p3973_p10, 1, 0 }
  0xac   : > { %p4765_p3 = scmp.lt.s32.totalorder %s3623_s16, 2  ;;  %p3989_p12 = por %p370_p11, %p369_p9 }
  0xad   : > { %s3982_s12 = scalar_select %p3973_p10, %s3599_s26, %s95_s5  }
  0xae   : > { %s3987_s29 = scalar_select %p3973_p10, %s3563_s0, %s353_s19  }
  0xaf   : > { %4825 = sst [smem:[#allocation54_spill]] %s3982_s12  ;;  %s506_s27 = sand.u32 1, %s3599_s26  }
  0xb0   : > { %4826 = sst [smem:[#allocation55_spill]] %s3987_s29  ;;  %s4763_s2 = sshll.u32 %s3619_s15, 2 }
  0xb1   : > { %s4827_s23 = scalar_select %p3989_p12, 1, 0 }
  0xb2   : > { %s2481_s6 = sshll.u32 %s506_s27, 4  ;;  %s514_s7 = sadd.s32 %s4763_s2, %s3940_s21 }
  0xb3   : > { %s2483_s9 = sshll.u32 %s514_s7, 6  ;;  %s4828_s3 = sld [smem:[#allocation57_spill]] }
  0xb4   : > { %s508_s5 = scalar_lea.vmem [#allocation11], %s2481_s6  ;;  %p4009_p0 = pnand %p4765_p3, %p3954_p13 }
  0xb5   : > { %s517_s19 = sshll.u32 %s508_s5, 4  ;;  %s3631_s7 = smov [#allocation19]   ;;  %s4003_s19 = int_to_ptr.vmem [resolvable:$true] %s517_s19 }
  0xb6   : > { %s4013_s11 = sshll.u32 %s3631_s7, 4  ;;  %p3183_p7 = pneg %p4009_p0  ;;  %s415_s11 = int_to_ptr.vmem [resolvable:$true] %s4013_s11 }
  0xb9   : > { %s4001_s10 = scalar_lea.hbm %s4828_s3, %s2483_s9  ;;  %s4830_s9 = sand.u32 1, %s3623_s16  }
  0xba   : > { %s4017_s30 = scalar_lea.sflag [#allocation12], %s4830_s9  ;;  %s3181_s2 = scalar_lea.hbm %s4001_s10, 256 }
  0xbb   : > { %p3182_p4 = scmp.ne.s32.totalorder %s4001_s10, %s3181_s2  ;;  %s3186_s5 = scalar_lea.hbm %s4828_s3, 512 }
  0xbc   : > { %p3187_p13 = scmp.lt.u32.totalorder %s4001_s10, %s4828_s3  ;;  %p3188_p3 = scmp.lt.u32.totalorder %s3186_s5, %s3181_s2 }
  0xbd   : > { %p3184_p9 = pnand %p3183_p7, %p3182_p4  ;;  %p3190_p12 = scmp.lt.u32.totalorder %s3181_s2, %s4001_s10 }
  0xbe   : > { %p3189_p1 = por %p3188_p3, %p3187_p13 }
  0xbf   : > { %p3185_p11 = pneg %p3184_p9 }
  0xc0   : > { %p3191_p5 = por %p3190_p12, %p3189_p1 }
  0xc2   : > { %p3192_p2 = pnand %p3191_p5, %p3185_p11 }
  0xc4   : > { %3195 = shalt.err (!%p3192_p2)
}
  0xc5   : > { %s3196_s7 = scalar_lea.vmem %s4003_s19, 256  ;;  %s3632_s9 = smov [#allocation11]  }
  0xc6   : > { %p3197_p4 = scmp.ne.s32.totalorder %s4003_s19, %s3196_s7  ;;  %s3201_s6 = sshll.u32 %s3632_s9, 4  ;;  %s3202_s6 = int_to_ptr.vmem [resolvable:$false] %s3201_s6 }
  0xc7   : > { %s3203_s20 = scalar_lea.vmem %s3202_s6, 512  ;;  %p3204_p6 = scmp.lt.s32.totalorder %s4003_s19, %s3202_s6 }
  0xc8   : > { %p3199_p9 = pnand %p3197_p4, %p3183_p7  ;;  %p3205_p3 = scmp.lt.s32.totalorder %s3203_s20, %s3196_s7 }
  0xca   : > { %p3200_p10 = pneg %p3199_p9  ;;  %p3206_p13 = por %p3205_p3, %p3204_p6 }
  0xcc   : > { %p3207_p1 = pnand %p3206_p13, %p3200_p10 }
  0xce   : > { %3210 = shalt.err (!%p3207_p1)
}
  0xcf   : > { %s4831_s2 = smov 4   ;;  %s4832_s12 = smov 64  }
  0xd0   : > { %2820 = dma.hbm_to_vmem [thread:$0]  (!%p4009_p0), %s4001_s10, 256, %s4003_s19, %s4017_s30, %s4832_s12, %s4832_s12, %s4831_s2  }
  0xd1   : > { %s4833_s8 = sld [smem:[#allocation62_spill]] }
  0xd7   : > { %s3211_s9 = scalar_lea.hbm %s4833_s8, 16 }
  0xd8   : > { %p3212_p6 = scmp.ne.s32.totalorder %s4833_s8, %s3211_s9  ;;  %p3218_p10 = scmp.lt.u32.totalorder %s3211_s9, %s4833_s8 }
  0xda   : > { %p3214_p2 = pnand %p3212_p6, %p3852_p8 }
  0xdc   : > { %p3215_p5 = pneg %p3214_p2 }
  0xde   : > { %p3220_p12 = pnand %p3218_p10, %p3215_p5 }
  0xe0   : > { %3223 = shalt.err (!%p3220_p12)
}
  0xe1   : > { %s3224_s3 = scalar_lea.vmem %s415_s11, 16  ;;  %s3231_s10 = scalar_lea.vmem %s415_s11, 32 }
  0xe2   : > { %p3225_p0 = scmp.ne.s32.totalorder %s415_s11, %s3224_s3  ;;  %p3232_p4 = scmp.lt.s32.totalorder %s415_s11, %s415_s11 }
  0xe3   : > { %p3233_p9 = scmp.lt.s32.totalorder %s3231_s10, %s3224_s3 }
  0xe4   : > { %p3227_p7 = pnand %p3225_p0, %p3852_p8 }
  0xe5   : > { %p3234_p3 = por %p3233_p9, %p3232_p4 }
  0xe6   : > { %p3228_p11 = pneg %p3227_p7 }
  0xe8   : > { %p3235_p13 = pnand %p3234_p3, %p3228_p11 }
  0xea   : > { %3238 = shalt.err (!%p3235_p13)
}
  0xeb   : > { %p4834_p1 = scmp.ne.s32.totalorder %s4812_s1, 0  ;;  %s3633_s5 = smov [#allocation22]  }
  0xec   : > { %s435_s9 = sshll.u32 %s3633_s5, 4  ;;  %s3634_s7 = smov [#allocation25]   ;;  %s436_s9 = int_to_ptr.vmem [resolvable:$true] %s435_s9 }
  0xed   : > { %2798 = dma.hbm_to_vmem [thread:$0]  (!%p4834_p1), %s4833_s8, 16, %s415_s11, [#allocation18]  }
  0xee   : > { %s459_s6 = sshll.u32 %s3634_s7, 4  ;;  %s4835_s26 = sld [smem:[#allocation64_spill]]  ;;  %s460_s6 = int_to_ptr.vmem [resolvable:$true] %s459_s6 }
  0xf4   : > { %s4836_s4 = smov %s4835_s26  ;;  %s3239_s29 = scalar_lea.hbm %s4835_s26, 256 }
  0xf5   : > { %p3240_p6 = scmp.ne.s32.totalorder %s4836_s4, %s3239_s29  ;;  %p3246_p10 = scmp.lt.u32.totalorder %s3239_s29, %s4836_s4 }
  0xf7   : > { %p3242_p2 = pnand %p3240_p6, %p3852_p8 }
  0xf9   : > { %p3243_p5 = pneg %p3242_p2 }
  0xfb   : > { %p3248_p12 = pnand %p3246_p10, %p3243_p5 }
  0xfd   : > { %3251 = shalt.err (!%p3248_p12)
}
  0xfe   : > { %s3252_s11 = scalar_lea.vmem %s436_s9, 256  ;;  %p3260_p4 = scmp.lt.s32.totalorder %s436_s9, %s436_s9 }
  0xff   : > { %p3253_p0 = scmp.ne.s32.totalorder %s436_s9, %s3252_s11  ;;  %p3261_p9 = scmp.lt.s32.totalorder %s3252_s11, %s3252_s11 }
 0x101   : > { %p3255_p7 = pnand %p3253_p0, %p3852_p8  ;;  %p3262_p3 = por %p3261_p9, %p3260_p4 }
 0x103   : > { %p3256_p11 = pneg %p3255_p7 }
 0x105   : > { %p3263_p13 = pnand %p3262_p3, %p3256_p11 }
 0x107   : > { %3266 = shalt.err (!%p3263_p13)
}
 0x108   : > { %2804 = dma.hbm_to_vmem [thread:$0]  (!%p4834_p1), %s4836_s4, 256, %s436_s9, [#allocation21], %s4832_s12, %s4832_s12, %s4831_s2  }
 0x109   : > { %s4837_s5 = sld [smem:[#allocation66_spill]] }
 0x10f   : > { %s3267_s7 = scalar_lea.hbm %s4837_s5, 1024 }
 0x110   : > { %p3268_p6 = scmp.ne.s32.totalorder %s4837_s5, %s3267_s7  ;;  %p3274_p10 = scmp.lt.u32.totalorder %s3267_s7, %s4837_s5 }
 0x112   : > { %p3270_p2 = pnand %p3268_p6, %p3852_p8 }
 0x114   : > { %p3271_p5 = pneg %p3270_p2 }
 0x116   : > { %p3276_p12 = pnand %p3274_p10, %p3271_p5 }
 0x118   : > { %3279 = shalt.err (!%p3276_p12)
}
 0x119   : > { %s3280_s19 = scalar_lea.vmem %s460_s6, 1024  ;;  %p3288_p4 = scmp.lt.s32.totalorder %s460_s6, %s460_s6 }
 0x11a   : > { %p3281_p0 = scmp.ne.s32.totalorder %s460_s6, %s3280_s19  ;;  %p3289_p9 = scmp.lt.s32.totalorder %s3280_s19, %s3280_s19 }
 0x11c   : > { %p3283_p7 = pnand %p3281_p0, %p3852_p8  ;;  %p3290_p3 = por %p3289_p9, %p3288_p4 }
 0x11e   : > { %p3284_p11 = pneg %p3283_p7 }
 0x120   : > { %p3291_p13 = pnand %p3290_p3, %p3284_p11 }
 0x122   : > { %3294 = shalt.err (!%p3291_p13)
}
 0x123   : > { %2810 = dma.hbm_to_vmem [thread:$0]  (!%p4834_p1), %s4837_s5, 1024, %s460_s6, [#allocation24], %s4832_s12, %s4832_s12, %s4831_s2  }
 0x124   : > { %s3635_s0 = smov [#allocation26]   ;;  %s4838_s7 = sld [smem:[#allocation67_spill]] }
 0x125   : > { %s473_s26 = sshll.u32 %s3635_s0, 4  ;;  %s474_s26 = int_to_ptr.vmem [resolvable:$true] %s473_s26 }
 0x12a   : > { %s3295_s27 = scalar_lea.hbm %s4838_s7, 16 }
 0x12b   : > { %p3296_p6 = scmp.ne.s32.totalorder %s4838_s7, %s3295_s27  ;;  %p3302_p10 = scmp.lt.u32.totalorder %s3295_s27, %s4838_s7 }
 0x12d   : > { %p3298_p2 = pnand %p3296_p6, %p3852_p8 }
 0x12f   : > { %p3299_p5 = pneg %p3298_p2 }
 0x131   : > { %p3304_p12 = pnand %p3302_p10, %p3299_p5 }
 0x133   : > { %3307 = shalt.err (!%p3304_p12)
}
 0x134   : > { %s3308_s6 = scalar_lea.vmem %s474_s26, 16  ;;  %s3315_s9 = scalar_lea.vmem %s474_s26, 32 }
 0x135   : > { %p3309_p0 = scmp.ne.s32.totalorder %s474_s26, %s3308_s6  ;;  %p3316_p4 = scmp.lt.s32.totalorder %s474_s26, %s474_s26 }
 0x136   : > { %p3317_p9 = scmp.lt.s32.totalorder %s3315_s9, %s3308_s6 }
 0x137   : > { %p3311_p7 = pnand %p3309_p0, %p3852_p8 }
 0x138   : > { %p3318_p3 = por %p3317_p9, %p3316_p4 }
 0x139   : > { %p3312_p11 = pneg %p3311_p7 }
 0x13b   : > { %p3319_p13 = pnand %p3318_p3, %p3312_p11 }
 0x13d   : > { %3322 = shalt.err (!%p3319_p13)
}
 0x13e   : > { %s4839_s29 = sld [smem:[#allocation49_spill]]  ;;  %s4840_s13 = sld [smem:[#allocation48_spill]] }
 0x13f   : > { %s4841_s28 = sld [smem:[#allocation47_spill]]  ;;  %p4842_p6 = scmp.ne.s32.totalorder %s4824_s22, 0 }
 0x140   : > { %2813 = dma.hbm_to_vmem [thread:$0]  (!%p4834_p1), %s4838_s7, 16, %s474_s26, [#allocation27]  }
 0x141   : > { %p4843_p2 = scmp.eq.s32.totalorder %s3623_s16, 0  ;;  %s493_s3 = sadd.s32 %s3619_s15, %s3940_s21 }
 0x142   : > { %p4844_p12 = scmp.eq.s32.totalorder %s3820_s14, 0  ;;  %s2480_s6 = sshll.u32 %s493_s3, 7 }
 0x143   : > { %s4846_s26 = sld [smem:[#allocation56_spill]]  ;;  %p4848_p1 = scmp.lt.s32.totalorder %s3623_s16, 2 }
 0x144   : > { %s65_s27 = sadd.s32 1, %s4839_s29  ;;  %p72_p8 = scmp.ne.s32.totalorder %s4839_s29, %s4840_s13 }
 0x145   : > { %s4133_s1 = scalar_select %p4842_p6, %s4839_s29, %s65_s27  }
 0x146   : > { %p74_p5 = por %p4843_p2, %p72_p8  ;;  %p78_p10 = scmp.ne.s32.totalorder %s4840_s13, %s4841_s28 }
 0x147   : > { %s484_s20 = sand.u32 1, %s4839_s29  }
 0x148   : > { %p4144_p0 = por %p4844_p12, %p78_p10  ;;  %s2479_s19 = sshll.u32 %s484_s20, 3 }
 0x149   : > { %s4847_s4 = smov %s4846_s26  ;;  %s4151_s0 = scalar_lea.hbm %s4846_s26, %s2480_s6 }
 0x14a   : > { %s4845_s10 = scalar_select %p4144_p0, 1, 0 }
 0x14b   : > { %s488_s27 = scalar_lea.vmem [#allocation8], %s2479_s19  ;;  %p4155_p7 = pnand %p4848_p1, %p74_p5 }
 0x14c   : > { %s497_s13 = sshll.u32 %s488_s27, 4  ;;  %s485_s29 = scalar_lea.sflag [#allocation9], %s484_s20  ;;  %s4159_s13 = int_to_ptr.vmem [resolvable:$true] %s497_s13 }
 0x14d   : > { %s3323_s28 = scalar_lea.hbm %s4151_s0, 128  ;;  %p3325_p4 = pneg %p4155_p7 }
 0x14e   : > { %p3324_p11 = scmp.ne.s32.totalorder %s4151_s0, %s3323_s28  ;;  %s3328_s6 = scalar_lea.hbm %s4847_s4, 256 }
 0x14f   : > { %p3329_p13 = scmp.lt.u32.totalorder %s4151_s0, %s4847_s4  ;;  %p3330_p8 = scmp.lt.u32.totalorder %s3328_s6, %s3323_s28 }
 0x150   : > { %p3326_p9 = pnand %p3325_p4, %p3324_p11  ;;  %p3332_p5 = scmp.lt.u32.totalorder %s3323_s28, %s4151_s0 }
 0x151   : > { %p3331_p2 = por %p3330_p8, %p3329_p13 }
 0x152   : > { %p3327_p3 = pneg %p3326_p9 }
 0x153   : > { %p3333_p10 = por %p3332_p5, %p3331_p2 }
 0x155   : > { %p3334_p12 = pnand %p3333_p10, %p3327_p3 }
 0x157   : > { %3337 = shalt.err (!%p3334_p12)
}
 0x158   : > { %s3338_s20 = scalar_lea.vmem %s4159_s13, 128  ;;  %s3636_s26 = smov [#allocation8]  }
 0x159   : > { %p3339_p1 = scmp.ne.s32.totalorder %s4159_s13, %s3338_s20  ;;  %s3343_s27 = sshll.u32 %s3636_s26, 4  ;;  %s3344_s27 = int_to_ptr.vmem [resolvable:$false] %s3343_s27 }
 0x15a   : > { %s3345_s3 = scalar_lea.vmem %s3344_s27, 256  ;;  %p3346_p0 = scmp.lt.s32.totalorder %s4159_s13, %s3344_s27 }
 0x15b   : > { %p3341_p11 = pnand %p3339_p1, %p3325_p4  ;;  %p3347_p13 = scmp.lt.s32.totalorder %s3345_s3, %s3338_s20 }
 0x15d   : > { %p3342_p9 = pneg %p3341_p11  ;;  %p3348_p8 = por %p3347_p13, %p3346_p0 }
 0x15f   : > { %p3349_p2 = pnand %p3348_p8, %p3342_p9 }
 0x161   : > { %3352 = shalt.err (!%p3349_p2)
}
 0x162   : > { %s4850_s28 = sld [smem:[#allocation45_spill]]  ;;  %s4851_s19 = sld [smem:[#allocation44_spill]] }
 0x163   : > { %s4852_s6 = sld [smem:[#allocation43_spill]]  ;;  %s118_s9 = sld [smem:[#allocation7]] }
 0x164   : > { %2817 = dma.hbm_to_vmem [thread:$0]  (!%p4155_p7), %s4151_s0, 128, %s4159_s13, %s485_s29  }
 0x165   : > { %p4853_p3 = scmp.eq.s32.totalorder %s3623_s16, 0  ;;  %p4854_p10 = scmp.eq.s32.totalorder %s3820_s14, 0 }
 0x166   : > { %p4856_p1 = scmp.lt.s32.totalorder %s3623_s16, 2  ;;  %s4858_s3 = sshll.u32 %s3619_s15, 2 }
 0x168   : > { %s125_s11 = sadd.s32 1, %s4850_s28  ;;  %p132_p0 = scmp.ne.s32.totalorder %s4850_s28, %s4851_s19 }
 0x169   : > { %p138_p4 = scmp.ne.s32.totalorder %s4851_s19, %s4852_s6  ;;  %s529_s21 = sand.u32 1, %s4850_s28  }
 0x16a   : > { %p134_p5 = por %p132_p0, %p4853_p3  ;;  %s2484_s26 = sshll.u32 %s529_s21, 4 }
 0x16b   : > { %p4196_p12 = por %p138_p4, %p4854_p10  ;;  %s4208_s0 = sadd.s32 %s4858_s3, %s118_s9 }
 0x16c   : > { %p4202_p11 = pnand %p4856_p1, %p134_p5  ;;  %s4781_s13 = sshll.u32 %s4208_s0, 6 }
 0x16d   : > { %s4855_s20 = scalar_select %p4196_p12, 1, 0 }
 0x16e   : > { %s4859_s6 = sld [smem:[#allocation58_spill]]  ;;  %s531_s21 = scalar_lea.vmem [#allocation13], %s2484_s26 }
 0x16f   : > { %s540_s5 = sshll.u32 %s531_s21, 4  ;;  %s4923_s28 = smov (!%p4842_p6, %s4850_s28), %s125_s11  ;;  %s4223_s5 = int_to_ptr.vmem [resolvable:$true] %s540_s5 }
 0x170   : > { %p3355_p9 = pneg %p4202_p11 }
 0x174   : > { %s4216_s4 = scalar_lea.hbm %s4859_s6, %s4781_s13  ;;  %s3358_s19 = scalar_lea.hbm %s4859_s6, 512 }
 0x175   : > { %s3353_s9 = scalar_lea.hbm %s4216_s4, 256  ;;  %p3359_p2 = scmp.lt.u32.totalorder %s4216_s4, %s4859_s6 }
 0x176   : > { %p3354_p7 = scmp.ne.s32.totalorder %s4216_s4, %s3353_s9  ;;  %p3360_p0 = scmp.lt.u32.totalorder %s3358_s19, %s3353_s9 }
 0x177   : > { %p3362_p3 = scmp.lt.u32.totalorder %s3353_s9, %s4216_s4 }
 0x178   : > { %p3356_p13 = pnand %p3355_p9, %p3354_p7  ;;  %p3361_p4 = por %p3360_p0, %p3359_p2 }
 0x17a   : > { %p3357_p8 = pneg %p3356_p13  ;;  %p3363_p5 = por %p3362_p3, %p3361_p4 }
 0x17c   : > { %p3364_p10 = pnand %p3363_p5, %p3357_p8 }
 0x17e   : > { %3367 = shalt.err (!%p3364_p10)
}
 0x17f   : > { %s3368_s11 = scalar_lea.vmem %s4223_s5, 256  ;;  %s3637_s21 = smov [#allocation13]  }
 0x180   : > { %p3369_p1 = scmp.ne.s32.totalorder %s4223_s5, %s3368_s11  ;;  %s3373_s3 = sshll.u32 %s3637_s21, 4  ;;  %s3374_s3 = int_to_ptr.vmem [resolvable:$false] %s3373_s3 }
 0x181   : > { %s3375_s13 = scalar_lea.vmem %s3374_s3, 512  ;;  %p3376_p12 = scmp.lt.s32.totalorder %s4223_s5, %s3374_s3 }
 0x182   : > { %p3371_p7 = pnand %p3369_p1, %p3355_p9  ;;  %p3377_p2 = scmp.lt.s32.totalorder %s3375_s13, %s3368_s11 }
 0x184   : > { %p3372_p13 = pneg %p3371_p7  ;;  %p3378_p0 = por %p3377_p2, %p3376_p12 }
 0x186   : > { %p3379_p4 = pnand %p3378_p0, %p3372_p13 }
 0x188   : > { %3382 = shalt.err (!%p3379_p4)
}
 0x189   : > { %s4860_s9 = sld [smem:[#allocation42_spill]]  ;;  %s4861_s29 = sld [smem:[#allocation41_spill]] }
 0x18a   : > { %s4862_s19 = sld [smem:[#allocation40_spill]]  ;;  %p4863_p8 = scmp.eq.s32.totalorder %s3623_s16, 0 }
 0x18b   : > { %2823 = dma.hbm_to_vmem [thread:$0]  (!%p4202_p11), %s4216_s4, 256, %s4223_s5, %s4017_s30, %s4832_s12, %s4832_s12, %s4831_s2  }
 0x18c   : > { %p4864_p5 = scmp.eq.s32.totalorder %s3820_s14, 0  ;;  %s4866_s13 = sshll.u32 %s4208_s0, 6 }
 0x18d   : > { %s4867_s8 = sld [smem:[#allocation59_spill]]  ;;  %p4868_p11 = scmp.lt.s32.totalorder %s3623_s16, 2 }
 0x18e   : > { %s4870_s0 = sand.u32 1, %s3623_s16  }
 0x18f   : > { %s155_s27 = sadd.s32 1, %s4860_s9  ;;  %p162_p12 = scmp.ne.s32.totalorder %s4860_s9, %s4861_s29 }
 0x190   : > { %s4258_s26 = scalar_select %p4842_p6, %s4860_s9, %s155_s27  }
 0x191   : > { %p168_p9 = scmp.ne.s32.totalorder %s4861_s29, %s4862_s19  ;;  %s552_s11 = sand.u32 1, %s4860_s9  }
 0x192   : > { %p164_p3 = por %p162_p12, %p4863_p8  ;;  %s2487_s3 = sshll.u32 %s552_s11, 4 }
 0x193   : > { %p4269_p10 = por %p168_p9, %p4864_p5  ;;  %s4278_s4 = scalar_lea.hbm %s4867_s8, %s4866_s13 }
 0x194   : > { %p4282_p6 = pnand %p4868_p11, %p164_p3  ;;  %s554_s30 = scalar_lea.vmem [#allocation14], %s2487_s3 }
 0x195   : > { %s563_s5 = sshll.u32 %s554_s30, 4  ;;  %s4290_s9 = scalar_lea.sflag [#allocation15], %s4870_s0  ;;  %s4286_s5 = int_to_ptr.vmem [resolvable:$true] %s563_s5 }
 0x196   : > { %s3383_s7 = scalar_lea.hbm %s4278_s4, 256  ;;  %p3385_p7 = pneg %p4282_p6 }
 0x197   : > { %p3384_p1 = scmp.ne.s32.totalorder %s4278_s4, %s3383_s7  ;;  %s3388_s19 = scalar_lea.hbm %s4867_s8, 512 }
 0x198   : > { %p3389_p0 = scmp.lt.u32.totalorder %s4278_s4, %s4867_s8  ;;  %p3390_p4 = scmp.lt.u32.totalorder %s3388_s19, %s3383_s7 }
 0x199   : > { %p3386_p13 = pnand %p3385_p7, %p3384_p1  ;;  %p3392_p9 = scmp.lt.u32.totalorder %s3383_s7, %s4278_s4 }
 0x19a   : > { %p3391_p12 = por %p3390_p4, %p3389_p0 }
 0x19b   : > { %p3387_p2 = pneg %p3386_p13 }
 0x19c   : > { %p3393_p8 = por %p3392_p9, %p3391_p12 }
 0x19e   : > { %p3394_p3 = pnand %p3393_p8, %p3387_p2 }
 0x1a0   : > { %3397 = shalt.err (!%p3394_p3)
}
 0x1a1   : > { %s3398_s3 = scalar_lea.vmem %s4286_s5, 256  ;;  %s3638_s13 = smov [#allocation14]  }
 0x1a2   : > { %p3399_p5 = scmp.ne.s32.totalorder %s4286_s5, %s3398_s3  ;;  %s3403_s30 = sshll.u32 %s3638_s13, 4  ;;  %s3404_s30 = int_to_ptr.vmem [resolvable:$false] %s3403_s30 }
 0x1a3   : > { %s3405_s0 = scalar_lea.vmem %s3404_s30, 512  ;;  %p3406_p13 = scmp.lt.s32.totalorder %s4286_s5, %s3404_s30 }
 0x1a4   : > { %p3401_p11 = pnand %p3399_p5, %p3385_p7  ;;  %p3407_p0 = scmp.lt.s32.totalorder %s3405_s0, %s3398_s3 }
 0x1a6   : > { %p3402_p1 = pneg %p3401_p11  ;;  %p3408_p4 = por %p3407_p0, %p3406_p13 }
 0x1a8   : > { %p3409_p12 = pnand %p3408_p4, %p3402_p1 }
 0x1aa   : > { %3412 = shalt.err (!%p3409_p12)
}
 0x1ab   : > { %2826 = dma.hbm_to_vmem [thread:$0]  (!%p4282_p6), %s4278_s4, 256, %s4286_s5, %s4290_s9, %s4832_s12, %s4832_s12, %s4831_s2  }
 0x1ac   : > { %s4871_s7 = sld [smem:[#allocation51_spill]] }
 0x1b2   : > { %p4872_p7 = scmp.ne.s32.totalorder %s4871_s7, 0 }
 0x1b3   : > { %s4873_s6 = sld [smem:[#allocation48_spill]] (!%p4872_p7)  ;;  %p4874_p2 = scmp.ne.s32.totalorder (!%p4872_p7), %s4845_s10, 0 }
 0x1b4   : > { %575 = sbr.rel (%p4872_p7) target bundleno = 3076 (0xc04), region = 68 }
 0x1b9   : > { %s577_s29 = sand.u32 (!%p4872_p7), 1, %s4873_s6  }
 0x1ba   : > { %s4324_s19 = sshll.u32 (!%p4872_p7), %s577_s29, 3  ;;  %s578_s27 = scalar_lea.sflag (!%p4872_p7), [#allocation9], %s577_s29 }
 0x1bb   : > { %s581_s11 = scalar_lea.vmem [#allocation8], %s4324_s19 }
 0x1bc   : > { %3514 = dma.done.wait (%p4874_p2), %s578_s27, 128  }
 0x1bd   : > { %3516 = vsyncadd (%p4874_p2), %s578_s27, 4294967168  ;;  %s4875_s22 = sld [smem:[#allocation53_spill]]  ;;  %s586_s2 = sand.u32 1, %s3820_s14  }
 0x1be   : > { %s588_s12 = sand.u32 1, %s3595_s25   ;;  %s587_s5 = scalar_lea.sflag [#allocation12], %s586_s2 }
 0x1bf   : > { %s2492_s4 = sshll.u32 %s588_s12, 4 }
 0x1c0   : > { %s4333_s9 = scalar_lea.vmem [#allocation11], %s2492_s4 }
 0x1c3   : > { %p4876_p6 = scmp.ne.s32.totalorder %s4875_s22, 0 }
 0x1c5   : > { %3518 = dma.done.wait (%p4876_p6), %s587_s5, 256  }
 0x1c6   : > { %3520 = vsyncadd (%p4876_p6), %s587_s5, 4294967040  ;;  %s4877_s3 = sld [smem:[#allocation44_spill]]  ;;  %p4878_p9 = scmp.ne.s32.totalorder %s4855_s20, 0 }
 0x1cc   : > { %s597_s13 = sand.u32 1, %s4877_s3  }
 0x1cd   : > { %s2493_s30 = sshll.u32 %s597_s13, 4 }
 0x1ce   : > { %s4340_s10 = scalar_lea.vmem [#allocation13], %s2493_s30 }
 0x1cf   : > { %3522 = dma.done.wait (%p4878_p9), %s587_s5, 256  }
 0x1d0   : > { %3524 = vsyncadd (%p4878_p9), %s587_s5, 4294967040  ;;  %s4879_s0 = sld [smem:[#allocation41_spill]]  ;;  %s605_s29 = scalar_lea.sflag [#allocation15], %s586_s2 }
 0x1d6   : > { %s606_s7 = sand.u32 1, %s4879_s0  }
 0x1d7   : > { %s2494_s6 = sshll.u32 %s606_s7, 4 }
 0x1d8   : > { %s4347_s27 = scalar_lea.vmem [#allocation14], %s2494_s6 }
 0x1d9   : > { %3526 = dma.done.wait (%p4269_p10), %s605_s29, 256  }
 0x1da   : > { %3528 = vsyncadd (%p4269_p10), %s605_s29, 4294967040  ;;  %p4880_p8 = scmp.eq.s32.totalorder %s3820_s14, 0 }
 0x1dc   : > { %3530 = dma.done.wait (%p4880_p8), [#allocation15], 256   ;;  %p4881_p3 = pmov %p4880_p8 }
 0x1de   : > { %3532 = vsyncadd (%p4881_p3), [#allocation15], 4294967040  ;;  %p4882_p5 = pmov %p4881_p3 }
 0x1df   : > { %p4883_p11 = pmov %p4881_p3 }
 0x1e0   : > { %3534 = dma.done.wait (%p4882_p5), [#allocation18], 32  }
 0x1e1   : > { %3536 = vsyncadd (%p4883_p11), [#allocation18], 4294967264  ;;  %p4884_p1 = pmov %p4881_p3 }
 0x1e3   : > { %3538 = dma.done.wait (%p4884_p1), [#allocation21], 272   ;;  %p4885_p13 = pmov %p4884_p1 }
 0x1e4   : > { %p4886_p10 = pmov %p4884_p1 }
 0x1e5   : > { %3540 = vsyncadd (%p4885_p13), [#allocation21], 4294967024 }
 0x1e6   : > { %3542 = dma.done.wait (%p4886_p10), [#allocation24], 1040   ;;  %p4887_p0 = pmov %p4884_p1 }
 0x1e8   : > { %3544 = vsyncadd (%p4887_p0), [#allocation24], 4294966256  ;;  %p4888_p4 = pmov %p4887_p0 }
 0x1e9   : > { %p4889_p12 = pmov %p4887_p0 }
 0x1ea   : > { %3546 = dma.done.wait (%p4888_p4), [#allocation27], 16  }
 0x1eb   : > { %3548 = vsyncadd (%p4889_p12), [#allocation27], 4294967280  ;;  %s693_s20 = sand.u32 1, %s3559_s18   ;;  %s4374_s21 = sld [smem:[#allocation6]] }
 0x1ec   : > { %s4376_s22 = sld [smem:[#allocation7]]  ;;  %s4380_s2 = sshll.u32 %s693_s20, 3 }
 0x1ed   : > { %s695_s12 = scalar_lea.vmem [#allocation28], %s4380_s2 }
 0x1f2   : > { %p2504_p7 = scmp.ne.s32.totalorder %s4376_s22, 0 }
 0x1f3   : > { %vm708_vm0 = vcmask (!%p2504_p7), 7168   ;;  %vm717_vm1 = vcmask (!%p2504_p7), 64512   ;;  %v3639_v0 = vmov (!%p2504_p7), -1e+30   ;;  %v3640_v1 = vmov (!%p2504_p7), 0.0  }
 0x1f4   : > { %707 = sbr.rel (%p2504_p7) target bundleno = 507 (0x1fb), region = 120  ;;  %709 = vst.msk [vmem:[#allocation2] sm:$0xff] (!%p2504_p7), %vm708_vm0, %v3639_v0  ;;  %710 = vst.msk [vmem:[#allocation2 + $0x8] sm:$0xff] (!%p2504_p7), %vm708_vm0, %v3639_v0 }
 0x1f5   : > { %711 = vst.msk [vmem:[#allocation2 + $0x10] sm:$0xff] (!%p2504_p7), %vm708_vm0, %v3639_v0  ;;  %712 = vst.msk [vmem:[#allocation2 + $0x18] sm:$0xff] (!%p2504_p7), %vm708_vm0, %v3639_v0 }
 0x1f6   : > { %713 = vst.msk [vmem:[#allocation3] sm:$0xff] (!%p2504_p7), %vm708_vm0, %v3640_v1  ;;  %714 = vst.msk [vmem:[#allocation3 + $0x8] sm:$0xff] (!%p2504_p7), %vm708_vm0, %v3640_v1 }
 0x1f7   : > { %715 = vst.msk [vmem:[#allocation3 + $0x10] sm:$0xff] (!%p2504_p7), %vm708_vm0, %v3640_v1  ;;  %716 = vst.msk [vmem:[#allocation3 + $0x18] sm:$0xff] (!%p2504_p7), %vm708_vm0, %v3640_v1 }
 0x1f8   : > { %718 = vst.msk [vmem:[#allocation4] sm:$0xff] (!%p2504_p7), %vm717_vm1, %v3640_v1  ;;  %719 = vst.msk [vmem:[#allocation4 + $0x8] sm:$0xff] (!%p2504_p7), %vm717_vm1, %v3640_v1 }
 0x1f9   : > { %720 = vst.msk [vmem:[#allocation4 + $0x10] sm:$0xff] (!%p2504_p7), %vm717_vm1, %v3640_v1  ;;  %721 = vst.msk [vmem:[#allocation4 + $0x18] sm:$0xff] (!%p2504_p7), %vm717_vm1, %v3640_v1 }
 0x1fb PF: > { %p2505_p2 = scmp.ge.s32.totalorder %s4376_s22, %s4374_s21 }
 0x1fc   : > { %v730_v2 = vld [vmem:[%s4340_s10] sm:$0xf] (!%p2505_p2)  ;;  %vm742_vm2 = vcmask (!%p2505_p2), 1043456   ;;  %v3641_v3 = vmov (!%p2505_p2), 0.0   ;;  %v731_v5 = vld [vmem:[%s4340_s10 + $0x4] sm:$0xf] (!%p2505_p2) }
 0x1fd   : > { %725 = sbr.rel (%p2505_p2) target bundleno = 1242 (0x4da), region = 124  ;;  %2599 = vmatprep.subr.bf16.mxu0 (!%p2505_p2), %v3641_v3  ;;  %v744_v4 = vsel (!%p2505_p2), %vm742_vm2, %v730_v2, 0  ;;  %2605 = vmatprep.subr.bf16.mxu1 (!%p2505_p2), %v3641_v3  ;;  %vm3642_vm3 = vmmov (!%p2505_p2), 0   ;;  %v790_v6 = vsel (!%p2505_p2), %vm742_vm2, %v731_v5, 0  ;;  %v726_v7 = vld [vmem:[%s4333_s9] sm:$0xf] (!%p2505_p2) }
 0x1fe   : > { %2600 = vmatpush3.bf16.msra.mxu0 (!%p2505_p2), %v744_v4  ;;  %2601 = vmatprep.mubr.msk.bf16.mxu0 (!%p2505_p2), %vm3642_vm3, %v3641_v3  ;;  %vm738_vm4 = vcmask (!%p2505_p2), 64512   ;;  %v732_v8 = vld [vmem:[%s4340_s10 + $0x8] sm:$0xf] (!%p2505_p2)  ;;  %v727_v10 = vld [vmem:[%s4333_s9 + $0x4] sm:$0xf] (!%p2505_p2)  ;;  %v3643_v35 = vmov (!%p2505_p2), 0  }
 0x1ff   : > { %2606 = vmatpush3.bf16.msra.mxu1 (!%p2505_p2), %v790_v6  ;;  %2611 = vmatprep.subr.bf16.mxu0 (!%p2505_p2), %v3641_v3  ;;  %v836_v9 = vsel (!%p2505_p2), %vm742_vm2, %v732_v8, 0  ;;  %v733_v11 = vld [vmem:[%s4340_s10 + $0xc] sm:$0xf] (!%p2505_p2)  ;;  %v728_v13 = vld [vmem:[%s4333_s9 + $0x8] sm:$0xf] (!%p2505_p2)  ;;  %v924_v36 = vld [vmem:[#allocation2] sm:$0xff] (!%p2505_p2) }
 0x200   : > { %2607 = vmatprep.mubr.msk.bf16.mxu1 (!%p2505_p2), %vm3642_vm3, %v3641_v3  ;;  %2617 = vmatprep.subr.bf16.mxu1 (!%p2505_p2), %v3641_v3  ;;  %v882_v12 = vsel (!%p2505_p2), %vm742_vm2, %v733_v11, 0  ;;  %v729_v14 = vld [vmem:[%s4333_s9 + $0xc] sm:$0xf] (!%p2505_p2)  ;;  %vm1012_vm5 = vcmask (!%p2505_p2), 7168   ;;  %v926_v44 = vld [vmem:[#allocation2 + $0x10] sm:$0xff] (!%p2505_p2) }
 0x201   : > { %2602 = vmatmul.mubr.msk.bf16.vlgmr.msra.gmra.mrb[0].mxu0 (!%p2505_p2), %vm738_vm4, %v726_v7  ;;  %3011 = vset.pattern.permute.xlu0 (!%p2505_p2), %v3643_v35  ;;  %v4433_v39 = vld [vmem:[#allocation2 + $0x8] sm:$0xff] (!%p2505_p2)  ;;  %v4444_v48 = vld [vmem:[#allocation2 + $0x18] sm:$0xff] (!%p2505_p2)  ;;  %v734_v53 = vld [vmem:[%s4347_s27] sm:$0xf] (!%p2505_p2) }
 0x202   : > { %2612 = vmatpush3.bf16.msra.mxu0 (!%p2505_p2), %v836_v9  ;;  %2608 = vmatmul.mubr.msk.bf16.vlgmr.msra.gmra.mrb[0].mxu1 (!%p2505_p2), %vm738_vm4, %v727_v10  ;;  %v1053_v54 = vsel (!%p2505_p2), %vm742_vm2, %v734_v53, 0  ;;  %v735_v56 = vld [vmem:[%s4347_s27 + $0x4] sm:$0xf] (!%p2505_p2)  ;;  %v736_v6 = vld [vmem:[%s4347_s27 + $0x8] sm:$0xf] (!%p2505_p2) }
 0x203   : > { %2618 = vmatpush3.bf16.msra.mxu1 (!%p2505_p2), %v882_v12  ;;  %2613 = vmatprep.mubr.msk.bf16.mxu0 (!%p2505_p2), %vm3642_vm3, %v3641_v3  ;;  %v1099_v57 = vsel (!%p2505_p2), %vm742_vm2, %v735_v56, 0  ;;  %v1145_v11 = vsel (!%p2505_p2), %vm742_vm2, %v736_v6, 0  ;;  %v737_v12 = vld [vmem:[%s4347_s27 + $0xc] sm:$0xf] (!%p2505_p2)  ;;  %v1019_v56 = vld [vmem:[#allocation4 + $0x10] sm:$0xff] (!%p2505_p2) }
 0x204   : > { %2619 = vmatprep.mubr.msk.bf16.mxu1 %vm3642_vm3, %v3641_v3  ;;  %2623 = vmatprep.subr.bf16.mxu0 %v3641_v3 }
 0x205   : > { %2629 = vmatprep.subr.bf16.mxu1 %v3641_v3  ;;  %3012 = vset.pattern.permute.xlu1 %v3643_v35 }
 0x209   : > { %2614 = vmatmul.mubr.msk.bf16.vlgmr.msra.gmra.mrb[4].mxu0 %vm738_vm4, %v728_v13 }
 0x20a   : > { %2620 = vmatmul.mubr.msk.bf16.vlgmr.msra.gmra.mrb[4].mxu1 %vm738_vm4, %v729_v14  ;;  %2625 = vmatprep.mubr.msk.bf16.mxu0 %vm3642_vm3, %v3641_v3 }
 0x20b   : > { %2631 = vmatprep.mubr.msk.bf16.mxu1 %vm3642_vm3, %v3641_v3  ;;  %2624 = vmatpush3.bf16.msra.mxu0 %v1053_v54 }
 0x20c   : > { %2635 = vmatprep.subr.bf16.mxu0 %v3641_v3  ;;  %2630 = vmatpush3.bf16.msra.mxu1 %v1099_v57 }
 0x20d   : > { %2641 = vmatprep.subr.bf16.mxu1 %v3641_v3 }
 0x2d4   : > { %v4420_v15 = vpop.f32.mrb[0].mxu0 }
 0x2d5   : > { %v2603_v16 = vpop.f32.mrb[1].mxu0  ;;  %v4422_v17 = vpop.f32.mrb[0].mxu1  ;;  %v928_v18 = vsel %vm738_vm4, %v4420_v15, -inf }
 0x2d6   : > { %929 = vmax.xlane.f32.xlu0 %v928_v18  ;;  %v783_v19 = vpop.f32.mrb[2].mxu0  ;;  %v2609_v20 = vpop.f32.mrb[1].mxu1  ;;  %v931_v23 = vsel %vm738_vm4, %v4422_v17, -inf }
 0x2d7   : > { %v2604_v21 = vpop.f32.mrb[3].mxu0  ;;  %v829_v22 = vpop.f32.mrb[2].mxu1 }
 0x2d8   : > { %v2610_v24 = vpop.f32.mrb[3].mxu1 }
 0x2da   : > { %932 = vmax.xlane.f32.xlu0 %v931_v23 }
 0x2dc   : > { %v872_v25 = vpop.f32.mrb[4].mxu0 }
 0x2dd   : > { %v2615_v26 = vpop.f32.mrb[5].mxu0  ;;  %v4428_v27 = vpop.f32.mrb[4].mxu1  ;;  %v934_v28 = vsel %vm738_vm4, %v872_v25, -inf }
 0x2de   : > { %935 = vmax.xlane.f32.xlu1 %v934_v28  ;;  %v875_v29 = vpop.f32.mrb[6].mxu0  ;;  %v2621_v30 = vpop.f32.mrb[5].mxu1  ;;  %v937_v33 = vsel %vm738_vm4, %v4428_v27, -inf }
 0x2df   : > { %v2616_v31 = vpop.f32.mrb[7].mxu0  ;;  %v921_v32 = vpop.f32.mrb[6].mxu1  ;;  %v988_v29 = vld [vmem:[#allocation3] sm:$0xff] }
 0x2e0   : > { %v2622_v34 = vpop.f32.mrb[7].mxu1  ;;  %v989_v32 = vld [vmem:[#allocation3 + $0x8] sm:$0xff] }
 0x2e2   : > { %938 = vmax.xlane.f32.xlu1 %v937_v33 }
 0x363   : > { %v930_v37 = vpop.xlane.xlu0 %929 }
 0x364   : > { %v940_v38 = vmax.f32 %v924_v36, %v930_v37 }
 0x366   : > { %v944_v40 = vsub.f32 %v924_v36, %v940_v38  ;;  %1241 = vst.msk [vmem:[#allocation2] sm:$0xff] %vm1012_vm5, %v940_v38  ;;  %958 = vperm.xlu0 %3011, %v940_v38   ;;  %v990_v38 = vld [vmem:[#allocation3 + $0x10] sm:$0xff] }
 0x367   : > { %v933_v41 = vpop.xlane.xlu0 %932 }
 0x368   : > { %v948_v42 = vmul.f32 1.442695, %v944_v40  ;;  %v4437_v43 = vmax.f32 %v4433_v39, %v933_v41  ;;  %v991_v41 = vld [vmem:[#allocation3 + $0x18] sm:$0xff] }
 0x36a   : > { %3013 = vpow2.f32 %v948_v42  ;;  %v945_v45 = vsub.f32 %v4433_v39, %v4437_v43  ;;  %1242 = vst.msk [vmem:[#allocation2 + $0x8] sm:$0xff] %vm1012_vm5, %v4437_v43  ;;  %963 = vperm.xlu1 %3012, %v4437_v43  }
 0x36b   : > { %v936_v46 = vpop.xlane.xlu1 %935 }
 0x36c   : > { %v942_v47 = vmax.f32 %v926_v44, %v936_v46  ;;  %v950_v21 = vmul.f32 1.442695, %v945_v45  ;;  %v1017_v46 = vld [vmem:[#allocation4] sm:$0xff] }
 0x36e   : > { %v946_v49 = vsub.f32 %v926_v44, %v942_v47  ;;  %1243 = vst.msk [vmem:[#allocation2 + $0x10] sm:$0xff] %vm1012_vm5, %v942_v47  ;;  %968 = vperm.xlu1 %3012, %v942_v47  }
 0x36f   : > { %v939_v50 = vpop.xlane.xlu1 %938 }
 0x370   : > { %v4448_v51 = vmax.f32 %v4444_v48, %v939_v50  ;;  %v952_v14 = vmul.f32 1.442695, %v946_v49 }
 0x372   : > { %v947_v52 = vsub.f32 %v4444_v48, %v4448_v51  ;;  %1244 = vst.msk [vmem:[#allocation2 + $0x18] sm:$0xff] %vm1012_vm5, %v4448_v51  ;;  %973 = vperm.xlu1 %3012, %v4448_v51   ;;  %v1018_v48 = vld [vmem:[#allocation4 + $0x8] sm:$0xff] }
 0x374   : > { %v4457_v55 = vpop.eup %3013  ;;  %v954_v26 = vmul.f32 1.442695, %v947_v52 }
 0x375   : > { %v992_v30 = vmul.f32 %v4457_v55, %v988_v29 }
 0x376   : > { %1023 = vperm.xlu1 %3012, %v4457_v55  }
 0x3e5   : > { %v959_v58 = vpop.permute.xlu0 %958 }
 0x3e6   : > { %v976_v59 = vsub.f32 %v4420_v15, %v959_v58 }
 0x3e8   : > { %v980_v60 = vmul.f32 1.442695, %v976_v59 }
 0x3e9   : > { %v964_v61 = vpop.permute.xlu1 %963 }
 0x3ea   : > { %3015 = vpow2.f32 %v980_v60  ;;  %v977_v62 = vsub.f32 %v4422_v17, %v964_v61  ;;  %v1191_v17 = vsel %vm742_vm2, %v737_v12, 0 }
 0x3ec   : > { %v982_v63 = vmul.f32 1.442695, %v977_v62 }
 0x3ed   : > { %v969_v0 = vpop.permute.xlu1 %968 }
 0x3ee   : > { %3017 = vpow2.f32 %v982_v63  ;;  %v978_v1 = vsub.f32 %v872_v25, %v969_v0  ;;  %v1020_v63 = vld [vmem:[#allocation4 + $0x18] sm:$0xff] }
 0x3f0   : > { %v984_v2 = vmul.f32 1.442695, %v978_v1 }
 0x3f1   : > { %v974_v4 = vpop.permute.xlu1 %973 }
 0x3f2   : > { %3019 = vpow2.f32 %v984_v2  ;;  %v979_v5 = vsub.f32 %v4428_v27, %v974_v4 }
 0x3f4   : > { %v3016_v7 = vpop.eup %3015  ;;  %v986_v8 = vmul.f32 1.442695, %v979_v5 }
 0x3f5   : > { %v996_v9 = vsel %vm738_vm4, %v3016_v7, 0.0  ;;  %v1045_v10 = vpack.c.bf16 %v3016_v7, %v3016_v7  ;;  %v1024_v28 = vpop.permute.xlu1 %1023 }
 0x3f6   : > { %3021 = vpow2.f32 %v986_v8  ;;  %997 = vadd.xlane.f32.xlu1 %v996_v9  ;;  %v1041_v47 = vmul.f32 %v1024_v28, %v1017_v46 }
 0x3f7   : > { %2626 = vmatmul.mubr.msk.bf16.vlgmr.msra.gmra.mrb[8].mxu0 %vm738_vm4, %v1045_v10  ;;  %3023 = vpow2.f32 %v952_v14 }
 0x3f8   : > { %v3018_v13 = vpop.eup %3017  ;;  %2636 = vmatpush3.bf16.msra.mxu0 %v1145_v11  ;;  %2637 = vmatprep.mubr.msk.bf16.mxu0 %vm3642_vm3, %v3641_v3  ;;  %3025 = vpow2.f32 %v950_v21 }
 0x3f9   : > { %v999_v15 = vsel %vm738_vm4, %v3018_v13, 0.0  ;;  %v1046_v16 = vpack.c.bf16 %v3018_v13, %v3018_v13  ;;  %3027 = vpow2.f32 %v954_v26 }
 0x3fa   : > { %1000 = vadd.xlane.f32.xlu0 %v999_v15 }
 0x3fb   : > { %2632 = vmatmul.mubr.msk.bf16.vlgmr.msra.gmra.mrb[8].mxu1 %vm738_vm4, %v1046_v16 }
 0x3fc   : > { %v3020_v18 = vpop.eup %3019  ;;  %2642 = vmatpush3.bf16.msra.mxu1 %v1191_v17  ;;  %2643 = vmatprep.mubr.msk.bf16.mxu1 %vm3642_vm3, %v3641_v3 }
 0x3fd   : > { %v1047_v19 = vpack.c.bf16 %v3020_v18, %v3020_v18  ;;  %v1002_v25 = vsel %vm738_vm4, %v3020_v18, 0.0 }
 0x3ff   : > { %2638 = vmatmul.mubr.msk.bf16.vlgmr.msra.gmra.mrb[12].mxu0 %vm738_vm4, %v1047_v19 }
 0x400   : > { %v3022_v20 = vpop.eup %3021 }
 0x401   : > { %v1048_v22 = vpack.c.bf16 %v3022_v20, %v3022_v20  ;;  %v3024_v23 = vpop.eup %3023  ;;  %v1005_v3 = vsel %vm738_vm4, %v3022_v20, 0.0 }
 0x402   : > { %v3026_v24 = vpop.eup %3025  ;;  %v994_v39 = vmul.f32 %v3024_v23, %v990_v38 }
 0x403   : > { %2644 = vmatmul.mubr.msk.bf16.vlgmr.msra.gmra.mrb[12].mxu1 %vm738_vm4, %v1048_v22  ;;  %v3028_v27 = vpop.eup %3027  ;;  %v993_v34 = vmul.f32 %v3026_v24, %v989_v32 }
 0x404   : > { %v995_v43 = vmul.f32 %v3028_v27, %v991_v41 }
 0x407   : > { %1033 = vperm.xlu1 %3012, %v3024_v23  }
 0x410   : > { %1028 = vperm.xlu0 %3011, %v3026_v24  }
 0x42b   : > { %1003 = vadd.xlane.f32.xlu1 %v1002_v25 }
 0x42f   : > { %1006 = vadd.xlane.f32.xlu1 %v1005_v3 }
 0x440   : > { %1038 = vperm.xlu1 %3012, %v3028_v27  }
 0x483   : > { %v998_v31 = vpop.xlane.xlu1 %997 }
 0x484   : > { %v1008_v33 = vadd.f32 %v998_v31, %v992_v30 }
 0x486   : > { %1013 = vst.msk [vmem:[#allocation3] sm:$0xff] %vm1012_vm5, %v1008_v33 }
 0x487   : > { %v1001_v35 = vpop.xlane.xlu0 %1000  ;;  %v1034_v37 = vpop.permute.xlu1 %1033 }
 0x488   : > { %v1009_v36 = vadd.f32 %v1001_v35, %v993_v34  ;;  %v1043_v61 = vmul.f32 %v1034_v37, %v1019_v56 }
 0x48a   : > { %1014 = vst.msk [vmem:[#allocation3 + $0x8] sm:$0xff] %vm1012_vm5, %v1009_v36 }
 0x48f   : > { %v1029_v49 = vpop.permute.xlu0 %1028 }
 0x490   : > { %v1042_v54 = vmul.f32 %v1029_v49, %v1018_v48 }
 0x4b8   : > { %v1004_v40 = vpop.xlane.xlu1 %1003 }
 0x4b9   : > { %v1010_v42 = vadd.f32 %v1004_v40, %v994_v39 }
 0x4bb   : > { %1015 = vst.msk [vmem:[#allocation3 + $0x10] sm:$0xff] %vm1012_vm5, %v1010_v42 }
 0x4bc   : > { %v1007_v44 = vpop.xlane.xlu1 %1006 }
 0x4bd   : > { %v1011_v45 = vadd.f32 %v1007_v44, %v995_v43 }
 0x4bf   : > { %1016 = vst.msk [vmem:[#allocation3 + $0x18] sm:$0xff] %vm1012_vm5, %v1011_v45 }
 0x4c0   : > { %v1039_v0 = vpop.permute.xlu1 %1038 }
 0x4c1   : > { %v1044_v6 = vmul.f32 %v1039_v0, %v1020_v63 }
 0x4ca   : > { %v1089_v50 = vpop.f32.mrb[8].mxu0 }
 0x4cb   : > { %v1233_v51 = vadd.f32 %v1089_v50, %v1041_v47  ;;  %v2627_v52 = vpop.f32.mrb[9].mxu0 }
 0x4cc   : > { %v1092_v53 = vpop.f32.mrb[10].mxu0 }
 0x4cd   : > { %1237 = vst.msk [vmem:[#allocation4] sm:$0xff] %vm738_vm4, %v1233_v51  ;;  %v2628_v55 = vpop.f32.mrb[11].mxu0 }
 0x4ce   : > { %v1135_v57 = vpop.f32.mrb[8].mxu1 }
 0x4cf   : > { %v1234_v58 = vadd.f32 %v1135_v57, %v1042_v54  ;;  %v2633_v59 = vpop.f32.mrb[9].mxu1 }
 0x4d0   : > { %v1138_v60 = vpop.f32.mrb[10].mxu1 }
 0x4d1   : > { %1238 = vst.msk [vmem:[#allocation4 + $0x8] sm:$0xff] %vm738_vm4, %v1234_v58  ;;  %v2634_v62 = vpop.f32.mrb[11].mxu1 }
 0x4d2   : > { %v1181_v1 = vpop.f32.mrb[12].mxu0 }
 0x4d3   : > { %v1235_v2 = vadd.f32 %v1181_v1, %v1043_v61  ;;  %v2639_v4 = vpop.f32.mrb[13].mxu0 }
 0x4d4   : > { %v1184_v5 = vpop.f32.mrb[14].mxu0 }
 0x4d5   : > { %1239 = vst.msk [vmem:[#allocation4 + $0x10] sm:$0xff] %vm738_vm4, %v1235_v2  ;;  %v2640_v7 = vpop.f32.mrb[15].mxu0 }
 0x4d6   : > { %v1227_v8 = vpop.f32.mrb[12].mxu1 }
 0x4d7   : > { %v1236_v9 = vadd.f32 %v1227_v8, %v1044_v6  ;;  %v2645_v10 = vpop.f32.mrb[13].mxu1 }
 0x4d8   : > { %v1230_v11 = vpop.f32.mrb[14].mxu1 }
 0x4d9   : > { %1240 = vst.msk [vmem:[#allocation4 + $0x18] sm:$0xff] %vm738_vm4, %v1236_v9  ;;  %v2646_v12 = vpop.f32.mrb[15].mxu1 }
 0x4da PF: > { %p2514_p6 = scmp.ne.s32.totalorder %s4376_s22, %s4374_s21 }
 0x4db   : > { %v1253_v13 = vld [vmem:[%s4340_s10] sm:$0xf] (!%p2514_p6)  ;;  %vm1265_vm6 = vcmask (!%p2514_p6), 1043456   ;;  %v3644_v14 = vmov (!%p2514_p6), 0.0   ;;  %vm3645_vm7 = vmmov (!%p2514_p6), 0   ;;  %vm1261_vm8 = vcmask (!%p2514_p6), 64512  }
 0x4dc   : > { %1248 = sbr.rel (%p2514_p6) target bundleno = 3048 (0xbe8), region = 128  ;;  %2647 = vmatprep.subr.bf16.mxu0 (!%p2514_p6), %v3644_v14  ;;  %v1267_v15 = vsel (!%p2514_p6), %vm1265_vm6, %v1253_v13, 0  ;;  %2649 = vmatprep.mubr.msk.bf16.mxu0 (!%p2514_p6), %vm3645_vm7, %v3644_v14  ;;  %v1254_v16 = vld [vmem:[%s4340_s10 + $0x4] sm:$0xf] (!%p2514_p6)  ;;  %v1249_v17 = vld [vmem:[%s4333_s9] sm:$0xf] (!%p2514_p6)  ;;  %v1447_v3 = vlaneseq (!%p2514_p6) }
 0x4dd   : > { %2648 = vmatpush3.bf16.msra.mxu0 (!%p2514_p6), %v1267_v15  ;;  %2665 = vmatprep.subr.bf16.mxu1 (!%p2514_p6), %v3644_v14  ;;  %v1313_v18 = vsel (!%p2514_p6), %vm1265_vm6, %v1254_v16, 0  ;;  %v1256_v19 = vld [vmem:[%s4340_s10 + $0xc] sm:$0xf] (!%p2514_p6)  ;;  %v1255_v22 = vld [vmem:[%s4340_s10 + $0x8] sm:$0xf] (!%p2514_p6)  ;;  %v3646_v50 = vmov (!%p2514_p6), 0  }
 0x4de   : > { %2653 = vmatprep.subr.bf16.mxu0 (!%p2514_p6), %v3644_v14  ;;  %2667 = vmatprep.mubr.msk.bf16.mxu1 (!%p2514_p6), %vm3645_vm7, %v3644_v14  ;;  %v1405_v20 = vsel (!%p2514_p6), %vm1265_vm6, %v1256_v19, 0  ;;  %v1252_v21 = vld [vmem:[%s4333_s9 + $0xc] sm:$0xf] (!%p2514_p6)  ;;  %v1250_v23 = vld [vmem:[%s4333_s9 + $0x4] sm:$0xf] (!%p2514_p6)  ;;  %v1359_v24 = vsel (!%p2514_p6), %vm1265_vm6, %v1255_v22, 0 }
 0x4df   : > { %2666 = vmatpush3.bf16.msra.mxu1 (!%p2514_p6), %v1405_v20  ;;  %v1251_v25 = vld [vmem:[%s4333_s9 + $0x8] sm:$0xf] (!%p2514_p6)  ;;  %v1448_v26 = vshrl.u32 (!%p2514_p6), %v1447_v3, 7  ;;  %v1450_v27 = vand.u32 (!%p2514_p6), 127, %v1447_v3  ;;  %3029 = vset.pattern.permute.xlu0 (!%p2514_p6), %v3646_v50  ;;  %v1458_v53 = vld [vmem:[#allocation2] sm:$0xff] (!%p2514_p6)  ;;  %v4553_v61 = vld [vmem:[#allocation2 + $0x10] sm:$0xff] (!%p2514_p6) }
 0x4e0   : > { %2650 = vmatmul.mubr.msk.bf16.vlgmr.msra.gmra.mrb[0].mxu0 (!%p2514_p6), %vm1261_vm8, %v1249_v17  ;;  %2677 = vmatprep.subr.bf16.mxu1 (!%p2514_p6), %v3644_v14  ;;  %v4545_v57 = vld [vmem:[#allocation2 + $0x8] sm:$0xff] (!%p2514_p6)  ;;  %v1257_v62 = vld [vmem:[%s4347_s27] sm:$0xf] (!%p2514_p6)  ;;  %v1461_v2 = vld [vmem:[#allocation2 + $0x18] sm:$0xff] (!%p2514_p6)  ;;  %vm2003_vm10 = vcmask (!%p2514_p6), 261120  }
 0x4e1   : > { %2654 = vmatpush3.bf16.msra.mxu0 (!%p2514_p6), %v1313_v18  ;;  %2655 = vmatprep.mubr.msk.bf16.mxu0 (!%p2514_p6), %vm3645_vm7, %v3644_v14  ;;  %vm1451_vm9 = vcmp.le.s32.totalorder (!%p2514_p6), %v1450_v27, %v1448_v26  ;;  %v1582_v0 = vsel (!%p2514_p6), %vm1265_vm6, %v1257_v62, 0  ;;  %v1258_v8 = vld [vmem:[%s4347_s27 + $0x4] sm:$0xf] (!%p2514_p6)  ;;  %v1259_v17 = vld [vmem:[%s4347_s27 + $0x8] sm:$0xf] (!%p2514_p6) }
 0x4e2   : > { %2659 = vmatprep.subr.bf16.mxu0 (!%p2514_p6), %v3644_v14  ;;  %2668 = vmatmul.mubr.msk.bf16.vlgmr.msra.gmra.mrb[0].mxu1 (!%p2514_p6), %vm1261_vm8, %v1252_v21  ;;  %v1628_v9 = vsel (!%p2514_p6), %vm1265_vm6, %v1258_v8, 0  ;;  %v1674_v22 = vsel (!%p2514_p6), %vm1265_vm6, %v1259_v17, 0  ;;  %v1260_v26 = vld [vmem:[%s4347_s27 + $0xc] sm:$0xf] (!%p2514_p6)  ;;  %v1798_v62 = vld [vmem:[#allocation16 + $0x4] sm:$0xf] (!%p2514_p6) }
 0x4e3   : > { %2679 = vmatprep.mubr.msk.bf16.mxu1 %vm3645_vm7, %v3644_v14  ;;  %3030 = vset.pattern.permute.xlu1 %v3646_v50 }
 0x4e4   : > { %2678 = vmatpush3.bf16.msra.mxu1 %v1628_v9 }
 0x4e5   : > { %2689 = vmatprep.subr.bf16.mxu1 %v3644_v14 }
 0x4e8   : > { %2656 = vmatmul.mubr.msk.bf16.vlgmr.msra.gmra.mrb[4].mxu0 %vm1261_vm8, %v1250_v23 }
 0x4e9   : > { %2660 = vmatpush3.bf16.msra.mxu0 %v1359_v24  ;;  %2661 = vmatprep.mubr.msk.bf16.mxu0 %vm3645_vm7, %v3644_v14 }
 0x4ea   : > { %2671 = vmatprep.subr.bf16.mxu0 %v3644_v14 }
 0x4f0   : > { %2662 = vmatmul.mubr.msk.bf16.vlgmr.msra.gmra.mrb[8].mxu0 %vm1261_vm8, %v1251_v25 }
 0x4f1   : > { %2673 = vmatprep.mubr.msk.bf16.mxu0 %vm3645_vm7, %v3644_v14  ;;  %2672 = vmatpush3.bf16.msra.mxu0 %v1582_v0  ;;  %v1803_v0 = vsel %vm1265_vm6, %v1798_v62, 0 }
 0x4f2   : > { %2683 = vmatprep.subr.bf16.mxu0 %v3644_v14 }
 0x5b3   : > { %v1303_v28 = vpop.f32.mrb[0].mxu0 }
 0x5b4   : > { %v1454_v29 = vsel %vm1451_vm9, %v1303_v28, -1e+30  ;;  %v2651_v30 = vpop.f32.mrb[1].mxu0 }
 0x5b5   : > { %v1306_v31 = vpop.f32.mrb[2].mxu0  ;;  %v1462_v32 = vsel %vm1261_vm8, %v1454_v29, -inf  ;;  %v1441_v34 = vpop.f32.mrb[0].mxu1 }
 0x5b6   : > { %1463 = vmax.xlane.f32.xlu0 %v1462_v32  ;;  %v2652_v33 = vpop.f32.mrb[3].mxu0  ;;  %v2669_v35 = vpop.f32.mrb[1].mxu1  ;;  %v4540_v47 = vsel %vm1451_vm9, %v1441_v34, -1e+30  ;;  %v1720_v32 = vsel %vm1265_vm6, %v1260_v26, 0 }
 0x5b7   : > { %v1444_v36 = vpop.f32.mrb[2].mxu1  ;;  %v1471_v52 = vsel %vm1261_vm8, %v4540_v47, -inf }
 0x5b8   : > { %v2670_v37 = vpop.f32.mrb[3].mxu1 }
 0x5bb   : > { %v1349_v38 = vpop.f32.mrb[4].mxu0 }
 0x5bc   : > { %v1455_v39 = vsel %vm1451_vm9, %v1349_v38, -1e+30  ;;  %v2657_v40 = vpop.f32.mrb[5].mxu0 }
 0x5bd   : > { %v1352_v41 = vpop.f32.mrb[6].mxu0  ;;  %v1465_v42 = vsel %vm1261_vm8, %v1455_v39, -inf }
 0x5be   : > { %1466 = vmax.xlane.f32.xlu0 %v1465_v42  ;;  %v2658_v43 = vpop.f32.mrb[7].mxu0 }
 0x5c3   : > { %v1395_v44 = vpop.f32.mrb[8].mxu0 }
 0x5c4   : > { %v1456_v45 = vsel %vm1451_vm9, %v1395_v44, -1e+30  ;;  %v2663_v46 = vpop.f32.mrb[9].mxu0  ;;  %v1522_v44 = vld [vmem:[#allocation3] sm:$0xff] }
 0x5c5   : > { %v1398_v48 = vpop.f32.mrb[10].mxu0  ;;  %v1468_v49 = vsel %vm1261_vm8, %v1456_v45, -inf }
 0x5c6   : > { %1469 = vmax.xlane.f32.xlu1 %v1468_v49  ;;  %v2664_v51 = vpop.f32.mrb[11].mxu0  ;;  %v1523_v49 = vld [vmem:[#allocation3 + $0x8] sm:$0xff] }
 0x5ca   : > { %1472 = vmax.xlane.f32.xlu1 %v1471_v52 }
 0x643   : > { %v1464_v54 = vpop.xlane.xlu0 %1463 }
 0x644   : > { %v1474_v55 = vmax.f32 %v1458_v53, %v1464_v54  ;;  %v1524_v54 = vld [vmem:[#allocation3 + $0x10] sm:$0xff] }
 0x646   : > { %v1478_v56 = vsub.f32 %v1458_v53, %v1474_v55  ;;  %1492 = vperm.xlu0 %3029, %v1474_v55  }
 0x64b   : > { %v1467_v58 = vpop.xlane.xlu0 %1466 }
 0x64c   : > { %v4548_v59 = vmax.f32 %v4545_v57, %v1467_v58 }
 0x64e   : > { %v1479_v60 = vsub.f32 %v4545_v57, %v4548_v59  ;;  %1497 = vperm.xlu1 %3030, %v4548_v59  }
 0x650   : > { %v1484_v41 = vmul.f32 1.442695, %v1479_v60  ;;  %v1525_v60 = vld [vmem:[#allocation3 + $0x18] sm:$0xff] }
 0x653   : > { %v1470_v63 = vpop.xlane.xlu1 %1469 }
 0x654   : > { %v4558_v1 = vmax.f32 %v4553_v61, %v1470_v63 }
 0x656   : > { %v1480_v4 = vsub.f32 %v4553_v61, %v4558_v1  ;;  %1502 = vperm.xlu1 %3030, %v4558_v1  }
 0x657   : > { %v1473_v5 = vpop.xlane.xlu1 %1472 }
 0x658   : > { %v1477_v6 = vmax.f32 %v1461_v2, %v1473_v5 }
 0x65a   : > { %v1481_v7 = vsub.f32 %v1461_v2, %v1477_v6  ;;  %1507 = vperm.xlu1 %3030, %v1477_v6  }
 0x65c   : > { %v1488_v33 = vmul.f32 1.442695, %v1481_v7 }
 0x6c5   : > { %v1493_v10 = vpop.permute.xlu0 %1492 }
 0x6c6   : > { %v1510_v11 = vsub.f32 %v1454_v29, %v1493_v10  ;;  %v1482_v29 = vmul.f32 1.442695, %v1478_v56  ;;  %v1795_v56 = vld [vmem:[#allocation16] sm:$0xf] }
 0x6c7   : > { %v1849_v57 = vsel %vm1265_vm6, %v1795_v56, 0 }
 0x6c8   : > { %v1514_v12 = vmul.f32 1.442695, %v1510_v11 }
 0x6ca   : > { %3041 = vpow2.f32 %v1514_v12 }
 0x6cd   : > { %v1498_v13 = vpop.permute.xlu1 %1497 }
 0x6ce   : > { %v1511_v15 = vsub.f32 %v1455_v39, %v1498_v13 }
 0x6d0   : > { %v1516_v16 = vmul.f32 1.442695, %v1511_v15 }
 0x6d2   : > { %3043 = vpow2.f32 %v1516_v16 }
 0x6d4   : > { %v3042_v18 = vpop.eup %3041 }
 0x6d5   : > { %v1503_v19 = vpop.permute.xlu1 %1502  ;;  %v1530_v20 = vsel %vm1261_vm8, %v3042_v18, 0.0  ;;  %v1574_v21 = vpack.c.bf16 %v3042_v18, %v3042_v18 }
 0x6d6   : > { %v1512_v23 = vsub.f32 %v1456_v45, %v1503_v19  ;;  %1531 = vadd.xlane.f32.xlu0 %v1530_v20  ;;  %v1486_v45 = vmul.f32 1.442695, %v1480_v4 }
 0x6d7   : > { %2674 = vmatmul.mubr.msk.bf16.vlgmr.msra.gmra.mrb[12].mxu0 %vm1261_vm8, %v1574_v21 }
 0x6d8   : > { %v1518_v24 = vmul.f32 1.442695, %v1512_v23  ;;  %2684 = vmatpush3.bf16.msra.mxu0 %v1674_v22  ;;  %2685 = vmatprep.mubr.msk.bf16.mxu0 %vm3645_vm7, %v3644_v14 }
 0x6d9   : > { %v1508_v25 = vpop.permute.xlu1 %1507  ;;  %2695 = vmatprep.subr.bf16.mxu0 %v3644_v14 }
 0x6da   : > { %3045 = vpow2.f32 %v1518_v24  ;;  %v1513_v3 = vsub.f32 %v4540_v47, %v1508_v25  ;;  %v1546_v24 = vld [vmem:[#allocation4] sm:$0xff] }
 0x6dc   : > { %v3044_v27 = vpop.eup %3043  ;;  %v1520_v28 = vmul.f32 1.442695, %v1513_v3 }
 0x6dd   : > { %v1533_v30 = vsel %vm1261_vm8, %v3044_v27, 0.0  ;;  %v1575_v31 = vpack.c.bf16 %v3044_v27, %v3044_v27 }
 0x6de   : > { %3047 = vpow2.f32 %v1520_v28  ;;  %1534 = vadd.xlane.f32.xlu1 %v1533_v30 }
 0x6df   : > { %2680 = vmatmul.mubr.msk.bf16.vlgmr.msra.gmra.mrb[4].mxu1 %vm1261_vm8, %v1575_v31  ;;  %3049 = vpow2.f32 %v1482_v29  ;;  %v1943_v29 = vld [vmem:[#allocation16 + $0xc] sm:$0xf]  ;;  %v1547_v31 = vld [vmem:[#allocation4 + $0x8] sm:$0xff] }
 0x6e0   : > { %2690 = vmatpush3.bf16.msra.mxu1 %v1720_v32  ;;  %2691 = vmatprep.mubr.msk.bf16.mxu1 %vm3645_vm7, %v3644_v14  ;;  %3051 = vpow2.f32 %v1488_v33  ;;  %v1948_v33 = vsel %vm1265_vm6, %v1943_v29, 0 }
 0x6e1   : > { %2701 = vmatprep.subr.bf16.mxu1 %v3644_v14  ;;  %3053 = vpow2.f32 %v1484_v41 }
 0x6e2   : > { %3055 = vpow2.f32 %v1486_v45 }
 0x6e4   : > { %v3046_v34 = vpop.eup %3045 }
 0x6e5   : > { %v1536_v35 = vsel %vm1261_vm8, %v3046_v34, 0.0  ;;  %v1576_v36 = vpack.c.bf16 %v3046_v34, %v3046_v34 }
 0x6e6   : > { %1537 = vadd.xlane.f32.xlu1 %v1536_v35 }
 0x6e7   : > { %2686 = vmatmul.mubr.msk.bf16.vlgmr.msra.gmra.mrb[16].mxu0 %vm1261_vm8, %v1576_v36 }
 0x6e8   : > { %v3048_v37 = vpop.eup %3047  ;;  %2697 = vmatprep.mubr.msk.bf16.mxu0 %vm3645_vm7, %v3644_v14  ;;  %2696 = vmatpush3.bf16.msra.mxu0 %v1803_v0 }
 0x6e9   : > { %v1539_v38 = vsel %vm1261_vm8, %v3048_v37, 0.0  ;;  %v1577_v39 = vpack.c.bf16 %v3048_v37, %v3048_v37  ;;  %v3050_v40 = vpop.eup %3049  ;;  %2707 = vmatprep.subr.bf16.mxu0 %v3644_v14  ;;  %v1893_v37 = vld [vmem:[#allocation16 + $0x8] sm:$0xf] }
 0x6ea   : > { %1540 = vadd.xlane.f32.xlu1 %v1539_v38  ;;  %v3052_v42 = vpop.eup %3051  ;;  %v1526_v46 = vmul.f32 %v3050_v40, %v1522_v44  ;;  %v1898_v41 = vsel %vm1265_vm6, %v1893_v37, 0  ;;  %v1549_v44 = vld [vmem:[#allocation4 + $0x18] sm:$0xff] }
 0x6eb   : > { %2692 = vmatmul.mubr.msk.bf16.vlgmr.msra.gmra.mrb[8].mxu1 %vm1261_vm8, %v1577_v39  ;;  %v3054_v43 = vpop.eup %3053  ;;  %v1529_v63 = vmul.f32 %v3052_v42, %v1525_v60  ;;  %v1548_v39 = vld [vmem:[#allocation4 + $0x10] sm:$0xff]  ;;  %v3037_v37 = vld [vmem:[#allocation25 + $0x20] sm:$0xff]  }
 0x6ec   : > { %1552 = vperm.xlu0 %3029, %v3050_v40   ;;  %2703 = vmatprep.mubr.msk.bf16.mxu1 %vm3645_vm7, %v3644_v14  ;;  %v1527_v50 = vmul.f32 %v3054_v43, %v1523_v49  ;;  %v3056_v53 = vpop.eup %3055 }
 0x6ed   : > { %v1528_v58 = vmul.f32 %v3056_v53, %v1524_v54  ;;  %2702 = vmatpush3.bf16.msra.mxu1 %v1849_v57 }
 0x6ee   : > { %2713 = vmatprep.subr.bf16.mxu1 %v3644_v14 }
 0x6f0   : > { %1567 = vperm.xlu0 %3029, %v3052_v42  }
 0x6fb   : > { %1557 = vperm.xlu1 %3030, %v3054_v43  }
 0x763   : > { %v1532_v47 = vpop.xlane.xlu0 %1531 }
 0x764   : > { %v1542_v48 = vadd.f32 %v1532_v47, %v1526_v46 }
 0x766   : > { %3057 = vrcp.f32 %v1542_v48 }
 0x76b   : > { %v1535_v51 = vpop.xlane.xlu1 %1534  ;;  %v1553_v25 = vpop.permute.xlu0 %1552 }
 0x76c   : > { %v1543_v52 = vadd.f32 %v1535_v51, %v1527_v50  ;;  %v1570_v26 = vmul.f32 %v1553_v25, %v1546_v24  ;;  %v3033_v24 = vld [vmem:[#allocation25] sm:$0xff]  }
 0x76e   : > { %3059 = vrcp.f32 %v1543_v52 }
 0x76f   : > { %v1568_v45 = vpop.permute.xlu0 %1567 }
 0x770   : > { %v3058_v55 = vpop.eup %3057  ;;  %v1573_v48 = vmul.f32 %v1568_v45, %v1549_v44 }
 0x771   : > { %1772 = vperm.xlu1 %3030, %v3058_v55  }
 0x773   : > { %v1538_v59 = vpop.xlane.xlu1 %1537 }
 0x774   : > { %v1544_v61 = vadd.f32 %v1538_v59, %v1528_v58 }
 0x776   : > { %3061 = vrcp.f32 %v1544_v61 }
 0x777   : > { %v1541_v1 = vpop.xlane.xlu1 %1540 }
 0x778   : > { %v3060_v2 = vpop.eup %3059  ;;  %v1545_v4 = vadd.f32 %v1541_v1, %v1529_v63 }
 0x779   : > { %1777 = vperm.xlu1 %3030, %v3060_v2  }
 0x77a   : > { %3063 = vrcp.f32 %v1545_v4 }
 0x77b   : > { %v1558_v3 = vpop.permute.xlu1 %1557 }
 0x77c   : > { %v1571_v34 = vmul.f32 %v1558_v3, %v1547_v31 }
 0x77d   : > { %1562 = vperm.xlu1 %3030, %v3056_v53  }
 0x780   : > { %v3062_v5 = vpop.eup %3061 }
 0x781   : > { %1782 = vperm.xlu1 %3030, %v3062_v5  }
 0x784   : > { %v3064_v6 = vpop.eup %3063 }
 0x785   : > { %1787 = vperm.xlu0 %3029, %v3064_v6  }
 0x7aa   : > { %v1618_v7 = vpop.f32.mrb[12].mxu0 }
 0x7ab   : > { %v2675_v8 = vpop.f32.mrb[13].mxu0  ;;  %v1762_v27 = vadd.f32 %v1618_v7, %v1570_v26  ;;  %v2527_v7 = vld [vmem:[#allocation17] ss:$0 sm:$0xff] }
 0x7ac   : > { %v1621_v9 = vpop.f32.mrb[14].mxu0 }
 0x7ad   : > { %v2676_v10 = vpop.f32.mrb[15].mxu0 }
 0x7ae   : > { %v1999_v10 = vld [vmem:[%s581_s11] sm:$0xff] }
 0x7b2   : > { %v1664_v11 = vpop.f32.mrb[4].mxu1 }
 0x7b3   : > { %v2681_v12 = vpop.f32.mrb[5].mxu1  ;;  %v1763_v35 = vadd.f32 %v1664_v11, %v1571_v34  ;;  %v3034_v34 = vld [vmem:[#allocation25 + $0x8] sm:$0xff]  }
 0x7b4   : > { %v1667_v13 = vpop.f32.mrb[6].mxu1 }
 0x7b5   : > { %v2682_v15 = vpop.f32.mrb[7].mxu1 }
 0x7ba   : > { %v1710_v16 = vpop.f32.mrb[16].mxu0 }
 0x7bb   : > { %v2687_v17 = vpop.f32.mrb[17].mxu0 }
 0x7bc   : > { %v1713_v18 = vpop.f32.mrb[18].mxu0 }
 0x7bd   : > { %v2688_v19 = vpop.f32.mrb[19].mxu0 }
 0x7be   : > { %v1756_v20 = vpop.f32.mrb[8].mxu1 }
 0x7bf   : > { %v2693_v21 = vpop.f32.mrb[9].mxu1  ;;  %v1765_v50 = vadd.f32 %v1756_v20, %v1573_v48 }
 0x7c0   : > { %v1759_v22 = vpop.f32.mrb[10].mxu1 }
 0x7c1   : > { %v2694_v23 = vpop.f32.mrb[11].mxu1  ;;  %v3031_v22 = vld [vmem:[#allocation22] sm:$0xff]  }
 0x7c2   : > { %v3032_v23 = vld [vmem:[#allocation22 + $0x8] sm:$0xff]  }
 0x7f0   : > { %v1773_v28 = vpop.permute.xlu1 %1772 }
 0x7f1   : > { %v1790_v30 = vmul.f32 %v1773_v28, %v1762_v27  ;;  %v2528_v28 = vld [vmem:[#allocation19] ss:$0 sm:$0xff] }
 0x7f3   : > { %v1794_v32 = vpack.c.bf16 %v1790_v30, %v1790_v30  ;;  %v2529_v30 = vld [vmem:[#allocation20] ss:$0 sm:$0xff] }
 0x7f5   : > { %2704 = vmatmul.mubr.msk.bf16.vlgmr.msra.gmra.mrb[12].mxu1 %vm1261_vm8, %v1794_v32 }
 0x7f6   : > { %2714 = vmatpush3.bf16.msra.mxu1 %v1948_v33  ;;  %2715 = vmatprep.mubr.msk.bf16.mxu1 %vm3645_vm7, %v3644_v14 }
 0x7f7   : > { %2727 = vmatprep.subr.bf16.mxu1 %v3644_v14 }
 0x7f8   : > { %v1778_v36 = vpop.permute.xlu1 %1777 }
 0x7f9   : > { %v1791_v38 = vmul.f32 %v1778_v36, %v1763_v35  ;;  %v3035_v35 = vld [vmem:[#allocation25 + $0x10] sm:$0xff]   ;;  %v3036_v36 = vld [vmem:[#allocation25 + $0x18] sm:$0xff]  }
 0x7fb   : > { %v1796_v40 = vpack.c.bf16 %v1791_v38, %v1791_v38  ;;  %v3038_v38 = vld [vmem:[#allocation25 + $0x28] sm:$0xff]  }
 0x7fc   : > { %v1563_v42 = vpop.permute.xlu1 %1562 }
 0x7fd   : > { %v1572_v43 = vmul.f32 %v1563_v42, %v1548_v39  ;;  %2698 = vmatmul.mubr.msk.bf16.vlgmr.msra.gmra.mrb[20].mxu0 %vm1261_vm8, %v1796_v40  ;;  %v3039_v39 = vld [vmem:[#allocation25 + $0x30] sm:$0xff]   ;;  %v3040_v40 = vld [vmem:[#allocation25 + $0x38] sm:$0xff]  }
 0x7fe   : > { %2708 = vmatpush3.bf16.msra.mxu0 %v1898_v41  ;;  %2709 = vmatprep.mubr.msk.bf16.mxu0 %vm3645_vm7, %v3644_v14  ;;  %v2530_v41 = vld [vmem:[#allocation23] ss:$0 sm:$0xff] }
 0x7ff   : > { %v1764_v46 = vadd.f32 %v1710_v16, %v1572_v43  ;;  %2719 = vmatprep.subr.bf16.mxu0 %v3644_v14 }
 0x800   : > { %v1783_v47 = vpop.permute.xlu1 %1782 }
 0x801   : > { %v1792_v49 = vmul.f32 %v1783_v47, %v1764_v46 }
 0x803   : > { %v1891_v51 = vpack.c.bf16 %v1792_v49, %v1792_v49 }
 0x804   : > { %v1788_v52 = vpop.permute.xlu0 %1787 }
 0x805   : > { %v1793_v53 = vmul.f32 %v1788_v52, %v1765_v50  ;;  %2710 = vmatmul.mubr.msk.bf16.vlgmr.msra.gmra.mrb[24].mxu0 %vm1261_vm8, %v1891_v51 }
 0x806   : > { %2723 = vmatprep.mubr.msk.bf16.mxu0 %vm3645_vm7, %v3644_v14  ;;  %2720 = vmatpush3.bf16.msra.mxu0 %v3031_v22 }
 0x807   : > { %v1941_v54 = vpack.c.bf16 %v1793_v53, %v1793_v53  ;;  %2721 = vmatprep.subr.bf16.mxu0 %v3644_v14 }
 0x809   : > { %2716 = vmatmul.mubr.msk.bf16.vlgmr.msra.gmra.mrb[16].mxu1 %vm1261_vm8, %v1941_v54 }
 0x80a   : > { %2743 = vmatprep.mubr.msk.bf16.mxu1 %vm3645_vm7, %v3644_v14  ;;  %2722 = vmatpush3.bf16.msra.mxu0 %v3032_v23 }
 0x80b   : > { %2728 = vmatpush3.bf16.msra.mxu1 %v3033_v24 }
 0x80c   : > { %2729 = vmatprep.subr.bf16.mxu1 %v3644_v14 }
 0x80f   : > { %2730 = vmatpush3.bf16.msra.mxu1 %v3034_v34 }
 0x810   : > { %2731 = vmatprep.subr.bf16.mxu1 %v3644_v14 }
 0x813   : > { %2732 = vmatpush3.bf16.msra.mxu1 %v3035_v35 }
 0x814   : > { %2733 = vmatprep.subr.bf16.mxu1 %v3644_v14 }
 0x817   : > { %2734 = vmatpush3.bf16.msra.mxu1 %v3036_v36 }
 0x818   : > { %2735 = vmatprep.subr.bf16.mxu1 %v3644_v14 }
 0x81b   : > { %2736 = vmatpush3.bf16.msra.mxu1 %v3037_v37 }
 0x81c   : > { %2737 = vmatprep.subr.bf16.mxu1 %v3644_v14 }
 0x81f   : > { %2738 = vmatpush3.bf16.msra.mxu1 %v3038_v38 }
 0x820   : > { %2739 = vmatprep.subr.bf16.mxu1 %v3644_v14 }
 0x823   : > { %2740 = vmatpush3.bf16.msra.mxu1 %v3039_v39 }
 0x824   : > { %2741 = vmatprep.subr.bf16.mxu1 %v3644_v14 }
 0x827   : > { %2742 = vmatpush3.bf16.msra.mxu1 %v3040_v40 }
 0x8c8   : > { %v1885_v55 = vpop.f32.mrb[12].mxu1 }
 0x8c9   : > { %v2705_v56 = vpop.f32.mrb[13].mxu1 }
 0x8ca   : > { %v1888_v57 = vpop.f32.mrb[14].mxu1 }
 0x8cb   : > { %v2706_v58 = vpop.f32.mrb[15].mxu1  ;;  %v2542_v57 = vld [vmem:[#allocation26] ss:$0 sm:$0xff] }
 0x8d0   : > { %v1839_v59 = vpop.f32.mrb[20].mxu0 }
 0x8d1   : > { %v1886_v60 = vadd.f32 %v1885_v55, %v1839_v59  ;;  %v2699_v61 = vpop.f32.mrb[21].mxu0 }
 0x8d2   : > { %v1842_v62 = vpop.f32.mrb[22].mxu0 }
 0x8d3   : > { %v2700_v63 = vpop.f32.mrb[23].mxu0 }
 0x8d8   : > { %v1934_v0 = vpop.f32.mrb[24].mxu0 }
 0x8d9   : > { %v1940_v1 = vadd.f32 %v1934_v0, %v1886_v60  ;;  %v2711_v2 = vpop.f32.mrb[25].mxu0 }
 0x8da   : > { %v1937_v4 = vpop.f32.mrb[26].mxu0 }
 0x8db   : > { %v2712_v5 = vpop.f32.mrb[27].mxu0 }
 0x8dc   : > { %v1984_v6 = vpop.f32.mrb[16].mxu1 }
 0x8dd   : > { %v1990_v8 = vadd.f32 %v1984_v6, %v1940_v1  ;;  %v2717_v9 = vpop.f32.mrb[17].mxu1 }
 0x8de   : > { %v1987_v11 = vpop.f32.mrb[18].mxu1 }
 0x8df   : > { %v1998_v12 = vadd.f32 %v2527_v7, %v1990_v8  ;;  %v2718_v13 = vpop.f32.mrb[19].mxu1 }
 0x8e1   : > { %v4618_v15 = vadd.f32 %v1999_v10, %v1998_v12 }
 0x8e3   : > { %v2004_v16 = vsel %vm2003_vm10, %v4618_v15, 0.0 }
 0x8e4   : > { %2005 = vadd.xlane.f32.xlu1 %v2004_v16 }
 0x971   : > { %v2006_v17 = vpop.xlane.xlu1 %2005 }
 0x972   : > { %v2008_v18 = vmul.f32 0.03125, %v2006_v17 }
 0x974   : > { %v2009_v19 = vsub.f32 %v4618_v15, %v2008_v18 }
 0x976   : > { %v2010_v20 = vmul.f32 %v2009_v19, %v2009_v19 }
 0x978   : > { %v2011_v21 = vsel %vm2003_vm10, %v2010_v20, 0.0 }
 0x979   : > { %2012 = vadd.xlane.f32.xlu0 %v2011_v21 }
 0xa06   : > { %v2013_v25 = vpop.xlane.xlu0 %2012 }
 0xa07   : > { %v2014_v3 = vmul.f32 0.03125, %v2013_v25 }
 0xa09   : > { %v2015_v26 = vadd.f32 1e-05, %v2014_v3 }
 0xa0b   : > { %3065 = vrsqrt.f32 %v2015_v26 }
 0xa15   : > { %v3066_v27 = vpop.eup %3065 }
 0xa16   : > { %v2017_v29 = vmul.f32 %v3066_v27, %v2009_v19 }
 0xa18   : > { %v2024_v31 = vmul.f32 %v2528_v28, %v2017_v29 }
 0xa1a   : > { %v2031_v32 = vadd.f32 %v2529_v30, %v2024_v31 }
 0xa1c   : > { %v2032_v33 = vpack.c.bf16 %v2031_v32, %v2031_v32 }
 0xa1e   : > { %2724 = vmatmul.mubr.msk.bf16.vlgmr.msra.gmra.mrb[28].mxu0 %vm2003_vm10, %v2032_v33 }
 0xaf1   : > { %v2093_v42 = vpop.f32.mrb[28].mxu0 }
 0xaf2   : > { %v2094_v43 = vadd.f32 %v2530_v41, %v2093_v42  ;;  %v2725_v44 = vpop.f32.mrb[29].mxu0 }
 0xaf3   : > { %v2096_v45 = vpop.f32.mrb[30].mxu0 }
 0xaf4   : > { %v2100_v46 = vmul.f32 0.044715, %v2094_v43  ;;  %v2726_v47 = vpop.f32.mrb[31].mxu0  ;;  %v2099_v53 = vmul.f32 0.5, %v2094_v43 }
 0xaf6   : > { %v2101_v48 = vmul.f32 %v2100_v46, %v2094_v43 }
 0xaf8   : > { %v2102_v49 = vmul.f32 %v2101_v48, %v2094_v43 }
 0xafa   : > { %v2103_v50 = vadd.f32 %v2102_v49, %v2094_v43 }
 0xafc   : > { %v2104_v51 = vmul.f32 0.7978846, %v2103_v50 }
 0xafe   : > { %3067 = vtanh.f32 %v2104_v51 }
 0xb08   : > { %v3068_v52 = vpop.eup %3067 }
 0xb09   : > { %v2106_v54 = vadd.f32 1.0, %v3068_v52 }
 0xb0b   : > { %v2107_v55 = vmul.f32 %v2106_v54, %v2099_v53 }
 0xb0d   : > { %v2108_v56 = vpack.c.bf16 %v2107_v55, %v2107_v55 }
 0xb0f   : > { %2744 = vmatmul.mubr.bf16.vlgmr.msra.gmra.mrb[20].mxu1 %v2108_v56 }
 0xbe2   : > { %v2207_v14 = vpop.f32.mrb[20].mxu1 }
 0xbe3   : > { %v2213_v58 = vadd.f32 %v2207_v14, %v4618_v15  ;;  %v2745_v59 = vpop.f32.mrb[21].mxu1 }
 0xbe4   : > { %v2210_v60 = vpop.f32.mrb[22].mxu1 }
 0xbe5   : > { %v2221_v61 = vadd.f32 %v2542_v57, %v2213_v58  ;;  %v2746_v62 = vpop.f32.mrb[23].mxu1 }
 0xbe7   : > { %2222 = vst.msk [vmem:[%s695_s12] sm:$0xff] %vm2003_vm10, %v2221_v61 }
 0xbe8 PF: > { %s2231_s14 = sld [smem:[#allocation6]]  ;;  %s4890_s19 = sld [smem:[#allocation50_spill]] }
 0xbe9   : > { %s2239_s11 = sshll.u32 %s695_s12, 4  ;;  %s4891_s13 = sld [smem:[#allocation68_spill]]  ;;  %s4640_s11 = int_to_ptr.vmem [resolvable:$true] %s2239_s11 }
 0xbea   : > { %s2224_s10 = scalar_lea.sflag [#allocation10], %s693_s20  ;;  %s3413_s0 = scalar_lea.vmem %s4640_s11, 128 }
 0xbeb   : > { %p3414_p9 = scmp.ne.s32.totalorder %s4640_s11, %s3413_s0  ;;  %p4892_p8 = scmp.ne.s32.totalorder %s4823_s24, 0 }
 0xbec   : > { %s3647_s7 = smov [#allocation28]  }
 0xbed   : > { %p3415_p3 = pnand %p3414_p9, %p4892_p8  ;;  %s3417_s6 = sshll.u32 %s3647_s7, 4  ;;  %s3418_s6 = int_to_ptr.vmem [resolvable:$false] %s3417_s6 }
 0xbee   : > { %s2235_s4 = sadd.s32 %s4890_s19, %s2231_s14  ;;  %s3419_s29 = scalar_lea.vmem %s3418_s6, 256 }
 0xbef   : > { %s2544_s5 = sshll.u32 %s2235_s4, 7  ;;  %p3416_p5 = pneg %p3415_p3 }
 0xbf0   : > { %s2237_s30 = scalar_lea.hbm %s4891_s13, %s2544_s5  ;;  %p3420_p11 = scmp.lt.s32.totalorder %s4640_s11, %s3418_s6 }
 0xbf1   : > { %p3421_p1 = scmp.lt.s32.totalorder %s3419_s29, %s3413_s0 }
 0xbf3   : > { %p3422_p13 = por %p3421_p1, %p3420_p11 }
 0xbf5   : > { %p3423_p10 = pnand %p3422_p13, %p3416_p5 }
 0xbf7   : > { %3426 = shalt.err (!%p3423_p10)
}
 0xbf8   : > { %s3427_s27 = scalar_lea.hbm %s2237_s30, 128  ;;  %s3431_s22 = scalar_lea.hbm %s4891_s13, 256 }
 0xbf9   : > { %p3428_p0 = scmp.ne.s32.totalorder %s2237_s30, %s3427_s27  ;;  %p3432_p7 = scmp.lt.u32.totalorder %s2237_s30, %s4891_s13 }
 0xbfa   : > { %p3433_p2 = scmp.lt.u32.totalorder %s3431_s22, %s3427_s27  ;;  %p3435_p9 = scmp.lt.u32.totalorder %s3427_s27, %s2237_s30 }
 0xbfb   : > { %p3429_p4 = pnand %p3428_p0, %p4892_p8 }
 0xbfc   : > { %p3434_p6 = por %p3433_p2, %p3432_p7 }
 0xbfd   : > { %p3430_p12 = pneg %p3429_p4 }
 0xbfe   : > { %p3436_p3 = por %p3435_p9, %p3434_p6 }
 0xc00   : > { %p3437_p5 = pnand %p3436_p3, %p3430_p12 }
 0xc02   : > { %3440 = shalt.err (!%p3437_p5)
}
 0xc03   : > { %2787 = dma.vmem_to_hbm [thread:$0]  (%p4892_p8), %s4640_s11, 128, %s2237_s30, %s2224_s10  }
 0xc04 PF: > { %s2251_s14 = sand.u32 1, %s3555_s17   ;;  %p4893_p11 = scmp.ne.s32.totalorder %s4827_s23, 0 }
 0xc05   : > { %p4894_p1 = scmp.ge.s32.totalorder %s3623_s16, 2  ;;  %s2252_s19 = scalar_lea.sflag [#allocation10], %s2251_s14 }
 0xc07   : > { %p2828_p13 = pnand %p4894_p1, %p4893_p11 }
 0xc09   : > { %3550 = dma.done.wait (!%p2828_p13), %s2252_s19, 128  }
 0xc0a   : > { %3552 = vsyncadd (!%p2828_p13), %s2252_s19, 4294967168  ;;  %s42_s16 = sadd.s32 1, %s3623_s16   ;;  %s4896_s24 = sld [smem:[#allocation39_spill]] }
 0xc0b   : > { %p4669_p10 = scmp.ge.s32.totalorder %s42_s16, 4   ;;  %s4897_s0 = sld [smem:[#allocation55_spill]] }
 0xc0c   : > { %s4898_s19 = sld [smem:[#allocation41_spill]]  ;;  %s4899_s11 = sld [smem:[#allocation42_spill]] }
 0xc0d   : > { %s4900_s21 = sld [smem:[#allocation44_spill]]  ;;  %s4901_s22 = sld [smem:[#allocation45_spill]] }
 0xc0e   : > { %s4902_s5 = sld [smem:[#allocation46_spill]]  ;;  %s4903_s9 = sld [smem:[#allocation54_spill]] }
 0xc0f   : > { %s4904_s27 = sld [smem:[#allocation48_spill]]  ;;  %s4905_s3 = sld [smem:[#allocation49_spill]] }
 0xc10   : > { %s4906_s30 = smov %s4133_s1  ;;  %s4907_s17 = smov %s3559_s18 }
 0xc11   : > { %s4908_s10 = sld [smem:[#allocation52_spill]]  ;;  %s4909_s18 = smov %s4896_s24 }
 0xc12   : > { %s4910_s1 = smov %s4899_s11  ;;  %s4911_s20 = smov %s4258_s26 }
 0xc13   : > { %s4912_s23 = smov %s4923_s28  ;;  %s4913_s24 = smov %s3595_s25 }
 0xc14   : > { %s4914_s25 = smov %s4902_s5  ;;  %s4915_s26 = smov %s4903_s9 }
 0xc15   : > { %s4916_s28 = smov %s4905_s3  ;;  %s4917_s29 = smov %s4906_s30 }
 0xc16   : > { %s4918_s30 = smov %s3619_s15  ;;  %41 = sbr.rel (!%p4669_p10) target bundleno = 36 (0x24), region = 197 }
 0xc17   : > { %s4919_s15 = smov %s4908_s10 }
 0xc1d   :  { %2257 = vsyncpa [#allocation9], 1 }
 0xc1e   :  { %2259 = vsyncpa [#allocation9 + $0x1], 1 }
 0xc1f   :  { %2260 = vsyncpa [#allocation12], 1 }
 0xc20   :  { %2262 = vsyncpa [#allocation12 + $0x1], 1 }
 0xc21   :  { %2263 = vsyncpa [#allocation15], 1 }
 0xc22   :  { %2265 = vsyncpa [#allocation15 + $0x1], 1 }
 0xc23   :  { %2266 = vsyncpa [#allocation18], 1 }
 0xc24   :  { %2267 = vsyncpa [#allocation21], 1 }
 0xc25   :  { %2268 = vsyncpa [#allocation24], 1 }
 0xc26   :  { %2269 = vsyncpa [#allocation27], 1 }
 0xc27   :  { %2270 = vsyncpa [#allocation10], 1 }
 0xc28   :  { %2272 = vsyncpa [#allocation10 + $0x1], 1 }

// kernel: block_forward.2
= control target key start
LH: loop header
LB: loop body
LE: loop exit
PB: predicated region body
PF: predicated region fallthrough
CT: control target
= control target key end

     0   :  { %s1772_s0 = inlined_call_operand.hbm [shape: f32[2,8,32], index: 0, kind: input, shape index: {}]   ;;  %s1773_s1 = inlined_call_operand.hbm [shape: f32[1,32], index: 1, kind: input, shape index: {}]   ;;  %s1774_s2 = inlined_call_operand.hbm [shape: f32[1,32], index: 2, kind: input, shape index: {}]   ;;  %s1775_s3 = inlined_call_operand.hbm [shape: bf16[32,96], index: 3, kind: input, shape index: {}]   ;;  %s1776_s4 = inlined_call_operand.hbm [shape: f32[1,96], index: 4, kind: input, shape index: {}]   ;;  %s1777_s5 = inlined_call_operand.hbm [shape: bf16[2,4,8,8], index: 5, kind: output, shape index: {0}]   ;;  %s1778_s6 = inlined_call_operand.hbm [shape: bf16[2,4,8,8], index: 6, kind: output, shape index: {1}]   ;;  %s1779_s7 = inlined_call_operand.hbm [shape: bf16[2,4,8,8], index: 7, kind: output, shape index: {2}]  }
   0x1   :  { %1784 = sst [smem:[#allocation20_spill]] %s1773_s1 }
   0x2   :  { %1785 = sst [smem:[#allocation21_spill]] %s1774_s2 }
   0x3   :  { %13 = vsyncpa [#allocation3], 0 }
   0x4   :  { %15 = vsyncpa [#allocation3 + $0x1], 0 }
   0x5   :  { %16 = vsyncpa [#allocation6], 0 }
   0x6   :  { %17 = vsyncpa [#allocation9], 0 }
   0x7   :  { %18 = vsyncpa [#allocation4], 0 }
   0x8   :  { %20 = vsyncpa [#allocation4 + $0x1], 0 }
   0x9   :  { %21 = vsyncpa [#allocation13], 0 }
   0xa   :  { %23 = vsyncpa [#allocation13 + $0x1], 0  ;;  %s1371_s24 = smov 0   ;;  %s1373_s25 = smov 0  }
   0xb   :  { %s1375_s26 = smov 0   ;;  %s1377_s27 = smov 0  }
   0xc   :  { %s1379_s28 = smov 0   ;;  %s1381_s29 = smov 0  }
   0xd LB: > { %s1402_s30 = sadd.s32 4294967295, %s1308_s29   ;;  %p825_p0 = scmp.ge.s32.totalorder %s1308_s29, 1  ;;  %s1308_s29 = sphi %s1381_s29, %s29_s29   ;;  %s1304_s28 = sphi %s1379_s28, %s1811_s28   ;;  %s1300_s27 = sphi %s1377_s27, %s1810_s27   ;;  %s1296_s26 = sphi %s1375_s26, %s1809_s26   ;;  %s1292_s25 = sphi %s1373_s25, %s1808_s25   ;;  %s1288_s24 = sphi %s1371_s24, %s1807_s24  }
   0xe   : > { %p1780_p1 = scmp.eq.s32.totalorder %s1402_s30, 0  ;;  %p242_p2 = scmp.lt.s32.totalorder %s1308_s29, 3 }
   0xf   : > { %s1310_s9 = smov [#allocation5]   ;;  %s1311_s11 = smov [#allocation8]  }
  0x10   : > { %p1407_p3 = pnand %p825_p0, %p242_p2  ;;  %s255_s10 = sshll.u32 %s1310_s9, 4  ;;  %s256_s10 = int_to_ptr.vmem [resolvable:$true] %s255_s10 }
  0x11   : > { %s276_s12 = sshll.u32 %s1311_s11, 4  ;;  %s1312_s14 = smov [#allocation7]   ;;  %s1420_s12 = int_to_ptr.vmem [resolvable:$true] %s276_s12 }
  0x12   : > { %s1786_s8 = scalar_select %p1407_p3, 1, 0 }
  0x13   : > { %p910_p5 = pneg %p1407_p3  ;;  %s1422_s15 = sshll.u32 %s1312_s14, 4  ;;  %s267_s15 = int_to_ptr.vmem [resolvable:$true] %s1422_s15 }
  0x14   : > { %s1788_s1 = sld [smem:[#allocation20_spill]] }
  0x15   : > { %p1416_p6 = pnand %p910_p5, %p1780_p1 }
  0x17   : > { %p1432_p8 = pneg %p1416_p6 }
  0x1a   : > { %s1016_s18 = scalar_lea.hbm %s1788_s1, 16 }
  0x1b   : > { %p1017_p7 = scmp.ne.s32.totalorder %s1788_s1, %s1016_s18  ;;  %p1023_p11 = scmp.lt.u32.totalorder %s1016_s18, %s1788_s1 }
  0x1d   : > { %p1019_p9 = pnand %p1432_p8, %p1017_p7 }
  0x1f   : > { %p1020_p10 = pneg %p1019_p9 }
  0x21   : > { %p1025_p12 = pnand %p1023_p11, %p1020_p10 }
  0x23   : > { %1028 = shalt.err (!%p1025_p12)
}
  0x24   : > { %s1029_s9 = scalar_lea.vmem %s256_s10, 16  ;;  %s1036_s11 = scalar_lea.vmem %s256_s10, 32 }
  0x25   : > { %p1030_p13 = scmp.ne.s32.totalorder %s256_s10, %s1029_s9  ;;  %p1037_p5 = scmp.lt.s32.totalorder %s256_s10, %s256_s10 }
  0x26   : > { %p1038_p4 = scmp.lt.s32.totalorder %s1036_s11, %s1029_s9 }
  0x27   : > { %p1032_p0 = pnand %p1030_p13, %p1432_p8 }
  0x28   : > { %p1039_p1 = por %p1038_p4, %p1037_p5 }
  0x29   : > { %p1033_p2 = pneg %p1032_p0 }
  0x2b   : > { %p1040_p3 = pnand %p1039_p1, %p1033_p2 }
  0x2d   : > { %1043 = shalt.err (!%p1040_p3)
}
  0x2e   : > { %913 = dma.hbm_to_vmem [thread:$0]  (!%p1416_p6), %s1788_s1, 16, %s256_s10, [#allocation6]  }
  0x2f   : > { %s1044_s19 = scalar_lea.hbm %s1775_s3, 256 }
  0x30   : > { %p1045_p7 = scmp.ne.s32.totalorder %s1775_s3, %s1044_s19  ;;  %p1051_p1 = scmp.lt.u32.totalorder %s1044_s19, %s1775_s3 }
  0x32   : > { %p1047_p9 = pnand %p1045_p7, %p1432_p8 }
  0x34   : > { %p1048_p4 = pneg %p1047_p9 }
  0x36   : > { %p1053_p3 = pnand %p1051_p1, %p1048_p4 }
  0x38   : > { %1056 = shalt.err (!%p1053_p3)
}
  0x39   : > { %s1057_s10 = scalar_lea.vmem %s1420_s12, 256  ;;  %p1065_p13 = scmp.lt.s32.totalorder %s1420_s12, %s1420_s12 }
  0x3a   : > { %p1058_p10 = scmp.ne.s32.totalorder %s1420_s12, %s1057_s10  ;;  %p1066_p0 = scmp.lt.s32.totalorder %s1057_s10, %s1057_s10 }
  0x3c   : > { %p1060_p11 = pnand %p1058_p10, %p1432_p8  ;;  %p1067_p2 = por %p1066_p0, %p1065_p13 }
  0x3e   : > { %p1061_p12 = pneg %p1060_p11 }
  0x40   : > { %p1068_p5 = pnand %p1067_p2, %p1061_p12 }
  0x42   : > { %1071 = shalt.err (!%p1068_p5)
}
  0x43   : > { %s1313_s11 = smov 64   ;;  %s1314_s14 = smov 4  }
  0x44   : > { %919 = dma.hbm_to_vmem [thread:$0]  (!%p1416_p6), %s1775_s3, 256, %s1420_s12, [#allocation9], %s1313_s11, %s1313_s11, %s1314_s14  }
  0x45   : > { %s1790_s2 = sld [smem:[#allocation21_spill]] }
  0x4b   : > { %s1072_s20 = scalar_lea.hbm %s1790_s2, 16 }
  0x4c   : > { %p1073_p7 = scmp.ne.s32.totalorder %s1790_s2, %s1072_s20  ;;  %p1079_p1 = scmp.lt.u32.totalorder %s1072_s20, %s1790_s2 }
  0x4e   : > { %p1075_p9 = pnand %p1073_p7, %p1432_p8 }
  0x50   : > { %p1076_p4 = pneg %p1075_p9 }
  0x52   : > { %p1081_p3 = pnand %p1079_p1, %p1076_p4 }
  0x54   : > { %1084 = shalt.err (!%p1081_p3)
}
  0x55   : > { %s1085_s16 = scalar_lea.vmem %s267_s15, 16  ;;  %s1092_s12 = scalar_lea.vmem %s267_s15, 32 }
  0x56   : > { %p1086_p10 = scmp.ne.s32.totalorder %s267_s15, %s1085_s16  ;;  %p1093_p13 = scmp.lt.s32.totalorder %s267_s15, %s267_s15 }
  0x57   : > { %p1094_p0 = scmp.lt.s32.totalorder %s1092_s12, %s1085_s16 }
  0x58   : > { %p1088_p11 = pnand %p1086_p10, %p1432_p8 }
  0x59   : > { %p1095_p2 = por %p1094_p0, %p1093_p13 }
  0x5a   : > { %p1089_p12 = pneg %p1088_p11 }
  0x5c   : > { %p1096_p5 = pnand %p1095_p2, %p1089_p12 }
  0x5e   : > { %1099 = shalt.err (!%p1096_p5)
}
  0x5f   : > { %916 = dma.hbm_to_vmem [thread:$0]  (!%p1416_p6), %s1790_s2, 16, %s267_s15, [#allocation6]  }
  0x60   : > { %s1315_s17 = smov [#allocation10]   ;;  %s1100_s22 = scalar_lea.hbm %s1776_s4, 16 }
  0x61   : > { %s290_s18 = sshll.u32 %s1315_s17, 4  ;;  %p1101_p7 = scmp.ne.s32.totalorder %s1776_s4, %s1100_s22  ;;  %s291_s18 = int_to_ptr.vmem [resolvable:$true] %s290_s18 }
  0x62   : > { %p1107_p1 = scmp.lt.u32.totalorder %s1100_s22, %s1776_s4 }
  0x63   : > { %p1103_p9 = pnand %p1101_p7, %p1432_p8 }
  0x65   : > { %p1104_p4 = pneg %p1103_p9 }
  0x67   : > { %p1109_p3 = pnand %p1107_p1, %p1104_p4 }
  0x69   : > { %1112 = shalt.err (!%p1109_p3)
}
  0x6a   : > { %s1113_s15 = scalar_lea.vmem %s291_s18, 16  ;;  %s1120_s12 = scalar_lea.vmem %s291_s18, 32 }
  0x6b   : > { %p1114_p10 = scmp.ne.s32.totalorder %s291_s18, %s1113_s15  ;;  %p1121_p13 = scmp.lt.s32.totalorder %s291_s18, %s291_s18 }
  0x6c   : > { %p1122_p0 = scmp.lt.s32.totalorder %s1120_s12, %s1113_s15 }
  0x6d   : > { %p1116_p11 = pnand %p1114_p10, %p1432_p8 }
  0x6e   : > { %p1123_p2 = por %p1122_p0, %p1121_p13 }
  0x6f   : > { %p1117_p12 = pneg %p1116_p11 }
  0x71   : > { %p1124_p5 = pnand %p1123_p2, %p1117_p12 }
  0x73   : > { %1127 = shalt.err (!%p1124_p5)
}
  0x74   : > { %922 = dma.hbm_to_vmem [thread:$0]  (!%p1416_p6), %s1776_s4, 16, %s291_s18, [#allocation9]  }
  0x75   : > { %s1782_s21 = sadd.s32 4294967294, %s1308_s29   ;;  %s41_s17 = sadd.s32 1, %s1304_s28 }
  0x76   : > { %p43_p8 = scmp.ge.s32.totalorder %s41_s17, 2  ;;  %s50_s13 = sadd.s32 1, %s1296_s26 }
  0x77   : > { %p57_p7 = scmp.ne.s32.totalorder %s1296_s26, %s1292_s25  ;;  %p58_p9 = scmp.eq.s32.totalorder %s1308_s29, 0 }
  0x78   : > { %s1813_s17 = smov (%p43_p8, %s41_s17), 0  ;;  %p63_p1 = scmp.ne.s32.totalorder %s1292_s25, %s1288_s24 }
  0x79   : > { %p1516_p4 = por %p58_p9, %p57_p7  ;;  %s45_s18 = ssub.s32 %s1304_s28, %s1813_s17 }
  0x7a   : > { %p173_p6 = scmp.eq.s32.totalorder %s1402_s30, 1  ;;  %p48_p3 = scmp.eq.s32.totalorder %s45_s18, 0 }
  0x7b   : > { %p1792_p10 = scmp.eq.s32.totalorder %s1402_s30, 0  ;;  %p179_p13 = scmp.eq.s32.totalorder %s1782_s21, 1 }
  0x7c   : > { %p1531_p12 = por %p173_p6, %p57_p7  ;;  %p941_p2 = scmp.lt.s32.totalorder %s1308_s29, 2 }
  0x7d   : > { %p1527_p11 = por %p1792_p10, %p63_p1  ;;  %p1540_p0 = por %p179_p13, %p63_p1 }
  0x7e   : > { %s1794_s22 = scalar_select %p1531_p12, 1, 0 }
  0x7f   : > { %s1538_s23 = scalar_select %p48_p3, %s1296_s26, %s50_s13  }
  0x80   : > { %s1795_s9 = scalar_select %p1540_p0, 1, 0 }
  0x81   : > { %s301_s10 = sand.u32 1, %s1296_s26   ;;  %s832_s16 = sshll.u32 %s1304_s28, 7 }
  0x82   : > { %s831_s15 = sshll.u32 %s301_s10, 3  ;;  %s1550_s14 = scalar_lea.hbm %s1772_s0, %s832_s16 }
  0x83   : > { %s305_s18 = scalar_lea.vmem [#allocation2], %s831_s15  ;;  %p1554_p5 = pnand %p941_p2, %p1516_p4 }
  0x84   : > { %s313_s13 = sshll.u32 %s305_s18, 4  ;;  %s302_s1 = scalar_lea.sflag [#allocation3], %s301_s10  ;;  %s1558_s13 = int_to_ptr.vmem [resolvable:$true] %s313_s13 }
  0x85   : > { %s1128_s2 = scalar_lea.hbm %s1550_s14, 128  ;;  %p1130_p7 = pneg %p1554_p5 }
  0x86   : > { %p1129_p8 = scmp.ne.s32.totalorder %s1550_s14, %s1128_s2  ;;  %s1133_s19 = scalar_lea.hbm %s1772_s0, 256 }
  0x87   : > { %p1134_p4 = scmp.lt.u32.totalorder %s1550_s14, %s1772_s0  ;;  %p1135_p6 = scmp.lt.u32.totalorder %s1133_s19, %s1128_s2 }
  0x88   : > { %p1131_p9 = pnand %p1130_p7, %p1129_p8  ;;  %p1137_p10 = scmp.lt.u32.totalorder %s1128_s2, %s1550_s14 }
  0x89   : > { %p1136_p3 = por %p1135_p6, %p1134_p4 }
  0x8a   : > { %p1132_p1 = pneg %p1131_p9 }
  0x8b   : > { %p1138_p13 = por %p1137_p10, %p1136_p3 }
  0x8d   : > { %p1139_p2 = pnand %p1138_p13, %p1132_p1 }
  0x8f   : > { %1142 = shalt.err (!%p1139_p2)
}
  0x90   : > { %s1143_s10 = scalar_lea.vmem %s1558_s13, 128  ;;  %s1316_s18 = smov [#allocation2]  }
  0x91   : > { %p1144_p8 = scmp.ne.s32.totalorder %s1558_s13, %s1143_s10  ;;  %s1148_s16 = sshll.u32 %s1316_s18, 4  ;;  %s1149_s16 = int_to_ptr.vmem [resolvable:$false] %s1148_s16 }
  0x92   : > { %s1150_s15 = scalar_lea.vmem %s1149_s16, 256  ;;  %p1151_p12 = scmp.lt.s32.totalorder %s1558_s13, %s1149_s16 }
  0x93   : > { %p1146_p9 = pnand %p1144_p8, %p1130_p7  ;;  %p1152_p4 = scmp.lt.s32.totalorder %s1150_s15, %s1143_s10 }
  0x95   : > { %p1147_p0 = pneg %p1146_p9  ;;  %p1153_p6 = por %p1152_p4, %p1151_p12 }
  0x97   : > { %p1154_p3 = pnand %p1153_p6, %p1147_p0 }
  0x99   : > { %1157 = shalt.err (!%p1154_p3)
}
  0x9a   : > { %926 = dma.hbm_to_vmem [thread:$0]  (!%p1554_p5), %s1550_s14, 128, %s1558_s13, %s302_s1  }
  0x9b   : > { %p1797_p1 = scmp.ne.s32.totalorder %s1786_s8, 0 }
  0x9c   : > { %s1588_s2 = sand.u32 (!%p1797_p1), 1, %s1292_s25  }
  0x9d   : > { %322 = sbr.rel (%p1797_p1) target bundleno = 996 (0x3e4), region = 40  ;;  %s834_s19 = sshll.u32 (!%p1797_p1), %s1588_s2, 3 }
  0x9e   : > { %s325_s12 = scalar_lea.sflag (!%p1797_p1), [#allocation3], %s1588_s2  ;;  %s328_s11 = scalar_lea.vmem (!%p1797_p1), [#allocation2], %s834_s19 }
  0xa4   : > { %1267 = dma.done.wait (%p1527_p11), %s325_s12, 128  }
  0xa5   : > { %1269 = vsyncadd (%p1527_p11), %s325_s12, 4294967168  ;;  %p1798_p12 = scmp.eq.s32.totalorder %s1402_s30, 0 }
  0xa7   : > { %1271 = dma.done.wait (%p1798_p12), [#allocation6], 32   ;;  %p1799_p0 = pmov %p1798_p12 }
  0xa9   : > { %1273 = vsyncadd (%p1799_p0), [#allocation6], 4294967264  ;;  %p1800_p5 = pmov %p1799_p0 }
  0xaa   : > { %p1801_p7 = pmov %p1799_p0 }
  0xab   : > { %1275 = dma.done.wait (%p1800_p5), [#allocation9], 272  }
  0xac   : > { %1277 = vsyncadd (%p1801_p7), [#allocation9], 4294967024  ;;  %vm389_vm0 = vcmask 261120   ;;  %v386_v0 = vld [vmem:[%s328_s11] sm:$0xff]  ;;  %v1012_v7 = vld [vmem:[#allocation8] sm:$0xff]   ;;  %v1317_v8 = vmov 0.0  }
  0xad   : > { %v390_v1 = vsel %vm389_vm0, %v386_v0, 0.0  ;;  %878 = vmatprep.subr.bf16.mxu0 %v1317_v8  ;;  %vm1318_vm1 = vmmov 0   ;;  %v1013_v9 = vld [vmem:[#allocation8 + $0x8] sm:$0xff]   ;;  %v842_v14 = vld [vmem:[#allocation5] ss:$0 sm:$0xff]  ;;  %s1608_s1 = sshll.u32 %s1588_s2, 4 }
  0xae   : > { %391 = vadd.xlane.f32.xlu0 %v390_v1  ;;  %882 = vmatprep.mubr.msk.bf16.mxu0 %vm1318_vm1, %v1317_v8  ;;  %v843_v16 = vld [vmem:[#allocation7] ss:$0 sm:$0xff]  ;;  %v844_v20 = vld [vmem:[#allocation10] ss:$0 sm:$0xff]  ;;  %s1319_s8 = smov 96   ;;  %vm524_vm2 = vcmask 60416  }
  0xaf   : > { %879 = vmatpush3.bf16.msra.mxu0 %v1012_v7  ;;  %s1320_s21 = smov 64   ;;  %s1321_s20 = smov 120  }
  0xb0   : > { %880 = vmatprep.subr.bf16.mxu0 %v1317_v8  ;;  %s1612_s14 = scalar_lea.vmem [#allocation11], %s1608_s1  ;;  %s1322_s13 = smov 56  }
  0xb1   : > { %s1323_s10 = smov 48   ;;  %s1324_s18 = smov 40  }
  0xb2   : > { %s1325_s16 = smov 112   ;;  %s1326_s15 = smov 104  }
  0xb3   : > { %881 = vmatpush3.bf16.msra.mxu0 %v1013_v9  ;;  %s1617_s19 = scalar_lea.vmem [#allocation14], %s1608_s1  ;;  %s602_s12 = sshll.u32 %s1612_s14, 4  ;;  %s1635_s12 = int_to_ptr.vmem [resolvable:$true] %s602_s12 }
  0xb4   : > { %s1631_s11 = sshll.u32 %s1300_s27, 8  ;;  %p1802_p10 = scmp.ne.s32.totalorder %s1794_s22, 0 }
  0xb5   : > { %s1327_s27 = smov [#allocation11]  }
 0x13b   : > { %v392_v2 = vpop.xlane.xlu0 %391 }
 0x13c   : > { %v394_v3 = vmul.f32 0.03125, %v392_v2 }
 0x13e   : > { %v395_v4 = vsub.f32 %v386_v0, %v394_v3 }
 0x140   : > { %v396_v5 = vmul.f32 %v395_v4, %v395_v4 }
 0x142   : > { %v397_v6 = vsel %vm389_vm0, %v396_v5, 0.0 }
 0x143   : > { %398 = vadd.xlane.f32.xlu0 %v397_v6 }
 0x1d0   : > { %v399_v10 = vpop.xlane.xlu0 %398 }
 0x1d1   : > { %v400_v11 = vmul.f32 0.03125, %v399_v10 }
 0x1d3   : > { %v401_v12 = vadd.f32 1e-05, %v400_v11 }
 0x1d5   : > { %1014 = vrsqrt.f32 %v401_v12 }
 0x1df   : > { %v1015_v13 = vpop.eup %1014 }
 0x1e0   : > { %v403_v15 = vmul.f32 %v1015_v13, %v395_v4 }
 0x1e2   : > { %v410_v17 = vmul.f32 %v842_v14, %v403_v15 }
 0x1e4   : > { %v417_v18 = vadd.f32 %v843_v16, %v410_v17 }
 0x1e6   : > { %v418_v19 = vpack.c.bf16 %v417_v18, %v417_v18 }
 0x1e8   : > { %883 = vmatmul.mubr.msk.bf16.vlgmr.msra.gmra.mrb[0].mxu0 %vm389_vm0, %v418_v19 }
 0x2bb   : > { %v479_v21 = vpop.f32.mrb[0].mxu0 }
 0x2bc   : > { %v480_v22 = vadd.f32 %v844_v20, %v479_v21  ;;  %v884_v23 = vpop.f32.mrb[1].mxu0 }
 0x2bd   : > { %v482_v24 = vpop.f32.mrb[2].mxu0 }
 0x2be   : > { %v485_v25 = vmul.f32 0.35355338, %v480_v22  ;;  %488 = vrot.lane.b32.xlu1 %v480_v22, %s1319_s8  ;;  %v885_v26 = vpop.f32.mrb[3].mxu0  ;;  %v870_v28 = vpack.c.bf16 %v480_v22, %v480_v22 }
 0x2c0   : > { %v486_v27 = vpack.c.bf16 %v485_v25, %v485_v25 }
 0x2c2   : > { %531 = vrot.lane.b32.xlu1 %v870_v28, %s1320_s21  ;;  %538 = vrot.lane.b32.xlu0 %v486_v27, %s1321_s20  ;;  %525 = vst.msk [vmem:[%s1612_s14] sm:$0xf] %vm524_vm2, %v486_v27 }
 0x2c6   : > { %546 = vrot.lane.b32.xlu1 %v870_v28, %s1322_s13  ;;  %s1641_s13 = scalar_lea.hbm %s1777_s5, %s1631_s11 }
 0x2ca   : > { %559 = vrot.lane.b32.xlu1 %v870_v28, %s1323_s10 }
 0x2ce   : > { %572 = vrot.lane.b32.xlu1 %v870_v28, %s1324_s18  ;;  %s1158_s18 = scalar_lea.vmem %s1635_s12, 256 }
 0x2cf   : > { %p1159_p11 = scmp.ne.s32.totalorder %s1635_s12, %s1158_s18 }
 0x2d1   : > { %p1160_p13 = pnand %p1159_p11, %p1802_p10 }
 0x2d2   : > { %551 = vrot.lane.b32.xlu1 %v486_v27, %s1325_s16  ;;  %s1162_s16 = sshll.u32 %s1327_s27, 4  ;;  %s1163_s16 = int_to_ptr.vmem [resolvable:$false] %s1162_s16 }
 0x2d3   : > { %p1161_p2 = pneg %p1160_p13  ;;  %p1165_p8 = scmp.lt.s32.totalorder %s1635_s12, %s1163_s16 }
 0x2d6   : > { %564 = vrot.lane.b32.xlu1 %v486_v27, %s1326_s15  ;;  %s1164_s15 = scalar_lea.vmem %s1163_s16, 512 }
 0x2d7   : > { %p1166_p9 = scmp.lt.s32.totalorder %s1164_s15, %s1158_s18 }
 0x2d9   : > { %p1167_p4 = por %p1166_p9, %p1165_p8 }
 0x2db   : > { %p1168_p6 = pnand %p1167_p4, %p1161_p2 }
 0x330   : > { %v489_v29 = vpop.permute.xlu1 %488 }
 0x331   : > { %491 = vxpose.xlu1.b32.start.end [1/1] (short) (narrow) %v489_v29, 32 }
 0x334   : > { %v532_v30 = vpop.permute.xlu1 %531  ;;  %v539_v31 = vpop.permute.xlu0 %538 }
 0x335   : > { %534 = vst.msk [vmem:[%s1617_s19] sm:$0xf] %vm524_vm2, %v532_v30  ;;  %850 = vst.msk [vmem:[%s1612_s14 + $0x4] sm:$0xf] %vm524_vm2, %v539_v31 }
 0x338   : > { %v547_v32 = vpop.permute.xlu1 %546 }
 0x339   : > { %852 = vst.msk [vmem:[%s1617_s19 + $0x4] sm:$0xf] %vm524_vm2, %v547_v32 }
 0x33c   : > { %v560_v33 = vpop.permute.xlu1 %559 }
 0x33d   : > { %855 = vst.msk [vmem:[%s1617_s19 + $0x8] sm:$0xf] %vm524_vm2, %v560_v33 }
 0x340   : > { %v573_v34 = vpop.permute.xlu1 %572 }
 0x341   : > { %858 = vst.msk [vmem:[%s1617_s19 + $0xc] sm:$0xf] %vm524_vm2, %v573_v34 }
 0x344   : > { %v552_v35 = vpop.permute.xlu1 %551 }
 0x345   : > { %853 = vst.msk [vmem:[%s1612_s14 + $0x8] sm:$0xf] %vm524_vm2, %v552_v35 }
 0x348   : > { %v565_v36 = vpop.permute.xlu1 %564 }
 0x349   : > { %856 = vst.msk [vmem:[%s1612_s14 + $0xc] sm:$0xf] %vm524_vm2, %v565_v36 }
 0x34a   : > { %1171 = shalt.err (!%p1168_p6)
}
 0x34b   : > { %s1172_s14 = scalar_lea.hbm %s1641_s13, 256  ;;  %s1176_s27 = scalar_lea.hbm %s1777_s5, 512 }
 0x34c   : > { %p1173_p3 = scmp.ne.s32.totalorder %s1641_s13, %s1172_s14  ;;  %p1177_p0 = scmp.lt.u32.totalorder %s1641_s13, %s1777_s5 }
 0x34d   : > { %p1178_p5 = scmp.lt.u32.totalorder %s1176_s27, %s1172_s14  ;;  %p1180_p11 = scmp.lt.u32.totalorder %s1172_s14, %s1641_s13 }
 0x34e   : > { %p1174_p1 = pnand %p1173_p3, %p1802_p10 }
 0x34f   : > { %p1179_p7 = por %p1178_p5, %p1177_p0 }
 0x350   : > { %p1175_p12 = pneg %p1174_p1 }
 0x351   : > { %p1181_p13 = por %p1180_p11, %p1179_p7 }
 0x353   : > { %p1182_p2 = pnand %p1181_p13, %p1175_p12 }
 0x355   : > { %1185 = shalt.err (!%p1182_p2)
}
 0x356   : > { %s1328_s18 = smov 4   ;;  %s1803_s15 = scalar_lea.sflag [#allocation4], %s1588_s2 }
 0x357   : > { %904 = dma.vmem_to_hbm [thread:$0]  (%p1802_p10), %s1635_s12, 256, %s1641_s13, %s1803_s15, %s1320_s21, %s1320_s21, %s1328_s18  }
 0x358   : > { %s377_s10 = scalar_lea.vmem [#allocation12], %s1608_s1  ;;  %s582_s14 = sand.u32 1, %s1402_s30  }
 0x359   : > { %s619_s2 = sshll.u32 %s377_s10, 4  ;;  %s636_s8 = sshll.u32 %s1617_s19, 4  ;;  %s1678_s2 = int_to_ptr.vmem [resolvable:$true] %s619_s2  ;;  %s1686_s8 = int_to_ptr.vmem [resolvable:$true] %s636_s8 }
 0x35a   : > { %s1684_s13 = scalar_lea.hbm %s1778_s6, %s1631_s11  ;;  %s1692_s30 = scalar_lea.hbm %s1779_s7, %s1631_s11 }
 0x35b   : > { %s1695_s19 = scalar_lea.sflag [#allocation13], %s582_s14  ;;  %s1186_s16 = scalar_lea.vmem %s1678_s2, 256 }
 0x35c   : > { %p1187_p8 = scmp.ne.s32.totalorder %s1678_s2, %s1186_s16  ;;  %s1329_s15 = smov [#allocation12]  }
 0x35d   : > { %s1190_s1 = sshll.u32 %s1329_s15, 4  ;;  %s1191_s1 = int_to_ptr.vmem [resolvable:$false] %s1190_s1 }
 0x35e   : > { %p1188_p9 = pnand %p1187_p8, %p1802_p10  ;;  %s1192_s12 = scalar_lea.vmem %s1191_s1, 512 }
 0x35f   : > { %p1193_p6 = scmp.lt.s32.totalorder %s1678_s2, %s1191_s1  ;;  %p1194_p3 = scmp.lt.s32.totalorder %s1192_s12, %s1186_s16 }
 0x360   : > { %p1189_p4 = pneg %p1188_p9 }
 0x361   : > { %p1195_p1 = por %p1194_p3, %p1193_p6 }
 0x363   : > { %p1196_p12 = pnand %p1195_p1, %p1189_p4 }
 0x3b1   : > { %v507_v37 = vpop.trf.xlu1 }
 0x3b2   : > { %v526_v38 = vpack.c.bf16 %v507_v37, %v507_v37 }
 0x3b4   : > { %527 = vst.msk [vmem:[%s377_s10] sm:$0xf] %vm524_vm2, %v526_v38 }
 0x3b5   : > { %v508_v39 = vpop.trf.xlu1 }
 0x3b6   : > { %v543_v40 = vpack.c.bf16 %v508_v39, %v508_v39 }
 0x3b8   : > { %851 = vst.msk [vmem:[%s377_s10 + $0x4] sm:$0xf] %vm524_vm2, %v543_v40 }
 0x3b9   : > { %v509_v41 = vpop.trf.xlu1 }
 0x3ba   : > { %v556_v42 = vpack.c.bf16 %v509_v41, %v509_v41 }
 0x3bc   : > { %854 = vst.msk [vmem:[%s377_s10 + $0x8] sm:$0xf] %vm524_vm2, %v556_v42 }
 0x3bd   : > { %v510_v43 = vpop.trf.xlu1 }
 0x3be   : > { %v569_v44 = vpack.c.bf16 %v510_v43, %v510_v43 }
 0x3c0   : > { %857 = vst.msk [vmem:[%s377_s10 + $0xc] sm:$0xf] %vm524_vm2, %v569_v44 }
 0x3c1   : > { %1199 = shalt.err (!%p1196_p12)
}
 0x3c2   : > { %s1200_s11 = scalar_lea.hbm %s1684_s13, 256  ;;  %s1204_s20 = scalar_lea.hbm %s1778_s6, 512 }
 0x3c3   : > { %p1201_p0 = scmp.ne.s32.totalorder %s1684_s13, %s1200_s11  ;;  %p1205_p11 = scmp.lt.u32.totalorder %s1684_s13, %s1778_s6 }
 0x3c4   : > { %p1206_p13 = scmp.lt.u32.totalorder %s1204_s20, %s1200_s11  ;;  %p1208_p8 = scmp.lt.u32.totalorder %s1200_s11, %s1684_s13 }
 0x3c5   : > { %p1202_p5 = pnand %p1201_p0, %p1802_p10 }
 0x3c6   : > { %p1207_p2 = por %p1206_p13, %p1205_p11 }
 0x3c7   : > { %p1203_p7 = pneg %p1202_p5 }
 0x3c8   : > { %p1209_p9 = por %p1208_p8, %p1207_p2 }
 0x3ca   : > { %p1210_p4 = pnand %p1209_p9, %p1203_p7 }
 0x3cc   : > { %1213 = shalt.err (!%p1210_p4)
}
 0x3cd   : > { %905 = dma.vmem_to_hbm [thread:$0]  (%p1802_p10), %s1678_s2, 256, %s1684_s13, %s1695_s19, %s1320_s21, %s1320_s21, %s1328_s18  }
 0x3ce   : > { %s1214_s16 = scalar_lea.vmem %s1686_s8, 256  ;;  %s1330_s1 = smov [#allocation14]  }
 0x3cf   : > { %p1215_p6 = scmp.ne.s32.totalorder %s1686_s8, %s1214_s16  ;;  %s1218_s12 = sshll.u32 %s1330_s1, 4  ;;  %s1219_s12 = int_to_ptr.vmem [resolvable:$false] %s1218_s12 }
 0x3d0   : > { %s1220_s11 = scalar_lea.vmem %s1219_s12, 512  ;;  %p1221_p12 = scmp.lt.s32.totalorder %s1686_s8, %s1219_s12 }
 0x3d1   : > { %p1216_p3 = pnand %p1215_p6, %p1802_p10  ;;  %p1222_p0 = scmp.lt.s32.totalorder %s1220_s11, %s1214_s16 }
 0x3d3   : > { %p1217_p1 = pneg %p1216_p3  ;;  %p1223_p5 = por %p1222_p0, %p1221_p12 }
 0x3d5   : > { %p1224_p7 = pnand %p1223_p5, %p1217_p1 }
 0x3d7   : > { %1227 = shalt.err (!%p1224_p7)
}
 0x3d8   : > { %s1228_s2 = scalar_lea.hbm %s1692_s30, 256  ;;  %s1232_s14 = scalar_lea.hbm %s1779_s7, 512 }
 0x3d9   : > { %p1229_p11 = scmp.ne.s32.totalorder %s1692_s30, %s1228_s2  ;;  %p1233_p8 = scmp.lt.u32.totalorder %s1692_s30, %s1779_s7 }
 0x3da   : > { %p1234_p9 = scmp.lt.u32.totalorder %s1232_s14, %s1228_s2  ;;  %p1236_p6 = scmp.lt.u32.totalorder %s1228_s2, %s1692_s30 }
 0x3db   : > { %p1230_p13 = pnand %p1229_p11, %p1802_p10 }
 0x3dc   : > { %p1235_p4 = por %p1234_p9, %p1233_p8 }
 0x3dd   : > { %p1231_p2 = pneg %p1230_p13 }
 0x3de   : > { %p1237_p3 = por %p1236_p6, %p1235_p4 }
 0x3e0   : > { %p1238_p1 = pnand %p1237_p3, %p1231_p2 }
 0x3e2   : > { %1241 = shalt.err (!%p1238_p1)
}
 0x3e3   : > { %906 = dma.vmem_to_hbm [thread:$0]  (%p1802_p10), %s1686_s8, 256, %s1692_s30, %s1695_s19, %s1320_s21, %s1320_s21, %s1328_s18  }
 0x3e4 PF: > { %s651_s15 = sand.u32 1, %s1288_s24   ;;  %p1804_p12 = scmp.ne.s32.totalorder %s1795_s9, 0 }
 0x3e5   : > { %p1805_p0 = scmp.ge.s32.totalorder %s1308_s29, 2  ;;  %s652_s16 = scalar_lea.sflag [#allocation4], %s651_s15 }
 0x3e7   : > { %p928_p5 = pnand %p1805_p0, %p1804_p12 }
 0x3e9   : > { %1279 = dma.done.wait (!%p928_p5), %s652_s16, 256  }
 0x3ea   : > { %1281 = vsyncadd (!%p928_p5), %s652_s16, 4294967040  ;;  %s1806_s22 = sadd.s32 4294967294, %s1308_s29  }
 0x3eb   : > { %s660_s1 = sand.u32 1, %s1806_s22  }
 0x3ec   : > { %s661_s12 = scalar_lea.sflag [#allocation13], %s660_s1 }
 0x3ed   : > { %1283 = dma.done.wait (!%p928_p5), %s661_s12, 512  }
 0x3ee   : > { %1285 = vsyncadd (!%p928_p5), %s661_s12, 4294966784  ;;  %s29_s29 = sadd.s32 1, %s1308_s29   ;;  %s1807_s24 = smov %s1292_s25 }
 0x3ef   : > { %p26_p10 = scmp.ge.s32.totalorder %s29_s29, 4   ;;  %s1808_s25 = smov %s1296_s26 }
 0x3f0   : > { %s1809_s26 = smov %s1538_s23  ;;  %s1810_s27 = smov %s1304_s28 }
 0x3f1   : > { %s1811_s28 = smov %s1813_s17  ;;  %28 = sbr.rel (!%p26_p10) target bundleno = 13 (0xd), region = 142 }
 0x3f8   :  { %675 = vsyncpa [#allocation3], 1 }
 0x3f9   :  { %677 = vsyncpa [#allocation3 + $0x1], 1 }
 0x3fa   :  { %678 = vsyncpa [#allocation6], 1 }
 0x3fb   :  { %679 = vsyncpa [#allocation9], 1 }
 0x3fc   :  { %680 = vsyncpa [#allocation4], 1 }
 0x3fd   :  { %682 = vsyncpa [#allocation4 + $0x1], 1 }
 0x3fe   :  { %683 = vsyncpa [#allocation13], 1 }
 0x3ff   :  { %685 = vsyncpa [#allocation13 + $0x1], 1 }

// kernel: block_forward.3
= control target key start
LH: loop header
LB: loop body
LE: loop exit
PB: predicated region body
PF: predicated region fallthrough
CT: control target
= control target key end

     0   :  { %s4728_s0 = inlined_call_operand.<no memory space> [shape: s32[1], index: 0, kind: input, shape index: {}, may-alias: {0,1}]   ;;  %s4729_s1 = inlined_call_operand.<no memory space> [shape: s32[1], index: 1, kind: input, shape index: {}, may-alias: {0,1}]   ;;  %s4730_s2 = inlined_call_operand.hbm [shape: f32[2,8,32], index: 2, kind: input, shape index: {}]   ;;  %s4731_s3 = inlined_call_operand.hbm [shape: bf16[2,4,8,8], index: 3, kind: input, shape index: {}]   ;;  %s4732_s4 = inlined_call_operand.hbm [shape: bf16[2,4,8,8], index: 4, kind: input, shape index: {}]   ;;  %s4733_s5 = inlined_call_operand.hbm [shape: bf16[2,4,8,8], index: 5, kind: input, shape index: {}]   ;;  %s4734_s6 = inlined_call_operand.hbm [shape: bf16[4,8,32], index: 6, kind: input, shape index: {}]   ;;  %s4735_s7 = inlined_call_operand.hbm [shape: f32[1,32], index: 7, kind: input, shape index: {}]   ;;  %s4736_s8 = inlined_call_operand.hbm [shape: f32[1,32], index: 8, kind: input, shape index: {}]   ;;  %s4737_s9 = inlined_call_operand.hbm [shape: f32[1,32], index: 9, kind: input, shape index: {}]   ;;  %s4738_s10 = inlined_call_operand.hbm [shape: bf16[32,128], index: 10, kind: input, shape index: {}]   ;;  %s4739_s11 = inlined_call_operand.hbm [shape: f32[1,128], index: 11, kind: input, shape index: {}]   ;;  %s4740_s12 = inlined_call_operand.hbm [shape: bf16[128,32], index: 12, kind: input, shape index: {}]   ;;  %s4741_s13 = inlined_call_operand.hbm [shape: f32[1,32], index: 13, kind: input, shape index: {}]   ;;  %s4742_s14 = inlined_call_operand.hbm [shape: f32[2,8,32], index: 14, kind: output, shape index: {}]  }
   0x1   :  { %4785 = sst [smem:[#allocation56_spill]] %s4730_s2 }
   0x2   :  { %4786 = sst [smem:[#allocation57_spill]] %s4731_s3 }
   0x3   :  { %4787 = sst [smem:[#allocation58_spill]] %s4732_s4 }
   0x4   :  { %4788 = sst [smem:[#allocation59_spill]] %s4733_s5 }
   0x5   :  { %4789 = sst [smem:[#allocation60_spill]] %s4734_s6 }
   0x6   :  { %4790 = sst [smem:[#allocation61_spill]] %s4735_s7 }
   0x7   :  { %4791 = sst [smem:[#allocation62_spill]] %s4736_s8 }
   0x8   :  { %4792 = sst [smem:[#allocation63_spill]] %s4737_s9 }
   0x9   :  { %4793 = sst [smem:[#allocation64_spill]] %s4738_s10 }
   0xa   :  { %4794 = sst [smem:[#allocation65_spill]] %s4739_s11 }
   0xb   :  { %4795 = sst [smem:[#allocation66_spill]] %s4740_s12 }
   0xc   :  { %4796 = sst [smem:[#allocation67_spill]] %s4741_s13 }
   0xd   :  { %4797 = sst [smem:[#allocation68_spill]] %s4742_s14 }
   0xe   :  { %19 = sst [smem:[#allocation6]] %s4728_s0 }
   0xf   :  { %20 = sst [smem:[#allocation7]] %s4729_s1 }
  0x10   :  { %21 = vsyncpa [#allocation9], 0 }
  0x11   :  { %23 = vsyncpa [#allocation9 + $0x1], 0 }
  0x12   :  { %24 = vsyncpa [#allocation12], 0 }
  0x13   :  { %26 = vsyncpa [#allocation12 + $0x1], 0 }
  0x14   :  { %27 = vsyncpa [#allocation15], 0 }
  0x15   :  { %29 = vsyncpa [#allocation15 + $0x1], 0 }
  0x16   :  { %30 = vsyncpa [#allocation18], 0 }
  0x17   :  { %31 = vsyncpa [#allocation21], 0 }
  0x18   :  { %32 = vsyncpa [#allocation24], 0 }
  0x19   :  { %33 = vsyncpa [#allocation27], 0 }
  0x1a   :  { %34 = vsyncpa [#allocation10], 0 }
  0x1b   :  { %36 = vsyncpa [#allocation10 + $0x1], 0  ;;  %s3729_s17 = smov 0   ;;  %s3731_s18 = smov 0  }
  0x1c   :  { %s3733_s0 = smov 0   ;;  %s3735_s19 = smov 0  }
  0x1d   :  { %s3737_s1 = smov 0   ;;  %s3739_s20 = smov 0  }
  0x1e   :  { %s3741_s21 = smov 0   ;;  %s3743_s22 = smov 0  }
  0x1f   :  { %s3745_s23 = smov 0   ;;  %s3747_s24 = smov 0  }
  0x20   :  { %s3749_s25 = smov 0   ;;  %s3751_s26 = smov 0  }
  0x21   :  { %s3753_s27 = smov 0   ;;  %s3755_s28 = smov 0  }
  0x22   :  { %s3757_s29 = smov 0   ;;  %s3759_s30 = smov 0  }
  0x23   :  { %s3761_s15 = smov 0   ;;  %s3763_s16 = smov 0  }
  0x24 LB: > { %4798 = sst [smem:[#allocation39_spill]] %s3563_s0  ;;  %s3820_s14 = sadd.s32 4294967295, %s3623_s16   ;;  %s3623_s16 = sphi %s3763_s16, %s42_s16   ;;  %s3619_s15 = sphi %s3761_s15, %s4919_s15   ;;  %s3615_s30 = sphi %s3759_s30, %s4918_s30   ;;  %s3611_s29 = sphi %s3757_s29, %s4917_s29   ;;  %s3607_s28 = sphi %s3755_s28, %s4916_s28   ;;  %s3603_s27 = sphi %s3753_s27, %s4904_s27   ;;  %s3599_s26 = sphi %s3751_s26, %s4915_s26   ;;  %s3595_s25 = sphi %s3749_s25, %s4914_s25   ;;  %s3591_s24 = sphi %s3747_s24, %s4913_s24   ;;  %s3587_s23 = sphi %s3745_s23, %s4912_s23   ;;  %s3583_s22 = sphi %s3743_s22, %s4901_s22   ;;  %s3579_s21 = sphi %s3741_s21, %s4900_s21   ;;  %s3575_s20 = sphi %s3739_s20, %s4911_s20   ;;  %s3571_s1 = sphi %s3737_s1, %s4910_s1   ;;  %s3567_s19 = sphi %s3735_s19, %s4898_s19   ;;  %s3563_s0 = sphi %s3733_s0, %s4897_s0   ;;  %s3559_s18 = sphi %s3731_s18, %s4909_s18   ;;  %s3555_s17 = sphi %s3729_s17, %s4907_s17  }
  0x25   : > { %4799 = sst [smem:[#allocation40_spill]] %s3567_s19  ;;  %p2469_p0 = scmp.ge.s32.totalorder %s3623_s16, 1 }
  0x26   : > { %4800 = sst [smem:[#allocation41_spill]] %s3571_s1  ;;  %p4757_p1 = scmp.eq.s32.totalorder %s3820_s14, 0 }
  0x27   : > { %4801 = sst [smem:[#allocation42_spill]] %s3575_s20  ;;  %p377_p2 = scmp.lt.s32.totalorder %s3623_s16, 3 }
  0x28   : > { %4802 = sst [smem:[#allocation43_spill]] %s3579_s21  ;;  %s3626_s20 = smov [#allocation17]  }
  0x29   : > { %4803 = sst [smem:[#allocation44_spill]] %s3583_s22  ;;  %p3825_p3 = pnand %p2469_p0, %p377_p2 }
  0x2a   : > { %4804 = sst [smem:[#allocation45_spill]] %s3587_s23  ;;  %s403_s4 = sshll.u32 %s3626_s20, 4  ;;  %s3840_s4 = int_to_ptr.vmem [resolvable:$true] %s403_s4 }
  0x2b   : > { %4805 = sst [smem:[#allocation46_spill]] %s3599_s26  ;;  %p2789_p4 = pneg %p3825_p3 }
  0x2c   : > { %4806 = sst [smem:[#allocation47_spill]] %s3603_s27  ;;  %s3627_s21 = smov [#allocation20]  }
  0x2d   : > { %4807 = sst [smem:[#allocation48_spill]] %s3607_s28  ;;  %p3836_p6 = pnand %p2789_p4, %p4757_p1 }
  0x2e   : > { %4808 = sst [smem:[#allocation49_spill]] %s3611_s29  ;;  %s3842_s22 = sshll.u32 %s3627_s21, 4  ;;  %s426_s22 = int_to_ptr.vmem [resolvable:$true] %s3842_s22 }
  0x2f   : > { %4809 = sst [smem:[#allocation50_spill]] %s3615_s30  ;;  %s3625_s30 = smov [#allocation16]  }
  0x30   : > { %s4810_s5 = scalar_select %p3825_p3, 1, 0 }
  0x31   : > { %s389_s19 = sshll.u32 %s3625_s30, 4  ;;  %s4813_s6 = sld [smem:[#allocation60_spill]]  ;;  %s3829_s19 = int_to_ptr.vmem [resolvable:$true] %s389_s19 }
  0x32   : > { %4811 = sst [smem:[#allocation51_spill]] %s4810_s5  ;;  %p3852_p8 = pneg %p3836_p6 }
  0x33   : > { %s4812_s1 = scalar_select %p3836_p6, 1, 0 }
  0x37   : > { %s3069_s2 = scalar_lea.hbm %s4813_s6, 256 }
  0x38   : > { %p3070_p7 = scmp.ne.s32.totalorder %s4813_s6, %s3069_s2  ;;  %p3076_p11 = scmp.lt.u32.totalorder %s3069_s2, %s4813_s6 }
  0x3a   : > { %p3072_p9 = pnand %p3852_p8, %p3070_p7 }
  0x3c   : > { %p3073_p10 = pneg %p3072_p9 }
  0x3e   : > { %p3078_p12 = pnand %p3076_p11, %p3073_p10 }
  0x40   : > { %3081 = shalt.err (!%p3078_p12)
}
  0x41   : > { %s3082_s5 = scalar_lea.vmem %s3829_s19, 256  ;;  %p3090_p4 = scmp.lt.s32.totalorder %s3829_s19, %s3829_s19 }
  0x42   : > { %p3083_p13 = scmp.ne.s32.totalorder %s3829_s19, %s3082_s5  ;;  %p3091_p5 = scmp.lt.s32.totalorder %s3082_s5, %s3082_s5 }
  0x44   : > { %p3085_p0 = pnand %p3083_p13, %p3852_p8  ;;  %p3092_p7 = por %p3091_p5, %p3090_p4 }
  0x46   : > { %p3086_p2 = pneg %p3085_p0 }
  0x48   : > { %p3093_p9 = pnand %p3092_p7, %p3086_p2 }
  0x4a   : > { %3096 = shalt.err (!%p3093_p9)
}
  0x4b   : > { %s4759_s23 = smov 64   ;;  %s4761_s2 = smov 4  }
  0x4c   : > { %2792 = dma.hbm_to_vmem [thread:$0]  (!%p3836_p6), %s4813_s6, 256, %s3829_s19, [#allocation15], %s4759_s23, %s4759_s23, %s4761_s2  }
  0x4d   : > { %s4815_s7 = sld [smem:[#allocation61_spill]] }
  0x53   : > { %s3097_s5 = scalar_lea.hbm %s4815_s7, 16 }
  0x54   : > { %p3098_p5 = scmp.ne.s32.totalorder %s4815_s7, %s3097_s5  ;;  %p3104_p12 = scmp.lt.u32.totalorder %s3097_s5, %s4815_s7 }
  0x56   : > { %p3100_p10 = pnand %p3098_p5, %p3852_p8 }
  0x58   : > { %p3101_p11 = pneg %p3100_p10 }
  0x5a   : > { %p3106_p13 = pnand %p3104_p12, %p3101_p11 }
  0x5c   : > { %3109 = shalt.err (!%p3106_p13)
}
  0x5d   : > { %s3110_s19 = scalar_lea.vmem %s3840_s4, 16  ;;  %s3117_s13 = scalar_lea.vmem %s3840_s4, 32 }
  0x5e   : > { %p3111_p0 = scmp.ne.s32.totalorder %s3840_s4, %s3110_s19  ;;  %p3118_p7 = scmp.lt.s32.totalorder %s3840_s4, %s3840_s4 }
  0x5f   : > { %p3119_p9 = scmp.lt.s32.totalorder %s3117_s13, %s3110_s19 }
  0x60   : > { %p3113_p2 = pnand %p3111_p0, %p3852_p8 }
  0x61   : > { %p3120_p5 = por %p3119_p9, %p3118_p7 }
  0x62   : > { %p3114_p4 = pneg %p3113_p2 }
  0x64   : > { %p3121_p10 = pnand %p3120_p5, %p3114_p4 }
  0x66   : > { %3124 = shalt.err (!%p3121_p10)
}
  0x67   : > { %2795 = dma.hbm_to_vmem [thread:$0]  (!%p3836_p6), %s4815_s7, 16, %s3840_s4, [#allocation18]  }
  0x68   : > { %s4816_s9 = sld [smem:[#allocation63_spill]] }
  0x6e   : > { %s3125_s30 = scalar_lea.hbm %s4816_s9, 16 }
  0x6f   : > { %p3126_p11 = scmp.ne.s32.totalorder %s4816_s9, %s3125_s30  ;;  %p3132_p0 = scmp.lt.u32.totalorder %s3125_s30, %s4816_s9 }
  0x71   : > { %p3128_p12 = pnand %p3126_p11, %p3852_p8 }
  0x73   : > { %p3129_p13 = pneg %p3128_p12 }
  0x75   : > { %p3134_p2 = pnand %p3132_p0, %p3129_p13 }
  0x77   : > { %3137 = shalt.err (!%p3134_p2)
}
  0x78   : > { %s3138_s13 = scalar_lea.vmem %s426_s22, 16  ;;  %s3145_s4 = scalar_lea.vmem %s426_s22, 32 }
  0x79   : > { %p3139_p4 = scmp.ne.s32.totalorder %s426_s22, %s3138_s13  ;;  %p3146_p5 = scmp.lt.s32.totalorder %s426_s22, %s426_s22 }
  0x7a   : > { %p3147_p10 = scmp.lt.s32.totalorder %s3145_s4, %s3138_s13 }
  0x7b   : > { %p3141_p7 = pnand %p3139_p4, %p3852_p8 }
  0x7c   : > { %p3148_p1 = por %p3147_p10, %p3146_p5 }
  0x7d   : > { %p3142_p9 = pneg %p3141_p7 }
  0x7f   : > { %p3149_p3 = pnand %p3148_p1, %p3142_p9 }
  0x81   : > { %3152 = shalt.err (!%p3149_p3)
}
  0x82   : > { %2801 = dma.hbm_to_vmem [thread:$0]  (!%p3836_p6), %s4816_s9, 16, %s426_s22, [#allocation21]  }
  0x83   : > { %s3630_s29 = smov [#allocation23]   ;;  %s4817_s11 = sld [smem:[#allocation65_spill]] }
  0x84   : > { %s449_s27 = sshll.u32 %s3630_s29, 4  ;;  %s450_s27 = int_to_ptr.vmem [resolvable:$true] %s449_s27 }
  0x89   : > { %s3153_s21 = scalar_lea.hbm %s4817_s11, 16 }
  0x8a   : > { %p3154_p11 = scmp.ne.s32.totalorder %s4817_s11, %s3153_s21  ;;  %p3160_p12 = scmp.lt.u32.totalorder %s3153_s21, %s4817_s11 }
  0x8c   : > { %p3156_p1 = pnand %p3154_p11, %p3852_p8 }
  0x8e   : > { %p3157_p3 = pneg %p3156_p1 }
  0x90   : > { %p3162_p13 = pnand %p3160_p12, %p3157_p3 }
  0x92   : > { %3165 = shalt.err (!%p3162_p13)
}
  0x93   : > { %s3166_s22 = scalar_lea.vmem %s450_s27, 16  ;;  %s3173_s10 = scalar_lea.vmem %s450_s27, 32 }
  0x94   : > { %p3167_p0 = scmp.ne.s32.totalorder %s450_s27, %s3166_s22  ;;  %p3174_p7 = scmp.lt.s32.totalorder %s450_s27, %s450_s27 }
  0x95   : > { %p3175_p9 = scmp.lt.s32.totalorder %s3173_s10, %s3166_s22 }
  0x96   : > { %p3169_p2 = pnand %p3167_p0, %p3852_p8 }
  0x97   : > { %p3176_p5 = por %p3175_p9, %p3174_p7 }
  0x98   : > { %p3170_p4 = pneg %p3169_p2 }
  0x9a   : > { %p3177_p10 = pnand %p3176_p5, %p3170_p4 }
  0x9c   : > { %3180 = shalt.err (!%p3177_p10)
}
  0x9d   : > { %2807 = dma.hbm_to_vmem [thread:$0]  (!%p3836_p6), %s4817_s11, 16, %s450_s27, [#allocation24]  }
  0x9e   : > { %s2468_s30 = sadd.s32 4294967294, %s3623_s16   ;;  %s54_s20 = sadd.s32 1, %s3619_s15 }
  0x9f   : > { %p56_p11 = scmp.ge.s32.totalorder %s54_s20, 2  ;;  %p4766_p1 = scmp.eq.s32.totalorder %s3623_s16, 0 }
  0xa0   : > { %s3940_s21 = sld [smem:[#allocation6]]  ;;  %s95_s5 = sadd.s32 1, %s3599_s26 }
  0xa1   : > { %s4921_s20 = smov (%p56_p11, %s54_s20), 0  ;;  %p102_p3 = scmp.ne.s32.totalorder %s3599_s26, %s3595_s25 }
  0xa2   : > { %4818 = sst [smem:[#allocation52_spill]] %s4921_s20  ;;  %p108_p12 = scmp.ne.s32.totalorder %s3595_s25, %s3591_s24 }
  0xa3   : > { %s60_s27 = ssub.s32 %s3619_s15, %s4921_s20  ;;  %s353_s19 = sadd.s32 1, %s3563_s0 }
  0xa4   : > { %p3954_p13 = por %p102_p3, %p4766_p1  ;;  %p4820_p0 = scmp.eq.s32.totalorder %s3820_s14, 0 }
  0xa5   : > { %p363_p4 = scmp.ne.s32.totalorder %s3563_s0, %s3559_s18  ;;  %p364_p7 = scmp.eq.s32.totalorder %s3820_s14, 1 }
  0xa6   : > { %p3960_p2 = por %p108_p12, %p4820_p0  ;;  %p369_p9 = scmp.ne.s32.totalorder %s3559_s18, %s3555_s17 }
  0xa7   : > { %p3969_p5 = por %p364_p7, %p363_p4  ;;  %p3973_p10 = scmp.eq.s32.totalorder %s60_s27, 0 }
  0xa8   : > { %s4821_s4 = scalar_select %p3960_p2, 1, 0 }
  0xa9   : > { %s4823_s24 = scalar_select %p3969_p5, 1, 0 }
  0xaa   : > { %4822 = sst [smem:[#allocation53_spill]] %s4821_s4  ;;  %p370_p11 = scmp.eq.s32.totalorder %s2468_s30, 1 }
  0xab   : > { %s4824_s22 = scalar_select %p3973_p10, 1, 0 }
  0xac   : > { %p4765_p3 = scmp.lt.s32.totalorder %s3623_s16, 2  ;;  %p3989_p12 = por %p370_p11, %p369_p9 }
  0xad   : > { %s3982_s12 = scalar_select %p3973_p10, %s3599_s26, %s95_s5  }
  0xae   : > { %s3987_s29 = scalar_select %p3973_p10, %s3563_s0, %s353_s19  }
  0xaf   : > { %4825 = sst [smem:[#allocation54_spill]] %s3982_s12  ;;  %s506_s27 = sand.u32 1, %s3599_s26  }
  0xb0   : > { %4826 = sst [smem:[#allocation55_spill]] %s3987_s29  ;;  %s4763_s2 = sshll.u32 %s3619_s15, 2 }
  0xb1   : > { %s4827_s23 = scalar_select %p3989_p12, 1, 0 }
  0xb2   : > { %s2481_s6 = sshll.u32 %s506_s27, 4  ;;  %s514_s7 = sadd.s32 %s4763_s2, %s3940_s21 }
  0xb3   : > { %s2483_s9 = sshll.u32 %s514_s7, 6  ;;  %s4828_s3 = sld [smem:[#allocation57_spill]] }
  0xb4   : > { %s508_s5 = scalar_lea.vmem [#allocation11], %s2481_s6  ;;  %p4009_p0 = pnand %p4765_p3, %p3954_p13 }
  0xb5   : > { %s517_s19 = sshll.u32 %s508_s5, 4  ;;  %s3631_s7 = smov [#allocation19]   ;;  %s4003_s19 = int_to_ptr.vmem [resolvable:$true] %s517_s19 }
  0xb6   : > { %s4013_s11 = sshll.u32 %s3631_s7, 4  ;;  %p3183_p7 = pneg %p4009_p0  ;;  %s415_s11 = int_to_ptr.vmem [resolvable:$true] %s4013_s11 }
  0xb9   : > { %s4001_s10 = scalar_lea.hbm %s4828_s3, %s2483_s9  ;;  %s4830_s9 = sand.u32 1, %s3623_s16  }
  0xba   : > { %s4017_s30 = scalar_lea.sflag [#allocation12], %s4830_s9  ;;  %s3181_s2 = scalar_lea.hbm %s4001_s10, 256 }
  0xbb   : > { %p3182_p4 = scmp.ne.s32.totalorder %s4001_s10, %s3181_s2  ;;  %s3186_s5 = scalar_lea.hbm %s4828_s3, 512 }
  0xbc   : > { %p3187_p13 = scmp.lt.u32.totalorder %s4001_s10, %s4828_s3  ;;  %p3188_p3 = scmp.lt.u32.totalorder %s3186_s5, %s3181_s2 }
  0xbd   : > { %p3184_p9 = pnand %p3183_p7, %p3182_p4  ;;  %p3190_p12 = scmp.lt.u32.totalorder %s3181_s2, %s4001_s10 }
  0xbe   : > { %p3189_p1 = por %p3188_p3, %p3187_p13 }
  0xbf   : > { %p3185_p11 = pneg %p3184_p9 }
  0xc0   : > { %p3191_p5 = por %p3190_p12, %p3189_p1 }
  0xc2   : > { %p3192_p2 = pnand %p3191_p5, %p3185_p11 }
  0xc4   : > { %3195 = shalt.err (!%p3192_p2)
}
  0xc5   : > { %s3196_s7 = scalar_lea.vmem %s4003_s19, 256  ;;  %s3632_s9 = smov [#allocation11]  }
  0xc6   : > { %p3197_p4 = scmp.ne.s32.totalorder %s4003_s19, %s3196_s7  ;;  %s3201_s6 = sshll.u32 %s3632_s9, 4  ;;  %s3202_s6 = int_to_ptr.vmem [resolvable:$false] %s3201_s6 }
  0xc7   : > { %s3203_s20 = scalar_lea.vmem %s3202_s6, 512  ;;  %p3204_p6 = scmp.lt.s32.totalorder %s4003_s19, %s3202_s6 }
  0xc8   : > { %p3199_p9 = pnand %p3197_p4, %p3183_p7  ;;  %p3205_p3 = scmp.lt.s32.totalorder %s3203_s20, %s3196_s7 }
  0xca   : > { %p3200_p10 = pneg %p3199_p9  ;;  %p3206_p13 = por %p3205_p3, %p3204_p6 }
  0xcc   : > { %p3207_p1 = pnand %p3206_p13, %p3200_p10 }
  0xce   : > { %3210 = shalt.err (!%p3207_p1)
}
  0xcf   : > { %s4831_s2 = smov 4   ;;  %s4832_s12 = smov 64  }
  0xd0   : > { %2820 = dma.hbm_to_vmem [thread:$0]  (!%p4009_p0), %s4001_s10, 256, %s4003_s19, %s4017_s30, %s4832_s12, %s4832_s12, %s4831_s2  }
  0xd1   : > { %s4833_s8 = sld [smem:[#allocation62_spill]] }
  0xd7   : > { %s3211_s9 = scalar_lea.hbm %s4833_s8, 16 }
  0xd8   : > { %p3212_p6 = scmp.ne.s32.totalorder %s4833_s8, %s3211_s9  ;;  %p3218_p10 = scmp.lt.u32.totalorder %s3211_s9, %s4833_s8 }
  0xda   : > { %p3214_p2 = pnand %p3212_p6, %p3852_p8 }
  0xdc   : > { %p3215_p5 = pneg %p3214_p2 }
  0xde   : > { %p3220_p12 = pnand %p3218_p10, %p3215_p5 }
  0xe0   : > { %3223 = shalt.err (!%p3220_p12)
}
  0xe1   : > { %s3224_s3 = scalar_lea.vmem %s415_s11, 16  ;;  %s3231_s10 = scalar_lea.vmem %s415_s11, 32 }
  0xe2   : > { %p3225_p0 = scmp.ne.s32.totalorder %s415_s11, %s3224_s3  ;;  %p3232_p4 = scmp.lt.s32.totalorder %s415_s11, %s415_s11 }
  0xe3   : > { %p3233_p9 = scmp.lt.s32.totalorder %s3231_s10, %s3224_s3 }
  0xe4   : > { %p3227_p7 = pnand %p3225_p0, %p3852_p8 }
  0xe5   : > { %p3234_p3 = por %p3233_p9, %p3232_p4 }
  0xe6   : > { %p3228_p11 = pneg %p3227_p7 }
  0xe8   : > { %p3235_p13 = pnand %p3234_p3, %p3228_p11 }
  0xea   : > { %3238 = shalt.err (!%p3235_p13)
}
  0xeb   : > { %p4834_p1 = scmp.ne.s32.totalorder %s4812_s1, 0  ;;  %s3633_s5 = smov [#allocation22]  }
  0xec   : > { %s435_s9 = sshll.u32 %s3633_s5, 4  ;;  %s3634_s7 = smov [#allocation25]   ;;  %s436_s9 = int_to_ptr.vmem [resolvable:$true] %s435_s9 }
  0xed   : > { %2798 = dma.hbm_to_vmem [thread:$0]  (!%p4834_p1), %s4833_s8, 16, %s415_s11, [#allocation18]  }
  0xee   : > { %s459_s6 = sshll.u32 %s3634_s7, 4  ;;  %s4835_s26 = sld [smem:[#allocation64_spill]]  ;;  %s460_s6 = int_to_ptr.vmem [resolvable:$true] %s459_s6 }
  0xf4   : > { %s4836_s4 = smov %s4835_s26  ;;  %s3239_s29 = scalar_lea.hbm %s4835_s26, 256 }
  0xf5   : > { %p3240_p6 = scmp.ne.s32.totalorder %s4836_s4, %s3239_s29  ;;  %p3246_p10 = scmp.lt.u32.totalorder %s3239_s29, %s4836_s4 }
  0xf7   : > { %p3242_p2 = pnand %p3240_p6, %p3852_p8 }
  0xf9   : > { %p3243_p5 = pneg %p3242_p2 }
  0xfb   : > { %p3248_p12 = pnand %p3246_p10, %p3243_p5 }
  0xfd   : > { %3251 = shalt.err (!%p3248_p12)
}
  0xfe   : > { %s3252_s11 = scalar_lea.vmem %s436_s9, 256  ;;  %p3260_p4 = scmp.lt.s32.totalorder %s436_s9, %s436_s9 }
  0xff   : > { %p3253_p0 = scmp.ne.s32.totalorder %s436_s9, %s3252_s11  ;;  %p3261_p9 = scmp.lt.s32.totalorder %s3252_s11, %s3252_s11 }
 0x101   : > { %p3255_p7 = pnand %p3253_p0, %p3852_p8  ;;  %p3262_p3 = por %p3261_p9, %p3260_p4 }
 0x103   : > { %p3256_p11 = pneg %p3255_p7 }
 0x105   : > { %p3263_p13 = pnand %p3262_p3, %p3256_p11 }
 0x107   : > { %3266 = shalt.err (!%p3263_p13)
}
 0x108   : > { %2804 = dma.hbm_to_vmem [thread:$0]  (!%p4834_p1), %s4836_s4, 256, %s436_s9, [#allocation21], %s4832_s12, %s4832_s12, %s4831_s2  }
 0x109   : > { %s4837_s5 = sld [smem:[#allocation66_spill]] }
 0x10f   : > { %s3267_s7 = scalar_lea.hbm %s4837_s5, 1024 }
 0x110   : > { %p3268_p6 = scmp.ne.s32.totalorder %s4837_s5, %s3267_s7  ;;  %p3274_p10 = scmp.lt.u32.totalorder %s3267_s7, %s4837_s5 }
 0x112   : > { %p3270_p2 = pnand %p3268_p6, %p3852_p8 }
 0x114   : > { %p3271_p5 = pneg %p3270_p2 }
 0x116   : > { %p3276_p12 = pnand %p3274_p10, %p3271_p5 }
 0x118   : > { %3279 = shalt.err (!%p3276_p12)
}
 0x119   : > { %s3280_s19 = scalar_lea.vmem %s460_s6, 1024  ;;  %p3288_p4 = scmp.lt.s32.totalorder %s460_s6, %s460_s6 }
 0x11a   : > { %p3281_p0 = scmp.ne.s32.totalorder %s460_s6, %s3280_s19  ;;  %p3289_p9 = scmp.lt.s32.totalorder %s3280_s19, %s3280_s19 }
 0x11c   : > { %p3283_p7 = pnand %p3281_p0, %p3852_p8  ;;  %p3290_p3 = por %p3289_p9, %p3288_p4 }
 0x11e   : > { %p3284_p11 = pneg %p3283_p7 }
 0x120   : > { %p3291_p13 = pnand %p3290_p3, %p3284_p11 }
 0x122   : > { %3294 = shalt.err (!%p3291_p13)
}
 0x123   : > { %2810 = dma.hbm_to_vmem [thread:$0]  (!%p4834_p1), %s4837_s5, 1024, %s460_s6, [#allocation24], %s4832_s12, %s4832_s12, %s4831_s2  }
 0x124   : > { %s3635_s0 = smov [#allocation26]   ;;  %s4838_s7 = sld [smem:[#allocation67_spill]] }
 0x125   : > { %s473_s26 = sshll.u32 %s3635_s0, 4  ;;  %s474_s26 = int_to_ptr.vmem [resolvable:$true] %s473_s26 }
 0x12a   : > { %s3295_s27 = scalar_lea.hbm %s4838_s7, 16 }
 0x12b   : > { %p3296_p6 = scmp.ne.s32.totalorder %s4838_s7, %s3295_s27  ;;  %p3302_p10 = scmp.lt.u32.totalorder %s3295_s27, %s4838_s7 }
 0x12d   : > { %p3298_p2 = pnand %p3296_p6, %p3852_p8 }
 0x12f   : > { %p3299_p5 = pneg %p3298_p2 }
 0x131   : > { %p3304_p12 = pnand %p3302_p10, %p3299_p5 }
 0x133   : > { %3307 = shalt.err (!%p3304_p12)
}
 0x134   : > { %s3308_s6 = scalar_lea.vmem %s474_s26, 16  ;;  %s3315_s9 = scalar_lea.vmem %s474_s26, 32 }
 0x135   : > { %p3309_p0 = scmp.ne.s32.totalorder %s474_s26, %s3308_s6  ;;  %p3316_p4 = scmp.lt.s32.totalorder %s474_s26, %s474_s26 }
 0x136   : > { %p3317_p9 = scmp.lt.s32.totalorder %s3315_s9, %s3308_s6 }
 0x137   : > { %p3311_p7 = pnand %p3309_p0, %p3852_p8 }
 0x138   : > { %p3318_p3 = por %p3317_p9, %p3316_p4 }
 0x139   : > { %p3312_p11 = pneg %p3311_p7 }
 0x13b   : > { %p3319_p13 = pnand %p3318_p3, %p3312_p11 }
 0x13d   : > { %3322 = shalt.err (!%p3319_p13)
}
 0x13e   : > { %s4839_s29 = sld [smem:[#allocation49_spill]]  ;;  %s4840_s13 = sld [smem:[#allocation48_spill]] }
 0x13f   : > { %s4841_s28 = sld [smem:[#allocation47_spill]]  ;;  %p4842_p6 = scmp.ne.s32.totalorder %s4824_s22, 0 }
 0x140   : > { %2813 = dma.hbm_to_vmem [thread:$0]  (!%p4834_p1), %s4838_s7, 16, %s474_s26, [#allocation27]  }
 0x141   : > { %p4843_p2 = scmp.eq.s32.totalorder %s3623_s16, 0  ;;  %s493_s3 = sadd.s32 %s3619_s15, %s3940_s21 }
 0x142   : > { %p4844_p12 = scmp.eq.s32.totalorder %s3820_s14, 0  ;;  %s2480_s6 = sshll.u32 %s493_s3, 7 }
 0x143   : > { %s4846_s26 = sld [smem:[#allocation56_spill]]  ;;  %p4848_p1 = scmp.lt.s32.totalorder %s3623_s16, 2 }
 0x144   : > { %s65_s27 = sadd.s32 1, %s4839_s29  ;;  %p72_p8 = scmp.ne.s32.totalorder %s4839_s29, %s4840_s13 }
 0x145   : > { %s4133_s1 = scalar_select %p4842_p6, %s4839_s29, %s65_s27  }
 0x146   : > { %p74_p5 = por %p4843_p2, %p72_p8  ;;  %p78_p10 = scmp.ne.s32.totalorder %s4840_s13, %s4841_s28 }
 0x147   : > { %s484_s20 = sand.u32 1, %s4839_s29  }
 0x148   : > { %p4144_p0 = por %p4844_p12, %p78_p10  ;;  %s2479_s19 = sshll.u32 %s484_s20, 3 }
 0x149   : > { %s4847_s4 = smov %s4846_s26  ;;  %s4151_s0 = scalar_lea.hbm %s4846_s26, %s2480_s6 }
 0x14a   : > { %s4845_s10 = scalar_select %p4144_p0, 1, 0 }
 0x14b   : > { %s488_s27 = scalar_lea.vmem [#allocation8], %s2479_s19  ;;  %p4155_p7 = pnand %p4848_p1, %p74_p5 }
 0x14c   : > { %s497_s13 = sshll.u32 %s488_s27, 4  ;;  %s485_s29 = scalar_lea.sflag [#allocation9], %s484_s20  ;;  %s4159_s13 = int_to_ptr.vmem [resolvable:$true] %s497_s13 }
 0x14d   : > { %s3323_s28 = scalar_lea.hbm %s4151_s0, 128  ;;  %p3325_p4 = pneg %p4155_p7 }
 0x14e   : > { %p3324_p11 = scmp.ne.s32.totalorder %s4151_s0, %s3323_s28  ;;  %s3328_s6 = scalar_lea.hbm %s4847_s4, 256 }
 0x14f   : > { %p3329_p13 = scmp.lt.u32.totalorder %s4151_s0, %s4847_s4  ;;  %p3330_p8 = scmp.lt.u32.totalorder %s3328_s6, %s3323_s28 }
 0x150   : > { %p3326_p9 = pnand %p3325_p4, %p3324_p11  ;;  %p3332_p5 = scmp.lt.u32.totalorder %s3323_s28, %s4151_s0 }
 0x151   : > { %p3331_p2 = por %p3330_p8, %p3329_p13 }
 0x152   : > { %p3327_p3 = pneg %p3326_p9 }
 0x153   : > { %p3333_p10 = por %p3332_p5, %p3331_p2 }
 0x155   : > { %p3334_p12 = pnand %p3333_p10, %p3327_p3 }
 0x157   : > { %3337 = shalt.err (!%p3334_p12)
}
 0x158   : > { %s3338_s20 = scalar_lea.vmem %s4159_s13, 128  ;;  %s3636_s26 = smov [#allocation8]  }
 0x159   : > { %p3339_p1 = scmp.ne.s32.totalorder %s4159_s13, %s3338_s20  ;;  %s3343_s27 = sshll.u32 %s3636_s26, 4  ;;  %s3344_s27 = int_to_ptr.vmem [resolvable:$false] %s3343_s27 }
 0x15a   : > { %s3345_s3 = scalar_lea.vmem %s3344_s27, 256  ;;  %p3346_p0 = scmp.lt.s32.totalorder %s4159_s13, %s3344_s27 }
 0x15b   : > { %p3341_p11 = pnand %p3339_p1, %p3325_p4  ;;  %p3347_p13 = scmp.lt.s32.totalorder %s3345_s3, %s3338_s20 }
 0x15d   : > { %p3342_p9 = pneg %p3341_p11  ;;  %p3348_p8 = por %p3347_p13, %p3346_p0 }
 0x15f   : > { %p3349_p2 = pnand %p3348_p8, %p3342_p9 }
 0x161   : > { %3352 = shalt.err (!%p3349_p2)
}
 0x162   : > { %s4850_s28 = sld [smem:[#allocation45_spill]]  ;;  %s4851_s19 = sld [smem:[#allocation44_spill]] }
 0x163   : > { %s4852_s6 = sld [smem:[#allocation43_spill]]  ;;  %s118_s9 = sld [smem:[#allocation7]] }
 0x164   : > { %2817 = dma.hbm_to_vmem [thread:$0]  (!%p4155_p7), %s4151_s0, 128, %s4159_s13, %s485_s29  }
 0x165   : > { %p4853_p3 = scmp.eq.s32.totalorder %s3623_s16, 0  ;;  %p4854_p10 = scmp.eq.s32.totalorder %s3820_s14, 0 }
 0x166   : > { %p4856_p1 = scmp.lt.s32.totalorder %s3623_s16, 2  ;;  %s4858_s3 = sshll.u32 %s3619_s15, 2 }
 0x168   : > { %s125_s11 = sadd.s32 1, %s4850_s28  ;;  %p132_p0 = scmp.ne.s32.totalorder %s4850_s28, %s4851_s19 }
 0x169   : > { %p138_p4 = scmp.ne.s32.totalorder %s4851_s19, %s4852_s6  ;;  %s529_s21 = sand.u32 1, %s4850_s28  }
 0x16a   : > { %p134_p5 = por %p132_p0, %p4853_p3  ;;  %s2484_s26 = sshll.u32 %s529_s21, 4 }
 0x16b   : > { %p4196_p12 = por %p138_p4, %p4854_p10  ;;  %s4208_s0 = sadd.s32 %s4858_s3, %s118_s9 }
 0x16c   : > { %p4202_p11 = pnand %p4856_p1, %p134_p5  ;;  %s4781_s13 = sshll.u32 %s4208_s0, 6 }
 0x16d   : > { %s4855_s20 = scalar_select %p4196_p12, 1, 0 }
 0x16e   : > { %s4859_s6 = sld [smem:[#allocation58_spill]]  ;;  %s531_s21 = scalar_lea.vmem [#allocation13], %s2484_s26 }
 0x16f   : > { %s540_s5 = sshll.u32 %s531_s21, 4  ;;  %s4923_s28 = smov (!%p4842_p6, %s4850_s28), %s125_s11  ;;  %s4223_s5 = int_to_ptr.vmem [resolvable:$true] %s540_s5 }
 0x170   : > { %p3355_p9 = pneg %p4202_p11 }
 0x174   : > { %s4216_s4 = scalar_lea.hbm %s4859_s6, %s4781_s13  ;;  %s3358_s19 = scalar_lea.hbm %s4859_s6, 512 }
 0x175   : > { %s3353_s9 = scalar_lea.hbm %s4216_s4, 256  ;;  %p3359_p2 = scmp.lt.u32.totalorder %s4216_s4, %s4859_s6 }
 0x176   : > { %p3354_p7 = scmp.ne.s32.totalorder %s4216_s4, %s3353_s9  ;;  %p3360_p0 = scmp.lt.u32.totalorder %s3358_s19, %s3353_s9 }
 0x177   : > { %p3362_p3 = scmp.lt.u32.totalorder %s3353_s9, %s4216_s4 }
 0x178   : > { %p3356_p13 = pnand %p3355_p9, %p3354_p7  ;;  %p3361_p4 = por %p3360_p0, %p3359_p2 }
 0x17a   : > { %p3357_p8 = pneg %p3356_p13  ;;  %p3363_p5 = por %p3362_p3, %p3361_p4 }
 0x17c   : > { %p3364_p10 = pnand %p3363_p5, %p3357_p8 }
 0x17e   : > { %3367 = shalt.err (!%p3364_p10)
}
 0x17f   : > { %s3368_s11 = scalar_lea.vmem %s4223_s5, 256  ;;  %s3637_s21 = smov [#allocation13]  }
 0x180   : > { %p3369_p1 = scmp.ne.s32.totalorder %s4223_s5, %s3368_s11  ;;  %s3373_s3 = sshll.u32 %s3637_s21, 4  ;;  %s3374_s3 = int_to_ptr.vmem [resolvable:$false] %s3373_s3 }
 0x181   : > { %s3375_s13 = scalar_lea.vmem %s3374_s3, 512  ;;  %p3376_p12 = scmp.lt.s32.totalorder %s4223_s5, %s3374_s3 }
 0x182   : > { %p3371_p7 = pnand %p3369_p1, %p3355_p9  ;;  %p3377_p2 = scmp.lt.s32.totalorder %s3375_s13, %s3368_s11 }
 0x184   : > { %p3372_p13 = pneg %p3371_p7  ;;  %p3378_p0 = por %p3377_p2, %p3376_p12 }
 0x186   : > { %p3379_p4 = pnand %p3378_p0, %p3372_p13 }
 0x188   : > { %3382 = shalt.err (!%p3379_p4)
}
 0x189   : > { %s4860_s9 = sld [smem:[#allocation42_spill]]  ;;  %s4861_s29 = sld [smem:[#allocation41_spill]] }
 0x18a   : > { %s4862_s19 = sld [smem:[#allocation40_spill]]  ;;  %p4863_p8 = scmp.eq.s32.totalorder %s3623_s16, 0 }
 0x18b   : > { %2823 = dma.hbm_to_vmem [thread:$0]  (!%p4202_p11), %s4216_s4, 256, %s4223_s5, %s4017_s30, %s4832_s12, %s4832_s12, %s4831_s2  }
 0x18c   : > { %p4864_p5 = scmp.eq.s32.totalorder %s3820_s14, 0  ;;  %s4866_s13 = sshll.u32 %s4208_s0, 6 }
 0x18d   : > { %s4867_s8 = sld [smem:[#allocation59_spill]]  ;;  %p4868_p11 = scmp.lt.s32.totalorder %s3623_s16, 2 }
 0x18e   : > { %s4870_s0 = sand.u32 1, %s3623_s16  }
 0x18f   : > { %s155_s27 = sadd.s32 1, %s4860_s9  ;;  %p162_p12 = scmp.ne.s32.totalorder %s4860_s9, %s4861_s29 }
 0x190   : > { %s4258_s26 = scalar_select %p4842_p6, %s4860_s9, %s155_s27  }
 0x191   : > { %p168_p9 = scmp.ne.s32.totalorder %s4861_s29, %s4862_s19  ;;  %s552_s11 = sand.u32 1, %s4860_s9  }
 0x192   : > { %p164_p3 = por %p162_p12, %p4863_p8  ;;  %s2487_s3 = sshll.u32 %s552_s11, 4 }
 0x193   : > { %p4269_p10 = por %p168_p9, %p4864_p5  ;;  %s4278_s4 = scalar_lea.hbm %s4867_s8, %s4866_s13 }
 0x194   : > { %p4282_p6 = pnand %p4868_p11, %p164_p3  ;;  %s554_s30 = scalar_lea.vmem [#allocation14], %s2487_s3 }
 0x195   : > { %s563_s5 = sshll.u32 %s554_s30, 4  ;;  %s4290_s9 = scalar_lea.sflag [#allocation15], %s4870_s0  ;;  %s4286_s5 = int_to_ptr.vmem [resolvable:$true] %s563_s5 }
 0x196   : > { %s3383_s7 = scalar_lea.hbm %s4278_s4, 256  ;;  %p3385_p7 = pneg %p4282_p6 }
 0x197   : > { %p3384_p1 = scmp.ne.s32.totalorder %s4278_s4, %s3383_s7  ;;  %s3388_s19 = scalar_lea.hbm %s4867_s8, 512 }
 0x198   : > { %p3389_p0 = scmp.lt.u32.totalorder %s4278_s4, %s4867_s8  ;;  %p3390_p4 = scmp.lt.u32.totalorder %s3388_s19, %s3383_s7 }
 0x199   : > { %p3386_p13 = pnand %p3385_p7, %p3384_p1  ;;  %p3392_p9 = scmp.lt.u32.totalorder %s3383_s7, %s4278_s4 }
 0x19a   : > { %p3391_p12 = por %p3390_p4, %p3389_p0 }
 0x19b   : > { %p3387_p2 = pneg %p3386_p13 }
 0x19c   : > { %p3393_p8 = por %p3392_p9, %p3391_p12 }
 0x19e   : > { %p3394_p3 = pnand %p3393_p8, %p3387_p2 }
 0x1a0   : > { %3397 = shalt.err (!%p3394_p3)
}
 0x1a1   : > { %s3398_s3 = scalar_lea.vmem %s4286_s5, 256  ;;  %s3638_s13 = smov [#allocation14]  }
 0x1a2   : > { %p3399_p5 = scmp.ne.s32.totalorder %s4286_s5, %s3398_s3  ;;  %s3403_s30 = sshll.u32 %s3638_s13, 4  ;;  %s3404_s30 = int_to_ptr.vmem [resolvable:$false] %s3403_s30 }
 0x1a3   : > { %s3405_s0 = scalar_lea.vmem %s3404_s30, 512  ;;  %p3406_p13 = scmp.lt.s32.totalorder %s4286_s5, %s3404_s30 }
 0x1a4   : > { %p3401_p11 = pnand %p3399_p5, %p3385_p7  ;;  %p3407_p0 = scmp.lt.s32.totalorder %s3405_s0, %s3398_s3 }
 0x1a6   : > { %p3402_p1 = pneg %p3401_p11  ;;  %p3408_p4 = por %p3407_p0, %p3406_p13 }
 0x1a8   : > { %p3409_p12 = pnand %p3408_p4, %p3402_p1 }
 0x1aa   : > { %3412 = shalt.err (!%p3409_p12)
}
 0x1ab   : > { %2826 = dma.hbm_to_vmem [thread:$0]  (!%p4282_p6), %s4278_s4, 256, %s4286_s5, %s4290_s9, %s4832_s12, %s4832_s12, %s4831_s2  }
 0x1ac   : > { %s4871_s7 = sld [smem:[#allocation51_spill]] }
 0x1b2   : > { %p4872_p7 = scmp.ne.s32.totalorder %s4871_s7, 0 }
 0x1b3   : > { %s4873_s6 = sld [smem:[#allocation48_spill]] (!%p4872_p7)  ;;  %p4874_p2 = scmp.ne.s32.totalorder (!%p4872_p7), %s4845_s10, 0 }
 0x1b4   : > { %575 = sbr.rel (%p4872_p7) target bundleno = 3076 (0xc04), region = 68 }
 0x1b9   : > { %s577_s29 = sand.u32 (!%p4872_p7), 1, %s4873_s6  }
 0x1ba   : > { %s4324_s19 = sshll.u32 (!%p4872_p7), %s577_s29, 3  ;;  %s578_s27 = scalar_lea.sflag (!%p4872_p7), [#allocation9], %s577_s29 }
 0x1bb   : > { %s581_s11 = scalar_lea.vmem [#allocation8], %s4324_s19 }
 0x1bc   : > { %3514 = dma.done.wait (%p4874_p2), %s578_s27, 128  }
 0x1bd   : > { %3516 = vsyncadd (%p4874_p2), %s578_s27, 4294967168  ;;  %s4875_s22 = sld [smem:[#allocation53_spill]]  ;;  %s586_s2 = sand.u32 1, %s3820_s14  }
 0x1be   : > { %s588_s12 = sand.u32 1, %s3595_s25   ;;  %s587_s5 = scalar_lea.sflag [#allocation12], %s586_s2 }
 0x1bf   : > { %s2492_s4 = sshll.u32 %s588_s12, 4 }
 0x1c0   : > { %s4333_s9 = scalar_lea.vmem [#allocation11], %s2492_s4 }
 0x1c3   : > { %p4876_p6 = scmp.ne.s32.totalorder %s4875_s22, 0 }
 0x1c5   : > { %3518 = dma.done.wait (%p4876_p6), %s587_s5, 256  }
 0x1c6   : > { %3520 = vsyncadd (%p4876_p6), %s587_s5, 4294967040  ;;  %s4877_s3 = sld [smem:[#allocation44_spill]]  ;;  %p4878_p9 = scmp.ne.s32.totalorder %s4855_s20, 0 }
 0x1cc   : > { %s597_s13 = sand.u32 1, %s4877_s3  }
 0x1cd   : > { %s2493_s30 = sshll.u32 %s597_s13, 4 }
 0x1ce   : > { %s4340_s10 = scalar_lea.vmem [#allocation13], %s2493_s30 }
 0x1cf   : > { %3522 = dma.done.wait (%p4878_p9), %s587_s5, 256  }
 0x1d0   : > { %3524 = vsyncadd (%p4878_p9), %s587_s5, 4294967040  ;;  %s4879_s0 = sld [smem:[#allocation41_spill]]  ;;  %s605_s29 = scalar_lea.sflag [#allocation15], %s586_s2 }
 0x1d6   : > { %s606_s7 = sand.u32 1, %s4879_s0  }
 0x1d7   : > { %s2494_s6 = sshll.u32 %s606_s7, 4 }
 0x1d8   : > { %s4347_s27 = scalar_lea.vmem [#allocation14], %s2494_s6 }
 0x1d9   : > { %3526 = dma.done.wait (%p4269_p10), %s605_s29, 256  }
 0x1da   : > { %3528 = vsyncadd (%p4269_p10), %s605_s29, 4294967040  ;;  %p4880_p8 = scmp.eq.s32.totalorder %s3820_s14, 0 }
 0x1dc   : > { %3530 = dma.done.wait (%p4880_p8), [#allocation15], 256   ;;  %p4881_p3 = pmov %p4880_p8 }
 0x1de   : > { %3532 = vsyncadd (%p4881_p3), [#allocation15], 4294967040  ;;  %p4882_p5 = pmov %p4881_p3 }
 0x1df   : > { %p4883_p11 = pmov %p4881_p3 }
 0x1e0   : > { %3534 = dma.done.wait (%p4882_p5), [#allocation18], 32  }
 0x1e1   : > { %3536 = vsyncadd (%p4883_p11), [#allocation18], 4294967264  ;;  %p4884_p1 = pmov %p4881_p3 }
 0x1e3   : > { %3538 = dma.done.wait (%p4884_p1), [#allocation21], 272   ;;  %p4885_p13 = pmov %p4884_p1 }
 0x1e4   : > { %p4886_p10 = pmov %p4884_p1 }
 0x1e5   : > { %3540 = vsyncadd (%p4885_p13), [#allocation21], 4294967024 }
 0x1e6   : > { %3542 = dma.done.wait (%p4886_p10), [#allocation24], 1040   ;;  %p4887_p0 = pmov %p4884_p1 }
 0x1e8   : > { %3544 = vsyncadd (%p4887_p0), [#allocation24], 4294966256  ;;  %p4888_p4 = pmov %p4887_p0 }
 0x1e9   : > { %p4889_p12 = pmov %p4887_p0 }
 0x1ea   : > { %3546 = dma.done.wait (%p4888_p4), [#allocation27], 16  }
 0x1eb   : > { %3548 = vsyncadd (%p4889_p12), [#allocation27], 4294967280  ;;  %s693_s20 = sand.u32 1, %s3559_s18   ;;  %s4374_s21 = sld [smem:[#allocation6]] }
 0x1ec   : > { %s4376_s22 = sld [smem:[#allocation7]]  ;;  %s4380_s2 = sshll.u32 %s693_s20, 3 }
 0x1ed   : > { %s695_s12 = scalar_lea.vmem [#allocation28], %s4380_s2 }
 0x1f2   : > { %p2504_p7 = scmp.ne.s32.totalorder %s4376_s22, 0 }
 0x1f3   : > { %vm708_vm0 = vcmask (!%p2504_p7), 7168   ;;  %vm717_vm1 = vcmask (!%p2504_p7), 64512   ;;  %v3639_v0 = vmov (!%p2504_p7), -1e+30   ;;  %v3640_v1 = vmov (!%p2504_p7), 0.0  }
 0x1f4   : > { %707 = sbr.rel (%p2504_p7) target bundleno = 507 (0x1fb), region = 120  ;;  %709 = vst.msk [vmem:[#allocation2] sm:$0xff] (!%p2504_p7), %vm708_vm0, %v3639_v0  ;;  %710 = vst.msk [vmem:[#allocation2 + $0x8] sm:$0xff] (!%p2504_p7), %vm708_vm0, %v3639_v0 }
 0x1f5   : > { %711 = vst.msk [vmem:[#allocation2 + $0x10] sm:$0xff] (!%p2504_p7), %vm708_vm0, %v3639_v0  ;;  %712 = vst.msk [vmem:[#allocation2 + $0x18] sm:$0xff] (!%p2504_p7), %vm708_vm0, %v3639_v0 }
 0x1f6   : > { %713 = vst.msk [vmem:[#allocation3] sm:$0xff] (!%p2504_p7), %vm708_vm0, %v3640_v1  ;;  %714 = vst.msk [vmem:[#allocation3 + $0x8] sm:$0xff] (!%p2504_p7), %vm708_vm0, %v3640_v1 }
 0x1f7   : > { %715 = vst.msk [vmem:[#allocation3 + $0x10] sm:$0xff] (!%p2504_p7), %vm708_vm0, %v3640_v1  ;;  %716 = vst.msk [vmem:[#allocation3 + $0x18] sm:$0xff] (!%p2504_p7), %vm708_vm0, %v3640_v1 }
 0x1f8   : > { %718 = vst.msk [vmem:[#allocation4] sm:$0xff] (!%p2504_p7), %vm717_vm1, %v3640_v1  ;;  %719 = vst.msk [vmem:[#allocation4 + $0x8] sm:$0xff] (!%p2504_p7), %vm717_vm1, %v3640_v1 }
 0x1f9   : > { %720 = vst.msk [vmem:[#allocation4 + $0x10] sm:$0xff] (!%p2504_p7), %vm717_vm1, %v3640_v1  ;;  %721 = vst.msk [vmem:[#allocation4 + $0x18] sm:$0xff] (!%p2504_p7), %vm717_vm1, %v3640_v1 }
 0x1fb PF: > { %p2505_p2 = scmp.ge.s32.totalorder %s4376_s22, %s4374_s21 }
 0x1fc   : > { %v730_v2 = vld [vmem:[%s4340_s10] sm:$0xf] (!%p2505_p2)  ;;  %vm742_vm2 = vcmask (!%p2505_p2), 1043456   ;;  %v3641_v3 = vmov (!%p2505_p2), 0.0   ;;  %v731_v5 = vld [vmem:[%s4340_s10 + $0x4] sm:$0xf] (!%p2505_p2) }
 0x1fd   : > { %725 = sbr.rel (%p2505_p2) target bundleno = 1242 (0x4da), region = 124  ;;  %2599 = vmatprep.subr.bf16.mxu0 (!%p2505_p2), %v3641_v3  ;;  %v744_v4 = vsel (!%p2505_p2), %vm742_vm2, %v730_v2, 0  ;;  %2605 = vmatprep.subr.bf16.mxu1 (!%p2505_p2), %v3641_v3  ;;  %vm3642_vm3 = vmmov (!%p2505_p2), 0   ;;  %v790_v6 = vsel (!%p2505_p2), %vm742_vm2, %v731_v5, 0  ;;  %v726_v7 = vld [vmem:[%s4333_s9] sm:$0xf] (!%p2505_p2) }
 0x1fe   : > { %2600 = vmatpush3.bf16.msra.mxu0 (!%p2505_p2), %v744_v4  ;;  %2601 = vmatprep.mubr.msk.bf16.mxu0 (!%p2505_p2), %vm3642_vm3, %v3641_v3  ;;  %vm738_vm4 = vcmask (!%p2505_p2), 64512   ;;  %v732_v8 = vld [vmem:[%s4340_s10 + $0x8] sm:$0xf] (!%p2505_p2)  ;;  %v727_v10 = vld [vmem:[%s4333_s9 + $0x4] sm:$0xf] (!%p2505_p2)  ;;  %v3643_v35 = vmov (!%p2505_p2), 0  }
 0x1ff   : > { %2606 = vmatpush3.bf16.msra.mxu1 (!%p2505_p2), %v790_v6  ;;  %2611 = vmatprep.subr.bf16.mxu0 (!%p2505_p2), %v3641_v3  ;;  %v836_v9 = vsel (!%p2505_p2), %vm742_vm2, %v732_v8, 0  ;;  %v733_v11 = vld [vmem:[%s4340_s10 + $0xc] sm:$0xf] (!%p2505_p2)  ;;  %v728_v13 = vld [vmem:[%s4333_s9 + $0x8] sm:$0xf] (!%p2505_p2)  ;;  %v924_v36 = vld [vmem:[#allocation2] sm:$0xff] (!%p2505_p2) }
 0x200   : > { %2607 = vmatprep.mubr.msk.bf16.mxu1 (!%p2505_p2), %vm3642_vm3, %v3641_v3  ;;  %2617 = vmatprep.subr.bf16.mxu1 (!%p2505_p2), %v3641_v3  ;;  %v882_v12 = vsel (!%p2505_p2), %vm742_vm2, %v733_v11, 0  ;;  %v729_v14 = vld [vmem:[%s4333_s9 + $0xc] sm:$0xf] (!%p2505_p2)  ;;  %vm1012_vm5 = vcmask (!%p2505_p2), 7168   ;;  %v926_v44 = vld [vmem:[#allocation2 + $0x10] sm:$0xff] (!%p2505_p2) }
 0x201   : > { %2602 = vmatmul.mubr.msk.bf16.vlgmr.msra.gmra.mrb[0].mxu0 (!%p2505_p2), %vm738_vm4, %v726_v7  ;;  %3011 = vset.pattern.permute.xlu0 (!%p2505_p2), %v3643_v35  ;;  %v4433_v39 = vld [vmem:[#allocation2 + $0x8] sm:$0xff] (!%p2505_p2)  ;;  %v4444_v48 = vld [vmem:[#allocation2 + $0x18] sm:$0xff] (!%p2505_p2)  ;;  %v734_v53 = vld [vmem:[%s4347_s27] sm:$0xf] (!%p2505_p2) }
 0x202   : > { %2612 = vmatpush3.bf16.msra.mxu0 (!%p2505_p2), %v836_v9  ;;  %2608 = vmatmul.mubr.msk.bf16.vlgmr.msra.gmra.mrb[0].mxu1 (!%p2505_p2), %vm738_vm4, %v727_v10  ;;  %v1053_v54 = vsel (!%p2505_p2), %vm742_vm2, %v734_v53, 0  ;;  %v735_v56 = vld [vmem:[%s4347_s27 + $0x4] sm:$0xf] (!%p2505_p2)  ;;  %v736_v6 = vld [vmem:[%s4347_s27 + $0x8] sm:$0xf] (!%p2505_p2) }
 0x203   : > { %2618 = vmatpush3.bf16.msra.mxu1 (!%p2505_p2), %v882_v12  ;;  %2613 = vmatprep.mubr.msk.bf16.mxu0 (!%p2505_p2), %vm3642_vm3, %v3641_v3  ;;  %v1099_v57 = vsel (!%p2505_p2), %vm742_vm2, %v735_v56, 0  ;;  %v1145_v11 = vsel (!%p2505_p2), %vm742_vm2, %v736_v6, 0  ;;  %v737_v12 = vld [vmem:[%s4347_s27 + $0xc] sm:$0xf] (!%p2505_p2)  ;;  %v1019_v56 = vld [vmem:[#allocation4 + $0x10] sm:$0xff] (!%p2505_p2) }
 0x204   : > { %2619 = vmatprep.mubr.msk.bf16.mxu1 %vm3642_vm3, %v3641_v3  ;;  %2623 = vmatprep.subr.bf16.mxu0 %v3641_v3 }
 0x205   : > { %2629 = vmatprep.subr.bf16.mxu1 %v3641_v3  ;;  %3012 = vset.pattern.permute.xlu1 %v3643_v35 }
 0x209   : > { %2614 = vmatmul.mubr.msk.bf16.vlgmr.msra.gmra.mrb[4].mxu0 %vm738_vm4, %v728_v13 }
 0x20a   : > { %2620 = vmatmul.mubr.msk.bf16.vlgmr.msra.gmra.mrb[4].mxu1 %vm738_vm4, %v729_v14  ;;  %2625 = vmatprep.mubr.msk.bf16.mxu0 %vm3642_vm3, %v3641_v3 }
 0x20b   : > { %2631 = vmatprep.mubr.msk.bf16.mxu1 %vm3642_vm3, %v3641_v3  ;;  %2624 = vmatpush3.bf16.msra.mxu0 %v1053_v54 }
 0x20c   : > { %2635 = vmatprep.subr.bf16.mxu0 %v3641_v3  ;;  %2630 = vmatpush3.bf16.msra.mxu1 %v1099_v57 }
 0x20d   : > { %2641 = vmatprep.subr.bf16.mxu1 %v3641_v3 }
 0x2d4   : > { %v4420_v15 = vpop.f32.mrb[0].mxu0 }
 0x2d5   : > { %v2603_v16 = vpop.f32.mrb[1].mxu0  ;;  %v4422_v17 = vpop.f32.mrb[0].mxu1  ;;  %v928_v18 = vsel %vm738_vm4, %v4420_v15, -inf }
 0x2d6   : > { %929 = vmax.xlane.f32.xlu0 %v928_v18  ;;  %v783_v19 = vpop.f32.mrb[2].mxu0  ;;  %v2609_v20 = vpop.f32.mrb[1].mxu1  ;;  %v931_v23 = vsel %vm738_vm4, %v4422_v17, -inf }
 0x2d7   : > { %v2604_v21 = vpop.f32.mrb[3].mxu0  ;;  %v829_v22 = vpop.f32.mrb[2].mxu1 }
 0x2d8   : > { %v2610_v24 = vpop.f32.mrb[3].mxu1 }
 0x2da   : > { %932 = vmax.xlane.f32.xlu0 %v931_v23 }
 0x2dc   : > { %v872_v25 = vpop.f32.mrb[4].mxu0 }
 0x2dd   : > { %v2615_v26 = vpop.f32.mrb[5].mxu0  ;;  %v4428_v27 = vpop.f32.mrb[4].mxu1  ;;  %v934_v28 = vsel %vm738_vm4, %v872_v25, -inf }
 0x2de   : > { %935 = vmax.xlane.f32.xlu1 %v934_v28  ;;  %v875_v29 = vpop.f32.mrb[6].mxu0  ;;  %v2621_v30 = vpop.f32.mrb[5].mxu1  ;;  %v937_v33 = vsel %vm738_vm4, %v4428_v27, -inf }
 0x2df   : > { %v2616_v31 = vpop.f32.mrb[7].mxu0  ;;  %v921_v32 = vpop.f32.mrb[6].mxu1  ;;  %v988_v29 = vld [vmem:[#allocation3] sm:$0xff] }
 0x2e0   : > { %v2622_v34 = vpop.f32.mrb[7].mxu1  ;;  %v989_v32 = vld [vmem:[#allocation3 + $0x8] sm:$0xff] }
 0x2e2   : > { %938 = vmax.xlane.f32.xlu1 %v937_v33 }
 0x363   : > { %v930_v37 = vpop.xlane.xlu0 %929 }
 0x364   : > { %v940_v38 = vmax.f32 %v924_v36, %v930_v37 }
 0x366   : > { %v944_v40 = vsub.f32 %v924_v36, %v940_v38  ;;  %1241 = vst.msk [vmem:[#allocation2] sm:$0xff] %vm1012_vm5, %v940_v38  ;;  %958 = vperm.xlu0 %3011, %v940_v38   ;;  %v990_v38 = vld [vmem:[#allocation3 + $0x10] sm:$0xff] }
 0x367   : > { %v933_v41 = vpop.xlane.xlu0 %932 }
 0x368   : > { %v948_v42 = vmul.f32 1.442695, %v944_v40  ;;  %v4437_v43 = vmax.f32 %v4433_v39, %v933_v41  ;;  %v991_v41 = vld [vmem:[#allocation3 + $0x18] sm:$0xff] }
 0x36a   : > { %3013 = vpow2.f32 %v948_v42  ;;  %v945_v45 = vsub.f32 %v4433_v39, %v4437_v43  ;;  %1242 = vst.msk [vmem:[#allocation2 + $0x8] sm:$0xff] %vm1012_vm5, %v4437_v43  ;;  %963 = vperm.xlu1 %3012, %v4437_v43  }
 0x36b   : > { %v936_v46 = vpop.xlane.xlu1 %935 }
 0x36c   : > { %v942_v47 = vmax.f32 %v926_v44, %v936_v46  ;;  %v950_v21 = vmul.f32 1.442695, %v945_v45  ;;  %v1017_v46 = vld [vmem:[#allocation4] sm:$0xff] }
 0x36e   : > { %v946_v49 = vsub.f32 %v926_v44, %v942_v47  ;;  %1243 = vst.msk [vmem:[#allocation2 + $0x10] sm:$0xff] %vm1012_vm5, %v942_v47  ;;  %968 = vperm.xlu1 %3012, %v942_v47  }
 0x36f   : > { %v939_v50 = vpop.xlane.xlu1 %938 }
 0x370   : > { %v4448_v51 = vmax.f32 %v4444_v48, %v939_v50  ;;  %v952_v14 = vmul.f32 1.442695, %v946_v49 }
 0x372   : > { %v947_v52 = vsub.f32 %v4444_v48, %v4448_v51  ;;  %1244 = vst.msk [vmem:[#allocation2 + $0x18] sm:$0xff] %vm1012_vm5, %v4448_v51  ;;  %973 = vperm.xlu1 %3012, %v4448_v51   ;;  %v1018_v48 = vld [vmem:[#allocation4 + $0x8] sm:$0xff] }
 0x374   : > { %v4457_v55 = vpop.eup %3013  ;;  %v954_v26 = vmul.f32 1.442695, %v947_v52 }
 0x375   : > { %v992_v30 = vmul.f32 %v4457_v55, %v988_v29 }
 0x376   : > { %1023 = vperm.xlu1 %3012, %v4457_v55  }
 0x3e5   : > { %v959_v58 = vpop.permute.xlu0 %958 }
 0x3e6   : > { %v976_v59 = vsub.f32 %v4420_v15, %v959_v58 }
 0x3e8   : > { %v980_v60 = vmul.f32 1.442695, %v976_v59 }
 0x3e9   : > { %v964_v61 = vpop.permute.xlu1 %963 }
 0x3ea   : > { %3015 = vpow2.f32 %v980_v60  ;;  %v977_v62 = vsub.f32 %v4422_v17, %v964_v61  ;;  %v1191_v17 = vsel %vm742_vm2, %v737_v12, 0 }
 0x3ec   : > { %v982_v63 = vmul.f32 1.442695, %v977_v62 }
 0x3ed   : > { %v969_v0 = vpop.permute.xlu1 %968 }
 0x3ee   : > { %3017 = vpow2.f32 %v982_v63  ;;  %v978_v1 = vsub.f32 %v872_v25, %v969_v0  ;;  %v1020_v63 = vld [vmem:[#allocation4 + $0x18] sm:$0xff] }
 0x3f0   : > { %v984_v2 = vmul.f32 1.442695, %v978_v1 }
 0x3f1   : > { %v974_v4 = vpop.permute.xlu1 %973 }
 0x3f2   : > { %3019 = vpow2.f32 %v984_v2  ;;  %v979_v5 = vsub.f32 %v4428_v27, %v974_v4 }
 0x3f4   : > { %v3016_v7 = vpop.eup %3015  ;;  %v986_v8 = vmul.f32 1.442695, %v979_v5 }
 0x3f5   : > { %v996_v9 = vsel %vm738_vm4, %v3016_v7, 0.0  ;;  %v1045_v10 = vpack.c.bf16 %v3016_v7, %v3016_v7  ;;  %v1024_v28 = vpop.permute.xlu1 %1023 }
 0x3f6   : > { %3021 = vpow2.f32 %v986_v8  ;;  %997 = vadd.xlane.f32.xlu1 %v996_v9  ;;  %v1041_v47 = vmul.f32 %v1024_v28, %v1017_v46 }
 0x3f7   : > { %2626 = vmatmul.mubr.msk.bf16.vlgmr.msra.gmra.mrb[8].mxu0 %vm738_vm4, %v1045_v10  ;;  %3023 = vpow2.f32 %v952_v14 }
 0x3f8   : > { %v3018_v13 = vpop.eup %3017  ;;  %2636 = vmatpush3.bf16.msra.mxu0 %v1145_v11  ;;  %2637 = vmatprep.mubr.msk.bf16.mxu0 %vm3642_vm3, %v3641_v3  ;;  %3025 = vpow2.f32 %v950_v21 }
 0x3f9   : > { %v999_v15 = vsel %vm738_vm4, %v3018_v13, 0.0  ;;  %v1046_v16 = vpack.c.bf16 %v3018_v13, %v3018_v13  ;;  %3027 = vpow2.f32 %v954_v26 }
 0x3fa   : > { %1000 = vadd.xlane.f32.xlu0 %v999_v15 }
 0x3fb   : > { %2632 = vmatmul.mubr.msk.bf16.vlgmr.msra.gmra.mrb[8].mxu1 %vm738_vm4, %v1046_v16 }
 0x3fc   : > { %v3020_v18 = vpop.eup %3019  ;;  %2642 = vmatpush3.bf16.msra.mxu1 %v1191_v17  ;;  %2643 = vmatprep.mubr.msk.bf16.mxu1 %vm3642_vm3, %v3641_v3 }
 0x3fd   : > { %v1047_v19 = vpack.c.bf16 %v3020_v18, %v3020_v18  ;;  %v1002_v25 = vsel %vm738_vm4, %v3020_v18, 0.0 }
 0x3ff   : > { %2638 = vmatmul.mubr.msk.bf16.vlgmr.msra.gmra.mrb[12].mxu0 %vm738_vm4, %v1047_v19 }
 0x400   : > { %v3022_v20 = vpop.eup %3021 }
 0x401   : > { %v1048_v22 = vpack.c.bf16 %v3022_v20, %v3022_v20  ;;  %v3024_v23 = vpop.eup %3023  ;;  %v1005_v3 = vsel %vm738_vm4, %v3022_v20, 0.0 }
 0x402   : > { %v3026_v24 = vpop.eup %3025  ;;  %v994_v39 = vmul.f32 %v3024_v23, %v990_v38 }
 0x403   : > { %2644 = vmatmul.mubr.msk.bf16.vlgmr.msra.gmra.mrb[12].mxu1 %vm738_vm4, %v1048_v22  ;;  %v3028_v27 = vpop.eup %3027  ;;  %v993_v34 = vmul.f32 %v3026_v24, %v989_v32 }
 0x404   : > { %v995_v43 = vmul.f32 %v3028_v27, %v991_v41 }
 0x407   : > { %1033 = vperm.xlu1 %3012, %v3024_v23  }
 0x410   : > { %1028 = vperm.xlu0 %3011, %v3026_v24  }
 0x42b   : > { %1003 = vadd.xlane.f32.xlu1 %v1002_v25 }
 0x42f   : > { %1006 = vadd.xlane.f32.xlu1 %v1005_v3 }
 0x440   : > { %1038 = vperm.xlu1 %3012, %v3028_v27  }
 0x483   : > { %v998_v31 = vpop.xlane.xlu1 %997 }
 0x484   : > { %v1008_v33 = vadd.f32 %v998_v31, %v992_v30 }
 0x486   : > { %1013 = vst.msk [vmem:[#allocation3] sm:$0xff] %vm1012_vm5, %v1008_v33 }
 0x487   : > { %v1001_v35 = vpop.xlane.xlu0 %1000  ;;  %v1034_v37 = vpop.permute.xlu1 %1033 }
 0x488   : > { %v1009_v36 = vadd.f32 %v1001_v35, %v993_v34  ;;  %v1043_v61 = vmul.f32 %v1034_v37, %v1019_v56 }
 0x48a   : > { %1014 = vst.msk [vmem:[#allocation3 + $0x8] sm:$0xff] %vm1012_vm5, %v1009_v36 }
 0x48f   : > { %v1029_v49 = vpop.permute.xlu0 %1028 }
 0x490   : > { %v1042_v54 = vmul.f32 %v1029_v49, %v1018_v48 }
 0x4b8   : > { %v1004_v40 = vpop.xlane.xlu1 %1003 }
 0x4b9   : > { %v1010_v42 = vadd.f32 %v1004_v40, %v994_v39 }
 0x4bb   : > { %1015 = vst.msk [vmem:[#allocation3 + $0x10] sm:$0xff] %vm1012_vm5, %v1010_v42 }
 0x4bc   : > { %v1007_v44 = vpop.xlane.xlu1 %1006 }
 0x4bd   : > { %v1011_v45 = vadd.f32 %v1007_v44, %v995_v43 }
 0x4bf   : > { %1016 = vst.msk [vmem:[#allocation3 + $0x18] sm:$0xff] %vm1012_vm5, %v1011_v45 }
 0x4c0   : > { %v1039_v0 = vpop.permute.xlu1 %1038 }
 0x4c1   : > { %v1044_v6 = vmul.f32 %v1039_v0, %v1020_v63 }
 0x4ca   : > { %v1089_v50 = vpop.f32.mrb[8].mxu0 }
 0x4cb   : > { %v1233_v51 = vadd.f32 %v1089_v50, %v1041_v47  ;;  %v2627_v52 = vpop.f32.mrb[9].mxu0 }
 0x4cc   : > { %v1092_v53 = vpop.f32.mrb[10].mxu0 }
 0x4cd   : > { %1237 = vst.msk [vmem:[#allocation4] sm:$0xff] %vm738_vm4, %v1233_v51  ;;  %v2628_v55 = vpop.f32.mrb[11].mxu0 }
 0x4ce   : > { %v1135_v57 = vpop.f32.mrb[8].mxu1 }
 0x4cf   : > { %v1234_v58 = vadd.f32 %v1135_v57, %v1042_v54  ;;  %v2633_v59 = vpop.f32.mrb[9].mxu1 }
 0x4d0   : > { %v1138_v60 = vpop.f32.mrb[10].mxu1 }
 0x4d1   : > { %1238 = vst.msk [vmem:[#allocation4 + $0x8] sm:$0xff] %vm738_vm4, %v1234_v58  ;;  %v2634_v62 = vpop.f32.mrb[11].mxu1 }
 0x4d2   : > { %v1181_v1 = vpop.f32.mrb[12].mxu0 }
 0x4d3   : > { %v1235_v2 = vadd.f32 %v1181_v1, %v1043_v61  ;;  %v2639_v4 = vpop.f32.mrb[13].mxu0 }
 0x4d4   : > { %v1184_v5 = vpop.f32.mrb[14].mxu0 }
 0x4d5   : > { %1239 = vst.msk [vmem:[#allocation4 + $0x10] sm:$0xff] %vm738_vm4, %v1235_v2  ;;  %v2640_v7 = vpop.f32.mrb[15].mxu0 }
 0x4d6   : > { %v1227_v8 = vpop.f32.mrb[12].mxu1 }
 0x4d7   : > { %v1236_v9 = vadd.f32 %v1227_v8, %v1044_v6  ;;  %v2645_v10 = vpop.f32.mrb[13].mxu1 }
 0x4d8   : > { %v1230_v11 = vpop.f32.mrb[14].mxu1 }
 0x4d9   : > { %1240 = vst.msk [vmem:[#allocation4 + $0x18] sm:$0xff] %vm738_vm4, %v1236_v9  ;;  %v2646_v12 = vpop.f32.mrb[15].mxu1 }
 0x4da PF: > { %p2514_p6 = scmp.ne.s32.totalorder %s4376_s22, %s4374_s21 }
 0x4db   : > { %v1253_v13 = vld [vmem:[%s4340_s10] sm:$0xf] (!%p2514_p6)  ;;  %vm1265_vm6 = vcmask (!%p2514_p6), 1043456   ;;  %v3644_v14 = vmov (!%p2514_p6), 0.0   ;;  %vm3645_vm7 = vmmov (!%p2514_p6), 0   ;;  %vm1261_vm8 = vcmask (!%p2514_p6), 64512  }
 0x4dc   : > { %1248 = sbr.rel (%p2514_p6) target bundleno = 3048 (0xbe8), region = 128  ;;  %2647 = vmatprep.subr.bf16.mxu0 (!%p2514_p6), %v3644_v14  ;;  %v1267_v15 = vsel (!%p2514_p6), %vm1265_vm6, %v1253_v13, 0  ;;  %2649 = vmatprep.mubr.msk.bf16.mxu0 (!%p2514_p6), %vm3645_vm7, %v3644_v14  ;;  %v1254_v16 = vld [vmem:[%s4340_s10 + $0x4] sm:$0xf] (!%p2514_p6)  ;;  %v1249_v17 = vld [vmem:[%s4333_s9] sm:$0xf] (!%p2514_p6)  ;;  %v1447_v3 = vlaneseq (!%p2514_p6) }
 0x4dd   : > { %2648 = vmatpush3.bf16.msra.mxu0 (!%p2514_p6), %v1267_v15  ;;  %2665 = vmatprep.subr.bf16.mxu1 (!%p2514_p6), %v3644_v14  ;;  %v1313_v18 = vsel (!%p2514_p6), %vm1265_vm6, %v1254_v16, 0  ;;  %v1256_v19 = vld [vmem:[%s4340_s10 + $0xc] sm:$0xf] (!%p2514_p6)  ;;  %v1255_v22 = vld [vmem:[%s4340_s10 + $0x8] sm:$0xf] (!%p2514_p6)  ;;  %v3646_v50 = vmov (!%p2514_p6), 0  }
 0x4de   : > { %2653 = vmatprep.subr.bf16.mxu0 (!%p2514_p6), %v3644_v14  ;;  %2667 = vmatprep.mubr.msk.bf16.mxu1 (!%p2514_p6), %vm3645_vm7, %v3644_v14  ;;  %v1405_v20 = vsel (!%p2514_p6), %vm1265_vm6, %v1256_v19, 0  ;;  %v1252_v21 = vld [vmem:[%s4333_s9 + $0xc] sm:$0xf] (!%p2514_p6)  ;;  %v1250_v23 = vld [vmem:[%s4333_s9 + $0x4] sm:$0xf] (!%p2514_p6)  ;;  %v1359_v24 = vsel (!%p2514_p6), %vm1265_vm6, %v1255_v22, 0 }
 0x4df   : > { %2666 = vmatpush3.bf16.msra.mxu1 (!%p2514_p6), %v1405_v20  ;;  %v1251_v25 = vld [vmem:[%s4333_s9 + $0x8] sm:$0xf] (!%p2514_p6)  ;;  %v1448_v26 = vshrl.u32 (!%p2514_p6), %v1447_v3, 7  ;;  %v1450_v27 = vand.u32 (!%p2514_p6), 127, %v1447_v3  ;;  %3029 = vset.pattern.permute.xlu0 (!%p2514_p6), %v3646_v50  ;;  %v1458_v53 = vld [vmem:[#allocation2] sm:$0xff] (!%p2514_p6)  ;;  %v4553_v61 = vld [vmem:[#allocation2 + $0x10] sm:$0xff] (!%p2514_p6) }
 0x4e0   : > { %2650 = vmatmul.mubr.msk.bf16.vlgmr.msra.gmra.mrb[0].mxu0 (!%p2514_p6), %vm1261_vm8, %v1249_v17  ;;  %2677 = vmatprep.subr.bf16.mxu1 (!%p2514_p6), %v3644_v14  ;;  %v4545_v57 = vld [vmem:[#allocation2 + $0x8] sm:$0xff] (!%p2514_p6)  ;;  %v1257_v62 = vld [vmem:[%s4347_s27] sm:$0xf] (!%p2514_p6)  ;;  %v1461_v2 = vld [vmem:[#allocation2 + $0x18] sm:$0xff] (!%p2514_p6)  ;;  %vm2003_vm10 = vcmask (!%p2514_p6), 261120  }
 0x4e1   : > { %2654 = vmatpush3.bf16.msra.mxu0 (!%p2514_p6), %v1313_v18  ;;  %2655 = vmatprep.mubr.msk.bf16.mxu0 (!%p2514_p6), %vm3645_vm7, %v3644_v14  ;;  %vm1451_vm9 = vcmp.le.s32.totalorder (!%p2514_p6), %v1450_v27, %v1448_v26  ;;  %v1582_v0 = vsel (!%p2514_p6), %vm1265_vm6, %v1257_v62, 0  ;;  %v1258_v8 = vld [vmem:[%s4347_s27 + $0x4] sm:$0xf] (!%p2514_p6)  ;;  %v1259_v17 = vld [vmem:[%s4347_s27 + $0x8] sm:$0xf] (!%p2514_p6) }
 0x4e2   : > { %2659 = vmatprep.subr.bf16.mxu0 (!%p2514_p6), %v3644_v14  ;;  %2668 = vmatmul.mubr.msk.bf16.vlgmr.msra.gmra.mrb[0].mxu1 (!%p2514_p6), %vm1261_vm8, %v1252_v21  ;;  %v1628_v9 = vsel (!%p2514_p6), %vm1265_vm6, %v1258_v8, 0  ;;  %v1674_v22 = vsel (!%p2514_p6), %vm1265_vm6, %v1259_v17, 0  ;;  %v1260_v26 = vld [vmem:[%s4347_s27 + $0xc] sm:$0xf] (!%p2514_p6)  ;;  %v1798_v62 = vld [vmem:[#allocation16 + $0x4] sm:$0xf] (!%p2514_p6) }
 0x4e3   : > { %2679 = vmatprep.mubr.msk.bf16.mxu1 %vm3645_vm7, %v3644_v14  ;;  %3030 = vset.pattern.permute.xlu1 %v3646_v50 }
 0x4e4   : > { %2678 = vmatpush3.bf16.msra.mxu1 %v1628_v9 }
 0x4e5   : > { %2689 = vmatprep.subr.bf16.mxu1 %v3644_v14 }
 0x4e8   : > { %2656 = vmatmul.mubr.msk.bf16.vlgmr.msra.gmra.mrb[4].mxu0 %vm1261_vm8, %v1250_v23 }
 0x4e9   : > { %2660 = vmatpush3.bf16.msra.mxu0 %v1359_v24  ;;  %2661 = vmatprep.mubr.msk.bf16.mxu0 %vm3645_vm7, %v3644_v14 }
 0x4ea   : > { %2671 = vmatprep.subr.bf16.mxu0 %v3644_v14 }
 0x4f0   : > { %2662 = vmatmul.mubr.msk.bf16.vlgmr.msra.gmra.mrb[8].mxu0 %vm1261_vm8, %v1251_v25 }
 0x4f1   : > { %2673 = vmatprep.mubr.msk.bf16.mxu0 %vm3645_vm7, %v3644_v14  ;;  %2672 = vmatpush3.bf16.msra.mxu0 %v1582_v0  ;;  %v1803_v0 = vsel %vm1265_vm6, %v1798_v62, 0 }
 0x4f2   : > { %2683 = vmatprep.subr.bf16.mxu0 %v3644_v14 }
 0x5b3   : > { %v1303_v28 = vpop.f32.mrb[0].mxu0 }
 0x5b4   : > { %v1454_v29 = vsel %vm1451_vm9, %v1303_v28, -1e+30  ;;  %v2651_v30 = vpop.f32.mrb[1].mxu0 }
 0x5b5   : > { %v1306_v31 = vpop.f32.mrb[2].mxu0  ;;  %v1462_v32 = vsel %vm1261_vm8, %v1454_v29, -inf  ;;  %v1441_v34 = vpop.f32.mrb[0].mxu1 }
 0x5b6   : > { %1463 = vmax.xlane.f32.xlu0 %v1462_v32  ;;  %v2652_v33 = vpop.f32.mrb[3].mxu0  ;;  %v2669_v35 = vpop.f32.mrb[1].mxu1  ;;  %v4540_v47 = vsel %vm1451_vm9, %v1441_v34, -1e+30  ;;  %v1720_v32 = vsel %vm1265_vm6, %v1260_v26, 0 }
 0x5b7   : > { %v1444_v36 = vpop.f32.mrb[2].mxu1  ;;  %v1471_v52 = vsel %vm1261_vm8, %v4540_v47, -inf }
 0x5b8   : > { %v2670_v37 = vpop.f32.mrb[3].mxu1 }
 0x5bb   : > { %v1349_v38 = vpop.f32.mrb[4].mxu0 }
 0x5bc   : > { %v1455_v39 = vsel %vm1451_vm9, %v1349_v38, -1e+30  ;;  %v2657_v40 = vpop.f32.mrb[5].mxu0 }
 0x5bd   : > { %v1352_v41 = vpop.f32.mrb[6].mxu0  ;;  %v1465_v42 = vsel %vm1261_vm8, %v1455_v39, -inf }
 0x5be   : > { %1466 = vmax.xlane.f32.xlu0 %v1465_v42  ;;  %v2658_v43 = vpop.f32.mrb[7].mxu0 }
 0x5c3   : > { %v1395_v44 = vpop.f32.mrb[8].mxu0 }
 0x5c4   : > { %v1456_v45 = vsel %vm1451_vm9, %v1395_v44, -1e+30  ;;  %v2663_v46 = vpop.f32.mrb[9].mxu0  ;;  %v1522_v44 = vld [vmem:[#allocation3] sm:$0xff] }
 0x5c5   : > { %v1398_v48 = vpop.f32.mrb[10].mxu0  ;;  %v1468_v49 = vsel %vm1261_vm8, %v1456_v45, -inf }
 0x5c6   : > { %1469 = vmax.xlane.f32.xlu1 %v1468_v49  ;;  %v2664_v51 = vpop.f32.mrb[11].mxu0  ;;  %v1523_v49 = vld [vmem:[#allocation3 + $0x8] sm:$0xff] }
 0x5ca   : > { %1472 = vmax.xlane.f32.xlu1 %v1471_v52 }
 0x643   : > { %v1464_v54 = vpop.xlane.xlu0 %1463 }
 0x644   : > { %v1474_v55 = vmax.f32 %v1458_v53, %v1464_v54  ;;  %v1524_v54 = vld [vmem:[#allocation3 + $0x10] sm:$0xff] }
 0x646   : > { %v1478_v56 = vsub.f32 %v1458_v53, %v1474_v55  ;;  %1492 = vperm.xlu0 %3029, %v1474_v55  }
 0x64b   : > { %v1467_v58 = vpop.xlane.xlu0 %1466 }
 0x64c   : > { %v4548_v59 = vmax.f32 %v4545_v57, %v1467_v58 }
 0x64e   : > { %v1479_v60 = vsub.f32 %v4545_v57, %v4548_v59  ;;  %1497 = vperm.xlu1 %3030, %v4548_v59  }
 0x650   : > { %v1484_v41 = vmul.f32 1.442695, %v1479_v60  ;;  %v1525_v60 = vld [vmem:[#allocation3 + $0x18] sm:$0xff] }
 0x653   : > { %v1470_v63 = vpop.xlane.xlu1 %1469 }
 0x654   : > { %v4558_v1 = vmax.f32 %v4553_v61, %v1470_v63 }
 0x656   : > { %v1480_v4 = vsub.f32 %v4553_v61, %v4558_v1  ;;  %1502 = vperm.xlu1 %3030, %v4558_v1  }
 0x657   : > { %v1473_v5 = vpop.xlane.xlu1 %1472 }
 0x658   : > { %v1477_v6 = vmax.f32 %v1461_v2, %v1473_v5 }
 0x65a   : > { %v1481_v7 = vsub.f32 %v1461_v2, %v1477_v6  ;;  %1507 = vperm.xlu1 %3030, %v1477_v6  }
 0x65c   : > { %v1488_v33 = vmul.f32 1.442695, %v1481_v7 }
 0x6c5   : > { %v1493_v10 = vpop.permute.xlu0 %1492 }
 0x6c6   : > { %v1510_v11 = vsub.f32 %v1454_v29, %v1493_v10  ;;  %v1482_v29 = vmul.f32 1.442695, %v1478_v56  ;;  %v1795_v56 = vld [vmem:[#allocation16] sm:$0xf] }
 0x6c7   : > { %v1849_v57 = vsel %vm1265_vm6, %v1795_v56, 0 }
 0x6c8   : > { %v1514_v12 = vmul.f32 1.442695, %v1510_v11 }
 0x6ca   : > { %3041 = vpow2.f32 %v1514_v12 }
 0x6cd   : > { %v1498_v13 = vpop.permute.xlu1 %1497 }
 0x6ce   : > { %v1511_v15 = vsub.f32 %v1455_v39, %v1498_v13 }
 0x6d0   : > { %v1516_v16 = vmul.f32 1.442695, %v1511_v15 }
 0x6d2   : > { %3043 = vpow2.f32 %v1516_v16 }
 0x6d4   : > { %v3042_v18 = vpop.eup %3041 }
 0x6d5   : > { %v1503_v19 = vpop.permute.xlu1 %1502  ;;  %v1530_v20 = vsel %vm1261_vm8, %v3042_v18, 0.0  ;;  %v1574_v21 = vpack.c.bf16 %v3042_v18, %v3042_v18 }
 0x6d6   : > { %v1512_v23 = vsub.f32 %v1456_v45, %v1503_v19  ;;  %1531 = vadd.xlane.f32.xlu0 %v1530_v20  ;;  %v1486_v45 = vmul.f32 1.442695, %v1480_v4 }
 0x6d7   : > { %2674 = vmatmul.mubr.msk.bf16.vlgmr.msra.gmra.mrb[12].mxu0 %vm1261_vm8, %v1574_v21 }
 0x6d8   : > { %v1518_v24 = vmul.f32 1.442695, %v1512_v23  ;;  %2684 = vmatpush3.bf16.msra.mxu0 %v1674_v22  ;;  %2685 = vmatprep.mubr.msk.bf16.mxu0 %vm3645_vm7, %v3644_v14 }
 0x6d9   : > { %v1508_v25 = vpop.permute.xlu1 %1507  ;;  %2695 = vmatprep.subr.bf16.mxu0 %v3644_v14 }
 0x6da   : > { %3045 = vpow2.f32 %v1518_v24  ;;  %v1513_v3 = vsub.f32 %v4540_v47, %v1508_v25  ;;  %v1546_v24 = vld [vmem:[#allocation4] sm:$0xff] }
 0x6dc   : > { %v3044_v27 = vpop.eup %3043  ;;  %v1520_v28 = vmul.f32 1.442695, %v1513_v3 }
 0x6dd   : > { %v1533_v30 = vsel %vm1261_vm8, %v3044_v27, 0.0  ;;  %v1575_v31 = vpack.c.bf16 %v3044_v27, %v3044_v27 }
 0x6de   : > { %3047 = vpow2.f32 %v1520_v28  ;;  %1534 = vadd.xlane.f32.xlu1 %v1533_v30 }
 0x6df   : > { %2680 = vmatmul.mubr.msk.bf16.vlgmr.msra.gmra.mrb[4].mxu1 %vm1261_vm8, %v1575_v31  ;;  %3049 = vpow2.f32 %v1482_v29  ;;  %v1943_v29 = vld [vmem:[#allocation16 + $0xc] sm:$0xf]  ;;  %v1547_v31 = vld [vmem:[#allocation4 + $0x8] sm:$0xff] }
 0x6e0   : > { %2690 = vmatpush3.bf16.msra.mxu1 %v1720_v32  ;;  %2691 = vmatprep.mubr.msk.bf16.mxu1 %vm3645_vm7, %v3644_v14  ;;  %3051 = vpow2.f32 %v1488_v33  ;;  %v1948_v33 = vsel %vm1265_vm6, %v1943_v29, 0 }
 0x6e1   : > { %2701 = vmatprep.subr.bf16.mxu1 %v3644_v14  ;;  %3053 = vpow2.f32 %v1484_v41 }
 0x6e2   : > { %3055 = vpow2.f32 %v1486_v45 }
 0x6e4   : > { %v3046_v34 = vpop.eup %3045 }
 0x6e5   : > { %v1536_v35 = vsel %vm1261_vm8, %v3046_v34, 0.0  ;;  %v1576_v36 = vpack.c.bf16 %v3046_v34, %v3046_v34 }
 0x6e6   : > { %1537 = vadd.xlane.f32.xlu1 %v1536_v35 }
 0x6e7   : > { %2686 = vmatmul.mubr.msk.bf16.vlgmr.msra.gmra.mrb[16].mxu0 %vm1261_vm8, %v1576_v36 }
 0x6e8   : > { %v3048_v37 = vpop.eup %3047  ;;  %2697 = vmatprep.mubr.msk.bf16.mxu0 %vm3645_vm7, %v3644_v14  ;;  %2696 = vmatpush3.bf16.msra.mxu0 %v1803_v0 }
 0x6e9   : > { %v1539_v38 = vsel %vm1261_vm8, %v3048_v37, 0.0  ;;  %v1577_v39 = vpack.c.bf16 %v3048_v37, %v3048_v37  ;;  %v3050_v40 = vpop.eup %3049  ;;  %2707 = vmatprep.subr.bf16.mxu0 %v3644_v14  ;;  %v1893_v37 = vld [vmem:[#allocation16 + $0x8] sm:$0xf] }
 0x6ea   : > { %1540 = vadd.xlane.f32.xlu1 %v1539_v38  ;;  %v3052_v42 = vpop.eup %3051  ;;  %v1526_v46 = vmul.f32 %v3050_v40, %v1522_v44  ;;  %v1898_v41 = vsel %vm1265_vm6, %v1893_v37, 0  ;;  %v1549_v44 = vld [vmem:[#allocation4 + $0x18] sm:$0xff] }
 0x6eb   : > { %2692 = vmatmul.mubr.msk.bf16.vlgmr.msra.gmra.mrb[8].mxu1 %vm1261_vm8, %v1577_v39  ;;  %v3054_v43 = vpop.eup %3053  ;;  %v1529_v63 = vmul.f32 %v3052_v42, %v1525_v60  ;;  %v1548_v39 = vld [vmem:[#allocation4 + $0x10] sm:$0xff]  ;;  %v3037_v37 = vld [vmem:[#allocation25 + $0x20] sm:$0xff]  }
 0x6ec   : > { %1552 = vperm.xlu0 %3029, %v3050_v40   ;;  %2703 = vmatprep.mubr.msk.bf16.mxu1 %vm3645_vm7, %v3644_v14  ;;  %v1527_v50 = vmul.f32 %v3054_v43, %v1523_v49  ;;  %v3056_v53 = vpop.eup %3055 }
 0x6ed   : > { %v1528_v58 = vmul.f32 %v3056_v53, %v1524_v54  ;;  %2702 = vmatpush3.bf16.msra.mxu1 %v1849_v57 }
 0x6ee   : > { %2713 = vmatprep.subr.bf16.mxu1 %v3644_v14 }
 0x6f0   : > { %1567 = vperm.xlu0 %3029, %v3052_v42  }
 0x6fb   : > { %1557 = vperm.xlu1 %3030, %v3054_v43  }
 0x763   : > { %v1532_v47 = vpop.xlane.xlu0 %1531 }
 0x764   : > { %v1542_v48 = vadd.f32 %v1532_v47, %v1526_v46 }
 0x766   : > { %3057 = vrcp.f32 %v1542_v48 }
 0x76b   : > { %v1535_v51 = vpop.xlane.xlu1 %1534  ;;  %v1553_v25 = vpop.permute.xlu0 %1552 }
 0x76c   : > { %v1543_v52 = vadd.f32 %v1535_v51, %v1527_v50  ;;  %v1570_v26 = vmul.f32 %v1553_v25, %v1546_v24  ;;  %v3033_v24 = vld [vmem:[#allocation25] sm:$0xff]  }
 0x76e   : > { %3059 = vrcp.f32 %v1543_v52 }
 0x76f   : > { %v1568_v45 = vpop.permute.xlu0 %1567 }
 0x770   : > { %v3058_v55 = vpop.eup %3057  ;;  %v1573_v48 = vmul.f32 %v1568_v45, %v1549_v44 }
 0x771   : > { %1772 = vperm.xlu1 %3030, %v3058_v55  }
 0x773   : > { %v1538_v59 = vpop.xlane.xlu1 %1537 }
 0x774   : > { %v1544_v61 = vadd.f32 %v1538_v59, %v1528_v58 }
 0x776   : > { %3061 = vrcp.f32 %v1544_v61 }
 0x777   : > { %v1541_v1 = vpop.xlane.xlu1 %1540 }
 0x778   : > { %v3060_v2 = vpop.eup %3059  ;;  %v1545_v4 = vadd.f32 %v1541_v1, %v1529_v63 }
 0x779   : > { %1777 = vperm.xlu1 %3030, %v3060_v2  }
 0x77a   : > { %3063 = vrcp.f32 %v1545_v4 }
 0x77b   : > { %v1558_v3 = vpop.permute.xlu1 %1557 }
 0x77c   : > { %v1571_v34 = vmul.f32 %v1558_v3, %v1547_v31 }
 0x77d   : > { %1562 = vperm.xlu1 %3030, %v3056_v53  }
 0x780   : > { %v3062_v5 = vpop.eup %3061 }
 0x781   : > { %1782 = vperm.xlu1 %3030, %v3062_v5  }
 0x784   : > { %v3064_v6 = vpop.eup %3063 }
 0x785   : > { %1787 = vperm.xlu0 %3029, %v3064_v6  }
 0x7aa   : > { %v1618_v7 = vpop.f32.mrb[12].mxu0 }
 0x7ab   : > { %v2675_v8 = vpop.f32.mrb[13].mxu0  ;;  %v1762_v27 = vadd.f32 %v1618_v7, %v1570_v26  ;;  %v2527_v7 = vld [vmem:[#allocation17] ss:$0 sm:$0xff] }
 0x7ac   : > { %v1621_v9 = vpop.f32.mrb[14].mxu0 }
 0x7ad   : > { %v2676_v10 = vpop.f32.mrb[15].mxu0 }
 0x7ae   : > { %v1999_v10 = vld [vmem:[%s581_s11] sm:$0xff] }
 0x7b2   : > { %v1664_v11 = vpop.f32.mrb[4].mxu1 }
 0x7b3   : > { %v2681_v12 = vpop.f32.mrb[5].mxu1  ;;  %v1763_v35 = vadd.f32 %v1664_v11, %v1571_v34  ;;  %v3034_v34 = vld [vmem:[#allocation25 + $0x8] sm:$0xff]  }
 0x7b4   : > { %v1667_v13 = vpop.f32.mrb[6].mxu1 }
 0x7b5   : > { %v2682_v15 = vpop.f32.mrb[7].mxu1 }
 0x7ba   : > { %v1710_v16 = vpop.f32.mrb[16].mxu0 }
 0x7bb   : > { %v2687_v17 = vpop.f32.mrb[17].mxu0 }
 0x7bc   : > { %v1713_v18 = vpop.f32.mrb[18].mxu0 }
 0x7bd   : > { %v2688_v19 = vpop.f32.mrb[19].mxu0 }
 0x7be   : > { %v1756_v20 = vpop.f32.mrb[8].mxu1 }
 0x7bf   : > { %v2693_v21 = vpop.f32.mrb[9].mxu1  ;;  %v1765_v50 = vadd.f32 %v1756_v20, %v1573_v48 }
 0x7c0   : > { %v1759_v22 = vpop.f32.mrb[10].mxu1 }
 0x7c1   : > { %v2694_v23 = vpop.f32.mrb[11].mxu1  ;;  %v3031_v22 = vld [vmem:[#allocation22] sm:$0xff]  }
 0x7c2   : > { %v3032_v23 = vld [vmem:[#allocation22 + $0x8] sm:$0xff]  }
 0x7f0   : > { %v1773_v28 = vpop.permute.xlu1 %1772 }
 0x7f1   : > { %v1790_v30 = vmul.f32 %v1773_v28, %v1762_v27  ;;  %v2528_v28 = vld [vmem:[#allocation19] ss:$0 sm:$0xff] }
 0x7f3   : > { %v1794_v32 = vpack.c.bf16 %v1790_v30, %v1790_v30  ;;  %v2529_v30 = vld [vmem:[#allocation20] ss:$0 sm:$0xff] }
 0x7f5   : > { %2704 = vmatmul.mubr.msk.bf16.vlgmr.msra.gmra.mrb[12].mxu1 %vm1261_vm8, %v1794_v32 }
 0x7f6   : > { %2714 = vmatpush3.bf16.msra.mxu1 %v1948_v33  ;;  %2715 = vmatprep.mubr.msk.bf16.mxu1 %vm3645_vm7, %v3644_v14 }
 0x7f7   : > { %2727 = vmatprep.subr.bf16.mxu1 %v3644_v14 }
 0x7f8   : > { %v1778_v36 = vpop.permute.xlu1 %1777 }
 0x7f9   : > { %v1791_v38 = vmul.f32 %v1778_v36, %v1763_v35  ;;  %v3035_v35 = vld [vmem:[#allocation25 + $0x10] sm:$0xff]   ;;  %v3036_v36 = vld [vmem:[#allocation25 + $0x18] sm:$0xff]  }
 0x7fb   : > { %v1796_v40 = vpack.c.bf16 %v1791_v38, %v1791_v38  ;;  %v3038_v38 = vld [vmem:[#allocation25 + $0x28] sm:$0xff]  }
 0x7fc   : > { %v1563_v42 = vpop.permute.xlu1 %1562 }
 0x7fd   : > { %v1572_v43 = vmul.f32 %v1563_v42, %v1548_v39  ;;  %2698 = vmatmul.mubr.msk.bf16.vlgmr.msra.gmra.mrb[20].mxu0 %vm1261_vm8, %v1796_v40  ;;  %v3039_v39 = vld [vmem:[#allocation25 + $0x30] sm:$0xff]   ;;  %v3040_v40 = vld [vmem:[#allocation25 + $0x38] sm:$0xff]  }
 0x7fe   : > { %2708 = vmatpush3.bf16.msra.mxu0 %v1898_v41  ;;  %2709 = vmatprep.mubr.msk.bf16.mxu0 %vm3645_vm7, %v3644_v14  ;;  %v2530_v41 = vld [vmem:[#allocation23] ss:$0 sm:$0xff] }
 0x7ff   : > { %v1764_v46 = vadd.f32 %v1710_v16, %v1572_v43  ;;  %2719 = vmatprep.subr.bf16.mxu0 %v3644_v14 }
 0x800   : > { %v1783_v47 = vpop.permute.xlu1 %1782 }
 0x801   : > { %v1792_v49 = vmul.f32 %v1783_v47, %v1764_v46 }
 0x803   : > { %v1891_v51 = vpack.c.bf16 %v1792_v49, %v1792_v49 }
 0x804   : > { %v1788_v52 = vpop.permute.xlu0 %1787 }
 0x805   : > { %v1793_v53 = vmul.f32 %v1788_v52, %v1765_v50  ;;  %2710 = vmatmul.mubr.msk.bf16.vlgmr.msra.gmra.mrb[24].mxu0 %vm1261_vm8, %v1891_v51 }
 0x806   : > { %2723 = vmatprep.mubr.msk.bf16.mxu0 %vm3645_vm7, %v3644_v14  ;;  %2720 = vmatpush3.bf16.msra.mxu0 %v3031_v22 }
 0x807   : > { %v1941_v54 = vpack.c.bf16 %v1793_v53, %v1793_v53  ;;  %2721 = vmatprep.subr.bf16.mxu0 %v3644_v14 }
 0x809   : > { %2716 = vmatmul.mubr.msk.bf16.vlgmr.msra.gmra.mrb[16].mxu1 %vm1261_vm8, %v1941_v54 }
 0x80a   : > { %2743 = vmatprep.mubr.msk.bf16.mxu1 %vm3645_vm7, %v3644_v14  ;;  %2722 = vmatpush3.bf16.msra.mxu0 %v3032_v23 }
 0x80b   : > { %2728 = vmatpush3.bf16.msra.mxu1 %v3033_v24 }
 0x80c   : > { %2729 = vmatprep.subr.bf16.mxu1 %v3644_v14 }
 0x80f   : > { %2730 = vmatpush3.bf16.msra.mxu1 %v3034_v34 }
 0x810   : > { %2731 = vmatprep.subr.bf16.mxu1 %v3644_v14 }
 0x813   : > { %2732 = vmatpush3.bf16.msra.mxu1 %v3035_v35 }
 0x814   : > { %2733 = vmatprep.subr.bf16.mxu1 %v3644_v14 }
 0x817   : > { %2734 = vmatpush3.bf16.msra.mxu1 %v3036_v36 }
 0x818   : > { %2735 = vmatprep.subr.bf16.mxu1 %v3644_v14 }
 0x81b   : > { %2736 = vmatpush3.bf16.msra.mxu1 %v3037_v37 }
 0x81c   : > { %2737 = vmatprep.subr.bf16.mxu1 %v3644_v14 }
 0x81f   : > { %2738 = vmatpush3.bf16.msra.mxu1 %v3038_v38 }
 0x820   : > { %2739 = vmatprep.subr.bf16.mxu1 %v3644_v14 }
 0x823   : > { %2740 = vmatpush3.bf16.msra.mxu1 %v3039_v39 }
 0x824   : > { %2741 = vmatprep.subr.bf16.mxu1 %v3644_v14 }
 0x827   : > { %2742 = vmatpush3.bf16.msra.mxu1 %v3040_v40 }
 0x8c8   : > { %v1885_v55 = vpop.f32.mrb[12].mxu1 }
 0x8c9   : > { %v2705_v56 = vpop.f32.mrb[13].mxu1 }
 0x8ca   : > { %v1888_v57 = vpop.f32.mrb[14].mxu1 }
 0x8cb   : > { %v2706_v58 = vpop.f32.mrb[15].mxu1  ;;  %v2542_v57 = vld [vmem:[#allocation26] ss:$0 sm:$0xff] }
 0x8d0   : > { %v1839_v59 = vpop.f32.mrb[20].mxu0 }
 0x8d1   : > { %v1886_v60 = vadd.f32 %v1885_v55, %v1839_v59  ;;  %v2699_v61 = vpop.f32.mrb[21].mxu0 }
 0x8d2   : > { %v1842_v62 = vpop.f32.mrb[22].mxu0 }
 0x8d3   : > { %v2700_v63 = vpop.f32.mrb[23].mxu0 }
 0x8d8   : > { %v1934_v0 = vpop.f32.mrb[24].mxu0 }
 0x8d9   : > { %v1940_v1 = vadd.f32 %v1934_v0, %v1886_v60  ;;  %v2711_v2 = vpop.f32.mrb[25].mxu0 }
 0x8da   : > { %v1937_v4 = vpop.f32.mrb[26].mxu0 }
 0x8db   : > { %v2712_v5 = vpop.f32.mrb[27].mxu0 }
 0x8dc   : > { %v1984_v6 = vpop.f32.mrb[16].mxu1 }
 0x8dd   : > { %v1990_v8 = vadd.f32 %v1984_v6, %v1940_v1  ;;  %v2717_v9 = vpop.f32.mrb[17].mxu1 }
 0x8de   : > { %v1987_v11 = vpop.f32.mrb[18].mxu1 }
 0x8df   : > { %v1998_v12 = vadd.f32 %v2527_v7, %v1990_v8  ;;  %v2718_v13 = vpop.f32.mrb[19].mxu1 }
 0x8e1   : > { %v4618_v15 = vadd.f32 %v1999_v10, %v1998_v12 }
 0x8e3   : > { %v2004_v16 = vsel %vm2003_vm10, %v4618_v15, 0.0 }
 0x8e4   : > { %2005 = vadd.xlane.f32.xlu1 %v2004_v16 }
 0x971   : > { %v2006_v17 = vpop.xlane.xlu1 %2005 }
 0x972   : > { %v2008_v18 = vmul.f32 0.03125, %v2006_v17 }
 0x974   : > { %v2009_v19 = vsub.f32 %v4618_v15, %v2008_v18 }
 0x976   : > { %v2010_v20 = vmul.f32 %v2009_v19, %v2009_v19 }
 0x978   : > { %v2011_v21 = vsel %vm2003_vm10, %v2010_v20, 0.0 }
 0x979   : > { %2012 = vadd.xlane.f32.xlu0 %v2011_v21 }
 0xa06   : > { %v2013_v25 = vpop.xlane.xlu0 %2012 }
 0xa07   : > { %v2014_v3 = vmul.f32 0.03125, %v2013_v25 }
 0xa09   : > { %v2015_v26 = vadd.f32 1e-05, %v2014_v3 }
 0xa0b   : > { %3065 = vrsqrt.f32 %v2015_v26 }
 0xa15   : > { %v3066_v27 = vpop.eup %3065 }
 0xa16   : > { %v2017_v29 = vmul.f32 %v3066_v27, %v2009_v19 }
 0xa18   : > { %v2024_v31 = vmul.f32 %v2528_v28, %v2017_v29 }
 0xa1a   : > { %v2031_v32 = vadd.f32 %v2529_v30, %v2024_v31 }
 0xa1c   : > { %v2032_v33 = vpack.c.bf16 %v2031_v32, %v2031_v32 }
 0xa1e   : > { %2724 = vmatmul.mubr.msk.bf16.vlgmr.msra.gmra.mrb[28].mxu0 %vm2003_vm10, %v2032_v33 }
 0xaf1   : > { %v2093_v42 = vpop.f32.mrb[28].mxu0 }
 0xaf2   : > { %v2094_v43 = vadd.f32 %v2530_v41, %v2093_v42  ;;  %v2725_v44 = vpop.f32.mrb[29].mxu0 }
 0xaf3   : > { %v2096_v45 = vpop.f32.mrb[30].mxu0 }
 0xaf4   : > { %v2100_v46 = vmul.f32 0.044715, %v2094_v43  ;;  %v2726_v47 = vpop.f32.mrb[31].mxu0  ;;  %v2099_v53 = vmul.f32 0.5, %v2094_v43 }
 0xaf6   : > { %v2101_v48 = vmul.f32 %v2100_v46, %v2094_v43 }
 0xaf8   : > { %v2102_v49 = vmul.f32 %v2101_v48, %v2094_v43 }
 0xafa   : > { %v2103_v50 = vadd.f32 %v2102_v49, %v2094_v43 }
 0xafc   : > { %v2104_v51 = vmul.f32 0.7978846, %v2103_v50 }
 0xafe   : > { %3067 = vtanh.f32 %v2104_v51 }
 0xb08   : > { %v3068_v52 = vpop.eup %3067 }
 0xb09   : > { %v2106_v54 = vadd.f32 1.0, %v3068_v52 }
 0xb0b   : > { %v2107_v55 = vmul.f32 %v2106_v54, %v2099_v53 }
 0xb0d   : > { %v2108_v56 = vpack.c.bf16 %v2107_v55, %v2107_v55 }
 0xb0f   : > { %2744 = vmatmul.mubr.bf16.vlgmr.msra.gmra.mrb[20].mxu1 %v2108_v56 }
 0xbe2   : > { %v2207_v14 = vpop.f32.mrb[20].mxu1 }
 0xbe3   : > { %v2213_v58 = vadd.f32 %v2207_v14, %v4618_v15  ;;  %v2745_v59 = vpop.f32.mrb[21].mxu1 }
 0xbe4   : > { %v2210_v60 = vpop.f32.mrb[22].mxu1 }
 0xbe5   : > { %v2221_v61 = vadd.f32 %v2542_v57, %v2213_v58  ;;  %v2746_v62 = vpop.f32.mrb[23].mxu1 }
 0xbe7   : > { %2222 = vst.msk [vmem:[%s695_s12] sm:$0xff] %vm2003_vm10, %v2221_v61 }
 0xbe8 PF: > { %s2231_s14 = sld [smem:[#allocation6]]  ;;  %s4890_s19 = sld [smem:[#allocation50_spill]] }
 0xbe9   : > { %s2239_s11 = sshll.u32 %s695_s12, 4  ;;  %s4891_s13 = sld [smem:[#allocation68_spill]]  ;;  %s4640_s11 = int_to_ptr.vmem [resolvable:$true] %s2239_s11 }
 0xbea   : > { %s2224_s10 = scalar_lea.sflag [#allocation10], %s693_s20  ;;  %s3413_s0 = scalar_lea.vmem %s4640_s11, 128 }
 0xbeb   : > { %p3414_p9 = scmp.ne.s32.totalorder %s4640_s11, %s3413_s0  ;;  %p4892_p8 = scmp.ne.s32.totalorder %s4823_s24, 0 }
 0xbec   : > { %s3647_s7 = smov [#allocation28]  }
 0xbed   : > { %p3415_p3 = pnand %p3414_p9, %p4892_p8  ;;  %s3417_s6 = sshll.u32 %s3647_s7, 4  ;;  %s3418_s6 = int_to_ptr.vmem [resolvable:$false] %s3417_s6 }
 0xbee   : > { %s2235_s4 = sadd.s32 %s4890_s19, %s2231_s14  ;;  %s3419_s29 = scalar_lea.vmem %s3418_s6, 256 }
 0xbef   : > { %s2544_s5 = sshll.u32 %s2235_s4, 7  ;;  %p3416_p5 = pneg %p3415_p3 }
 0xbf0   : > { %s2237_s30 = scalar_lea.hbm %s4891_s13, %s2544_s5  ;;  %p3420_p11 = scmp.lt.s32.totalorder %s4640_s11, %s3418_s6 }
 0xbf1   : > { %p3421_p1 = scmp.lt.s32.totalorder %s3419_s29, %s3413_s0 }
 0xbf3   : > { %p3422_p13 = por %p3421_p1, %p3420_p11 }
 0xbf5   : > { %p3423_p10 = pnand %p3422_p13, %p3416_p5 }
 0xbf7   : > { %3426 = shalt.err (!%p3423_p10)
}
 0xbf8   : > { %s3427_s27 = scalar_lea.hbm %s2237_s30, 128  ;;  %s3431_s22 = scalar_lea.hbm %s4891_s13, 256 }
 0xbf9   : > { %p3428_p0 = scmp.ne.s32.totalorder %s2237_s30, %s3427_s27  ;;  %p3432_p7 = scmp.lt.u32.totalorder %s2237_s30, %s4891_s13 }
 0xbfa   : > { %p3433_p2 = scmp.lt.u32.totalorder %s3431_s22, %s3427_s27  ;;  %p3435_p9 = scmp.lt.u32.totalorder %s3427_s27, %s2237_s30 }
 0xbfb   : > { %p3429_p4 = pnand %p3428_p0, %p4892_p8 }
 0xbfc   : > { %p3434_p6 = por %p3433_p2, %p3432_p7 }
 0xbfd   : > { %p3430_p12 = pneg %p3429_p4 }
 0xbfe   : > { %p3436_p3 = por %p3435_p9, %p3434_p6 }
 0xc00   : > { %p3437_p5 = pnand %p3436_p3, %p3430_p12 }
 0xc02   : > { %3440 = shalt.err (!%p3437_p5)
}
 0xc03   : > { %2787 = dma.vmem_to_hbm [thread:$0]  (%p4892_p8), %s4640_s11, 128, %s2237_s30, %s2224_s10  }
 0xc04 PF: > { %s2251_s14 = sand.u32 1, %s3555_s17   ;;  %p4893_p11 = scmp.ne.s32.totalorder %s4827_s23, 0 }
 0xc05   : > { %p4894_p1 = scmp.ge.s32.totalorder %s3623_s16, 2  ;;  %s2252_s19 = scalar_lea.sflag [#allocation10], %s2251_s14 }
 0xc07   : > { %p2828_p13 = pnand %p4894_p1, %p4893_p11 }
 0xc09   : > { %3550 = dma.done.wait (!%p2828_p13), %s2252_s19, 128  }
 0xc0a   : > { %3552 = vsyncadd (!%p2828_p13), %s2252_s19, 4294967168  ;;  %s42_s16 = sadd.s32 1, %s3623_s16   ;;  %s4896_s24 = sld [smem:[#allocation39_spill]] }
 0xc0b   : > { %p4669_p10 = scmp.ge.s32.totalorder %s42_s16, 4   ;;  %s4897_s0 = sld [smem:[#allocation55_spill]] }
 0xc0c   : > { %s4898_s19 = sld [smem:[#allocation41_spill]]  ;;  %s4899_s11 = sld [smem:[#allocation42_spill]] }
 0xc0d   : > { %s4900_s21 = sld [smem:[#allocation44_spill]]  ;;  %s4901_s22 = sld [smem:[#allocation45_spill]] }
 0xc0e   : > { %s4902_s5 = sld [smem:[#allocation46_spill]]  ;;  %s4903_s9 = sld [smem:[#allocation54_spill]] }
 0xc0f   : > { %s4904_s27 = sld [smem:[#allocation48_spill]]  ;;  %s4905_s3 = sld [smem:[#allocation49_spill]] }
 0xc10   : > { %s4906_s30 = smov %s4133_s1  ;;  %s4907_s17 = smov %s3559_s18 }
 0xc11   : > { %s4908_s10 = sld [smem:[#allocation52_spill]]  ;;  %s4909_s18 = smov %s4896_s24 }
 0xc12   : > { %s4910_s1 = smov %s4899_s11  ;;  %s4911_s20 = smov %s4258_s26 }
 0xc13   : > { %s4912_s23 = smov %s4923_s28  ;;  %s4913_s24 = smov %s3595_s25 }
 0xc14   : > { %s4914_s25 = smov %s4902_s5  ;;  %s4915_s26 = smov %s4903_s9 }
 0xc15   : > { %s4916_s28 = smov %s4905_s3  ;;  %s4917_s29 = smov %s4906_s30 }
 0xc16   : > { %s4918_s30 = smov %s3619_s15  ;;  %41 = sbr.rel (!%p4669_p10) target bundleno = 36 (0x24), region = 197 }
 0xc17   : > { %s4919_s15 = smov %s4908_s10 }
 0xc1d   :  { %2257 = vsyncpa [#allocation9], 1 }
 0xc1e   :  { %2259 = vsyncpa [#allocation9 + $0x1], 1 }
 0xc1f   :  { %2260 = vsyncpa [#allocation12], 1 }
 0xc20   :  { %2262 = vsyncpa [#allocation12 + $0x1], 1 }
 0xc21   :  { %2263 = vsyncpa [#allocation15], 1 }
 0xc22   :  { %2265 = vsyncpa [#allocation15 + $0x1], 1 }
 0xc23   :  { %2266 = vsyncpa [#allocation18], 1 }
 0xc24   :  { %2267 = vsyncpa [#allocation21], 1 }
 0xc25   :  { %2268 = vsyncpa [#allocation24], 1 }
 0xc26   :  { %2269 = vsyncpa [#allocation27], 1 }
 0xc27   :  { %2270 = vsyncpa [#allocation10], 1 }
 0xc28   :  { %2272 = vsyncpa [#allocation10 + $0x1], 1 }

</bundles_post_ra>
